<compile_context>
chip_gen: v5e
topology: v5e:2x2
jax: 0.10.0
libtpu: 0.0.40
codegen_flags: <defaults>
</compile_context>

<pallas_src>
import jax
import jax.numpy as jnp
from jax import lax
from jax.experimental import pallas as pl
from jax.experimental.pallas import tpu as pltpu


_VMEM_LIMIT = 32 * 1024 * 1024  # safe on v5e/v6e (128 MiB phys) and v7x (64 MiB)


def _lrelu(x):
    return jnp.where(x >= 0, x, 0.2 * x)


# ---------------------------------------------------------------------------
# Kernel 1: whole dense path in one pallas_call.
# Grid tiles only fc3's N dim; fc1/fc2 (+ their BatchNorms) are tiny and are
# recomputed per tile so the grid axis can stay "parallel" (megacore-safe).
# ---------------------------------------------------------------------------
def _dense_kernel(noise_ref, labels_ref, w1_ref, g1_ref, b1_ref,
                  w2_ref, g2_ref, b2_ref, w3a_ref, w3b_ref, bias3_ref, o_ref):
    def bn_lrelu(y, g, b):
        # training-mode BatchNorm1d, one-pass (E[y^2] - mean^2) statistics
        mean = jnp.mean(y, axis=0, keepdims=True)
        var = jnp.maximum(jnp.mean(y * y, axis=0, keepdims=True) - mean * mean,
                          0.0)
        return _lrelu((y - mean) * (lax.rsqrt(var + 1e-5) * g) + b)

    # fc1 -> bn1 -> LeakyReLU   (fc1 bias dropped: absorbed by BN)
    y1 = bn_lrelu(
        jnp.dot(noise_ref[...], w1_ref[...], preferred_element_type=jnp.float32),
        g1_ref[...], b1_ref[...])
    # fc2 -> bn2 -> LeakyReLU   (fc2 bias dropped: absorbed by BN)
    y2 = bn_lrelu(
        jnp.dot(labels_ref[...], w2_ref[...], preferred_element_type=jnp.float32),
        g2_ref[...], b2_ref[...])
    # fc3 on concat([y1, y2]): split-K pair of matmuls (bf16 weights, f32 acc)
    acc = jnp.dot(y1.astype(w3a_ref.dtype), w3a_ref[...],
                  preferred_element_type=jnp.float32)
    acc = acc + jnp.dot(y2.astype(w3b_ref.dtype), w3b_ref[...],
                        preferred_element_type=jnp.float32)
    acc = acc + bias3_ref[...]
    # TODO(synk): nn.Dropout(p=0.5) modeled as eval-mode identity.
    o_ref[...] = _lrelu(acc)


def dense_path(q, noise, labels, tile_n=896):
    B, z_dim = noise.shape
    num_class = labels.shape[1]
    n3 = q["bias3"].shape[1]                     # 6272, NHWC-packed columns
    if n3 % tile_n:
        tile_n = n3
    const = lambda j: (0, 0)
    tiled = lambda j: (0, j)
    return pl.pallas_call(
        _dense_kernel,
        out_shape=jax.ShapeDtypeStruct((B, n3), jnp.float32),
        grid_spec=pltpu.PrefetchScalarGridSpec(
            num_scalar_prefetch=0,
            grid=(n3 // tile_n,),
            in_specs=[
                pl.BlockSpec((B, z_dim), const),          # noise (resident)
                pl.BlockSpec((B, num_class), const),      # labels (resident)
                pl.BlockSpec((z_dim, 300), const),        # fc1 weight (K,N)
                pl.BlockSpec((1, 300), const),            # bn1 gamma
                pl.BlockSpec((1, 300), const),            # bn1 beta
                pl.BlockSpec((num_class, 1500), const),   # fc2 weight (K,N)
                pl.BlockSpec((1, 1500), const),           # bn2 gamma
                pl.BlockSpec((1, 1500), const),           # bn2 beta
                pl.BlockSpec((300, tile_n), tiled),       # fc3 weight, y1 half (bf16)
                pl.BlockSpec((1500, tile_n), tiled),      # fc3 weight, y2 half (bf16)
                pl.BlockSpec((1, tile_n), tiled),         # fc3 bias
            ],
            out_specs=pl.BlockSpec((B, tile_n), tiled),
        ),
        compiler_params=pltpu.CompilerParams(
            dimension_semantics=("parallel",),
            vmem_limit_bytes=_VMEM_LIMIT),
    )(noise, labels, q["w1"], q["g1"], q["b1"], q["w2"], q["g2"], q["b2"],
      q["w3a"], q["w3b"], q["bias3"])


# ---------------------------------------------------------------------------
# Kernel 2: ConvTranspose2d(128->64, k4 s2 p1) + BatchNorm2d + LeakyReLU.
# One GEMM: cols (M, 9*128) @ W (9*128, 4*64).  Output columns are
# (phase, channel), so the output is lane-dense (256 wide) with no padding.
# BN batch statistics are taken over all rows AND all 4 phase segments
# (segments combined with pltpu.roll), i.e. over the full (B,14,14) output.
# M is intentionally NOT tiled here (batch statistics need the whole batch).
# ---------------------------------------------------------------------------
def _dc1_kernel(cols_ref, w_ref, g_ref, b_ref, o_ref):
    y = jnp.dot(cols_ref[...], w_ref[...], preferred_element_type=jnp.float32)
    n = y.shape[1]                          # 4 * Cout = 256
    cnt = 4.0 * y.shape[0]                  # elements per channel = B*14*14
    s1 = jnp.sum(y, axis=0, keepdims=True)
    s2 = jnp.sum(y * y, axis=0, keepdims=True)
    # Sum the four Cout-wide phase segments; afterwards every segment holds the
    # full per-channel totals, already tiled for broadcasting against y.
    s1 = s1 + pltpu.roll(s1, n // 2, axis=1)
    s1 = s1 + pltpu.roll(s1, n // 4, axis=1)
    s2 = s2 + pltpu.roll(s2, n // 2, axis=1)
    s2 = s2 + pltpu.roll(s2, n // 4, axis=1)
    mean = s1 * (1.0 / cnt)
    var = jnp.maximum(s2 * (1.0 / cnt) - mean * mean, 0.0)
    o_ref[...] = _lrelu((y - mean) * (lax.rsqrt(var + 1e-5) * g_ref[...])
                        + b_ref[...])


def deconv1(cols, w, gamma, beta):
    M, K = cols.shape
    N = w.shape[1]
    return pl.pallas_call(
        _dc1_kernel,
        out_shape=jax.ShapeDtypeStruct((M, N), jnp.float32),
        grid_spec=pltpu.PrefetchScalarGridSpec(
            num_scalar_prefetch=0,
            grid=(1,),   # M untiled: BN needs the whole batch in one tile
            in_specs=[pl.BlockSpec((M, K), lambda i: (0, 0)),
                      pl.BlockSpec((K, N), lambda i: (0, 0)),
                      pl.BlockSpec((1, N), lambda i: (0, 0)),
                      pl.BlockSpec((1, N), lambda i: (0, 0))],
            out_specs=pl.BlockSpec((M, N), lambda i: (0, 0)),
        ),
        compiler_params=pltpu.CompilerParams(
            dimension_semantics=("arbitrary",),
            vmem_limit_bytes=_VMEM_LIMIT),
    )(cols, w, gamma, beta)


# ---------------------------------------------------------------------------
# Kernel 3: ConvTranspose2d(64->1, k4 s2 p1) + Tanh.
# cols (M, 9*64) @ W (9*64, 128): the 4 phases live in output columns 0..3,
# zero-padded to 128 lanes so stores are lane-dense.  No BN -> M is tiled and
# the grid axis is "parallel" (both TensorCores on v7x).
# ---------------------------------------------------------------------------
def _dc2_kernel(cols_ref, w_ref, bias_ref, o_ref):
    y = jnp.dot(cols_ref[...], w_ref[...], preferred_element_type=jnp.float32)
    o_ref[...] = jnp.tanh(y + bias_ref[...])


def deconv2(cols, w, bias):
    M, K = cols.shape
    N = w.shape[1]
    tile_m = M
    for cand in (256, 128, 64, 56, 32, 16, 8):
        if M % cand == 0:
            tile_m = cand
            break
    return pl.pallas_call(
        _dc2_kernel,
        out_shape=jax.ShapeDtypeStruct((M, N), jnp.float32),
        grid_spec=pltpu.PrefetchScalarGridSpec(
            num_scalar_prefetch=0,
            grid=(M // tile_m,),
            in_specs=[pl.BlockSpec((tile_m, K), lambda i: (i, 0)),
                      pl.BlockSpec((K, N), lambda i: (0, 0)),
                      pl.BlockSpec((1, N), lambda i: (0, 0))],
            out_specs=pl.BlockSpec((tile_m, N), lambda i: (i, 0)),
        ),
        compiler_params=pltpu.CompilerParams(
            dimension_semantics=("parallel",),
            vmem_limit_bytes=_VMEM_LIMIT),
    )(cols, w, bias)


# ---------------------------------------------------------------------------
# Glue: 9-offset / 4-phase decomposition of ConvTranspose2d(k=4, s=2, p=1):
#   out[b, 2m+py, 2n+px, co] = sum_{dy,dx in {0,1}, ci}
#       x_pad[b, m+py+dy, n+px+dx, ci] * w[ci, co, 3-py-2*dy, 3-px-2*dx]
# ---------------------------------------------------------------------------
def _offset_cols(x):
    """x: (B, H, W, C) -> (B*H*W, 9*C); tap s = sy*3+sx over the 3x3 offsets."""
    B, H, W, C = x.shape
    xp = jnp.pad(x, ((0, 0), (1, 1), (1, 1), (0, 0)))
    taps = [xp[:, sy:sy + H, sx:sx + W, :] for sy in range(3) for sx in range(3)]
    return jnp.stack(taps, axis=3).reshape(B * H * W, 9 * C)


def _interleave_phases(y, B, H, W, C):
    """y: (B*H*W, 4*C), columns = (phase py*2+px, channel) -> (B, 2H, 2W, C)."""
    y = y.reshape(B, H, W, 2, 2, C)
    y = y.transpose(0, 1, 3, 2, 4, 5)            # (B, H, py, W, px, C)
    return y.reshape(B, 2 * H, 2 * W, C)


def _pack_deconv_weight(w):
    """PyTorch ConvTranspose2d weight (Cin, Cout, 4, 4) -> (9*Cin, 4*Cout).
    Rows = (offset s = sy*3+sx, ci); columns = (phase p = py*2+px, co)."""
    cin, cout = w.shape[0], w.shape[1]
    mat = jnp.zeros((9 * cin, 4 * cout), w.dtype)
    for py in range(2):
        for px in range(2):
            p = py * 2 + px
            for dy in range(2):
                for dx in range(2):
                    s = (py + dy) * 3 + (px + dx)
                    ky, kx = 3 - py - 2 * dy, 3 - px - 2 * dx
                    mat = mat.at[s * cin:(s + 1) * cin,
                                 p * cout:(p + 1) * cout].set(w[:, :, ky, kx])
    return mat


# ---------------------------------------------------------------------------
# Parameters: PyTorch-layout init (matching init_weights()) + one-time packing.
# ---------------------------------------------------------------------------
def init_torch_params(key, z_dim, num_class):
    ks = jax.random.split(key, 8)
    f32 = jnp.float32
    p = {}
    p["fc1_w"] = 0.02 * jax.random.normal(ks[0], (300, z_dim), f32)
    p["fc1_b"] = jnp.zeros((300,), f32)
    p["bn1_g"] = 1.0 + 0.02 * jax.random.normal(ks[1], (300,), f32)
    p["bn1_b"] = jnp.zeros((300,), f32)
    p["fc2_w"] = 0.02 * jax.random.normal(ks[2], (1500, num_class), f32)
    p["fc2_b"] = jnp.zeros((1500,), f32)
    p["bn2_g"] = 1.0 + 0.02 * jax.random.normal(ks[3], (1500,), f32)
    p["bn2_b"] = jnp.zeros((1500,), f32)
    p["fc3_w"] = 0.02 * jax.random.normal(ks[4], (128 * 7 * 7, 1800), f32)
    p["fc3_b"] = jnp.zeros((128 * 7 * 7,), f32)
    p["dc1_w"] = 0.02 * jax.random.normal(ks[5], (128, 64, 4, 4), f32)
    p["dc1_b"] = jnp.zeros((64,), f32)
    p["bnc1_g"] = 1.0 + 0.02 * jax.random.normal(ks[6], (64,), f32)
    p["bnc1_b"] = jnp.zeros((64,), f32)
    p["dc2_w"] = 0.02 * jax.random.normal(ks[7], (64, 1, 4, 4), f32)
    p["dc2_b"] = jnp.zeros((1,), f32)
    return p


def pack_params(p):
    """One-time packing into the kernel-side layout (no per-forward transposes)."""
    q = {}
    # dense path: weights pre-transposed to (K, N); biases before BN dropped.
    q["w1"] = jnp.asarray(p["fc1_w"].T)                        # (z_dim, 300)
    q["g1"] = p["bn1_g"].reshape(1, -1)
    q["b1"] = p["bn1_b"].reshape(1, -1)
    q["w2"] = jnp.asarray(p["fc2_w"].T)                        # (num_class, 1500)
    q["g2"] = p["bn2_g"].reshape(1, -1)
    q["b2"] = p["bn2_b"].reshape(1, -1)
    # fc3: (6272,1800) -> (1800,6272); output columns permuted from
    # (ch*49 + h*7 + w) to ((h*7 + w)*128 + ch) so the kernel emits the NHWC
    # conv layout directly; split into the y1/y2 halves of the concat; bf16.
    w3 = p["fc3_w"].T.reshape(1800, 128, 7, 7).transpose(0, 2, 3, 1)
    w3 = w3.reshape(1800, 6272)
    q["w3a"] = w3[:300].astype(jnp.bfloat16)
    q["w3b"] = w3[300:].astype(jnp.bfloat16)
    q["bias3"] = p["fc3_b"].reshape(128, 7, 7).transpose(1, 2, 0).reshape(1, 6272)
    # deconv1: phase/offset packed weight; BN scale/shift tiled per phase.
    q["wc1"] = _pack_deconv_weight(p["dc1_w"])                 # (1152, 256)
    q["gc1"] = jnp.tile(p["bnc1_g"], 4).reshape(1, 256)
    q["bc1"] = jnp.tile(p["bnc1_b"], 4).reshape(1, 256)
    # deconv2: phases in columns 0..3, zero-padded to 128 lanes.
    wc2 = _pack_deconv_weight(p["dc2_w"])                      # (576, 4)
    q["wc2"] = jnp.pad(wc2, ((0, 0), (0, 128 - wc2.shape[1])))
    q["bias2"] = jnp.pad(jnp.tile(p["dc2_b"], 4), (0, 124)).reshape(1, 128)
    return q


# ---------------------------------------------------------------------------
# Generator forward (all matmul / BN / activation hot paths run in Pallas)
# ---------------------------------------------------------------------------
def generator_forward(q, noise, labels):
    B = noise.shape[0]
    # fc1+bn1+lrelu, fc2+bn2+lrelu, concat, fc3+bias+lrelu -- one fused kernel
    x = dense_path(q, noise, labels)                         # (B, 6272) NHWC-packed
    x = x.reshape(B, 7, 7, 128)
    # ConvTranspose2d(128->64, k4 s2 p1) + BatchNorm2d + LeakyReLU
    a = deconv1(_offset_cols(x), q["wc1"], q["gc1"], q["bc1"])   # (B*49, 256)
    a = _interleave_phases(a, B, 7, 7, 64)                   # (B, 14, 14, 64)
    # ConvTranspose2d(64->1, k4 s2 p1) + Tanh
    o = deconv2(_offset_cols(a), q["wc2"], q["bias2"])       # (B*196, 128)
    o = _interleave_phases(o[:, :4], B, 14, 14, 1)           # (B, 28, 28, 1)
    return o.transpose(0, 3, 1, 2)                           # (B, 1, 28, 28)


# ---------------------------------------------------------------------------
# Pure-JAX reference (same train-mode BN semantics) for sanity checking
# ---------------------------------------------------------------------------
def reference_forward(params, noise, labels):
    def lrelu(x):
        return jnp.where(x >= 0, x, 0.2 * x)

    def bn(x, g, b, axes):
        m = x.mean(axes, keepdims=True)
        v = ((x - m) ** 2).mean(axes, keepdims=True)
        return (x - m) / jnp.sqrt(v + 1e-5) * g + b

    y1 = lrelu(bn(noise @ params["fc1_w"].T + params["fc1_b"],
                  params["bn1_g"], params["bn1_b"], (0,)))
    y2 = lrelu(bn(labels @ params["fc2_w"].T + params["fc2_b"],
                  params["bn2_g"], params["bn2_b"], (0,)))
    x = jnp.concatenate([y1, y2], axis=1)
    x = lrelu(x @ params["fc3_w"].T + params["fc3_b"])
    B = x.shape[0]
    x = x.reshape(B, 128, 7, 7)

    def convT(x, w, b):
        wf = jnp.flip(w, (2, 3)).transpose(1, 0, 2, 3)   # (Cout, Cin, kH, kW)
        y = lax.conv_general_dilated(
            x, wf, window_strides=(1, 1), padding=((2, 2), (2, 2)),
            lhs_dilation=(2, 2), dimension_numbers=("NCHW", "OIHW", "NCHW"))
        return y + b.reshape(1, -1, 1, 1)

    x = convT(x, params["dc1_w"], params["dc1_b"])
    x = lrelu(bn(x, params["bnc1_g"].reshape(1, -1, 1, 1),
                 params["bnc1_b"].reshape(1, -1, 1, 1), (0, 2, 3)))
    x = jnp.tanh(convT(x, params["dc2_w"], params["dc2_b"]))
    return x


if __name__ == "__main__":
    z_dim, num_class, B = 32, 10, 2
    key = jax.random.PRNGKey(0)
    kp, kn, kl = jax.random.split(key, 3)
    torch_params = init_torch_params(kp, z_dim, num_class)
    packed = pack_params(torch_params)          # one-time, outside the forward
    noise = jax.random.normal(kn, (B, z_dim), jnp.float32)
    labels = jax.nn.one_hot(
        jax.random.randint(kl, (B,), 0, num_class), num_class, dtype=jnp.float32)

    fwd = jax.jit(generator_forward)
    out = jax.block_until_ready(fwd(packed, noise, labels))

    assert out.shape == (B, 1, 28, 28), out.shape
    ref = reference_forward(torch_params, noise, labels)
    err = float(jnp.max(jnp.abs(out - ref)))
    assert err < 5e-2, f"max abs mismatch vs reference: {err}"
    print("KERNEL_OK")
</pallas_src>

<mosaic_0001>
module attributes {stable_mosaic.version = 11 : i64} {
  func.func @_dense_kernel(%arg0: i32, %arg1: memref<2x32xf32, #tpu.memory_space<vmem>>, %arg2: memref<2x10xf32, #tpu.memory_space<vmem>>, %arg3: memref<32x300xf32, #tpu.memory_space<vmem>>, %arg4: memref<1x300xf32, #tpu.memory_space<vmem>>, %arg5: memref<1x300xf32, #tpu.memory_space<vmem>>, %arg6: memref<10x1500xf32, #tpu.memory_space<vmem>>, %arg7: memref<1x1500xf32, #tpu.memory_space<vmem>>, %arg8: memref<1x1500xf32, #tpu.memory_space<vmem>>, %arg9: memref<300x896xbf16, #tpu.memory_space<vmem>>, %arg10: memref<1500x896xbf16, #tpu.memory_space<vmem>>, %arg11: memref<1x896xf32, #tpu.memory_space<vmem>>, %arg12: memref<2x896xf32, #tpu.memory_space<vmem>>) attributes {dimension_semantics = [#tpu.dimension_semantics<parallel>], iteration_bounds = array<i64: 7>, scalar_prefetch = 0 : i64, scratch_operands = 0 : i64, tpu.core_type = #tpu.core_type<tc>, window_params = [{pipeline_mode = #tpu.pipeline_mode<synchronous>, transform_indices = @transform_0, window_bounds = array<i64: 2, 32>}, {pipeline_mode = #tpu.pipeline_mode<synchronous>, transform_indices = @transform_1, window_bounds = array<i64: 2, 10>}, {pipeline_mode = #tpu.pipeline_mode<synchronous>, transform_indices = @transform_2, window_bounds = array<i64: 32, 300>}, {pipeline_mode = #tpu.pipeline_mode<synchronous>, transform_indices = @transform_3, window_bounds = array<i64: 1, 300>}, {pipeline_mode = #tpu.pipeline_mode<synchronous>, transform_indices = @transform_4, window_bounds = array<i64: 1, 300>}, {pipeline_mode = #tpu.pipeline_mode<synchronous>, transform_indices = @transform_5, window_bounds = array<i64: 10, 1500>}, {pipeline_mode = #tpu.pipeline_mode<synchronous>, transform_indices = @transform_6, window_bounds = array<i64: 1, 1500>}, {pipeline_mode = #tpu.pipeline_mode<synchronous>, transform_indices = @transform_7, window_bounds = array<i64: 1, 1500>}, {transform_indices = @transform_8, window_bounds = array<i64: 300, 896>}, {transform_indices = @transform_9, window_bounds = array<i64: 1500, 896>}, {transform_indices = @transform_10, window_bounds = array<i64: 1, 896>}, {transform_indices = @transform_11, window_bounds = array<i64: 2, 896>}]} {
    %c0 = arith.constant 0 : index
    %c0_0 = arith.constant 0 : index
    %0 = vector.load %arg1[%c0, %c0_0] : memref<2x32xf32, #tpu.memory_space<vmem>>, vector<2x32xf32>
    %c0_1 = arith.constant 0 : index
    %c0_2 = arith.constant 0 : index
    %1 = vector.load %arg3[%c0_1, %c0_2] : memref<32x300xf32, #tpu.memory_space<vmem>>, vector<32x300xf32>
    %cst = arith.constant dense<0.000000e+00> : vector<2x300xf32>
    %2 = tpu.matmul %0, %1, %cst {dimension_numbers = #tpu.dot_dimension_numbers<[1], [0], [0], [1], [0, 0, 1, 1], [], []>} : vector<2x32xf32>, vector<32x300xf32>, vector<2x300xf32> -> vector<2x300xf32>
    %c0_3 = arith.constant 0 : index
    %c0_4 = arith.constant 0 : index
    %3 = vector.load %arg4[%c0_3, %c0_4] : memref<1x300xf32, #tpu.memory_space<vmem>>, vector<1x300xf32>
    %c0_5 = arith.constant 0 : index
    %c0_6 = arith.constant 0 : index
    %4 = vector.load %arg5[%c0_5, %c0_6] : memref<1x300xf32, #tpu.memory_space<vmem>>, vector<1x300xf32>
    %cst_7 = arith.constant dense<0.000000e+00> : vector<300xf32>
    %5 = vector.multi_reduction <add>, %2, %cst_7 [0] : vector<2x300xf32> to vector<300xf32>
    %6 = vector.shape_cast %5 : vector<300xf32> to vector<1x300xf32>
    %cst_8 = arith.constant 2.000000e+00 : f32
    %7 = vector.broadcast %cst_8 : f32 to vector<1x300xf32>
    %8 = arith.divf %6, %7 : vector<1x300xf32>
    %9 = arith.mulf %2, %2 : vector<2x300xf32>
    %cst_9 = arith.constant dense<0.000000e+00> : vector<300xf32>
    %10 = vector.multi_reduction <add>, %9, %cst_9 [0] : vector<2x300xf32> to vector<300xf32>
    %11 = vector.shape_cast %10 : vector<300xf32> to vector<1x300xf32>
    %cst_10 = arith.constant 2.000000e+00 : f32
    %12 = vector.broadcast %cst_10 : f32 to vector<1x300xf32>
    %13 = arith.divf %11, %12 : vector<1x300xf32>
    %14 = arith.mulf %8, %8 : vector<1x300xf32>
    %15 = arith.subf %13, %14 : vector<1x300xf32>
    %cst_11 = arith.constant 0.000000e+00 : f32
    %16 = vector.broadcast %cst_11 : f32 to vector<1x300xf32>
    %17 = arith.maximumf %15, %16 : vector<1x300xf32>
    %18 = vector.broadcast %8 : vector<1x300xf32> to vector<2x300xf32>
    %19 = arith.subf %2, %18 : vector<2x300xf32>
    %cst_12 = arith.constant 9.99999974E-6 : f32
    %20 = vector.broadcast %cst_12 : f32 to vector<1x300xf32>
    %21 = arith.addf %17, %20 : vector<1x300xf32>
    %22 = math.rsqrt %21 : vector<1x300xf32>
    %23 = arith.mulf %22, %3 : vector<1x300xf32>
    %24 = vector.broadcast %23 : vector<1x300xf32> to vector<2x300xf32>
    %25 = arith.mulf %19, %24 : vector<2x300xf32>
    %26 = vector.broadcast %4 : vector<1x300xf32> to vector<2x300xf32>
    %27 = arith.addf %25, %26 : vector<2x300xf32>
    %cst_13 = arith.constant 0.000000e+00 : f32
    %28 = vector.broadcast %cst_13 : f32 to vector<2x300xf32>
    %29 = arith.cmpf oge, %27, %28 : vector<2x300xf32>
    %cst_14 = arith.constant 2.000000e-01 : f32
    %30 = vector.broadcast %cst_14 : f32 to vector<2x300xf32>
    %31 = arith.mulf %30, %27 : vector<2x300xf32>
    %32 = arith.select %29, %27, %31 : vector<2x300xi1>, vector<2x300xf32>
    %c0_15 = arith.constant 0 : index
    %c0_16 = arith.constant 0 : index
    %33 = vector.load %arg2[%c0_15, %c0_16] : memref<2x10xf32, #tpu.memory_space<vmem>>, vector<2x10xf32>
    %c0_17 = arith.constant 0 : index
    %c0_18 = arith.constant 0 : index
    %34 = vector.load %arg6[%c0_17, %c0_18] : memref<10x1500xf32, #tpu.memory_space<vmem>>, vector<10x1500xf32>
    %cst_19 = arith.constant dense<0.000000e+00> : vector<2x1500xf32>
    %35 = tpu.matmul %33, %34, %cst_19 {dimension_numbers = #tpu.dot_dimension_numbers<[1], [0], [0], [1], [0, 0, 1, 1], [], []>} : vector<2x10xf32>, vector<10x1500xf32>, vector<2x1500xf32> -> vector<2x1500xf32>
    %c0_20 = arith.constant 0 : index
    %c0_21 = arith.constant 0 : index
    %36 = vector.load %arg7[%c0_20, %c0_21] : memref<1x1500xf32, #tpu.memory_space<vmem>>, vector<1x1500xf32>
    %c0_22 = arith.constant 0 : index
    %c0_23 = arith.constant 0 : index
    %37 = vector.load %arg8[%c0_22, %c0_23] : memref<1x1500xf32, #tpu.memory_space<vmem>>, vector<1x1500xf32>
    %cst_24 = arith.constant dense<0.000000e+00> : vector<1500xf32>
    %38 = vector.multi_reduction <add>, %35, %cst_24 [0] : vector<2x1500xf32> to vector<1500xf32>
    %39 = vector.shape_cast %38 : vector<1500xf32> to vector<1x1500xf32>
    %cst_25 = arith.constant 2.000000e+00 : f32
    %40 = vector.broadcast %cst_25 : f32 to vector<1x1500xf32>
    %41 = arith.divf %39, %40 : vector<1x1500xf32>
    %42 = arith.mulf %35, %35 : vector<2x1500xf32>
    %cst_26 = arith.constant dense<0.000000e+00> : vector<1500xf32>
    %43 = vector.multi_reduction <add>, %42, %cst_26 [0] : vector<2x1500xf32> to vector<1500xf32>
    %44 = vector.shape_cast %43 : vector<1500xf32> to vector<1x1500xf32>
    %cst_27 = arith.constant 2.000000e+00 : f32
    %45 = vector.broadcast %cst_27 : f32 to vector<1x1500xf32>
    %46 = arith.divf %44, %45 : vector<1x1500xf32>
    %47 = arith.mulf %41, %41 : vector<1x1500xf32>
    %48 = arith.subf %46, %47 : vector<1x1500xf32>
    %cst_28 = arith.constant 0.000000e+00 : f32
    %49 = vector.broadcast %cst_28 : f32 to vector<1x1500xf32>
    %50 = arith.maximumf %48, %49 : vector<1x1500xf32>
    %51 = vector.broadcast %41 : vector<1x1500xf32> to vector<2x1500xf32>
    %52 = arith.subf %35, %51 : vector<2x1500xf32>
    %cst_29 = arith.constant 9.99999974E-6 : f32
    %53 = vector.broadcast %cst_29 : f32 to vector<1x1500xf32>
    %54 = arith.addf %50, %53 : vector<1x1500xf32>
    %55 = math.rsqrt %54 : vector<1x1500xf32>
    %56 = arith.mulf %55, %36 : vector<1x1500xf32>
    %57 = vector.broadcast %56 : vector<1x1500xf32> to vector<2x1500xf32>
    %58 = arith.mulf %52, %57 : vector<2x1500xf32>
    %59 = vector.broadcast %37 : vector<1x1500xf32> to vector<2x1500xf32>
    %60 = arith.addf %58, %59 : vector<2x1500xf32>
    %cst_30 = arith.constant 0.000000e+00 : f32
    %61 = vector.broadcast %cst_30 : f32 to vector<2x1500xf32>
    %62 = arith.cmpf oge, %60, %61 : vector<2x1500xf32>
    %cst_31 = arith.constant 2.000000e-01 : f32
    %63 = vector.broadcast %cst_31 : f32 to vector<2x1500xf32>
    %64 = arith.mulf %63, %60 : vector<2x1500xf32>
    %65 = arith.select %62, %60, %64 : vector<2x1500xi1>, vector<2x1500xf32>
    %66 = arith.truncf %32 : vector<2x300xf32> to vector<2x300xbf16>
    %c0_32 = arith.constant 0 : index
    %c0_33 = arith.constant 0 : index
    %67 = vector.load %arg9[%c0_32, %c0_33] : memref<300x896xbf16, #tpu.memory_space<vmem>>, vector<300x896xbf16>
    %cst_34 = arith.constant dense<0.000000e+00> : vector<2x896xf32>
    %68 = tpu.matmul %66, %67, %cst_34 {dimension_numbers = #tpu.dot_dimension_numbers<[1], [0], [0], [1], [0, 0, 1, 1], [], []>} : vector<2x300xbf16>, vector<300x896xbf16>, vector<2x896xf32> -> vector<2x896xf32>
    %69 = arith.truncf %65 : vector<2x1500xf32> to vector<2x1500xbf16>
    %c0_35 = arith.constant 0 : index
    %c0_36 = arith.constant 0 : index
    %70 = vector.load %arg10[%c0_35, %c0_36] : memref<1500x896xbf16, #tpu.memory_space<vmem>>, vector<1500x896xbf16>
    %cst_37 = arith.constant dense<0.000000e+00> : vector<2x896xf32>
    %71 = tpu.matmul %69, %70, %cst_37 {dimension_numbers = #tpu.dot_dimension_numbers<[1], [0], [0], [1], [0, 0, 1, 1], [], []>} : vector<2x1500xbf16>, vector<1500x896xbf16>, vector<2x896xf32> -> vector<2x896xf32>
    %72 = arith.addf %68, %71 : vector<2x896xf32>
    %c0_38 = arith.constant 0 : index
    %c0_39 = arith.constant 0 : index
    %73 = vector.load %arg11[%c0_38, %c0_39] : memref<1x896xf32, #tpu.memory_space<vmem>>, vector<1x896xf32>
    %74 = vector.broadcast %73 : vector<1x896xf32> to vector<2x896xf32>
    %75 = arith.addf %72, %74 : vector<2x896xf32>
    %cst_40 = arith.constant 0.000000e+00 : f32
    %76 = vector.broadcast %cst_40 : f32 to vector<2x896xf32>
    %77 = arith.cmpf oge, %75, %76 : vector<2x896xf32>
    %cst_41 = arith.constant 2.000000e-01 : f32
    %78 = vector.broadcast %cst_41 : f32 to vector<2x896xf32>
    %79 = arith.mulf %78, %75 : vector<2x896xf32>
    %80 = arith.select %77, %75, %79 : vector<2x896xi1>, vector<2x896xf32>
    %c0_42 = arith.constant 0 : index
    %c0_43 = arith.constant 0 : index
    %81 = vector.load %arg12[%c0_42, %c0_43] : memref<2x896xf32, #tpu.memory_space<vmem>>, vector<2x896xf32>
    tpu.vector_store %arg12[%c0_42, %c0_43], %80 {strides = array<i32>} : memref<2x896xf32, #tpu.memory_space<vmem>>, vector<2x896xf32>,
    return
  }
  func.func @transform_0(%arg0: i32) -> (i32, i32) {
    %c0_i32 = arith.constant 0 : i32
    %c0_i32_0 = arith.constant 0 : i32
    %c0_i32_1 = arith.constant 0 : i32
    return %c0_i32, %c0_i32_0 : i32, i32
  }
  func.func @transform_1(%arg0: i32) -> (i32, i32) {
    %c0_i32 = arith.constant 0 : i32
    %c0_i32_0 = arith.constant 0 : i32
    %c0_i32_1 = arith.constant 0 : i32
    return %c0_i32, %c0_i32_0 : i32, i32
  }
  func.func @transform_2(%arg0: i32) -> (i32, i32) {
    %c0_i32 = arith.constant 0 : i32
    %c0_i32_0 = arith.constant 0 : i32
    %c0_i32_1 = arith.constant 0 : i32
    return %c0_i32, %c0_i32_0 : i32, i32
  }
  func.func @transform_3(%arg0: i32) -> (i32, i32) {
    %c0_i32 = arith.constant 0 : i32
    %c0_i32_0 = arith.constant 0 : i32
    %c0_i32_1 = arith.constant 0 : i32
    return %c0_i32, %c0_i32_0 : i32, i32
  }
  func.func @transform_4(%arg0: i32) -> (i32, i32) {
    %c0_i32 = arith.constant 0 : i32
    %c0_i32_0 = arith.constant 0 : i32
    %c0_i32_1 = arith.constant 0 : i32
    return %c0_i32, %c0_i32_0 : i32, i32
  }
  func.func @transform_5(%arg0: i32) -> (i32, i32) {
    %c0_i32 = arith.constant 0 : i32
    %c0_i32_0 = arith.constant 0 : i32
    %c0_i32_1 = arith.constant 0 : i32
    return %c0_i32, %c0_i32_0 : i32, i32
  }
  func.func @transform_6(%arg0: i32) -> (i32, i32) {
    %c0_i32 = arith.constant 0 : i32
    %c0_i32_0 = arith.constant 0 : i32
    %c0_i32_1 = arith.constant 0 : i32
    return %c0_i32, %c0_i32_0 : i32, i32
  }
  func.func @transform_7(%arg0: i32) -> (i32, i32) {
    %c0_i32 = arith.constant 0 : i32
    %c0_i32_0 = arith.constant 0 : i32
    %c0_i32_1 = arith.constant 0 : i32
    return %c0_i32, %c0_i32_0 : i32, i32
  }
  func.func @transform_8(%arg0: i32) -> (i32, i32) {
    %c0_i32 = arith.constant 0 : i32
    %c0_i32_0 = arith.constant 0 : i32
    return %c0_i32, %arg0 : i32, i32
  }
  func.func @transform_9(%arg0: i32) -> (i32, i32) {
    %c0_i32 = arith.constant 0 : i32
    %c0_i32_0 = arith.constant 0 : i32
    return %c0_i32, %arg0 : i32, i32
  }
  func.func @transform_10(%arg0: i32) -> (i32, i32) {
    %c0_i32 = arith.constant 0 : i32
    %c0_i32_0 = arith.constant 0 : i32
    return %c0_i32, %arg0 : i32, i32
  }
  func.func @transform_11(%arg0: i32) -> (i32, i32) {
    %c0_i32 = arith.constant 0 : i32
    %c0_i32_0 = arith.constant 0 : i32
    return %c0_i32, %arg0 : i32, i32
  }
}

module attributes {stable_mosaic.version = 11 : i64} {
  func.func @_dc1_kernel(%arg0: i32, %arg1: memref<98x1152xf32, #tpu.memory_space<vmem>>, %arg2: memref<1152x256xf32, #tpu.memory_space<vmem>>, %arg3: memref<1x256xf32, #tpu.memory_space<vmem>>, %arg4: memref<1x256xf32, #tpu.memory_space<vmem>>, %arg5: memref<98x256xf32, #tpu.memory_space<vmem>>) attributes {dimension_semantics = [#tpu.dimension_semantics<arbitrary>], iteration_bounds = array<i64: 1>, scalar_prefetch = 0 : i64, scratch_operands = 0 : i64, tpu.core_type = #tpu.core_type<tc>, window_params = [{pipeline_mode = #tpu.pipeline_mode<synchronous>, transform_indices = @transform_0, window_bounds = array<i64: 98, 1152>}, {pipeline_mode = #tpu.pipeline_mode<synchronous>, transform_indices = @transform_1, window_bounds = array<i64: 1152, 256>}, {pipeline_mode = #tpu.pipeline_mode<synchronous>, transform_indices = @transform_2, window_bounds = array<i64: 1, 256>}, {pipeline_mode = #tpu.pipeline_mode<synchronous>, transform_indices = @transform_3, window_bounds = array<i64: 1, 256>}, {pipeline_mode = #tpu.pipeline_mode<synchronous>, transform_indices = @transform_4, window_bounds = array<i64: 98, 256>}]} {
    %c0 = arith.constant 0 : index
    %c0_0 = arith.constant 0 : index
    %0 = vector.load %arg1[%c0, %c0_0] : memref<98x1152xf32, #tpu.memory_space<vmem>>, vector<98x1152xf32>
    %c0_1 = arith.constant 0 : index
    %c0_2 = arith.constant 0 : index
    %1 = vector.load %arg2[%c0_1, %c0_2] : memref<1152x256xf32, #tpu.memory_space<vmem>>, vector<1152x256xf32>
    %cst = arith.constant dense<0.000000e+00> : vector<98x256xf32>
    %2 = tpu.matmul %0, %1, %cst {dimension_numbers = #tpu.dot_dimension_numbers<[1], [0], [0], [1], [0, 0, 1, 1], [], []>} : vector<98x1152xf32>, vector<1152x256xf32>, vector<98x256xf32> -> vector<98x256xf32>
    %cst_3 = arith.constant dense<0.000000e+00> : vector<256xf32>
    %3 = vector.multi_reduction <add>, %2, %cst_3 [0] : vector<98x256xf32> to vector<256xf32>
    %4 = vector.shape_cast %3 : vector<256xf32> to vector<1x256xf32>
    %5 = arith.mulf %2, %2 : vector<98x256xf32>
    %cst_4 = arith.constant dense<0.000000e+00> : vector<256xf32>
    %6 = vector.multi_reduction <add>, %5, %cst_4 [0] : vector<98x256xf32> to vector<256xf32>
    %7 = vector.shape_cast %6 : vector<256xf32> to vector<1x256xf32>
    %c128_i32 = arith.constant 128 : i32
    %8 = tpu.dynamic_rotate %4 by %c128_i32 dim 1 : vector<1x256xf32>, i32 -> vector<1x256xf32>
    %9 = arith.addf %4, %8 : vector<1x256xf32>
    %c64_i32 = arith.constant 64 : i32
    %10 = tpu.dynamic_rotate %9 by %c64_i32 dim 1 : vector<1x256xf32>, i32 -> vector<1x256xf32>
    %11 = arith.addf %9, %10 : vector<1x256xf32>
    %c128_i32_5 = arith.constant 128 : i32
    %12 = tpu.dynamic_rotate %7 by %c128_i32_5 dim 1 : vector<1x256xf32>, i32 -> vector<1x256xf32>
    %13 = arith.addf %7, %12 : vector<1x256xf32>
    %c64_i32_6 = arith.constant 64 : i32
    %14 = tpu.dynamic_rotate %13 by %c64_i32_6 dim 1 : vector<1x256xf32>, i32 -> vector<1x256xf32>
    %15 = arith.addf %13, %14 : vector<1x256xf32>
    %cst_7 = arith.constant 0.00255102036 : f32
    %16 = vector.broadcast %cst_7 : f32 to vector<1x256xf32>
    %17 = arith.mulf %11, %16 : vector<1x256xf32>
    %cst_8 = arith.constant 0.00255102036 : f32
    %18 = vector.broadcast %cst_8 : f32 to vector<1x256xf32>
    %19 = arith.mulf %15, %18 : vector<1x256xf32>
    %20 = arith.mulf %17, %17 : vector<1x256xf32>
    %21 = arith.subf %19, %20 : vector<1x256xf32>
    %cst_9 = arith.constant 0.000000e+00 : f32
    %22 = vector.broadcast %cst_9 : f32 to vector<1x256xf32>
    %23 = arith.maximumf %21, %22 : vector<1x256xf32>
    %24 = vector.broadcast %17 : vector<1x256xf32> to vector<98x256xf32>
    %25 = arith.subf %2, %24 : vector<98x256xf32>
    %cst_10 = arith.constant 9.99999974E-6 : f32
    %26 = vector.broadcast %cst_10 : f32 to vector<1x256xf32>
    %27 = arith.addf %23, %26 : vector<1x256xf32>
    %28 = math.rsqrt %27 : vector<1x256xf32>
    %c0_11 = arith.constant 0 : index
    %c0_12 = arith.constant 0 : index
    %29 = vector.load %arg3[%c0_11, %c0_12] : memref<1x256xf32, #tpu.memory_space<vmem>>, vector<1x256xf32>
    %30 = arith.mulf %28, %29 : vector<1x256xf32>
    %31 = vector.broadcast %30 : vector<1x256xf32> to vector<98x256xf32>
    %32 = arith.mulf %25, %31 : vector<98x256xf32>
    %c0_13 = arith.constant 0 : index
    %c0_14 = arith.constant 0 : index
    %33 = vector.load %arg4[%c0_13, %c0_14] : memref<1x256xf32, #tpu.memory_space<vmem>>, vector<1x256xf32>
    %34 = vector.broadcast %33 : vector<1x256xf32> to vector<98x256xf32>
    %35 = arith.addf %32, %34 : vector<98x256xf32>
    %cst_15 = arith.constant 0.000000e+00 : f32
    %36 = vector.broadcast %cst_15 : f32 to vector<98x256xf32>
    %37 = arith.cmpf oge, %35, %36 : vector<98x256xf32>
    %cst_16 = arith.constant 2.000000e-01 : f32
    %38 = vector.broadcast %cst_16 : f32 to vector<98x256xf32>
    %39 = arith.mulf %38, %35 : vector<98x256xf32>
    %40 = arith.select %37, %35, %39 : vector<98x256xi1>, vector<98x256xf32>
    %c0_17 = arith.constant 0 : index
    %c0_18 = arith.constant 0 : index
    %41 = vector.load %arg5[%c0_17, %c0_18] : memref<98x256xf32, #tpu.memory_space<vmem>>, vector<98x256xf32>
    tpu.vector_store %arg5[%c0_17, %c0_18], %40 {strides = array<i32>} : memref<98x256xf32, #tpu.memory_space<vmem>>, vector<98x256xf32>,
    return
  }
  func.func @transform_0(%arg0: i32) -> (i32, i32) {
    %c0_i32 = arith.constant 0 : i32
    %c0_i32_0 = arith.constant 0 : i32
    %c0_i32_1 = arith.constant 0 : i32
    return %c0_i32, %c0_i32_0 : i32, i32
  }
  func.func @transform_1(%arg0: i32) -> (i32, i32) {
    %c0_i32 = arith.constant 0 : i32
    %c0_i32_0 = arith.constant 0 : i32
    %c0_i32_1 = arith.constant 0 : i32
    return %c0_i32, %c0_i32_0 : i32, i32
  }
  func.func @transform_2(%arg0: i32) -> (i32, i32) {
    %c0_i32 = arith.constant 0 : i32
    %c0_i32_0 = arith.constant 0 : i32
    %c0_i32_1 = arith.constant 0 : i32
    return %c0_i32, %c0_i32_0 : i32, i32
  }
  func.func @transform_3(%arg0: i32) -> (i32, i32) {
    %c0_i32 = arith.constant 0 : i32
    %c0_i32_0 = arith.constant 0 : i32
    %c0_i32_1 = arith.constant 0 : i32
    return %c0_i32, %c0_i32_0 : i32, i32
  }
  func.func @transform_4(%arg0: i32) -> (i32, i32) {
    %c0_i32 = arith.constant 0 : i32
    %c0_i32_0 = arith.constant 0 : i32
    %c0_i32_1 = arith.constant 0 : i32
    return %c0_i32, %c0_i32_0 : i32, i32
  }
}

module attributes {stable_mosaic.version = 11 : i64} {
  func.func @_dc2_kernel(%arg0: i32, %arg1: memref<56x576xf32, #tpu.memory_space<vmem>>, %arg2: memref<576x128xf32, #tpu.memory_space<vmem>>, %arg3: memref<1x128xf32, #tpu.memory_space<vmem>>, %arg4: memref<56x128xf32, #tpu.memory_space<vmem>>) attributes {dimension_semantics = [#tpu.dimension_semantics<parallel>], iteration_bounds = array<i64: 7>, scalar_prefetch = 0 : i64, scratch_operands = 0 : i64, tpu.core_type = #tpu.core_type<tc>, window_params = [{transform_indices = @transform_0, window_bounds = array<i64: 56, 576>}, {pipeline_mode = #tpu.pipeline_mode<synchronous>, transform_indices = @transform_1, window_bounds = array<i64: 576, 128>}, {pipeline_mode = #tpu.pipeline_mode<synchronous>, transform_indices = @transform_2, window_bounds = array<i64: 1, 128>}, {transform_indices = @transform_3, window_bounds = array<i64: 56, 128>}]} {
    %c0 = arith.constant 0 : index
    %c0_0 = arith.constant 0 : index
    %0 = vector.load %arg1[%c0, %c0_0] : memref<56x576xf32, #tpu.memory_space<vmem>>, vector<56x576xf32>
    %c0_1 = arith.constant 0 : index
    %c0_2 = arith.constant 0 : index
    %1 = vector.load %arg2[%c0_1, %c0_2] : memref<576x128xf32, #tpu.memory_space<vmem>>, vector<576x128xf32>
    %cst = arith.constant dense<0.000000e+00> : vector<56x128xf32>
    %2 = tpu.matmul %0, %1, %cst {dimension_numbers = #tpu.dot_dimension_numbers<[1], [0], [0], [1], [0, 0, 1, 1], [], []>} : vector<56x576xf32>, vector<576x128xf32>, vector<56x128xf32> -> vector<56x128xf32>
    %c0_3 = arith.constant 0 : index
    %c0_4 = arith.constant 0 : index
    %3 = vector.load %arg3[%c0_3, %c0_4] : memref<1x128xf32, #tpu.memory_space<vmem>>, vector<1x128xf32>
    %4 = vector.broadcast %3 : vector<1x128xf32> to vector<56x128xf32>
    %5 = arith.addf %2, %4 : vector<56x128xf32>
    %6 = math.tanh %5 : vector<56x128xf32>
    %c0_5 = arith.constant 0 : index
    %c0_6 = arith.constant 0 : index
    %7 = vector.load %arg4[%c0_5, %c0_6] : memref<56x128xf32, #tpu.memory_space<vmem>>, vector<56x128xf32>
    tpu.vector_store %arg4[%c0_5, %c0_6], %6 {strides = array<i32>} : memref<56x128xf32, #tpu.memory_space<vmem>>, vector<56x128xf32>,
    return
  }
  func.func @transform_0(%arg0: i32) -> (i32, i32) {
    %c0_i32 = arith.constant 0 : i32
    %c0_i32_0 = arith.constant 0 : i32
    return %arg0, %c0_i32 : i32, i32
  }
  func.func @transform_1(%arg0: i32) -> (i32, i32) {
    %c0_i32 = arith.constant 0 : i32
    %c0_i32_0 = arith.constant 0 : i32
    %c0_i32_1 = arith.constant 0 : i32
    return %c0_i32, %c0_i32_0 : i32, i32
  }
  func.func @transform_2(%arg0: i32) -> (i32, i32) {
    %c0_i32 = arith.constant 0 : i32
    %c0_i32_0 = arith.constant 0 : i32
    %c0_i32_1 = arith.constant 0 : i32
    return %c0_i32, %c0_i32_0 : i32, i32
  }
  func.func @transform_3(%arg0: i32) -> (i32, i32) {
    %c0_i32 = arith.constant 0 : i32
    %c0_i32_0 = arith.constant 0 : i32
    return %arg0, %c0_i32 : i32, i32
  }
}

</mosaic_0001>

<bundles_post_ra>
// kernel: generator_forward.4
= control target key start
LH: loop header
LB: loop body
LE: loop exit
PB: predicated region body
PF: predicated region fallthrough
CT: control target
= control target key end

     0   :  { %vm1441_vm0 = vcmask 1041408   ;;  %s4250_s1 = inlined_call_operand.vmem [shape: f32[1152,256], index: 1, kind: input, shape index: {}]   ;;  %s4251_s0 = inlined_call_operand.vmem [shape: f32[98,1152], index: 0, kind: input, shape index: {}]   ;;  %s4252_s2 = inlined_call_operand.vmem [shape: f32[1,256], index: 2, kind: input, shape index: {}]   ;;  %s4253_s3 = inlined_call_operand.vmem [shape: f32[1,256], index: 3, kind: input, shape index: {}]   ;;  %s4254_s4 = inlined_call_operand.vmem [shape: f32[98,256], index: 4, kind: output, shape index: {}]  }
   0x1   :  { %v164_v0 = vld [vmem:[%s4250_s1 + $0xf0] sm:$0xff]  ;;  %v162_v2 = vld [vmem:[%s4250_s1 + $0xe0] sm:$0xff]  ;;  %v80_v32 = vld [vmem:[%s4251_s0 + $0x1f8] sm:$0xff] }
   0x2   :  { %v196_v1 = vld [vmem:[%s4250_s1 + $0x1f0] sm:$0xff]  ;;  %1762 = vmatpush.msra.mxu2 %v164_v0  ;;  %v194_v3 = vld [vmem:[%s4250_s1 + $0x1e0] sm:$0xff]  ;;  %422 = vmatpush.msra.mxu0 %v164_v0  ;;  %v18_v36 = vld [vmem:[%s4251_s0 + $0x8] sm:$0xff] }
   0x3   :  { %1778 = vmatpush.msra.mxu3 %v196_v1  ;;  %478 = vmatpush.msra.mxu1 %v196_v1  ;;  %v160_v4 = vld [vmem:[%s4250_s1 + $0xd0] sm:$0xff]  ;;  %v158_v6 = vld [vmem:[%s4250_s1 + $0xc0] sm:$0xff]  ;;  %v90_v47 = vld [vmem:[%s4251_s0 + $0x248] sm:$0xff] }
   0x4   :  { %v192_v5 = vld [vmem:[%s4250_s1 + $0x1d0] sm:$0xff]  ;;  %1763 = vmatpush.msra.mxu2 %v162_v2  ;;  %423 = vmatpush.msra.mxu0 %v162_v2  ;;  %v190_v7 = vld [vmem:[%s4250_s1 + $0x1c0] sm:$0xff]  ;;  %v2062_v50 = vld [vmem:[%s4251_s0 + $0x48] sm:$0xff] }
   0x5   :  { %1779 = vmatpush.msra.mxu3 %v194_v3  ;;  %479 = vmatpush.msra.mxu1 %v194_v3  ;;  %v156_v8 = vld [vmem:[%s4250_s1 + $0xb0] sm:$0xff]  ;;  %v154_v10 = vld [vmem:[%s4250_s1 + $0xa0] sm:$0xff]  ;;  %v98_v62 = vld [vmem:[%s4251_s0 + $0x288] sm:$0xff] }
   0x6   :  { %1764 = vmatpush.msra.mxu2 %v160_v4  ;;  %424 = vmatpush.msra.mxu0 %v160_v4  ;;  %v188_v9 = vld [vmem:[%s4250_s1 + $0x1b0] sm:$0xff]  ;;  %v186_v11 = vld [vmem:[%s4250_s1 + $0x1a0] sm:$0xff]  ;;  %v36_v4 = vld [vmem:[%s4251_s0 + $0x98] sm:$0xff] }
   0x7   :  { %1780 = vmatpush.msra.mxu3 %v192_v5  ;;  %480 = vmatpush.msra.mxu1 %v192_v5  ;;  %v152_v12 = vld [vmem:[%s4250_s1 + $0x90] sm:$0xff]  ;;  %v150_v14 = vld [vmem:[%s4250_s1 + $0x80] sm:$0xff] }
   0x8   :  { %1765 = vmatpush.msra.mxu2 %v158_v6  ;;  %425 = vmatpush.msra.mxu0 %v158_v6  ;;  %v184_v13 = vld [vmem:[%s4250_s1 + $0x190] sm:$0xff]  ;;  %v182_v15 = vld [vmem:[%s4250_s1 + $0x180] sm:$0xff] }
   0x9   :  { %1781 = vmatpush.msra.mxu3 %v190_v7  ;;  %481 = vmatpush.msra.mxu1 %v190_v7  ;;  %v148_v16 = vld [vmem:[%s4250_s1 + $0x70] sm:$0xff]  ;;  %v146_v18 = vld [vmem:[%s4250_s1 + $0x60] sm:$0xff] }
   0xa   :  { %1766 = vmatpush.msra.mxu2 %v156_v8  ;;  %426 = vmatpush.msra.mxu0 %v156_v8  ;;  %v180_v17 = vld [vmem:[%s4250_s1 + $0x170] sm:$0xff]  ;;  %v178_v19 = vld [vmem:[%s4250_s1 + $0x160] sm:$0xff] }
   0xb   :  { %1782 = vmatpush.msra.mxu3 %v188_v9  ;;  %482 = vmatpush.msra.mxu1 %v188_v9  ;;  %v144_v20 = vld [vmem:[%s4250_s1 + $0x50] sm:$0xff]  ;;  %v142_v22 = vld [vmem:[%s4250_s1 + $0x40] sm:$0xff] }
   0xc   :  { %1767 = vmatpush.msra.mxu2 %v154_v10  ;;  %427 = vmatpush.msra.mxu0 %v154_v10  ;;  %v176_v21 = vld [vmem:[%s4250_s1 + $0x150] sm:$0xff]  ;;  %v174_v23 = vld [vmem:[%s4250_s1 + $0x140] sm:$0xff] }
   0xd   :  { %1783 = vmatpush.msra.mxu3 %v186_v11  ;;  %483 = vmatpush.msra.mxu1 %v186_v11  ;;  %v140_v24 = vld [vmem:[%s4250_s1 + $0x30] sm:$0xff]  ;;  %v138_v26 = vld [vmem:[%s4250_s1 + $0x20] sm:$0xff] }
   0xe   :  { %1768 = vmatpush.msra.mxu2 %v152_v12  ;;  %428 = vmatpush.msra.mxu0 %v152_v12  ;;  %v172_v25 = vld [vmem:[%s4250_s1 + $0x130] sm:$0xff]  ;;  %v170_v27 = vld [vmem:[%s4250_s1 + $0x120] sm:$0xff] }
   0xf   :  { %1784 = vmatpush.msra.mxu3 %v184_v13  ;;  %484 = vmatpush.msra.mxu1 %v184_v13  ;;  %v136_v28 = vld [vmem:[%s4250_s1 + $0x10] sm:$0xff]  ;;  %v134_v30 = vld [vmem:[%s4250_s1] sm:$0xff] }
  0x10   :  { %1769 = vmatpush.msra.mxu2 %v150_v14  ;;  %429 = vmatpush.msra.mxu0 %v150_v14  ;;  %v168_v29 = vld [vmem:[%s4250_s1 + $0x110] sm:$0xff]  ;;  %v166_v31 = vld [vmem:[%s4250_s1 + $0x100] sm:$0xff] }
  0x11   :  { %1785 = vmatpush.msra.mxu3 %v182_v15  ;;  %485 = vmatpush.msra.mxu1 %v182_v15  ;;  %v81_v33 = vld [vmem:[%s4251_s0 + $0x200] sm:$0xff]  ;;  %v228_v34 = vld [vmem:[%s4250_s1 + $0x2f0] sm:$0xff]  ;;  %v108_v15 = vld [vmem:[%s4251_s0 + $0x2d8] sm:$0xff] }
  0x12   :  { %1770 = vmatpush.msra.mxu2 %v148_v16  ;;  %430 = vmatpush.msra.mxu0 %v148_v16  ;;  %v2014_v35 = vld [vmem:[%s4251_s0] sm:$0xff]  ;;  %v260_v37 = vld [vmem:[%s4250_s1 + $0x3f0] sm:$0xff] }
  0x13   :  { %1786 = vmatpush.msra.mxu3 %v180_v17  ;;  %486 = vmatpush.msra.mxu1 %v180_v17  ;;  %v292_v38 = vld [vmem:[%s4250_s1 + $0x4f0] sm:$0xff]  ;;  %v226_v39 = vld [vmem:[%s4250_s1 + $0x2e0] sm:$0xff] }
  0x14   :  { %1771 = vmatpush.msra.mxu2 %v146_v18  ;;  %431 = vmatpush.msra.mxu0 %v146_v18  ;;  %v324_v40 = vld [vmem:[%s4250_s1 + $0x5f0] sm:$0xff]  ;;  %v258_v41 = vld [vmem:[%s4250_s1 + $0x3e0] sm:$0xff]  ;;  %v2164_v18 = vld [vmem:[%s4251_s0 + $0xd8] sm:$0xff] }
  0x15   :  { %1787 = vmatpush.msra.mxu3 %v178_v19  ;;  %487 = vmatpush.msra.mxu1 %v178_v19  ;;  %v224_v42 = vld [vmem:[%s4250_s1 + $0x2d0] sm:$0xff]  ;;  %v290_v43 = vld [vmem:[%s4250_s1 + $0x4e0] sm:$0xff] }
  0x16   :  { %1772 = vmatpush.msra.mxu2 %v144_v20  ;;  %432 = vmatpush.msra.mxu0 %v144_v20  ;;  %v256_v44 = vld [vmem:[%s4250_s1 + $0x3d0] sm:$0xff]  ;;  %v322_v45 = vld [vmem:[%s4250_s1 + $0x5e0] sm:$0xff] }
  0x17   :  { %1788 = vmatpush.msra.mxu3 %v176_v21  ;;  %488 = vmatpush.msra.mxu1 %v176_v21  ;;  %v89_v46 = vld [vmem:[%s4251_s0 + $0x240] sm:$0xff]  ;;  %v288_v49 = vld [vmem:[%s4250_s1 + $0x4d0] sm:$0xff] }
  0x18   :  { %1773 = vmatpush.msra.mxu2 %v142_v22  ;;  %433 = vmatpush.msra.mxu0 %v142_v22  ;;  %v222_v48 = vld [vmem:[%s4250_s1 + $0x2c0] sm:$0xff]  ;;  %v27_v52 = vld [vmem:[%s4251_s0 + $0x50] sm:$0xff] }
  0x19   :  { %1789 = vmatpush.msra.mxu3 %v174_v23  ;;  %489 = vmatpush.msra.mxu1 %v174_v23  ;;  %v254_v51 = vld [vmem:[%s4250_s1 + $0x3c0] sm:$0xff]  ;;  %v220_v53 = vld [vmem:[%s4250_s1 + $0x2b0] sm:$0xff] }
  0x1a   :  { %1774 = vmatpush.msra.mxu2 %v140_v24  ;;  %434 = vmatpush.msra.mxu0 %v140_v24  ;;  %v320_v54 = vld [vmem:[%s4250_s1 + $0x5d0] sm:$0xff]  ;;  %v286_v55 = vld [vmem:[%s4250_s1 + $0x4c0] sm:$0xff] }
  0x1b   :  { %1790 = vmatpush.msra.mxu3 %v172_v25  ;;  %490 = vmatpush.msra.mxu1 %v172_v25  ;;  %v252_v56 = vld [vmem:[%s4250_s1 + $0x3b0] sm:$0xff]  ;;  %v218_v57 = vld [vmem:[%s4250_s1 + $0x2a0] sm:$0xff] }
  0x1c   :  { %1775 = vmatpush.msra.mxu2 %v138_v26  ;;  %435 = vmatpush.msra.mxu0 %v138_v26  ;;  %v318_v58 = vld [vmem:[%s4250_s1 + $0x5c0] sm:$0xff]  ;;  %v284_v59 = vld [vmem:[%s4250_s1 + $0x4b0] sm:$0xff] }
  0x1d   :  { %1791 = vmatpush.msra.mxu3 %v170_v27  ;;  %491 = vmatpush.msra.mxu1 %v170_v27  ;;  %v250_v60 = vld [vmem:[%s4250_s1 + $0x3a0] sm:$0xff]  ;;  %v216_v61 = vld [vmem:[%s4250_s1 + $0x290] sm:$0xff] }
  0x1e   :  { %1776 = vmatpush.msra.mxu2 %v136_v28  ;;  %436 = vmatpush.msra.mxu0 %v136_v28  ;;  %v99_v63 = vld [vmem:[%s4251_s0 + $0x290] sm:$0xff]  ;;  %v214_v3 = vld [vmem:[%s4250_s1 + $0x280] sm:$0xff] }
  0x1f   :  { %1792 = vmatpush.msra.mxu3 %v168_v29  ;;  %492 = vmatpush.msra.mxu1 %v168_v29  ;;  %v316_v0 = vld [vmem:[%s4250_s1 + $0x5b0] sm:$0xff]  ;;  %v282_v5 = vld [vmem:[%s4250_s1 + $0x4a0] sm:$0xff] }
  0x20   :  { %1777 = vmatpush.msra.mxu2 %v134_v30  ;;  %437 = vmatpush.msra.mxu0 %v134_v30  ;;  %v248_v1 = vld [vmem:[%s4250_s1 + $0x390] sm:$0xff]  ;;  %v314_v6 = vld [vmem:[%s4250_s1 + $0x5a0] sm:$0xff]  ;;  %v116_v30 = vld [vmem:[%s4251_s0 + $0x318] sm:$0xff] }
  0x21   :  { %1793 = vmatpush.msra.mxu3 %v166_v31  ;;  %459 = vmatmul.f32.vlgmr.msra.gmra.mxu2 %v80_v32  ;;  %v2113_v2 = vld [vmem:[%s4251_s0 + $0x90] sm:$0xff]  ;;  %v246_v7 = vld [vmem:[%s4250_s1 + $0x380] sm:$0xff] }
  0x22   :  { %515 = vmatmul.f32.vlgmr.msra.gmra.mxu3 %v81_v33  ;;  %534 = vmatpush.msrb.mxu2 %v228_v34  ;;  %v280_v8 = vld [vmem:[%s4250_s1 + $0x490] sm:$0xff]  ;;  %v210_v12 = vld [vmem:[%s4250_s1 + $0x260] sm:$0xff] }
  0x23   :  { %493 = vmatpush.msra.mxu1 %v166_v31  ;;  %438 = vmatmul.f32.vlgmr.msra.gmra.mxu0 %v2014_v35  ;;  %v212_v9 = vld [vmem:[%s4250_s1 + $0x270] sm:$0xff]  ;;  %v278_v13 = vld [vmem:[%s4250_s1 + $0x480] sm:$0xff] }
  0x24   :  { %494 = vmatmul.f32.vlgmr.msra.gmra.mxu1 %v18_v36  ;;  %590 = vmatpush.msrb.mxu3 %v260_v37  ;;  %v312_v10 = vld [vmem:[%s4250_s1 + $0x590] sm:$0xff]  ;;  %v242_v16 = vld [vmem:[%s4250_s1 + $0x360] sm:$0xff]  ;;  %v54_v37 = vld [vmem:[%s4251_s0 + $0x128] sm:$0xff] }
  0x25   :  { %646 = vmatpush.msrb.mxu0 %v292_v38  ;;  %535 = vmatpush.msrb.mxu2 %v226_v39  ;;  %v244_v11 = vld [vmem:[%s4250_s1 + $0x370] sm:$0xff]  ;;  %v310_v17 = vld [vmem:[%s4250_s1 + $0x580] sm:$0xff] }
  0x26   :  { %702 = vmatpush.msrb.mxu1 %v324_v40  ;;  %591 = vmatpush.msrb.mxu3 %v258_v41  ;;  %v107_v14 = vld [vmem:[%s4251_s0 + $0x2d0] sm:$0xff]  ;;  %v45_v20 = vld [vmem:[%s4251_s0 + $0xe0] sm:$0xff] }
  0x27   :  { %536 = vmatpush.msrb.mxu2 %v224_v42  ;;  %647 = vmatpush.msrb.mxu0 %v290_v43  ;;  %v208_v19 = vld [vmem:[%s4250_s1 + $0x250] sm:$0xff]  ;;  %v206_v24 = vld [vmem:[%s4250_s1 + $0x240] sm:$0xff] }
  0x28   :  { %592 = vmatpush.msrb.mxu3 %v256_v44  ;;  %703 = vmatpush.msrb.mxu1 %v322_v45  ;;  %v276_v21 = vld [vmem:[%s4250_s1 + $0x470] sm:$0xff]  ;;  %v274_v25 = vld [vmem:[%s4250_s1 + $0x460] sm:$0xff] }
  0x29   :  { %462 = vmatmul.f32.gmra.mxu2 %v89_v46  ;;  %648 = vmatpush.msrb.mxu0 %v288_v49  ;;  %v240_v22 = vld [vmem:[%s4250_s1 + $0x350] sm:$0xff]  ;;  %v238_v26 = vld [vmem:[%s4250_s1 + $0x340] sm:$0xff] }
  0x2a   :  { %518 = vmatmul.f32.gmra.mxu3 %v90_v47  ;;  %537 = vmatpush.msrb.mxu2 %v222_v48  ;;  %v308_v23 = vld [vmem:[%s4250_s1 + $0x570] sm:$0xff]  ;;  %v306_v27 = vld [vmem:[%s4250_s1 + $0x560] sm:$0xff]  ;;  %v126_v48 = vld [vmem:[%s4251_s0 + $0x368] sm:$0x3] }
  0x2b   :  { %441 = vmatmul.f32.gmra.mxu0 %v2062_v50  ;;  %593 = vmatpush.msrb.mxu3 %v254_v51  ;;  %v204_v28 = vld [vmem:[%s4250_s1 + $0x230] sm:$0xff]  ;;  %v117_v31 = vld [vmem:[%s4251_s0 + $0x320] sm:$0xff] }
  0x2c   :  { %497 = vmatmul.f32.gmra.mxu1 %v27_v52  ;;  %538 = vmatpush.msrb.mxu2 %v220_v53  ;;  %v272_v29 = vld [vmem:[%s4250_s1 + $0x450] sm:$0xff]  ;;  %v202_v33 = vld [vmem:[%s4250_s1 + $0x220] sm:$0xff]  ;;  %v2266_v52 = vld [vmem:[%s4251_s0 + $0x168] sm:$0xff] }
  0x2d   :  { %704 = vmatpush.msrb.mxu1 %v320_v54  ;;  %649 = vmatpush.msrb.mxu0 %v286_v55  ;;  %v236_v32 = vld [vmem:[%s4250_s1 + $0x330] sm:$0xff]  ;;  %v2215_v34 = vld [vmem:[%s4251_s0 + $0x120] sm:$0xff] }
  0x2e   :  { %594 = vmatpush.msrb.mxu3 %v252_v56  ;;  %539 = vmatpush.msrb.mxu2 %v218_v57  ;;  %v304_v36 = vld [vmem:[%s4250_s1 + $0x550] sm:$0xff]  ;;  %v234_v38 = vld [vmem:[%s4250_s1 + $0x320] sm:$0xff] }
  0x2f   :  { %705 = vmatpush.msrb.mxu1 %v318_v58  ;;  %650 = vmatpush.msrb.mxu0 %v284_v59  ;;  %v270_v39 = vld [vmem:[%s4250_s1 + $0x440] sm:$0xff]  ;;  %v200_v40 = vld [vmem:[%s4250_s1 + $0x210] sm:$0xff] }
  0x30   :  { %595 = vmatpush.msrb.mxu3 %v250_v60  ;;  %540 = vmatpush.msrb.mxu2 %v216_v61  ;;  %v302_v41 = vld [vmem:[%s4250_s1 + $0x540] sm:$0xff]  ;;  %v232_v42 = vld [vmem:[%s4250_s1 + $0x310] sm:$0xff] }
  0x31   :  { %465 = vmatmul.f32.gmra.mxu2 %v98_v62  ;;  %706 = vmatpush.msrb.mxu1 %v316_v0  ;;  %v268_v43 = vld [vmem:[%s4250_s1 + $0x430] sm:$0xff]  ;;  %v198_v44 = vld [vmem:[%s4250_s1 + $0x200] sm:$0xff] }
  0x32   :  { %521 = vmatmul.f32.gmra.mxu3 %v99_v63  ;;  %541 = vmatpush.msrb.mxu2 %v214_v3  ;;  %v300_v45 = vld [vmem:[%s4250_s1 + $0x530] sm:$0xff]  ;;  %v230_v46 = vld [vmem:[%s4250_s1 + $0x300] sm:$0xff]  ;;  %v165_v63 = vld [vmem:[%s4250_s1 + $0xf8] sm:$0xff] }
  0x33   :  { %596 = vmatpush.msrb.mxu3 %v248_v1  ;;  %444 = vmatmul.f32.gmra.mxu0 %v2113_v2  ;;  %v125_v47 = vld [vmem:[%s4251_s0 + $0x360] sm:$0x3]  ;;  %v356_v51 = vld [vmem:[%s4250_s1 + $0x6f0] sm:$0xff]  ;;  %v20_v1 = vld [vmem:[%s4251_s0 + $0x18] sm:$0xff] }
  0x34   :  { %500 = vmatmul.f32.gmra.mxu1 %v36_v4  ;;  %651 = vmatpush.msrb.mxu0 %v282_v5  ;;  %v266_v49 = vld [vmem:[%s4250_s1 + $0x420] sm:$0xff]  ;;  %v63_v54 = vld [vmem:[%s4251_s0 + $0x170] sm:$0xff] }
  0x35   :  { %707 = vmatpush.msrb.mxu1 %v314_v6  ;;  %597 = vmatpush.msrb.mxu3 %v246_v7  ;;  %v298_v53 = vld [vmem:[%s4250_s1 + $0x520] sm:$0xff]  ;;  %v388_v55 = vld [vmem:[%s4250_s1 + $0x7f0] sm:$0xff]  ;;  %v163_v6 = vld [vmem:[%s4250_s1 + $0xe8] sm:$0xff] }
  0x36   :  { %652 = vmatpush.msrb.mxu0 %v280_v8  ;;  %542 = vmatpush.msrb.mxu2 %v212_v9  ;;  %v264_v56 = vld [vmem:[%s4250_s1 + $0x410] sm:$0xff]  ;;  %v354_v58 = vld [vmem:[%s4250_s1 + $0x6e0] sm:$0xff]  ;;  %v72_v7 = vld [vmem:[%s4251_s0 + $0x1b8] sm:$0xff] }
  0x37   :  { %708 = vmatpush.msrb.mxu1 %v312_v10  ;;  %598 = vmatpush.msrb.mxu3 %v244_v11  ;;  %v296_v57 = vld [vmem:[%s4250_s1 + $0x510] sm:$0xff]  ;;  %v386_v59 = vld [vmem:[%s4250_s1 + $0x7e0] sm:$0xff] }
  0x38   :  { %543 = vmatpush.msrb.mxu2 %v210_v12  ;;  %653 = vmatpush.msrb.mxu0 %v278_v13  ;;  %v262_v60 = vld [vmem:[%s4250_s1 + $0x400] sm:$0xff]  ;;  %v420_v62 = vld [vmem:[%s4250_s1 + $0x8f0] sm:$0xff]  ;;  %v161_v12 = vld [vmem:[%s4250_s1 + $0xd8] sm:$0xff] }
  0x39   :  { %468 = vmatmul.f32.gmra.mxu2 %v107_v14  ;;  %599 = vmatpush.msrb.mxu3 %v242_v16  ;;  %v294_v61 = vld [vmem:[%s4250_s1 + $0x500] sm:$0xff]  ;;  %v19_v0 = vld [vmem:[%s4251_s0 + $0x10] sm:$0xff]  ;;  %v159_v16 = vld [vmem:[%s4250_s1 + $0xc8] sm:$0xff] }
  0x3a   :  { %524 = vmatmul.f32.gmra.mxu3 %v108_v15  ;;  %709 = vmatpush.msrb.mxu1 %v310_v17  ;;  %v352_v3 = vld [vmem:[%s4250_s1 + $0x6d0] sm:$0xff]  ;;  %v418_v8 = vld [vmem:[%s4250_s1 + $0x8e0] sm:$0xff]  ;;  %v28_v17 = vld [vmem:[%s4251_s0 + $0x58] sm:$0xff] }
  0x3b   :  { %447 = vmatmul.f32.gmra.mxu0 %v2164_v18  ;;  %544 = vmatpush.msrb.mxu2 %v208_v19  ;;  %v384_v4 = vld [vmem:[%s4250_s1 + $0x7d0] sm:$0xff]  ;;  %v350_v9 = vld [vmem:[%s4250_s1 + $0x6c0] sm:$0xff] }
  0x3c   :  { %503 = vmatmul.f32.gmra.mxu1 %v45_v20  ;;  %654 = vmatpush.msrb.mxu0 %v276_v21  ;;  %v2317_v5 = vld [vmem:[%s4251_s0 + $0x1b0] sm:$0xff]  ;;  %v382_v10 = vld [vmem:[%s4250_s1 + $0x7c0] sm:$0xff] }
  0x3d   :  { %600 = vmatpush.msrb.mxu3 %v240_v22  ;;  %710 = vmatpush.msrb.mxu1 %v308_v23  ;;  %v416_v11 = vld [vmem:[%s4250_s1 + $0x8d0] sm:$0xff]  ;;  %v414_v15 = vld [vmem:[%s4250_s1 + $0x8c0] sm:$0xff]  ;;  %v157_v23 = vld [vmem:[%s4250_s1 + $0xb8] sm:$0xff] }
  0x3e   :  { %545 = vmatpush.msrb.mxu2 %v206_v24  ;;  %655 = vmatpush.msrb.mxu0 %v274_v25  ;;  %v348_v13 = vld [vmem:[%s4250_s1 + $0x6b0] sm:$0xff]  ;;  %v29_v19 = vld [vmem:[%s4251_s0 + $0x60] sm:$0xff]  ;;  %v22_v24 = vld [vmem:[%s4251_s0 + $0x28] sm:$0xff] }
  0x3f   :  { %601 = vmatpush.msrb.mxu3 %v238_v26  ;;  %711 = vmatpush.msrb.mxu1 %v306_v27  ;;  %v380_v14 = vld [vmem:[%s4250_s1 + $0x7b0] sm:$0xff]  ;;  %v346_v20 = vld [vmem:[%s4250_s1 + $0x6a0] sm:$0xff] }
  0x40   :  { %546 = vmatpush.msrb.mxu2 %v204_v28  ;;  %656 = vmatpush.msrb.mxu0 %v272_v29  ;;  %v378_v21 = vld [vmem:[%s4250_s1 + $0x7a0] sm:$0xff]  ;;  %v412_v25 = vld [vmem:[%s4250_s1 + $0x8b0] sm:$0xff]  ;;  %v155_v29 = vld [vmem:[%s4250_s1 + $0xa8] sm:$0xff] }
  0x41   :  { %471 = vmatmul.f32.gmra.mxu2 %v116_v30  ;;  %602 = vmatpush.msrb.mxu3 %v236_v32  ;;  %v21_v22 = vld [vmem:[%s4251_s0 + $0x20] sm:$0xff]  ;;  %v344_v26 = vld [vmem:[%s4250_s1 + $0x690] sm:$0xff]  ;;  %v38_v32 = vld [vmem:[%s4251_s0 + $0xa8] sm:$0xff] }
  0x42   :  { %527 = vmatmul.f32.gmra.mxu3 %v117_v31  ;;  %547 = vmatpush.msrb.mxu2 %v202_v33  ;;  %v376_v27 = vld [vmem:[%s4250_s1 + $0x790] sm:$0xff]  ;;  %v410_v28 = vld [vmem:[%s4250_s1 + $0x8a0] sm:$0xff]  ;;  %v30_v33 = vld [vmem:[%s4251_s0 + $0x68] sm:$0xff] }
  0x43   :  { %450 = vmatmul.f32.gmra.mxu0 %v2215_v34  ;;  %712 = vmatpush.msrb.mxu1 %v304_v36  ;;  %v342_v30 = vld [vmem:[%s4250_s1 + $0x680] sm:$0xff]  ;;  %v31_v36 = vld [vmem:[%s4251_s0 + $0x70] sm:$0xff] }
  0x44   :  { %506 = vmatmul.f32.gmra.mxu1 %v54_v37  ;;  %603 = vmatpush.msrb.mxu3 %v234_v38  ;;  %v37_v31 = vld [vmem:[%s4251_s0 + $0xa0] sm:$0xff]  ;;  %v408_v38 = vld [vmem:[%s4250_s1 + $0x890] sm:$0xff] }
  0x45   :  { %657 = vmatpush.msrb.mxu0 %v270_v39  ;;  %548 = vmatpush.msrb.mxu2 %v200_v40  ;;  %v374_v37 = vld [vmem:[%s4250_s1 + $0x780] sm:$0xff]  ;;  %v153_v39 = vld [vmem:[%s4250_s1 + $0x98] sm:$0xff]  ;;  %v340_v40 = vld [vmem:[%s4250_s1 + $0x670] sm:$0xff] }
  0x46   :  { %713 = vmatpush.msrb.mxu1 %v302_v41  ;;  %604 = vmatpush.msrb.mxu3 %v232_v42  ;;  %v372_v41 = vld [vmem:[%s4250_s1 + $0x770] sm:$0xff]  ;;  %v46_v42 = vld [vmem:[%s4251_s0 + $0xe8] sm:$0xff] }
  0x47   :  { %658 = vmatpush.msrb.mxu0 %v268_v43  ;;  %549 = vmatpush.msrb.mxu2 %v198_v44  ;;  %v47_v43 = vld [vmem:[%s4251_s0 + $0xf0] sm:$0xff] }
  0x48   :  { %714 = vmatpush.msrb.mxu1 %v300_v45  ;;  %605 = vmatpush.msrb.mxu3 %v230_v46  ;;  %v39_v44 = vld [vmem:[%s4251_s0 + $0xb0] sm:$0xff]  ;;  %v40_v45 = vld [vmem:[%s4251_s0 + $0xb8] sm:$0xff]  ;;  %v406_v46 = vld [vmem:[%s4250_s1 + $0x880] sm:$0xff] }
  0x49   :  { %474 = vmatmul.f32.gmra.mxu2 %v125_v47  ;;  %659 = vmatpush.msrb.mxu0 %v266_v49  ;;  %v151_v47 = vld [vmem:[%s4250_s1 + $0x88] sm:$0xff]  ;;  %v370_v49 = vld [vmem:[%s4250_s1 + $0x760] sm:$0xff] }
  0x4a   :  { %530 = vmatmul.f32.gmra.mxu3 %v126_v48  ;;  %758 = vmatpush.msra.mxu2 %v356_v51  ;;  %v338_v48 = vld [vmem:[%s4250_s1 + $0x660] sm:$0xff]  ;;  %v404_v51 = vld [vmem:[%s4250_s1 + $0x870] sm:$0xff] }
  0x4b   :  { %453 = vmatmul.f32.gmra.mxu0 %v2266_v52  ;;  %715 = vmatpush.msrb.mxu1 %v298_v53  ;;  %v55_v53 = vld [vmem:[%s4251_s0 + $0x130] sm:$0xff] }
  0x4c   :  { %509 = vmatmul.f32.gmra.mxu1 %v63_v54  ;;  %814 = vmatpush.msra.mxu3 %v388_v55  ;;  %v56_v54 = vld [vmem:[%s4251_s0 + $0x138] sm:$0xff] }
  0x4d   :  { %660 = vmatpush.msrb.mxu0 %v264_v56  ;;  %716 = vmatpush.msrb.mxu1 %v296_v57  ;;  %v48_v55 = vld [vmem:[%s4251_s0 + $0xf8] sm:$0xff]  ;;  %v49_v56 = vld [vmem:[%s4251_s0 + $0x100] sm:$0xff] }
  0x4e   :  { %759 = vmatpush.msra.mxu2 %v354_v58  ;;  %815 = vmatpush.msra.mxu3 %v386_v59  ;;  %v149_v57 = vld [vmem:[%s4250_s1 + $0x78] sm:$0xff]  ;;  %v336_v58 = vld [vmem:[%s4250_s1 + $0x650] sm:$0xff] }
  0x4f   :  { %661 = vmatpush.msrb.mxu0 %v262_v60  ;;  %717 = vmatpush.msrb.mxu1 %v294_v61  ;;  %v368_v59 = vld [vmem:[%s4250_s1 + $0x750] sm:$0xff]  ;;  %v402_v60 = vld [vmem:[%s4250_s1 + $0x860] sm:$0xff]  ;;  %v147_v61 = vld [vmem:[%s4250_s1 + $0x68] sm:$0xff] }
  0x50   :  { %760 = vmatpush.msra.mxu2 %v352_v3  ;;  %816 = vmatpush.msra.mxu3 %v384_v4  ;;  %v334_v3 = vld [vmem:[%s4250_s1 + $0x640] sm:$0xff] }
  0x51   :  { %870 = vmatpush.msra.mxu0 %v420_v62  ;;  %926 = vmatpush.msra.mxu1 %v165_v63  ;;  %v64_v62 = vld [vmem:[%s4251_s0 + $0x178] sm:$0xff]  ;;  %v65_v63 = vld [vmem:[%s4251_s0 + $0x180] sm:$0xff] }
  0x52   :  { %550 = vmatmul.f32.vlgmr.msrb.gmra.mxu2 %v19_v0  ;;  %606 = vmatmul.f32.vlgmr.msrb.gmra.mxu3 %v20_v1  ;;  %v57_v0 = vld [vmem:[%s4251_s0 + $0x140] sm:$0xff]  ;;  %v58_v1 = vld [vmem:[%s4251_s0 + $0x148] sm:$0xff] }
  0x53   :  { %456 = vmatmul.f32.gmra.mxu0 %v2317_v5  ;;  %927 = vmatpush.msra.mxu1 %v163_v6  ;;  %v366_v4 = vld [vmem:[%s4250_s1 + $0x740] sm:$0xff]  ;;  %v400_v6 = vld [vmem:[%s4250_s1 + $0x850] sm:$0xff] }
  0x54   :  { %512 = vmatmul.f32.gmra.mxu1 %v72_v7  ;;  %871 = vmatpush.msra.mxu0 %v418_v8  ;;  %v145_v7 = vld [vmem:[%s4250_s1 + $0x58] sm:$0xff]  ;;  %v332_v8 = vld [vmem:[%s4250_s1 + $0x630] sm:$0xff] }
  0x55   :  { %761 = vmatpush.msra.mxu2 %v350_v9  ;;  %817 = vmatpush.msra.mxu3 %v382_v10  ;;  %v73_v9 = vld [vmem:[%s4251_s0 + $0x1c0] sm:$0xff]  ;;  %v74_v10 = vld [vmem:[%s4251_s0 + $0x1c8] sm:$0xff] }
  0x56   :  { %872 = vmatpush.msra.mxu0 %v416_v11  ;;  %928 = vmatpush.msra.mxu1 %v161_v12  ;;  %v66_v11 = vld [vmem:[%s4251_s0 + $0x188] sm:$0xff]  ;;  %v67_v12 = vld [vmem:[%s4251_s0 + $0x190] sm:$0xff] }
  0x57   :  { %762 = vmatpush.msra.mxu2 %v348_v13  ;;  %818 = vmatpush.msra.mxu3 %v380_v14  ;;  %v364_v13 = vld [vmem:[%s4250_s1 + $0x730] sm:$0xff]  ;;  %v398_v14 = vld [vmem:[%s4250_s1 + $0x840] sm:$0xff] }
  0x58   :  { %873 = vmatpush.msra.mxu0 %v414_v15  ;;  %929 = vmatpush.msra.mxu1 %v159_v16  ;;  %v143_v15 = vld [vmem:[%s4250_s1 + $0x48] sm:$0xff]  ;;  %v330_v16 = vld [vmem:[%s4250_s1 + $0x620] sm:$0xff] }
  0x59   :  { %763 = vmatpush.msra.mxu2 %v346_v20  ;;  %819 = vmatpush.msra.mxu3 %v378_v21  ;;  %v75_v20 = vld [vmem:[%s4251_s0 + $0x1d0] sm:$0xff]  ;;  %v76_v21 = vld [vmem:[%s4251_s0 + $0x1d8] sm:$0xff] }
  0x5a   :  { %553 = vmatmul.f32.gmra.mxu2 %v28_v17  ;;  %609 = vmatmul.f32.gmra.mxu3 %v29_v19  ;;  %v82_v17 = vld [vmem:[%s4251_s0 + $0x208] sm:$0xff]  ;;  %v83_v19 = vld [vmem:[%s4251_s0 + $0x210] sm:$0xff] }
  0x5b   :  { %662 = vmatmul.f32.vlgmr.msrb.gmra.mxu0 %v21_v22  ;;  %930 = vmatpush.msra.mxu1 %v157_v23  ;;  %v362_v22 = vld [vmem:[%s4250_s1 + $0x720] sm:$0xff]  ;;  %v396_v23 = vld [vmem:[%s4250_s1 + $0x830] sm:$0xff] }
  0x5c   :  { %718 = vmatmul.f32.vlgmr.msrb.gmra.mxu1 %v22_v24  ;;  %874 = vmatpush.msra.mxu0 %v412_v25  ;;  %v141_v24 = vld [vmem:[%s4250_s1 + $0x38] sm:$0xff]  ;;  %v328_v25 = vld [vmem:[%s4250_s1 + $0x610] sm:$0xff] }
  0x5d   :  { %764 = vmatpush.msra.mxu2 %v344_v26  ;;  %820 = vmatpush.msra.mxu3 %v376_v27  ;;  %v360_v26 = vld [vmem:[%s4250_s1 + $0x710] sm:$0xff] }
  0x5e   :  { %875 = vmatpush.msra.mxu0 %v410_v28  ;;  %931 = vmatpush.msra.mxu1 %v155_v29  ;;  %v91_v27 = vld [vmem:[%s4251_s0 + $0x250] sm:$0xff]  ;;  %v92_v28 = vld [vmem:[%s4251_s0 + $0x258] sm:$0xff] }
  0x5f   :  { %765 = vmatpush.msra.mxu2 %v342_v30  ;;  %821 = vmatpush.msra.mxu3 %v374_v37  ;;  %v84_v29 = vld [vmem:[%s4251_s0 + $0x218] sm:$0xff]  ;;  %v85_v30 = vld [vmem:[%s4251_s0 + $0x220] sm:$0xff]  ;;  %v392_v37 = vld [vmem:[%s4250_s1 + $0x810] sm:$0xff] }
  0x60   :  { %876 = vmatpush.msra.mxu0 %v408_v38  ;;  %932 = vmatpush.msra.mxu1 %v153_v39  ;;  %v100_v38 = vld [vmem:[%s4251_s0 + $0x298] sm:$0xff]  ;;  %v101_v39 = vld [vmem:[%s4251_s0 + $0x2a0] sm:$0xff] }
  0x61   :  { %766 = vmatpush.msra.mxu2 %v340_v40  ;;  %822 = vmatpush.msra.mxu3 %v372_v41  ;;  %v93_v40 = vld [vmem:[%s4251_s0 + $0x260] sm:$0xff]  ;;  %v94_v41 = vld [vmem:[%s4251_s0 + $0x268] sm:$0xff] }
  0x62   :  { %556 = vmatmul.f32.gmra.mxu2 %v37_v31  ;;  %612 = vmatmul.f32.gmra.mxu3 %v38_v32  ;;  %v394_v31 = vld [vmem:[%s4250_s1 + $0x820] sm:$0xff]  ;;  %v139_v32 = vld [vmem:[%s4250_s1 + $0x28] sm:$0xff] }
  0x63   :  { %665 = vmatmul.f32.gmra.mxu0 %v30_v33  ;;  %767 = vmatpush.msra.mxu2 %v338_v48  ;;  %v326_v33 = vld [vmem:[%s4250_s1 + $0x600] sm:$0xff]  ;;  %v110_v48 = vld [vmem:[%s4251_s0 + $0x2e8] sm:$0xff] }
  0x64   :  { %721 = vmatmul.f32.gmra.mxu1 %v31_v36  ;;  %877 = vmatpush.msra.mxu0 %v406_v46  ;;  %v358_v36 = vld [vmem:[%s4250_s1 + $0x700] sm:$0xff]  ;;  %v135_v46 = vld [vmem:[%s4250_s1 + $0x8] sm:$0xff] }
  0x65   :  { %933 = vmatpush.msra.mxu1 %v151_v47  ;;  %823 = vmatpush.msra.mxu3 %v370_v49  ;;  %v109_v47 = vld [vmem:[%s4251_s0 + $0x2e0] sm:$0xff] }
  0x66   :  { %878 = vmatpush.msra.mxu0 %v404_v51  ;;  %768 = vmatpush.msra.mxu2 %v336_v58  ;;  %v102_v51 = vld [vmem:[%s4251_s0 + $0x2a8] sm:$0xff] }
  0x67   :  { %934 = vmatpush.msra.mxu1 %v149_v57  ;;  %824 = vmatpush.msra.mxu3 %v368_v59  ;;  %v261_v57 = vld [vmem:[%s4250_s1 + $0x3f8] sm:$0xff] }
  0x68   :  { %879 = vmatpush.msra.mxu0 %v402_v60  ;;  %769 = vmatpush.msra.mxu2 %v334_v3  ;;  %v111_v3 = vld [vmem:[%s4251_s0 + $0x2f0] sm:$0xff] }
  0x69   :  { %935 = vmatpush.msra.mxu1 %v147_v61  ;;  %825 = vmatpush.msra.mxu3 %v366_v4  ;;  %v293_v61 = vld [vmem:[%s4250_s1 + $0x4f8] sm:$0xff] }
  0x6a   :  { %559 = vmatmul.f32.gmra.mxu2 %v46_v42  ;;  %615 = vmatmul.f32.gmra.mxu3 %v47_v43  ;;  %v137_v42 = vld [vmem:[%s4250_s1 + $0x18] sm:$0xff] }
  0x6b   :  { %668 = vmatmul.f32.gmra.mxu0 %v39_v44  ;;  %936 = vmatpush.msra.mxu1 %v145_v7  ;;  %v197_v43 = vld [vmem:[%s4250_s1 + $0x1f8] sm:$0xff] }
  0x6c   :  { %724 = vmatmul.f32.gmra.mxu1 %v40_v45  ;;  %880 = vmatpush.msra.mxu0 %v400_v6  ;;  %v229_v44 = vld [vmem:[%s4250_s1 + $0x2f8] sm:$0xff]  ;;  %v390_v45 = vld [vmem:[%s4250_s1 + $0x800] sm:$0xff] }
  0x6d   :  { %770 = vmatpush.msra.mxu2 %v332_v8  ;;  %826 = vmatpush.msra.mxu3 %v364_v13  ;;  %v112_v6 = vld [vmem:[%s4251_s0 + $0x2f8] sm:$0xff]  ;;  %v259_v8 = vld [vmem:[%s4250_s1 + $0x3e8] sm:$0xff] }
  0x6e   :  { %881 = vmatpush.msra.mxu0 %v398_v14  ;;  %937 = vmatpush.msra.mxu1 %v143_v15  ;;  %v225_v7 = vld [vmem:[%s4250_s1 + $0x2d8] sm:$0xff]  ;;  %v191_v13 = vld [vmem:[%s4250_s1 + $0x1c8] sm:$0xff]  ;;  %v127_v15 = vld [vmem:[%s4251_s0 + $0x370] sm:$0x3] }
  0x6f   :  { %771 = vmatpush.msra.mxu2 %v330_v16  ;;  %827 = vmatpush.msra.mxu3 %v362_v22  ;;  %v223_v14 = vld [vmem:[%s4250_s1 + $0x2c8] sm:$0xff]  ;;  %v128_v16 = vld [vmem:[%s4251_s0 + $0x378] sm:$0x3] }
  0x70   :  { %882 = vmatpush.msra.mxu0 %v396_v23  ;;  %938 = vmatpush.msra.mxu1 %v141_v24  ;;  %v257_v22 = vld [vmem:[%s4250_s1 + $0x3d8] sm:$0xff] }
  0x71   :  { %772 = vmatpush.msra.mxu2 %v328_v25  ;;  %828 = vmatpush.msra.mxu3 %v360_v26  ;;  %v289_v23 = vld [vmem:[%s4250_s1 + $0x4d8] sm:$0xff] }
  0x72   :  { %562 = vmatmul.f32.gmra.mxu2 %v55_v53  ;;  %618 = vmatmul.f32.gmra.mxu3 %v56_v54  ;;  %v103_v54 = vld [vmem:[%s4251_s0 + $0x2b0] sm:$0xff]  ;;  %v189_v24 = vld [vmem:[%s4250_s1 + $0x1b8] sm:$0xff] }
  0x73   :  { %671 = vmatmul.f32.gmra.mxu0 %v48_v55  ;;  %939 = vmatpush.msra.mxu1 %v139_v32  ;;  %v195_v55 = vld [vmem:[%s4250_s1 + $0x1e8] sm:$0xff] }
  0x74   :  { %727 = vmatmul.f32.gmra.mxu1 %v49_v56  ;;  %883 = vmatpush.msra.mxu0 %v394_v31  ;;  %v227_v56 = vld [vmem:[%s4250_s1 + $0x2e8] sm:$0xff] }
  0x75   :  { %773 = vmatpush.msra.mxu2 %v326_v33  ;;  %829 = vmatpush.msra.mxu3 %v358_v36  ;;  %v255_v31 = vld [vmem:[%s4250_s1 + $0x3c8] sm:$0xff]  ;;  %v129_v33 = vld [vmem:[%s4251_s0 + $0x380] sm:$0x3] }
  0x76   :  { %884 = vmatpush.msra.mxu0 %v392_v37  ;;  %940 = vmatpush.msra.mxu1 %v137_v42  ;;  %v130_v37 = vld [vmem:[%s4251_s0 + $0x388] sm:$0x3] }
  0x77   :  { %982 = vmatpush.msrb.mxu2 %v197_v43  ;;  %1038 = vmatpush.msrb.mxu3 %v229_v44  ;;  %v219_v43 = vld [vmem:[%s4250_s1 + $0x2a8] sm:$0xff]  ;;  %v253_v44 = vld [vmem:[%s4250_s1 + $0x3b8] sm:$0xff] }
  0x78   :  { %885 = vmatpush.msra.mxu0 %v390_v45  ;;  %941 = vmatpush.msra.mxu1 %v135_v46  ;;  %v32_v45 = vld [vmem:[%s4251_s0 + $0x78] sm:$0xff]  ;;  %v33_v46 = vld [vmem:[%s4251_s0 + $0x80] sm:$0xff] }
  0x79   :  { %983 = vmatpush.msrb.mxu2 %v195_v55  ;;  %1039 = vmatpush.msrb.mxu3 %v227_v56  ;;  %v185_v55 = vld [vmem:[%s4250_s1 + $0x198] sm:$0xff] }
  0x7a   :  { %565 = vmatmul.f32.gmra.mxu2 %v64_v62  ;;  %621 = vmatmul.f32.gmra.mxu3 %v65_v63  ;;  %v193_v62 = vld [vmem:[%s4250_s1 + $0x1d8] sm:$0xff]  ;;  %v118_v63 = vld [vmem:[%s4251_s0 + $0x328] sm:$0xff] }
  0x7b   :  { %674 = vmatmul.f32.gmra.mxu0 %v57_v0  ;;  %v119_v0 = vld [vmem:[%s4251_s0 + $0x330] sm:$0xff]  ;;  %1150 = vmatpush.msrb.mxu1 %v293_v61  ;;  %v217_v56 = vld [vmem:[%s4250_s1 + $0x298] sm:$0xff]  ;;  %v251_v61 = vld [vmem:[%s4250_s1 + $0x3a8] sm:$0xff] }
  0x7c   :  { %730 = vmatmul.f32.gmra.mxu1 %v58_v1  ;;  %1094 = vmatpush.msrb.mxu0 %v261_v57 }
  0x7d   :  { %984 = vmatpush.msrb.mxu2 %v193_v62  ;;  %1040 = vmatpush.msrb.mxu3 %v225_v7  ;;  %v41_v62 = vld [vmem:[%s4251_s0 + $0xc0] sm:$0xff] }
  0x7e   :  { %1095 = vmatpush.msrb.mxu0 %v259_v8  ;;  %v215_v8 = vld [vmem:[%s4250_s1 + $0x288] sm:$0xff] }
  0x7f   :  { %985 = vmatpush.msrb.mxu2 %v191_v13  ;;  %1041 = vmatpush.msrb.mxu3 %v223_v14  ;;  %v281_v14 = vld [vmem:[%s4250_s1 + $0x498] sm:$0xff] }
  0x80   :  { %1096 = vmatpush.msrb.mxu0 %v257_v22  ;;  %v43_v22 = vld [vmem:[%s4251_s0 + $0xd0] sm:$0xff] }
  0x81   :  { %986 = vmatpush.msrb.mxu2 %v189_v24  ;;  %v247_v24 = vld [vmem:[%s4250_s1 + $0x388] sm:$0xff] }
  0x82   :  { %568 = vmatmul.f32.gmra.mxu2 %v73_v9  ;;  %624 = vmatmul.f32.gmra.mxu3 %v74_v10 }
  0x83   :  { %677 = vmatmul.f32.gmra.mxu0 %v66_v11 }
  0x84   :  { %733 = vmatmul.f32.gmra.mxu1 %v67_v12  ;;  %v291_v12 = vld [vmem:[%s4250_s1 + $0x4e8] sm:$0xff]  ;;  %1097 = vmatpush.msrb.mxu0 %v255_v31 }
  0x85   :  { %1151 = vmatpush.msrb.mxu1 %v291_v12  ;;  %v179_v31 = vld [vmem:[%s4250_s1 + $0x168] sm:$0xff] }
  0x86   :  { %1098 = vmatpush.msrb.mxu0 %v253_v44  ;;  %v177_v44 = vld [vmem:[%s4250_s1 + $0x158] sm:$0xff] }
  0x87   :  { %1152 = vmatpush.msrb.mxu1 %v289_v23 }
  0x88   :  { %1099 = vmatpush.msrb.mxu0 %v251_v61  ;;  %v275_v61 = vld [vmem:[%s4250_s1 + $0x468] sm:$0xff] }
  0x8a   :  { %571 = vmatmul.f32.gmra.mxu2 %v82_v17  ;;  %627 = vmatmul.f32.gmra.mxu3 %v83_v19  ;;  %v120_v19 = vld [vmem:[%s4251_s0 + $0x338] sm:$0xff] }
  0x8b   :  { %680 = vmatmul.f32.gmra.mxu0 %v75_v20 }
  0x8c   :  { %736 = vmatmul.f32.gmra.mxu1 %v76_v21  ;;  %v121_v21 = vld [vmem:[%s4251_s0 + $0x340] sm:$0xff] }
  0x92   :  { %574 = vmatmul.f32.gmra.mxu2 %v91_v27  ;;  %630 = vmatmul.f32.gmra.mxu3 %v92_v28  ;;  %v221_v28 = vld [vmem:[%s4250_s1 + $0x2b8] sm:$0xff] }
  0x93   :  { %683 = vmatmul.f32.gmra.mxu0 %v84_v29  ;;  %v23_v29 = vld [vmem:[%s4251_s0 + $0x30] sm:$0xff]  ;;  %1042 = vmatpush.msrb.mxu3 %v221_v28 }
  0x94   :  { %739 = vmatmul.f32.gmra.mxu1 %v85_v30  ;;  %v24_v30 = vld [vmem:[%s4251_s0 + $0x38] sm:$0xff] }
  0x95   :  { %1043 = vmatpush.msrb.mxu3 %v219_v43 }
  0x97   :  { %1044 = vmatpush.msrb.mxu3 %v217_v56 }
  0x99   :  { %1045 = vmatpush.msrb.mxu3 %v215_v8 }
  0x9a   :  { %577 = vmatmul.f32.gmra.mxu2 %v100_v38  ;;  %633 = vmatmul.f32.gmra.mxu3 %v101_v39  ;;  %v287_v38 = vld [vmem:[%s4250_s1 + $0x4c8] sm:$0xff] }
  0x9b   :  { %686 = vmatmul.f32.gmra.mxu0 %v93_v40  ;;  %1153 = vmatpush.msrb.mxu1 %v287_v38  ;;  %v187_v39 = vld [vmem:[%s4250_s1 + $0x1a8] sm:$0xff] }
  0x9c   :  { %742 = vmatmul.f32.gmra.mxu1 %v94_v41  ;;  %987 = vmatpush.msrb.mxu2 %v187_v39  ;;  %v2845_v39 = vld [vmem:[%s4251_s0 + $0x118] sm:$0xff] }
  0x9e   :  { %988 = vmatpush.msrb.mxu2 %v185_v55 }
  0xa0   :  { %v2611_v49 = vpop.f32.mrf.mxu0 }
  0xa1   :  { %v2616_v53 = vpop.f32.mrf.mxu1 }
  0xa2   :  { %580 = vmatmul.f32.gmra.mxu2 %v109_v47  ;;  %636 = vmatmul.f32.gmra.mxu3 %v110_v48  ;;  %v285_v47 = vld [vmem:[%s4250_s1 + $0x4b8] sm:$0xff] }
  0xa3   :  { %689 = vmatmul.f32.gmra.mxu0 %v102_v51  ;;  %v25_v51 = vld [vmem:[%s4251_s0 + $0x40] sm:$0xff]  ;;  %1154 = vmatpush.msrb.mxu1 %v285_v47 }
  0xa4   :  { %v460_v58 = vpop.f32.mrf.mxu2  ;;  %745 = vmatmul.f32.gmra.mxu1 %v103_v54 }
  0xa5   :  { %v516_v59 = vpop.f32.mrf.mxu3 }
  0xa6   :  { %v2630_v60 = vadd.f32 %v516_v59, %v460_v58 }
  0xa8   :  { %v2644_v1 = vpop.f32.mrf.mxu0 }
  0xa9   :  { %v2649_v4 = vpop.f32.mrf.mxu1 }
  0xaa   :  { %583 = vmatmul.f32.gmra.mxu2 %v118_v63  ;;  %639 = vmatmul.f32.gmra.mxu3 %v119_v0  ;;  %v42_v63 = vld [vmem:[%s4251_s0 + $0xc8] sm:$0xff]  ;;  %v499_v43 = vadd.f32 %v2649_v4, %v2644_v1  ;;  %v2866_v1 = vld [vmem:[%s4251_s0 + $0x198] sm:$0xff]  ;;  %v2871_v4 = vld [vmem:[%s4251_s0 + $0x1a0] sm:$0xff] }
  0xab   :  { %692 = vmatmul.f32.gmra.mxu0 %v111_v3  ;;  %v183_v0 = vld [vmem:[%s4250_s1 + $0x188] sm:$0xff] }
  0xac   :  { %v463_v9 = vpop.f32.mrf.mxu2  ;;  %748 = vmatmul.f32.gmra.mxu1 %v112_v6  ;;  %v34_v6 = vld [vmem:[%s4251_s0 + $0x88] sm:$0xff]  ;;  %989 = vmatpush.msrb.mxu2 %v183_v0 }
  0xad   :  { %v519_v10 = vpop.f32.mrf.mxu3 }
  0xae   :  { %v2660_v11 = vadd.f32 %v519_v10, %v463_v9  ;;  %v249_v9 = vld [vmem:[%s4250_s1 + $0x398] sm:$0xff] }
  0xaf   :  { %1100 = vmatpush.msrb.mxu0 %v249_v9  ;;  %v241_v9 = vld [vmem:[%s4250_s1 + $0x358] sm:$0xff] }
  0xb0   :  { %v2677_v17 = vpop.f32.mrf.mxu0 }
  0xb1   :  { %v2682_v20 = vpop.f32.mrf.mxu1  ;;  %1101 = vmatpush.msrb.mxu0 %v247_v24 }
  0xb2   :  { %586 = vmatmul.f32.gmra.mxu2 %v127_v15  ;;  %642 = vmatmul.f32.gmra.mxu3 %v128_v16  ;;  %v181_v15 = vld [vmem:[%s4250_s1 + $0x178] sm:$0xff]  ;;  %v50_v16 = vld [vmem:[%s4251_s0 + $0x108] sm:$0xff] }
  0xb3   :  { %695 = vmatmul.f32.gmra.mxu0 %v120_v19  ;;  %v51_v19 = vld [vmem:[%s4251_s0 + $0x110] sm:$0xff]  ;;  %990 = vmatpush.msrb.mxu2 %v181_v15  ;;  %v2928_v15 = vld [vmem:[%s4251_s0 + $0x1a8] sm:$0xff] }
  0xb4   :  { %v466_v25 = vpop.f32.mrf.mxu2  ;;  %751 = vmatmul.f32.gmra.mxu1 %v121_v21 }
  0xb5   :  { %v522_v26 = vpop.f32.mrf.mxu3  ;;  %991 = vmatpush.msrb.mxu2 %v179_v31  ;;  %v2967_v31 = vld [vmem:[%s4251_s0 + $0x1f0] sm:$0xff] }
  0xb6   :  { %v2696_v27 = vadd.f32 %v522_v26, %v466_v25  ;;  %v496_v25 = vadd.f32 %v2616_v53, %v2611_v49  ;;  %v279_v26 = vld [vmem:[%s4250_s1 + $0x488] sm:$0xff]  ;;  %v60_v49 = vld [vmem:[%s4251_s0 + $0x158] sm:$0xff] }
  0xb7   :  { %992 = vmatpush.msrb.mxu2 %v177_v44 }
  0xb8   :  { %v2710_v32 = vpop.f32.mrf.mxu0 }
  0xb9   :  { %v2715_v36 = vpop.f32.mrf.mxu1 }
  0xba   :  { %774 = vmatmul.f32.vlgmr.msra.gmra.mxu2 %v23_v29  ;;  %830 = vmatmul.f32.vlgmr.msra.gmra.mxu3 %v24_v30 }
  0xbb   :  { %698 = vmatmul.f32.gmra.mxu0 %v129_v33  ;;  %v2827_v33 = vld [vmem:[%s4251_s0 + $0x150] sm:$0xff] }
  0xbc   :  { %v469_v40 = vpop.f32.mrf.mxu2  ;;  %754 = vmatmul.f32.gmra.mxu1 %v130_v37  ;;  %v245_v37 = vld [vmem:[%s4250_s1 + $0x378] sm:$0xff] }
  0xbd   :  { %v525_v41 = vpop.f32.mrf.mxu3  ;;  %1102 = vmatpush.msrb.mxu0 %v245_v37  ;;  %v237_v37 = vld [vmem:[%s4250_s1 + $0x338] sm:$0xff] }
  0xbe   :  { %v2726_v42 = vadd.f32 %v525_v41, %v469_v40  ;;  %v277_v41 = vld [vmem:[%s4250_s1 + $0x478] sm:$0xff] }
  0xc0   :  { %v2743_v48 = vpop.f32.mrf.mxu0 }
  0xc1   :  { %v2748_v54 = vpop.f32.mrf.mxu1 }
  0xc2   :  { %777 = vmatmul.f32.gmra.mxu2 %v32_v45  ;;  %833 = vmatmul.f32.gmra.mxu3 %v33_v46 }
  0xc3   :  { %886 = vmatmul.f32.vlgmr.msra.gmra.mxu0 %v25_v51  ;;  %v209_v51 = vld [vmem:[%s4250_s1 + $0x258] sm:$0xff] }
  0xc4   :  { %v472_v57 = vpop.f32.mrf.mxu2  ;;  %942 = vmatmul.f32.vlgmr.msra.gmra.mxu1 %v2014_v35  ;;  %v283_v35 = vld [vmem:[%s4250_s1 + $0x4a8] sm:$0xff] }
  0xc5   :  { %v528_v58 = vpop.f32.mrf.mxu3  ;;  %1155 = vmatpush.msrb.mxu1 %v283_v35  ;;  %v207_v35 = vld [vmem:[%s4250_s1 + $0x248] sm:$0xff] }
  0xc6   :  { %v2757_v59 = vadd.f32 %v528_v58, %v472_v57  ;;  %v2883_v57 = vld [vmem:[%s4251_s0 + $0x160] sm:$0xff] }
  0xc7   :  { %1156 = vmatpush.msrb.mxu1 %v281_v14 }
  0xc8   :  { %v2774_v3 = vpop.f32.mrf.mxu0 }
  0xc9   :  { %v2779_v7 = vpop.f32.mrf.mxu1  ;;  %1157 = vmatpush.msrb.mxu1 %v279_v26 }
  0xca   :  { %780 = vmatmul.f32.gmra.mxu2 %v41_v62  ;;  %836 = vmatmul.f32.gmra.mxu3 %v42_v63  ;;  %v175_v62 = vld [vmem:[%s4250_s1 + $0x148] sm:$0xff]  ;;  %v502_v63 = vadd.f32 %v2682_v20, %v2677_v17  ;;  %v2908_v17 = vld [vmem:[%s4251_s0 + $0x1e0] sm:$0xff] }
  0xcb   :  { %889 = vmatmul.f32.gmra.mxu0 %v34_v6  ;;  %1158 = vmatpush.msrb.mxu1 %v277_v41  ;;  %v2913_v20 = vld [vmem:[%s4251_s0 + $0x1e8] sm:$0xff]  ;;  %v508_v41 = vadd.f32 %v2748_v54, %v2743_v48  ;;  %v2992_v48 = vld [vmem:[%s4251_s0 + $0x270] sm:$0xff]  ;;  %v2997_v54 = vld [vmem:[%s4251_s0 + $0x278] sm:$0xff] }
  0xcc   :  { %v475_v10 = vpop.f32.mrf.mxu2  ;;  %945 = vmatmul.f32.gmra.mxu1 %v2062_v50  ;;  %v213_v50 = vld [vmem:[%s4250_s1 + $0x278] sm:$0xff]  ;;  %993 = vmatpush.msrb.mxu2 %v175_v62 }
  0xcd   :  { %v531_v12 = vpop.f32.mrf.mxu3  ;;  %1046 = vmatpush.msrb.mxu3 %v213_v50  ;;  %1159 = vmatpush.msrb.mxu1 %v275_v61  ;;  %v505_v50 = vadd.f32 %v2715_v36, %v2710_v32  ;;  %v2950_v32 = vld [vmem:[%s4251_s0 + $0x228] sm:$0xff]  ;;  %v2955_v36 = vld [vmem:[%s4251_s0 + $0x230] sm:$0xff]  ;;  %v3009_v61 = vld [vmem:[%s4251_s0 + $0x238] sm:$0xff] }
  0xce   :  { %v2788_v13 = vadd.f32 %v531_v12, %v475_v10  ;;  %v173_v12 = vld [vmem:[%s4250_s1 + $0x138] sm:$0xff] }
  0xcf   :  { %994 = vmatpush.msrb.mxu2 %v173_v12 }
  0xd0   :  { %v2805_v21 = vpop.f32.mrf.mxu0 }
  0xd1   :  { %v2810_v23 = vpop.f32.mrf.mxu1 }
  0xd2   :  { %783 = vmatmul.f32.gmra.mxu2 %v50_v16  ;;  %839 = vmatmul.f32.gmra.mxu3 %v51_v19  ;;  %v205_v19 = vld [vmem:[%s4250_s1 + $0x238] sm:$0xff] }
  0xd3   :  { %892 = vmatmul.f32.gmra.mxu0 %v43_v22  ;;  %v239_v22 = vld [vmem:[%s4250_s1 + $0x348] sm:$0xff] }
  0xd4   :  { %948 = vmatmul.f32.gmra.mxu1 %v2113_v2  ;;  %v211_v2 = vld [vmem:[%s4250_s1 + $0x268] sm:$0xff] }
  0xd5   :  { %v551_v28 = vpop.f32.mrf.mxu2  ;;  %v607_v29 = vpop.f32.mrf.mxu3  ;;  %1047 = vmatpush.msrb.mxu3 %v211_v2  ;;  %v203_v2 = vld [vmem:[%s4250_s1 + $0x228] sm:$0xff] }
  0xd6   :  { %v552_v30 = vadd.f32 %v551_v28, %v496_v25  ;;  %v271_v28 = vld [vmem:[%s4250_s1 + $0x448] sm:$0xff] }
  0xd7   :  { %1048 = vmatpush.msrb.mxu3 %v209_v51 }
  0xd8   :  { %v2832_v53 = vadd.f32 %v607_v29, %v552_v30  ;;  %v2840_v38 = vpop.f32.mrf.mxu0 }
  0xd9   :  { %v2848_v40 = vpop.f32.mrf.mxu1  ;;  %1049 = vmatpush.msrb.mxu3 %v207_v35  ;;  %v511_v35 = vadd.f32 %v2779_v7, %v2774_v3  ;;  %v199_v3 = vld [vmem:[%s4250_s1 + $0x208] sm:$0xff]  ;;  %v3036_v7 = vld [vmem:[%s4251_s0 + $0x2b8] sm:$0xff] }
  0xda   :  { %786 = vmatmul.f32.gmra.mxu2 %v2827_v33  ;;  %842 = vmatmul.f32.gmra.mxu3 %v60_v49 }
  0xdb   :  { %895 = vmatmul.f32.gmra.mxu0 %v2845_v39  ;;  %1050 = vmatpush.msrb.mxu3 %v205_v19  ;;  %v3041_v19 = vld [vmem:[%s4251_s0 + $0x2c0] sm:$0xff] }
  0xdc   :  { %951 = vmatmul.f32.gmra.mxu1 %v2164_v18  ;;  %v243_v18 = vld [vmem:[%s4250_s1 + $0x368] sm:$0xff] }
  0xdd   :  { %v554_v45 = vpop.f32.mrf.mxu2  ;;  %v610_v46 = vpop.f32.mrf.mxu3  ;;  %1103 = vmatpush.msrb.mxu0 %v243_v18  ;;  %1051 = vmatpush.msrb.mxu3 %v203_v2  ;;  %v514_v2 = vadd.f32 %v2810_v23, %v2805_v21  ;;  %v3080_v21 = vld [vmem:[%s4251_s0 + $0x300] sm:$0xff]  ;;  %v3085_v23 = vld [vmem:[%s4251_s0 + $0x308] sm:$0xff] }
  0xde   :  { %v555_v47 = vadd.f32 %v554_v45, %v499_v43  ;;  %v269_v43 = vld [vmem:[%s4250_s1 + $0x438] sm:$0xff]  ;;  %4266 = vst [vmem:[#allocation2_spill] sm:$0xff] %v3085_v23 }
  0xdf   :  { %1104 = vmatpush.msrb.mxu0 %v241_v9 }
  0xe0   :  { %v2873_v55 = vadd.f32 %v610_v46, %v555_v47  ;;  %v2878_v56 = vpop.f32.mrf.mxu0  ;;  %v169_v47 = vld [vmem:[%s4250_s1 + $0x118] sm:$0xff] }
  0xe1   :  { %v2886_v58 = vpop.f32.mrf.mxu1  ;;  %1105 = vmatpush.msrb.mxu0 %v239_v22  ;;  %v233_v22 = vld [vmem:[%s4250_s1 + $0x318] sm:$0xff] }
  0xe2   :  { %789 = vmatmul.f32.gmra.mxu2 %v2866_v1  ;;  %845 = vmatmul.f32.gmra.mxu3 %v2871_v4 }
  0xe3   :  { %898 = vmatmul.f32.gmra.mxu0 %v2883_v57 }
  0xe4   :  { %954 = vmatmul.f32.gmra.mxu1 %v2215_v34  ;;  %v273_v34 = vld [vmem:[%s4250_s1 + $0x458] sm:$0xff]  ;;  %1106 = vmatpush.msrb.mxu0 %v237_v37 }
  0xe5   :  { %v557_v0 = vpop.f32.mrf.mxu2  ;;  %v613_v6 = vpop.f32.mrf.mxu3  ;;  %1160 = vmatpush.msrb.mxu1 %v273_v34  ;;  %v167_v34 = vld [vmem:[%s4250_s1 + $0x108] sm:$0xff]  ;;  %v357_v37 = vld [vmem:[%s4250_s1 + $0x6f8] sm:$0xff] }
  0xe6   :  { %v558_v8 = vadd.f32 %v557_v0, %v502_v63  ;;  %v235_v63 = vld [vmem:[%s4250_s1 + $0x328] sm:$0xff] }
  0xe7   :  { %1161 = vmatpush.msrb.mxu1 %v271_v28  ;;  %1107 = vmatpush.msrb.mxu0 %v235_v63  ;;  %v267_v0 = vld [vmem:[%s4250_s1 + $0x428] sm:$0xff]  ;;  %v265_v28 = vld [vmem:[%s4250_s1 + $0x418] sm:$0xff] }
  0xe8   :  { %v2915_v10 = vadd.f32 %v613_v6, %v558_v8  ;;  %v2923_v14 = vpop.f32.mrf.mxu0  ;;  %v1797_v8 = vld [vmem:[%s4251_s0 + $0x1f8] sm:$0xff] }
  0xe9   :  { %v2931_v16 = vpop.f32.mrf.mxu1  ;;  %1162 = vmatpush.msrb.mxu1 %v269_v43  ;;  %1108 = vmatpush.msrb.mxu0 %v233_v22  ;;  %v1798_v43 = vld [vmem:[%s4251_s0 + $0x240] sm:$0xff] }
  0xea   :  { %792 = vmatmul.f32.gmra.mxu2 %v2908_v17  ;;  %848 = vmatmul.f32.gmra.mxu3 %v2913_v20 }
  0xeb   :  { %901 = vmatmul.f32.gmra.mxu0 %v2928_v15  ;;  %1163 = vmatpush.msrb.mxu1 %v267_v0 }
  0xec   :  { %957 = vmatmul.f32.gmra.mxu1 %v2266_v52  ;;  %v171_v52 = vld [vmem:[%s4250_s1 + $0x128] sm:$0xff] }
  0xed   :  { %v560_v24 = vpop.f32.mrf.mxu2  ;;  %v616_v25 = vpop.f32.mrf.mxu3  ;;  %995 = vmatpush.msrb.mxu2 %v171_v52  ;;  %v325_v52 = vld [vmem:[%s4250_s1 + $0x5f8] sm:$0xff]  ;;  %1164 = vmatpush.msrb.mxu1 %v265_v28 }
  0xee   :  { %v561_v26 = vadd.f32 %v560_v24, %v505_v50  ;;  %v421_v28 = vld [vmem:[%s4250_s1 + $0x8f8] sm:$0xff] }
  0xef   :  { %996 = vmatpush.msrb.mxu2 %v169_v47 }
  0xf0   :  { %v2957_v29 = vadd.f32 %v616_v25, %v561_v26  ;;  %v2962_v30 = vpop.f32.mrf.mxu0  ;;  %v3053_v25 = vld [vmem:[%s4251_s0 + $0x280] sm:$0xff] }
  0xf1   :  { %v2970_v49 = vpop.f32.mrf.mxu1  ;;  %997 = vmatpush.msrb.mxu2 %v167_v34 }
  0xf2   :  { %795 = vmatmul.f32.gmra.mxu2 %v2950_v32  ;;  %851 = vmatmul.f32.gmra.mxu3 %v2955_v36 }
  0xf3   :  { %904 = vmatmul.f32.gmra.mxu0 %v2967_v31  ;;  %1206 = vmatpush.msra.mxu2 %v325_v52  ;;  %v3123_v52 = vld [vmem:[%s4251_s0 + $0x348] sm:$0xff] }
  0xf4   :  { %960 = vmatmul.f32.gmra.mxu1 %v2317_v5  ;;  %v201_v5 = vld [vmem:[%s4250_s1 + $0x218] sm:$0xff]  ;;  %4268 = vst [vmem:[#allocation4_spill] sm:$0xff] %v3123_v52 }
  0xf5   :  { %v563_v44 = vpop.f32.mrf.mxu2  ;;  %v619_v45 = vpop.f32.mrf.mxu3  ;;  %1052 = vmatpush.msrb.mxu3 %v201_v5  ;;  %v263_v5 = vld [vmem:[%s4250_s1 + $0x408] sm:$0xff] }
  0xf6   :  { %v564_v46 = vadd.f32 %v563_v44, %v508_v41  ;;  %1165 = vmatpush.msrb.mxu1 %v263_v5 }
  0xf7   :  { %1053 = vmatpush.msrb.mxu3 %v199_v3 }
  0xf8   :  { %v2999_v51 = vadd.f32 %v619_v45, %v564_v46  ;;  %v3004_v18 = vpop.f32.mrf.mxu0  ;;  %v231_v46 = vld [vmem:[%s4250_s1 + $0x308] sm:$0xff]  ;;  %1374 = vmatpush.msra.mxu1 %v421_v28 }
  0xf9   :  { %v3012_v62 = vpop.f32.mrf.mxu1  ;;  %1262 = vmatpush.msra.mxu3 %v357_v37  ;;  %1109 = vmatpush.msrb.mxu0 %v231_v46  ;;  %v387_v46 = vld [vmem:[%s4250_s1 + $0x7e8] sm:$0xff] }
  0xfa   :  { %798 = vmatmul.f32.gmra.mxu2 %v2992_v48  ;;  %854 = vmatmul.f32.gmra.mxu3 %v2997_v54  ;;  %v351_v28 = vld [vmem:[%s4250_s1 + $0x6c8] sm:$0xff] }
  0xfb   :  { %907 = vmatmul.f32.gmra.mxu0 %v3009_v61 }
  0xfc   :  { %963 = vmatmul.f32.gmra.mxu1 %v1797_v8  ;;  %v355_v8 = vld [vmem:[%s4250_s1 + $0x6e8] sm:$0xff] }
  0xfd   :  { %v566_v6 = vpop.f32.mrf.mxu2  ;;  %v622_v9 = vpop.f32.mrf.mxu3  ;;  %1263 = vmatpush.msra.mxu3 %v355_v8 }
  0xfe   :  { %v567_v12 = vadd.f32 %v566_v6, %v511_v35  ;;  %v3097_v35 = vld [vmem:[%s4251_s0 + $0x2c8] sm:$0xff] }
  0xff   :  { %4267 = vst [vmem:[#allocation3_spill] sm:$0xff] %v3097_v35  ;;  %v323_v6 = vld [vmem:[%s4250_s1 + $0x5e8] sm:$0xff] }
 0x100   :  { %v3043_v50 = vadd.f32 %v622_v9, %v567_v12  ;;  %v3048_v24 = vpop.f32.mrf.mxu0  ;;  %1207 = vmatpush.msra.mxu2 %v323_v6  ;;  %v389_v9 = vld [vmem:[%s4250_s1 + $0x7f8] sm:$0xff]  ;;  %v1799_v12 = vld [vmem:[%s4251_s0 + $0x288] sm:$0xff]  ;;  %v1800_v6 = vld [vmem:[%s4251_s0 + $0x2d0] sm:$0xff] }
 0x101   :  { %v3056_v26 = vpop.f32.mrf.mxu1  ;;  %1318 = vmatpush.msra.mxu0 %v389_v9 }
 0x102   :  { %801 = vmatmul.f32.gmra.mxu2 %v3036_v7  ;;  %857 = vmatmul.f32.gmra.mxu3 %v3041_v19 }
 0x103   :  { %910 = vmatmul.f32.gmra.mxu0 %v3053_v25 }
 0x104   :  { %966 = vmatmul.f32.gmra.mxu1 %v1798_v43  ;;  %v3140_v43 = vld [vmem:[%s4251_s0 + $0x310] sm:$0xff]  ;;  %1319 = vmatpush.msra.mxu0 %v387_v46 }
 0x105   :  { %v569_v41 = vpop.f32.mrf.mxu2  ;;  %v625_v44 = vpop.f32.mrf.mxu3  ;;  %4270 = vst [vmem:[#allocation6_spill] sm:$0xff] %v3140_v43 }
 0x106   :  { %v570_v45 = vadd.f32 %v569_v41, %v514_v2  ;;  %v3128_v2 = vld [vmem:[%s4251_s0 + $0x350] sm:$0xff] }
 0x107   :  { %4269 = vst [vmem:[#allocation5_spill] sm:$0xff] %v3128_v2 }
 0x108   :  { %v3087_v47 = vadd.f32 %v625_v44, %v570_v45  ;;  %v3092_v63 = vpop.f32.mrf.mxu0  ;;  %v353_v45 = vld [vmem:[%s4250_s1 + $0x6d8] sm:$0xff] }
 0x109   :  { %v3100_v0 = vpop.f32.mrf.mxu1  ;;  %1264 = vmatpush.msra.mxu3 %v353_v45  ;;  %v3183_v45 = vld [vmem:[%s4251_s0 + $0x358] sm:$0xff] }
 0x10a   :  { %804 = vmatmul.f32.gmra.mxu2 %v3080_v21  ;;  %860 = vmatmul.f32.gmra.mxu3 %v3085_v23  ;;  %4273 = vst [vmem:[#allocation9_spill] sm:$0xff] %v3183_v45  ;;  %v343_v23 = vld [vmem:[%s4250_s1 + $0x688] sm:$0xff] }
 0x10b   :  { %913 = vmatmul.f32.gmra.mxu0 %v3097_v35  ;;  %1265 = vmatpush.msra.mxu3 %v351_v28 }
 0x10c   :  { %969 = vmatmul.f32.gmra.mxu1 %v1799_v12  ;;  %v319_v12 = vld [vmem:[%s4250_s1 + $0x5c8] sm:$0xff] }
 0x10d   :  { %v572_v34 = vpop.f32.mrf.mxu2  ;;  %v628_v3 = vpop.f32.mrf.mxu3 }
 0x10e   :  { %v573_v22 = vadd.f32 %v572_v34, %v2630_v60  ;;  %v321_v60 = vld [vmem:[%s4250_s1 + $0x5d8] sm:$0xff]  ;;  %v419_v34 = vld [vmem:[%s4250_s1 + $0x8e8] sm:$0xff] }
 0x10f   :  { %1208 = vmatpush.msra.mxu2 %v321_v60  ;;  %1375 = vmatpush.msra.mxu1 %v419_v34  ;;  %v1801_v34 = vld [vmem:[%s4251_s0 + $0x318] sm:$0xff] }
 0x110   :  { %v3130_v37 = vadd.f32 %v628_v3, %v573_v22  ;;  %v3135_v41 = vpop.f32.mrf.mxu0  ;;  %v3166_v3 = vld [vmem:[%s4251_s0 + $0x390] sm:$0x3]  ;;  %v3171_v22 = vld [vmem:[%s4251_s0 + $0x398] sm:$0x3] }
 0x111   :  { %v3143_v44 = vpop.f32.mrf.mxu1  ;;  %4271 = vst [vmem:[#allocation7_spill] sm:$0xff] %v3166_v3  ;;  %1209 = vmatpush.msra.mxu2 %v319_v12 }
 0x112   :  { %807 = vmatmul.f32.gmra.mxu2 %v3123_v52  ;;  %863 = vmatmul.f32.gmra.mxu3 %v3128_v2  ;;  %4272 = vst [vmem:[#allocation8_spill] sm:$0xff] %v3171_v22  ;;  %v341_v52 = vld [vmem:[%s4250_s1 + $0x678] sm:$0xff] }
 0x113   :  { %916 = vmatmul.f32.gmra.mxu0 %v3140_v43 }
 0x114   :  { %972 = vmatmul.f32.gmra.mxu1 %v1800_v6  ;;  %v417_v6 = vld [vmem:[%s4250_s1 + $0x8d8] sm:$0xff] }
 0x115   :  { %v575_v5 = vpop.f32.mrf.mxu2  ;;  %v631_v8 = vpop.f32.mrf.mxu3  ;;  %1376 = vmatpush.msra.mxu1 %v417_v6 }
 0x116   :  { %v576_v9 = vadd.f32 %v575_v5, %v2660_v11  ;;  %v385_v5 = vld [vmem:[%s4250_s1 + $0x7d8] sm:$0xff] }
 0x117   :  { %1320 = vmatpush.msra.mxu0 %v385_v5  ;;  %v349_v5 = vld [vmem:[%s4250_s1 + $0x6b8] sm:$0xff] }
 0x118   :  { %v3173_v11 = vadd.f32 %v631_v8, %v576_v9  ;;  %v3178_v60 = vpop.f32.mrf.mxu0  ;;  %v317_v8 = vld [vmem:[%s4250_s1 + $0x5b8] sm:$0xff]  ;;  %1266 = vmatpush.msra.mxu3 %v349_v5 }
 0x119   :  { %v3186_v46 = vpop.f32.mrf.mxu1  ;;  %1210 = vmatpush.msra.mxu2 %v317_v8  ;;  %v3216_v8 = vld [vmem:[%s4251_s0 + $0x3a0] sm:$0x3] }
 0x11a   :  { %810 = vmatmul.f32.gmra.mxu2 %v3166_v3  ;;  %866 = vmatmul.f32.gmra.mxu3 %v3171_v22  ;;  %4274 = vst [vmem:[#allocation10_spill] sm:$0xff] %v3216_v8 }
 0x11b   :  { %919 = vmatmul.f32.gmra.mxu0 %v3183_v45  ;;  %v383_v45 = vld [vmem:[%s4250_s1 + $0x7c8] sm:$0xff] }
 0x11c   :  { %975 = vmatmul.f32.gmra.mxu1 %v1801_v34  ;;  %1321 = vmatpush.msra.mxu0 %v383_v45  ;;  %v415_v34 = vld [vmem:[%s4250_s1 + $0x8c8] sm:$0xff] }
 0x11d   :  { %v578_v9 = vpop.f32.mrf.mxu2  ;;  %v634_v12 = vpop.f32.mrf.mxu3  ;;  %v315_v45 = vld [vmem:[%s4250_s1 + $0x5a8] sm:$0xff]  ;;  %1377 = vmatpush.msra.mxu1 %v415_v34 }
 0x11e   :  { %v579_v28 = vadd.f32 %v578_v9, %v2696_v27  ;;  %v1802_v27 = vld [vmem:[%s4251_s0 + $0x8] sm:$0xff]  ;;  %v1803_v9 = vld [vmem:[%s4251_s0 + $0x10] sm:$0xff]  ;;  %1211 = vmatpush.msra.mxu2 %v315_v45 }
 0x120   :  { %v3206_v22 = vadd.f32 %v634_v12, %v579_v28  ;;  %v3211_v2 = vpop.f32.mrf.mxu0  ;;  %v1804_v28 = vld [vmem:[%s4251_s0 + $0x360] sm:$0x3] }
 0x121   :  { %v3221_v6 = vpop.f32.mrf.mxu1 }
 0x122   :  { %998 = vmatmul.f32.vlgmr.msrb.gmra.mxu2 %v1802_v27  ;;  %1054 = vmatmul.f32.vlgmr.msrb.gmra.mxu3 %v1803_v9  ;;  %v347_v9 = vld [vmem:[%s4250_s1 + $0x6a8] sm:$0xff] }
 0x123   :  { %922 = vmatmul.f32.gmra.mxu0 %v3216_v8  ;;  %v381_v8 = vld [vmem:[%s4250_s1 + $0x7b8] sm:$0xff]  ;;  %1267 = vmatpush.msra.mxu3 %v347_v9 }
 0x124   :  { %978 = vmatmul.f32.gmra.mxu1 %v1804_v28  ;;  %1322 = vmatpush.msra.mxu0 %v381_v8  ;;  %v413_v28 = vld [vmem:[%s4250_s1 + $0x8b8] sm:$0xff] }
 0x125   :  { %v581_v12 = vpop.f32.mrf.mxu2  ;;  %v637_v5 = vpop.f32.mrf.mxu3  ;;  %1378 = vmatpush.msra.mxu1 %v413_v28  ;;  %v1806_v8 = vld [vmem:[%s4251_s0 + $0x58] sm:$0xff] }
 0x126   :  { %v582_v27 = vadd.f32 %v581_v12, %v2726_v42  ;;  %v1805_v42 = vld [vmem:[%s4251_s0 + $0x50] sm:$0xff]  ;;  %v1807_v12 = vld [vmem:[%s4251_s0 + $0x18] sm:$0xff] }
 0x128   :  { %v3243_v3 = vadd.f32 %v637_v5, %v582_v27  ;;  %v3248_v45 = vpop.f32.mrf.mxu0  ;;  %v1808_v27 = vld [vmem:[%s4251_s0 + $0x20] sm:$0xff] }
 0x129   :  { %v3253_v34 = vpop.f32.mrf.mxu1 }
 0x12a   :  { %1001 = vmatmul.f32.gmra.mxu2 %v1805_v42  ;;  %1057 = vmatmul.f32.gmra.mxu3 %v1806_v8  ;;  %v313_v42 = vld [vmem:[%s4250_s1 + $0x598] sm:$0xff] }
 0x12b   :  { %1110 = vmatmul.f32.vlgmr.msrb.gmra.mxu0 %v1807_v12  ;;  %v345_v8 = vld [vmem:[%s4250_s1 + $0x698] sm:$0xff]  ;;  %v379_v12 = vld [vmem:[%s4250_s1 + $0x7a8] sm:$0xff]  ;;  %1212 = vmatpush.msra.mxu2 %v313_v42 }
 0x12c   :  { %1166 = vmatmul.f32.vlgmr.msrb.gmra.mxu1 %v1808_v27  ;;  %1268 = vmatpush.msra.mxu3 %v345_v8  ;;  %v1809_v42 = vld [vmem:[%s4251_s0 + $0x98] sm:$0xff]  ;;  %v1811_v8 = vld [vmem:[%s4251_s0 + $0x60] sm:$0xff] }
 0x12d   :  { %v584_v5 = vpop.f32.mrf.mxu2  ;;  %v640_v9 = vpop.f32.mrf.mxu3  ;;  %1323 = vmatpush.msra.mxu0 %v379_v12 }
 0x12e   :  { %v585_v28 = vadd.f32 %v584_v5, %v2757_v59  ;;  %v411_v59 = vld [vmem:[%s4250_s1 + $0x8a8] sm:$0xff]  ;;  %1269 = vmatpush.msra.mxu3 %v343_v23  ;;  %v1813_v23 = vld [vmem:[%s4251_s0 + $0xe0] sm:$0xff] }
 0x12f   :  { %v311_v5 = vld [vmem:[%s4250_s1 + $0x588] sm:$0xff]  ;;  %1379 = vmatpush.msra.mxu1 %v411_v59 }
 0x130   :  { %v3274_v43 = vadd.f32 %v640_v9, %v585_v28  ;;  %v3282_v27 = vpop.f32.mrf.mxu0  ;;  %1213 = vmatpush.msra.mxu2 %v311_v5  ;;  %v1810_v28 = vld [vmem:[%s4251_s0 + $0xa0] sm:$0xff]  ;;  %v1812_v59 = vld [vmem:[%s4251_s0 + $0x68] sm:$0xff]  ;;  %1270 = vmatpush.msra.mxu3 %v341_v52 }
 0x131   :  { %v3287_v9 = vpop.f32.mrf.mxu1 }
 0x132   :  { %1004 = vmatmul.f32.gmra.mxu2 %v1809_v42  ;;  %1060 = vmatmul.f32.gmra.mxu3 %v1810_v28  ;;  %v377_v28 = vld [vmem:[%s4250_s1 + $0x798] sm:$0xff] }
 0x133   :  { %1113 = vmatmul.f32.gmra.mxu0 %v1811_v8  ;;  %v409_v8 = vld [vmem:[%s4250_s1 + $0x898] sm:$0xff] }
 0x134   :  { %1169 = vmatmul.f32.gmra.mxu1 %v1812_v59  ;;  %1324 = vmatpush.msra.mxu0 %v377_v28  ;;  %v309_v59 = vld [vmem:[%s4250_s1 + $0x578] sm:$0xff] }
 0x135   :  { %v587_v12 = vpop.f32.mrf.mxu2  ;;  %v643_v5 = vpop.f32.mrf.mxu3  ;;  %1380 = vmatpush.msra.mxu1 %v409_v8  ;;  %1214 = vmatpush.msra.mxu2 %v309_v59 }
 0x136   :  { %v588_v42 = vadd.f32 %v587_v12, %v2788_v13  ;;  %v664_v13 = vadd.f32 %v2840_v38, %v2832_v53  ;;  %v1814_v53 = vld [vmem:[%s4251_s0 + $0xe8] sm:$0xff] }
 0x138   :  { %v3313_v12 = vadd.f32 %v643_v5, %v588_v42  ;;  %v3318_v35 = vpop.f32.mrf.mxu0  ;;  %v720_v38 = vadd.f32 %v2848_v40, %v664_v13  ;;  %v1815_v5 = vld [vmem:[%s4251_s0 + $0xa8] sm:$0xff]  ;;  %v1816_v42 = vld [vmem:[%s4251_s0 + $0xb0] sm:$0xff] }
 0x139   :  { %v3323_v28 = vpop.f32.mrf.mxu1  ;;  %v407_v40 = vld [vmem:[%s4250_s1 + $0x888] sm:$0xff] }
 0x13a   :  { %1007 = vmatmul.f32.gmra.mxu2 %v1813_v23  ;;  %1063 = vmatmul.f32.gmra.mxu3 %v1814_v53  ;;  %v375_v23 = vld [vmem:[%s4250_s1 + $0x788] sm:$0xff]  ;;  %v667_v53 = vadd.f32 %v2878_v56, %v2873_v55  ;;  %v1818_v56 = vld [vmem:[%s4251_s0 + $0x130] sm:$0xff] }
 0x13b   :  { %1116 = vmatmul.f32.gmra.mxu0 %v1815_v5  ;;  %v307_v13 = vld [vmem:[%s4250_s1 + $0x568] sm:$0xff]  ;;  %1381 = vmatpush.msra.mxu1 %v407_v40 }
 0x13c   :  { %1172 = vmatmul.f32.gmra.mxu1 %v1816_v42  ;;  %1325 = vmatpush.msra.mxu0 %v375_v23  ;;  %v1817_v23 = vld [vmem:[%s4251_s0 + $0x128] sm:$0xff] }
 0x13d   :  { %v775_v52 = vpop.f32.mrf.mxu2  ;;  %v831_v8 = vpop.f32.mrf.mxu3  ;;  %1215 = vmatpush.msra.mxu2 %v307_v13  ;;  %v1820_v13 = vld [vmem:[%s4251_s0 + $0xf8] sm:$0xff] }
 0x13e   :  { %v776_v59 = vadd.f32 %v775_v52, %v720_v38  ;;  %v339_v38 = vld [vmem:[%s4250_s1 + $0x668] sm:$0xff]  ;;  %v373_v52 = vld [vmem:[%s4250_s1 + $0x778] sm:$0xff] }
 0x13f   :  { %1271 = vmatpush.msra.mxu3 %v339_v38  ;;  %1326 = vmatpush.msra.mxu0 %v373_v52 }
 0x140   :  { %v3346_v5 = vadd.f32 %v831_v8, %v776_v59  ;;  %v3354_v42 = vpop.f32.mrf.mxu0  ;;  %v723_v8 = vadd.f32 %v2886_v58, %v667_v53  ;;  %v1819_v59 = vld [vmem:[%s4251_s0 + $0xf0] sm:$0xff]  ;;  %v305_v58 = vld [vmem:[%s4250_s1 + $0x558] sm:$0xff] }
 0x141   :  { %v3359_v55 = vpop.f32.mrf.mxu1  ;;  %v337_v53 = vld [vmem:[%s4250_s1 + $0x658] sm:$0xff]  ;;  %1216 = vmatpush.msra.mxu2 %v305_v58  ;;  %v1824_v58 = vld [vmem:[%s4251_s0 + $0x140] sm:$0xff] }
 0x142   :  { %1010 = vmatmul.f32.gmra.mxu2 %v1817_v23  ;;  %1066 = vmatmul.f32.gmra.mxu3 %v1818_v56  ;;  %v405_v23 = vld [vmem:[%s4250_s1 + $0x878] sm:$0xff]  ;;  %v670_v56 = vadd.f32 %v2923_v14, %v2915_v10 }
 0x143   :  { %1119 = vmatmul.f32.gmra.mxu0 %v1819_v59  ;;  %1382 = vmatpush.msra.mxu1 %v405_v23  ;;  %v1822_v10 = vld [vmem:[%s4251_s0 + $0x178] sm:$0xff] }
 0x144   :  { %1175 = vmatmul.f32.gmra.mxu1 %v1820_v13  ;;  %1272 = vmatpush.msra.mxu3 %v337_v53  ;;  %v1821_v13 = vld [vmem:[%s4251_s0 + $0x170] sm:$0xff]  ;;  %v726_v14 = vadd.f32 %v2931_v16, %v670_v56  ;;  %v303_v16 = vld [vmem:[%s4250_s1 + $0x548] sm:$0xff] }
 0x145   :  { %v778_v40 = vpop.f32.mrf.mxu2  ;;  %v834_v38 = vpop.f32.mrf.mxu3  ;;  %v335_v56 = vld [vmem:[%s4250_s1 + $0x648] sm:$0xff]  ;;  %1217 = vmatpush.msra.mxu2 %v303_v16  ;;  %v1827_v16 = vld [vmem:[%s4251_s0 + $0x180] sm:$0xff] }
 0x146   :  { %v779_v52 = vadd.f32 %v778_v40, %v723_v8  ;;  %v371_v8 = vld [vmem:[%s4250_s1 + $0x768] sm:$0xff]  ;;  %1273 = vmatpush.msra.mxu3 %v335_v56 }
 0x147   :  { %1327 = vmatpush.msra.mxu0 %v371_v8 }
 0x148   :  { %v3382_v59 = vadd.f32 %v834_v38, %v779_v52  ;;  %v3387_v40 = vpop.f32.mrf.mxu0  ;;  %v1823_v38 = vld [vmem:[%s4251_s0 + $0x138] sm:$0xff] }
 0x149   :  { %v3392_v23 = vpop.f32.mrf.mxu1 }
 0x14a   :  { %1013 = vmatmul.f32.gmra.mxu2 %v1821_v13  ;;  %1069 = vmatmul.f32.gmra.mxu3 %v1822_v10  ;;  %v403_v13 = vld [vmem:[%s4250_s1 + $0x868] sm:$0xff]  ;;  %v369_v10 = vld [vmem:[%s4250_s1 + $0x758] sm:$0xff] }
 0x14b   :  { %1122 = vmatmul.f32.gmra.mxu0 %v1823_v38  ;;  %1383 = vmatpush.msra.mxu1 %v403_v13 }
 0x14c   :  { %1178 = vmatmul.f32.gmra.mxu1 %v1824_v58  ;;  %1328 = vmatpush.msra.mxu0 %v369_v10  ;;  %v301_v58 = vld [vmem:[%s4250_s1 + $0x538] sm:$0xff]  ;;  %v1828_v10 = vld [vmem:[%s4251_s0 + $0x188] sm:$0xff] }
 0x14d   :  { %v781_v52 = vpop.f32.mrf.mxu2  ;;  %v837_v53 = vpop.f32.mrf.mxu3  ;;  %1218 = vmatpush.msra.mxu2 %v301_v58 }
 0x14e   :  { %v782_v8 = vadd.f32 %v781_v52, %v726_v14  ;;  %v673_v14 = vadd.f32 %v2962_v30, %v2957_v29  ;;  %v401_v52 = vld [vmem:[%s4250_s1 + $0x858] sm:$0xff] }
 0x14f   :  { %1384 = vmatpush.msra.mxu1 %v401_v52  ;;  %v1825_v29 = vld [vmem:[%s4251_s0 + $0x1b8] sm:$0xff] }
 0x150   :  { %v3418_v38 = vadd.f32 %v837_v53, %v782_v8  ;;  %v3426_v13 = vpop.f32.mrf.mxu0  ;;  %v1826_v53 = vld [vmem:[%s4251_s0 + $0x1c0] sm:$0xff]  ;;  %v729_v8 = vadd.f32 %v2970_v49, %v673_v14  ;;  %v367_v49 = vld [vmem:[%s4250_s1 + $0x748] sm:$0xff] }
 0x151   :  { %v3431_v30 = vpop.f32.mrf.mxu1  ;;  %v399_v14 = vld [vmem:[%s4250_s1 + $0x848] sm:$0xff]  ;;  %1329 = vmatpush.msra.mxu0 %v367_v49  ;;  %v1832_v49 = vld [vmem:[%s4251_s0 + $0x1d0] sm:$0xff] }
 0x152   :  { %1016 = vmatmul.f32.gmra.mxu2 %v1825_v29  ;;  %1072 = vmatmul.f32.gmra.mxu3 %v1826_v53  ;;  %v333_v29 = vld [vmem:[%s4250_s1 + $0x638] sm:$0xff]  ;;  %v676_v53 = vadd.f32 %v3004_v18, %v2999_v51  ;;  %v1830_v51 = vld [vmem:[%s4251_s0 + $0x208] sm:$0xff] }
 0x153   :  { %1125 = vmatmul.f32.gmra.mxu0 %v1827_v16  ;;  %1274 = vmatpush.msra.mxu3 %v333_v29 }
 0x154   :  { %1181 = vmatmul.f32.gmra.mxu1 %v1828_v10  ;;  %v1829_v10 = vld [vmem:[%s4251_s0 + $0x200] sm:$0xff]  ;;  %v732_v18 = vadd.f32 %v3012_v62, %v676_v53  ;;  %v365_v62 = vld [vmem:[%s4250_s1 + $0x738] sm:$0xff] }
 0x155   :  { %v784_v56 = vpop.f32.mrf.mxu2  ;;  %v840_v52 = vpop.f32.mrf.mxu3  ;;  %1385 = vmatpush.msra.mxu1 %v399_v14  ;;  %v397_v53 = vld [vmem:[%s4250_s1 + $0x838] sm:$0xff]  ;;  %1330 = vmatpush.msra.mxu0 %v365_v62 }
 0x156   :  { %v785_v58 = vadd.f32 %v784_v56, %v729_v8  ;;  %v299_v8 = vld [vmem:[%s4250_s1 + $0x528] sm:$0xff] }
 0x157   :  { %1219 = vmatpush.msra.mxu2 %v299_v8  ;;  %1386 = vmatpush.msra.mxu1 %v397_v53  ;;  %v1836_v53 = vld [vmem:[%s4251_s0 + $0x218] sm:$0xff] }
 0x158   :  { %v3454_v16 = vadd.f32 %v840_v52, %v785_v58  ;;  %v3459_v56 = vpop.f32.mrf.mxu0  ;;  %v1831_v52 = vld [vmem:[%s4251_s0 + $0x1c8] sm:$0xff] }
 0x159   :  { %v3464_v29 = vpop.f32.mrf.mxu1 }
 0x15a   :  { %1019 = vmatmul.f32.gmra.mxu2 %v1829_v10  ;;  %1075 = vmatmul.f32.gmra.mxu3 %v1830_v51  ;;  %v331_v10 = vld [vmem:[%s4250_s1 + $0x628] sm:$0xff]  ;;  %v297_v51 = vld [vmem:[%s4250_s1 + $0x518] sm:$0xff] }
 0x15b   :  { %1128 = vmatmul.f32.gmra.mxu0 %v1831_v52  ;;  %1275 = vmatpush.msra.mxu3 %v331_v10  ;;  %v1833_v10 = vld [vmem:[%s4251_s0 + $0x248] sm:$0xff] }
 0x15c   :  { %1184 = vmatmul.f32.gmra.mxu1 %v1832_v49  ;;  %1220 = vmatpush.msra.mxu2 %v297_v51 }
 0x15d   :  { %v787_v58 = vpop.f32.mrf.mxu2  ;;  %v843_v14 = vpop.f32.mrf.mxu3 }
 0x15e   :  { %v788_v8 = vadd.f32 %v787_v58, %v732_v18  ;;  %v679_v18 = vadd.f32 %v3048_v24, %v3043_v50  ;;  %v329_v58 = vld [vmem:[%s4250_s1 + $0x618] sm:$0xff]  ;;  %v1834_v50 = vld [vmem:[%s4251_s0 + $0x250] sm:$0xff] }
 0x15f   :  { %1276 = vmatpush.msra.mxu3 %v329_v58 }
 0x160   :  { %v3490_v52 = vadd.f32 %v843_v14, %v788_v8  ;;  %v3495_v49 = vpop.f32.mrf.mxu0  ;;  %v735_v24 = vadd.f32 %v3056_v26, %v679_v18  ;;  %v1835_v14 = vld [vmem:[%s4251_s0 + $0x210] sm:$0xff]  ;;  %v395_v26 = vld [vmem:[%s4250_s1 + $0x828] sm:$0xff] }
 0x161   :  { %v3500_v62 = vpop.f32.mrf.mxu1  ;;  %v295_v18 = vld [vmem:[%s4250_s1 + $0x508] sm:$0xff]  ;;  %1387 = vmatpush.msra.mxu1 %v395_v26 }
 0x162   :  { %1022 = vmatmul.f32.gmra.mxu2 %v1833_v10  ;;  %1078 = vmatmul.f32.gmra.mxu3 %v1834_v50  ;;  %v363_v10 = vld [vmem:[%s4250_s1 + $0x728] sm:$0xff] }
 0x163   :  { %1131 = vmatmul.f32.gmra.mxu0 %v1835_v14  ;;  %v327_v50 = vld [vmem:[%s4250_s1 + $0x608] sm:$0xff]  ;;  %1221 = vmatpush.msra.mxu2 %v295_v18  ;;  %v1840_v18 = vld [vmem:[%s4251_s0 + $0x260] sm:$0xff] }
 0x164   :  { %1187 = vmatmul.f32.gmra.mxu1 %v1836_v53  ;;  %1331 = vmatpush.msra.mxu0 %v363_v10  ;;  %v1837_v10 = vld [vmem:[%s4251_s0 + $0x290] sm:$0xff] }
 0x165   :  { %v790_v8 = vpop.f32.mrf.mxu2  ;;  %v846_v51 = vpop.f32.mrf.mxu3  ;;  %1277 = vmatpush.msra.mxu3 %v327_v50 }
 0x166   :  { %v791_v58 = vadd.f32 %v790_v8, %v735_v24  ;;  %v682_v24 = vadd.f32 %v3092_v63, %v3087_v47  ;;  %v361_v8 = vld [vmem:[%s4250_s1 + $0x718] sm:$0xff] }
 0x167   :  { %1332 = vmatpush.msra.mxu0 %v361_v8  ;;  %v1838_v47 = vld [vmem:[%s4251_s0 + $0x298] sm:$0xff] }
 0x168   :  { %v3526_v14 = vadd.f32 %v846_v51, %v791_v58  ;;  %v3531_v53 = vpop.f32.mrf.mxu0  ;;  %v738_v63 = vadd.f32 %v3100_v0, %v682_v24  ;;  %v1839_v51 = vld [vmem:[%s4251_s0 + $0x258] sm:$0xff]  ;;  %v359_v0 = vld [vmem:[%s4250_s1 + $0x708] sm:$0xff]  ;;  %v685_v24 = vadd.f32 %v3135_v41, %v3130_v37  ;;  %v1842_v37 = vld [vmem:[%s4251_s0 + $0x2e0] sm:$0xff] }
 0x169   :  { %v3536_v26 = vpop.f32.mrf.mxu1  ;;  %1333 = vmatpush.msra.mxu0 %v359_v0 }
 0x16a   :  { %1025 = vmatmul.f32.gmra.mxu2 %v1837_v10  ;;  %1081 = vmatmul.f32.gmra.mxu3 %v1838_v47  ;;  %v393_v10 = vld [vmem:[%s4250_s1 + $0x818] sm:$0xff]  ;;  %v741_v41 = vadd.f32 %v3143_v44, %v685_v24  ;;  %v1845_v44 = vld [vmem:[%s4251_s0 + $0x320] sm:$0xff] }
 0x16b   :  { %1134 = vmatmul.f32.gmra.mxu0 %v1839_v51  ;;  %1388 = vmatpush.msra.mxu1 %v393_v10  ;;  %v391_v51 = vld [vmem:[%s4250_s1 + $0x808] sm:$0xff] }
 0x16c   :  { %1190 = vmatmul.f32.gmra.mxu1 %v1840_v18  ;;  %v1844_v10 = vld [vmem:[%s4251_s0 + $0x2a8] sm:$0xff] }
 0x16d   :  { %v793_v58 = vpop.f32.mrf.mxu2  ;;  %v849_v50 = vpop.f32.mrf.mxu3  ;;  %1389 = vmatpush.msra.mxu1 %v391_v51 }
 0x16e   :  { %v794_v8 = vadd.f32 %v793_v58, %v738_v63  ;;  %v1841_v58 = vld [vmem:[%s4251_s0 + $0x2d8] sm:$0xff] }
 0x170   :  { %v3556_v47 = vadd.f32 %v849_v50, %v794_v8  ;;  %v3561_v63 = vpop.f32.mrf.mxu0  ;;  %v1843_v50 = vld [vmem:[%s4251_s0 + $0x2a0] sm:$0xff] }
 0x171   :  { %4275 = vst [vmem:[#allocation11_spill] sm:$0xff] %v3561_v63  ;;  %v3566_v18 = vpop.f32.mrf.mxu1 }
 0x172   :  { %1028 = vmatmul.f32.gmra.mxu2 %v1841_v58  ;;  %1084 = vmatmul.f32.gmra.mxu3 %v1842_v37  ;;  %v688_v58 = vadd.f32 %v3178_v60, %v3173_v11  ;;  %v1847_v11 = vld [vmem:[%s4251_s0 + $0x2e8] sm:$0xff] }
 0x173   :  { %1137 = vmatmul.f32.gmra.mxu0 %v1843_v50  ;;  %v1846_v50 = vld [vmem:[%s4251_s0 + $0x328] sm:$0xff] }
 0x174   :  { %1193 = vmatmul.f32.gmra.mxu1 %v1844_v10 }
 0x175   :  { %v796_v8 = vpop.f32.mrf.mxu2  ;;  %v852_v0 = vpop.f32.mrf.mxu3 }
 0x176   :  { %v797_v51 = vadd.f32 %v796_v8, %v741_v41  ;;  %v744_v41 = vadd.f32 %v3186_v46, %v688_v58  ;;  %v1848_v8 = vld [vmem:[%s4251_s0 + $0x2f0] sm:$0xff]  ;;  %v1849_v46 = vld [vmem:[%s4251_s0 + $0x368] sm:$0x3] }
 0x178   :  { %v3580_v63 = vadd.f32 %v852_v0, %v797_v51  ;;  %v3582_v37 = vpop.f32.mrf.mxu0  ;;  %v691_v51 = vadd.f32 %v3211_v2, %v3206_v22  ;;  %v1851_v2 = vld [vmem:[%s4251_s0 + $0x330] sm:$0xff] }
 0x179   :  { %v3587_v24 = vpop.f32.mrf.mxu1 }
 0x17a   :  { %1031 = vmatmul.f32.gmra.mxu2 %v1845_v44  ;;  %1087 = vmatmul.f32.gmra.mxu3 %v1846_v50 }
 0x17b   :  { %1140 = vmatmul.f32.gmra.mxu0 %v1847_v11  ;;  %v1850_v11 = vld [vmem:[%s4251_s0 + $0x370] sm:$0x3] }
 0x17c   :  { %1196 = vmatmul.f32.gmra.mxu1 %v1848_v8 }
 0x17d   :  { %v799_v60 = vpop.f32.mrf.mxu2  ;;  %v855_v10 = vpop.f32.mrf.mxu3 }
 0x17e   :  { %v800_v0 = vadd.f32 %v799_v60, %v744_v41  ;;  %v747_v41 = vadd.f32 %v3221_v6, %v691_v51  ;;  %v1852_v60 = vld [vmem:[%s4251_s0 + $0x338] sm:$0xff]  ;;  %v1853_v6 = vld [vmem:[%s4251_s0 + $0x28] sm:$0xff] }
 0x180   :  { %v3601_v44 = vadd.f32 %v855_v10, %v800_v0  ;;  %v3603_v50 = vpop.f32.mrf.mxu0  ;;  %v694_v0 = vadd.f32 %v3248_v45, %v3243_v3  ;;  %v1855_v3 = vld [vmem:[%s4251_s0 + $0x378] sm:$0x3] }
 0x181   :  { %v3608_v58 = vpop.f32.mrf.mxu1 }
 0x182   :  { %1034 = vmatmul.f32.gmra.mxu2 %v1849_v46  ;;  %1090 = vmatmul.f32.gmra.mxu3 %v1850_v11 }
 0x183   :  { %1143 = vmatmul.f32.gmra.mxu0 %v1851_v2  ;;  %v1854_v2 = vld [vmem:[%s4251_s0 + $0x30] sm:$0xff] }
 0x184   :  { %1199 = vmatmul.f32.gmra.mxu1 %v1852_v60 }
 0x185   :  { %v802_v22 = vpop.f32.mrf.mxu2  ;;  %v858_v8 = vpop.f32.mrf.mxu3 }
 0x186   :  { %v803_v10 = vadd.f32 %v802_v22, %v747_v41  ;;  %v750_v41 = vadd.f32 %v3253_v34, %v694_v0  ;;  %v1856_v22 = vld [vmem:[%s4251_s0 + $0x380] sm:$0x3]  ;;  %v1857_v34 = vld [vmem:[%s4251_s0 + $0x70] sm:$0xff] }
 0x188   :  { %v3622_v46 = vadd.f32 %v858_v8, %v803_v10  ;;  %v3624_v11 = vpop.f32.mrf.mxu0  ;;  %v697_v10 = vadd.f32 %v3282_v27, %v3274_v43  ;;  %v1859_v43 = vld [vmem:[%s4251_s0 + $0x38] sm:$0xff] }
 0x189   :  { %v3629_v51 = vpop.f32.mrf.mxu1 }
 0x18a   :  { %1222 = vmatmul.f32.vlgmr.msra.gmra.mxu2 %v1853_v6  ;;  %1278 = vmatmul.f32.vlgmr.msra.gmra.mxu3 %v1854_v2 }
 0x18b   :  { %1146 = vmatmul.f32.gmra.mxu0 %v1855_v3  ;;  %v1858_v3 = vld [vmem:[%s4251_s0 + $0x78] sm:$0xff] }
 0x18c   :  { %1202 = vmatmul.f32.gmra.mxu1 %v1856_v22 }
 0x18d   :  { %v805_v45 = vpop.f32.mrf.mxu2  ;;  %v861_v60 = vpop.f32.mrf.mxu3 }
 0x18e   :  { %v806_v8 = vadd.f32 %v805_v45, %v750_v41  ;;  %v753_v41 = vadd.f32 %v3287_v9, %v697_v10  ;;  %v1860_v45 = vld [vmem:[%s4251_s0 + $0x40] sm:$0xff]  ;;  %v1861_v9 = vld [vmem:[%s4251_s0 + $0xb8] sm:$0xff] }
 0x190   :  { %v3643_v6 = vadd.f32 %v861_v60, %v806_v8  ;;  %v3645_v2 = vpop.f32.mrf.mxu0  ;;  %v700_v8 = vadd.f32 %v3318_v35, %v3313_v12  ;;  %v1863_v35 = vld [vmem:[%s4251_s0 + $0x80] sm:$0xff] }
 0x191   :  { %v3650_v0 = vpop.f32.mrf.mxu1 }
 0x192   :  { %1225 = vmatmul.f32.gmra.mxu2 %v1857_v34  ;;  %1281 = vmatmul.f32.gmra.mxu3 %v1858_v3 }
 0x193   :  { %1334 = vmatmul.f32.vlgmr.msra.gmra.mxu0 %v1859_v43  ;;  %v1862_v43 = vld [vmem:[%s4251_s0 + $0xc0] sm:$0xff] }
 0x194   :  { %1390 = vmatmul.f32.vlgmr.msra.gmra.mxu1 %v1860_v45 }
 0x195   :  { %v808_v27 = vpop.f32.mrf.mxu2  ;;  %v864_v22 = vpop.f32.mrf.mxu3 }
 0x196   :  { %v809_v60 = vadd.f32 %v808_v27, %v753_v41  ;;  %v756_v41 = vadd.f32 %v3323_v28, %v700_v8  ;;  %v1864_v27 = vld [vmem:[%s4251_s0 + $0x88] sm:$0xff]  ;;  %v1865_v28 = vld [vmem:[%s4251_s0 + $0x100] sm:$0xff] }
 0x198   :  { %v3664_v34 = vadd.f32 %v864_v22, %v809_v60  ;;  %v3666_v3 = vpop.f32.mrf.mxu0 }
 0x199   :  { %4277 = vst [vmem:[#allocation13_spill] sm:$0xff] %v3666_v3  ;;  %v3671_v10 = vpop.f32.mrf.mxu1 }
 0x19a   :  { %4276 = vst [vmem:[#allocation12_spill] sm:$0xff] %v3664_v34  ;;  %1228 = vmatmul.f32.gmra.mxu2 %v1861_v9  ;;  %1284 = vmatmul.f32.gmra.mxu3 %v1862_v43  ;;  %v1866_v43 = vld [vmem:[%s4251_s0 + $0x108] sm:$0xff] }
 0x19b   :  { %1337 = vmatmul.f32.gmra.mxu0 %v1863_v35 }
 0x19c   :  { %1393 = vmatmul.f32.gmra.mxu1 %v1864_v27 }
 0x19d   :  { %v811_v12 = vpop.f32.mrf.mxu2  ;;  %v867_v45 = vpop.f32.mrf.mxu3 }
 0x19e   :  { %v812_v22 = vadd.f32 %v811_v12, %v756_v41  ;;  %v1867_v41 = vld [vmem:[%s4251_s0 + $0xc8] sm:$0xff]  ;;  %v1868_v12 = vld [vmem:[%s4251_s0 + $0xd0] sm:$0xff] }
 0x1a0   :  { %v3683_v60 = vadd.f32 %v867_v45, %v812_v22  ;;  %v3685_v9 = vpop.f32.mrf.mxu0 }
 0x1a1   :  { %4278 = vst [vmem:[#allocation14_spill] sm:$0xff] %v3685_v9  ;;  %v3690_v8 = vpop.f32.mrf.mxu1 }
 0x1a2   :  { %1231 = vmatmul.f32.gmra.mxu2 %v1865_v28  ;;  %1287 = vmatmul.f32.gmra.mxu3 %v1866_v43  ;;  %v1869_v43 = vld [vmem:[%s4251_s0 + $0x148] sm:$0xff] }
 0x1a3   :  { %1340 = vmatmul.f32.gmra.mxu0 %v1867_v41  ;;  %v1870_v41 = vld [vmem:[%s4251_s0 + $0x110] sm:$0xff] }
 0x1a4   :  { %1396 = vmatmul.f32.gmra.mxu1 %v1868_v12 }
 0x1a5   :  { %v999_v35 = vpop.f32.mrf.mxu2  ;;  %v1055_v27 = vpop.f32.mrf.mxu3 }
 0x1a6   :  { %v1000_v45 = vadd.f32 %v999_v35, %v3359_v55 }
 0x1a8   :  { %v3702_v22 = vadd.f32 %v1055_v27, %v1000_v45  ;;  %v3704_v28 = vpop.f32.mrf.mxu0 }
 0x1a9   :  { %v3709_v3 = vpop.f32.mrf.mxu1 }
 0x1aa   :  { %1234 = vmatmul.f32.gmra.mxu2 %v1869_v43  ;;  %1290 = vmatmul.f32.gmra.mxu3 %v2827_v33  ;;  %v1871_v43 = vld [vmem:[%s4251_s0 + $0x190] sm:$0xff] }
 0x1ab   :  { %1343 = vmatmul.f32.gmra.mxu0 %v1870_v41 }
 0x1ac   :  { %1399 = vmatmul.f32.gmra.mxu1 %v2845_v39  ;;  %v1872_v39 = vld [vmem:[%s4251_s0 + $0x158] sm:$0xff] }
 0x1ad   :  { %v1002_v12 = vpop.f32.mrf.mxu2  ;;  %v1058_v55 = vpop.f32.mrf.mxu3 }
 0x1ae   :  { %v1003_v35 = vadd.f32 %v1002_v12, %v3392_v23 }
 0x1b0   :  { %v3717_v27 = vadd.f32 %v1058_v55, %v1003_v35  ;;  %v3719_v45 = vpop.f32.mrf.mxu0 }
 0x1b1   :  { %v3724_v33 = vpop.f32.mrf.mxu1 }
 0x1b2   :  { %1237 = vmatmul.f32.gmra.mxu2 %v1871_v43  ;;  %1293 = vmatmul.f32.gmra.mxu3 %v2866_v1  ;;  %v1873_v43 = vld [vmem:[%s4251_s0 + $0x1d8] sm:$0xff] }
 0x1b3   :  { %1346 = vmatmul.f32.gmra.mxu0 %v1872_v39 }
 0x1b4   :  { %1402 = vmatmul.f32.gmra.mxu1 %v2883_v57 }
 0x1b5   :  { %v1005_v41 = vpop.f32.mrf.mxu2  ;;  %v1061_v23 = vpop.f32.mrf.mxu3 }
 0x1b6   :  { %v1006_v12 = vadd.f32 %v1005_v41, %v3431_v30 }
 0x1b8   :  { %v1062_v55 = vadd.f32 %v1061_v23, %v1006_v12  ;;  %v1117_v35 = vpop.f32.mrf.mxu0 }
 0x1b9   :  { %v1173_v1 = vpop.f32.mrf.mxu1 }
 0x1ba   :  { %v1118_v34 = vadd.f32 %v1117_v35, %v1062_v55  ;;  %1240 = vmatmul.f32.gmra.mxu2 %v1873_v43  ;;  %1296 = vmatmul.f32.gmra.mxu3 %v2908_v17  ;;  %v1874_v55 = vld [vmem:[%s4251_s0 + $0x220] sm:$0xff] }
 0x1bb   :  { %1349 = vmatmul.f32.gmra.mxu0 %v2871_v4 }
 0x1bc   :  { %v3736_v9 = vadd.f32 %v1173_v1, %v1118_v34  ;;  %1405 = vmatmul.f32.gmra.mxu1 %v2928_v15 }
 0x1bd   :  { %v1008_v39 = vpop.f32.mrf.mxu2  ;;  %v1064_v57 = vpop.f32.mrf.mxu3 }
 0x1be   :  { %v1009_v30 = vadd.f32 %v1008_v39, %v3464_v29  ;;  %v1875_v39 = vld [vmem:[%s4251_s0 + $0x268] sm:$0xff] }
 0x1c0   :  { %v1065_v41 = vadd.f32 %v1064_v57, %v1009_v30  ;;  %v1120_v23 = vpop.f32.mrf.mxu0 }
 0x1c1   :  { %v1176_v35 = vpop.f32.mrf.mxu1 }
 0x1c2   :  { %v1121_v12 = vadd.f32 %v1120_v23, %v1065_v41  ;;  %1243 = vmatmul.f32.gmra.mxu2 %v1874_v55  ;;  %1299 = vmatmul.f32.gmra.mxu3 %v2950_v32 }
 0x1c3   :  { %1352 = vmatmul.f32.gmra.mxu0 %v2913_v20 }
 0x1c4   :  { %v3745_v17 = vadd.f32 %v1176_v35, %v1121_v12  ;;  %1408 = vmatmul.f32.gmra.mxu1 %v2967_v31  ;;  %v1876_v12 = vld [vmem:[%s4251_s0 + $0x2b0] sm:$0xff] }
 0x1c5   :  { %v1011_v4 = vpop.f32.mrf.mxu2  ;;  %v1067_v15 = vpop.f32.mrf.mxu3 }
 0x1c6   :  { %v1012_v29 = vadd.f32 %v1011_v4, %v3500_v62 }
 0x1c8   :  { %v1068_v34 = vadd.f32 %v1067_v15, %v1012_v29  ;;  %v1123_v43 = vpop.f32.mrf.mxu0  ;;  %v1877_v29 = vld [vmem:[%s4251_s0 + $0x2f8] sm:$0xff] }
 0x1c9   :  { %v1179_v57 = vpop.f32.mrf.mxu1 }
 0x1ca   :  { %v1124_v1 = vadd.f32 %v1123_v43, %v1068_v34  ;;  %1246 = vmatmul.f32.gmra.mxu2 %v1875_v39  ;;  %1302 = vmatmul.f32.gmra.mxu3 %v2992_v48 }
 0x1cb   :  { %1355 = vmatmul.f32.gmra.mxu0 %v2955_v36 }
 0x1cc   :  { %v3754_v32 = vadd.f32 %v1179_v57, %v1124_v1  ;;  %1411 = vmatmul.f32.gmra.mxu1 %v3009_v61 }
 0x1cd   :  { %v1014_v20 = vpop.f32.mrf.mxu2  ;;  %v1070_v31 = vpop.f32.mrf.mxu3 }
 0x1ce   :  { %v1015_v62 = vadd.f32 %v1014_v20, %v3536_v26  ;;  %v1878_v20 = vld [vmem:[%s4251_s0 + $0x340] sm:$0xff] }
 0x1d0   :  { %v1071_v30 = vadd.f32 %v1070_v31, %v1015_v62  ;;  %v1126_v41 = vpop.f32.mrf.mxu0 }
 0x1d1   :  { %v1182_v55 = vpop.f32.mrf.mxu1 }
 0x1d2   :  { %v1127_v23 = vadd.f32 %v1126_v41, %v1071_v30  ;;  %1249 = vmatmul.f32.gmra.mxu2 %v1876_v12  ;;  %1305 = vmatmul.f32.gmra.mxu3 %v3036_v7  ;;  %v4282_v41 = vld [vmem:[#allocation6_spill] sm:$0xff] }
 0x1d3   :  { %1358 = vmatmul.f32.gmra.mxu0 %v2997_v54 }
 0x1d4   :  { %v3763_v48 = vadd.f32 %v1182_v55, %v1127_v23  ;;  %1414 = vmatmul.f32.gmra.mxu1 %v3053_v25  ;;  %v4279_v25 = vld [vmem:[#allocation3_spill] sm:$0xff] }
 0x1d5   :  { %v1017_v36 = vpop.f32.mrf.mxu2  ;;  %v1073_v61 = vpop.f32.mrf.mxu3 }
 0x1d6   :  { %v1018_v26 = vadd.f32 %v1017_v36, %v3566_v18 }
 0x1d8   :  { %v1074_v35 = vadd.f32 %v1073_v61, %v1018_v26  ;;  %v1129_v4 = vpop.f32.mrf.mxu0  ;;  %v1879_v61 = vld [vmem:[%s4251_s0 + $0x388] sm:$0x3]  ;;  %s1880_s0 = smov 64  }
 0x1d9   :  { %v1185_v34 = vpop.f32.mrf.mxu1 }
 0x1da   :  { %v1130_v15 = vadd.f32 %v1129_v4, %v1074_v35  ;;  %1252 = vmatmul.f32.gmra.mxu2 %v1877_v29  ;;  %1308 = vmatmul.f32.gmra.mxu3 %v3080_v21  ;;  %v4280_v21 = vld [vmem:[#allocation4_spill] sm:$0xff]  ;;  %v4283_v35 = vld [vmem:[#allocation7_spill] sm:$0xff] }
 0x1db   :  { %1361 = vmatmul.f32.gmra.mxu0 %v3041_v19  ;;  %v4281_v19 = vld [vmem:[#allocation2_spill] sm:$0xff] }
 0x1dc   :  { %v3772_v7 = vadd.f32 %v1185_v34, %v1130_v15  ;;  %1417 = vmatmul.f32.gmra.mxu1 %v4279_v25  ;;  %v4284_v15 = vld [vmem:[#allocation5_spill] sm:$0xff] }
 0x1dd   :  { %v1020_v54 = vpop.f32.mrf.mxu2  ;;  %v1076_v43 = vpop.f32.mrf.mxu3  ;;  %v4285_v34 = vld [vmem:[#allocation9_spill] sm:$0xff] }
 0x1de   :  { %v1021_v18 = vadd.f32 %v1020_v54, %v3587_v24 }
 0x1e0   :  { %v1077_v1 = vadd.f32 %v1076_v43, %v1021_v18  ;;  %v1132_v39 = vpop.f32.mrf.mxu0 }
 0x1e1   :  { %v1188_v31 = vpop.f32.mrf.mxu1 }
 0x1e2   :  { %v1133_v57 = vadd.f32 %v1132_v39, %v1077_v1  ;;  %1255 = vmatmul.f32.gmra.mxu2 %v1878_v20  ;;  %1311 = vmatmul.f32.gmra.mxu3 %v4280_v21 }
 0x1e3   :  { %1364 = vmatmul.f32.gmra.mxu0 %v4281_v19 }
 0x1e4   :  { %v3781_v62 = vadd.f32 %v1188_v31, %v1133_v57  ;;  %1420 = vmatmul.f32.gmra.mxu1 %v4282_v41  ;;  %v4286_v57 = vld [vmem:[#allocation8_spill] sm:$0xff]  ;;  %v4287_v31 = vld [vmem:[#allocation10_spill] sm:$0xff] }
 0x1e5   :  { %v1023_v30 = vpop.f32.mrf.mxu2  ;;  %v1079_v23 = vpop.f32.mrf.mxu3 }
 0x1e6   :  { %v1024_v24 = vadd.f32 %v1023_v30, %v3608_v58 }
 0x1e8   :  { %v1080_v12 = vadd.f32 %v1079_v23, %v1024_v24  ;;  %v1135_v55 = vpop.f32.mrf.mxu0 }
 0x1e9   :  { %v1191_v26 = vpop.f32.mrf.mxu1 }
 0x1ea   :  { %v1136_v36 = vadd.f32 %v1135_v55, %v1080_v12  ;;  %1258 = vmatmul.f32.gmra.mxu2 %v1879_v61  ;;  %1314 = vmatmul.f32.gmra.mxu3 %v4283_v35 }
 0x1eb   :  { %1367 = vmatmul.f32.gmra.mxu0 %v4284_v15 }
 0x1ec   :  { %v3790_v4 = vadd.f32 %v1191_v26, %v1136_v36  ;;  %1423 = vmatmul.f32.gmra.mxu1 %v4285_v34 }
 0x1ed   :  { %v1026_v29 = vpop.f32.mrf.mxu2  ;;  %v1082_v54 = vpop.f32.mrf.mxu3 }
 0x1ee   :  { %v1027_v58 = vadd.f32 %v1026_v29, %v3629_v51 }
 0x1f0   :  { %v1083_v25 = vadd.f32 %v1082_v54, %v1027_v58  ;;  %v1138_v43 = vpop.f32.mrf.mxu0  ;;  %v1112_v58 = vadd.f32 %v3704_v28, %v3702_v22 }
 0x1f1   :  { %v1194_v1 = vpop.f32.mrf.mxu1 }
 0x1f2   :  { %v1139_v18 = vadd.f32 %v1138_v43, %v1083_v25 }
 0x1f3   :  { %1370 = vmatmul.f32.gmra.mxu0 %v4286_v57  ;;  %v1168_v57 = vadd.f32 %v3709_v3, %v1112_v58 }
 0x1f4   :  { %v3795_v39 = vadd.f32 %v1194_v1, %v1139_v18  ;;  %1426 = vmatmul.f32.gmra.mxu1 %v4287_v31 }
 0x1f5   :  { %v1029_v20 = vpop.f32.mrf.mxu2  ;;  %v1085_v21 = vpop.f32.mrf.mxu3 }
 0x1f6   :  { %v1030_v19 = vadd.f32 %v1029_v20, %v3650_v0 }
 0x1f8   :  { %v1086_v30 = vadd.f32 %v1085_v21, %v1030_v19  ;;  %v1141_v41 = vpop.f32.mrf.mxu0  ;;  %v1115_v19 = vadd.f32 %v3719_v45, %v3717_v27 }
 0x1f9   :  { %v1197_v24 = vpop.f32.mrf.mxu1 }
 0x1fa   :  { %v1142_v23 = vadd.f32 %v1141_v41, %v1086_v30  ;;  %v1171_v22 = vadd.f32 %v3724_v33, %v1115_v19 }
 0x1fc   :  { %v3800_v12 = vadd.f32 %v1197_v24, %v1142_v23 }
 0x1fd   :  { %v1032_v51 = vpop.f32.mrf.mxu2  ;;  %v1088_v55 = vpop.f32.mrf.mxu3 }
 0x1fe   :  { %v1033_v36 = vadd.f32 %v1032_v51, %v3671_v10 }
 0x200   :  { %v1089_v61 = vadd.f32 %v1088_v55, %v1033_v36  ;;  %v1144_v26 = vpop.f32.mrf.mxu0 }
 0x201   :  { %v1200_v15 = vpop.f32.mrf.mxu1 }
 0x202   :  { %v1145_v35 = vadd.f32 %v1144_v26, %v1089_v61 }
 0x204   :  { %v3803_v29 = vadd.f32 %v1200_v15, %v1145_v35 }
 0x205   :  { %v1035_v34 = vpop.f32.mrf.mxu2  ;;  %v1091_v54 = vpop.f32.mrf.mxu3 }
 0x206   :  { %4288 = vst [vmem:[#allocation3_spill] sm:$0xff] %v3803_v29  ;;  %v1036_v0 = vadd.f32 %v1035_v34, %v3690_v8 }
 0x208   :  { %v1092_v25 = vadd.f32 %v1091_v54, %v1036_v0  ;;  %v1147_v43 = vpop.f32.mrf.mxu0 }
 0x209   :  { %v1203_v1 = vpop.f32.mrf.mxu1 }
 0x20a   :  { %v1148_v18 = vadd.f32 %v1147_v43, %v1092_v25 }
 0x20c   :  { %v3809_v10 = vadd.f32 %v1203_v1, %v1148_v18 }
 0x20d   :  { %v1223_v20 = vpop.f32.mrf.mxu2  ;;  %v1279_v31 = vpop.f32.mrf.mxu3 }
 0x20e   :  { %4289 = vst [vmem:[#allocation4_spill] sm:$0xff] %v3809_v10  ;;  %v1224_v21 = vadd.f32 %v1223_v20, %v1168_v57 }
 0x210   :  { %v1280_v30 = vadd.f32 %v1279_v31, %v1224_v21  ;;  %v1335_v41 = vpop.f32.mrf.mxu0 }
 0x211   :  { %v1391_v23 = vpop.f32.mrf.mxu1 }
 0x212   :  { %v1336_v8 = vadd.f32 %v1335_v41, %v1280_v30 }
 0x214   :  { %v3814_v28 = vadd.f32 %v1391_v23, %v1336_v8 }
 0x215   :  { %v1226_v24 = vpop.f32.mrf.mxu2  ;;  %v1282_v51 = vpop.f32.mrf.mxu3 }
 0x216   :  { %v1227_v55 = vadd.f32 %v1226_v24, %v1171_v22  ;;  %v3838_v24 = vadd.f32 %v3387_v40, %v3382_v59 }
 0x218   :  { %v1283_v3 = vadd.f32 %v1282_v51, %v1227_v55  ;;  %v1338_v36 = vpop.f32.mrf.mxu0  ;;  %4291 = vst [vmem:[#allocation6_spill] sm:$0xff] %v3838_v24 }
 0x219   :  { %v1394_v26 = vpop.f32.mrf.mxu1 }
 0x21a   :  { %v1339_v61 = vadd.f32 %v1338_v36, %v1283_v3  ;;  %v3846_v3 = vadd.f32 %v3354_v42, %v3346_v5  ;;  %v3850_v36 = vadd.f32 %v3426_v13, %v3418_v38  ;;  %v3866_v42 = vadd.f32 %v3495_v49, %v3490_v52 }
 0x21c   :  { %v3816_v35 = vadd.f32 %v1394_v26, %v1339_v61  ;;  %4294 = vst [vmem:[#allocation9_spill] sm:$0xff] %v3850_v36  ;;  %v1471_v61 = vmul.f32 %v3838_v24, %v3838_v24  ;;  %v3856_v26 = vadd.f32 %v3459_v56, %v3454_v16  ;;  %v1469_v10 = vmul.f32 %v3846_v3, %v3846_v3 }
 0x21d   :  { %v1229_v15 = vpop.f32.mrf.mxu2  ;;  %v1285_v34 = vpop.f32.mrf.mxu3  ;;  %v1473_v5 = vmul.f32 %v3850_v36, %v3850_v36  ;;  %v1430_v13 = vadd.f32 %v3838_v24, %v3846_v3 }
 0x21e   :  { %v1230_v38 = vadd.f32 %v1229_v15, %v3736_v9  ;;  %v1495_v16 = vadd.f32 %v1471_v61, %v1469_v10  ;;  %v1475_v56 = vmul.f32 %v3856_v26, %v3856_v26  ;;  %v1477_v9 = vmul.f32 %v3866_v42, %v3866_v42  ;;  %v4295_v10 = vld [vmem:[#allocation11_spill] sm:$0xff] }
 0x21f   :  { %v1431_v52 = vadd.f32 %v1430_v13, %v3850_v36  ;;  %v3887_v15 = vadd.f32 %v4295_v10, %v3556_v47 }
 0x220   :  { %v1341_v27 = vpop.f32.mrf.mxu0  ;;  %v1496_v49 = vadd.f32 %v1495_v16, %v1473_v5  ;;  %v1286_v61 = vadd.f32 %v1285_v34, %v1230_v38 }
 0x221   :  { %v3818_v45 = vpop.f32.mrf.mxu1 }
 0x222   :  { %v1497_v24 = vadd.f32 %v1496_v49, %v1475_v56  ;;  %v1342_v38 = vadd.f32 %v1341_v27, %v1286_v61  ;;  %v1472_v61 = vmul.f32 %v3816_v35, %v3816_v35 }
 0x224   :  { %v1498_v34 = vadd.f32 %v1497_v24, %v1477_v9  ;;  %v3916_v27 = vadd.f32 %v3818_v45, %v1342_v38 }
 0x225   :  { %v1232_v54 = vpop.f32.mrf.mxu2  ;;  %v1288_v0 = vpop.f32.mrf.mxu3 }
 0x228   :  { %v1344_v58 = vpop.f32.mrf.mxu0 }
 0x229   :  { %v3820_v33 = vpop.f32.mrf.mxu1 }
 0x22d   :  { %v1235_v25 = vpop.f32.mrf.mxu2  ;;  %v1291_v43 = vpop.f32.mrf.mxu3 }
 0x230   :  { %v3822_v18 = vpop.f32.mrf.mxu0 }
 0x231   :  { %v3824_v1 = vpop.f32.mrf.mxu1 }
 0x235   :  { %v1238_v57 = vpop.f32.mrf.mxu2  ;;  %v1294_v20 = vpop.f32.mrf.mxu3 }
 0x236   :  { %v1239_v36 = vadd.f32 %v1238_v57, %v3763_v48 }
 0x238   :  { %v3826_v31 = vpop.f32.mrf.mxu0  ;;  %v1295_v24 = vadd.f32 %v1294_v20, %v1239_v36 }
 0x239   :  { %v3828_v21 = vpop.f32.mrf.mxu1 }
 0x23d   :  { %v1241_v19 = vpop.f32.mrf.mxu2  ;;  %v1297_v30 = vpop.f32.mrf.mxu3 }
 0x23e   :  { %v1242_v48 = vadd.f32 %v1241_v19, %v3772_v7 }
 0x240   :  { %v3830_v41 = vpop.f32.mrf.mxu0 }
 0x241   :  { %v3832_v8 = vpop.f32.mrf.mxu1 }
 0x242   :  { %4290 = vst [vmem:[#allocation2_spill] sm:$0xff] %v3832_v8  ;;  %v1233_v8 = vadd.f32 %v1232_v54, %v3745_v17  ;;  %v3895_v54 = vadd.f32 %v3582_v37, %v3580_v63 }
 0x244   :  { %v1289_v16 = vadd.f32 %v1288_v0, %v1233_v8  ;;  %v1483_v0 = vmul.f32 %v3895_v54, %v3895_v54 }
 0x245   :  { %v1244_v23 = vpop.f32.mrf.mxu2  ;;  %v3834_v22 = vpop.f32.mrf.mxu3 }
 0x246   :  { %v1345_v8 = vadd.f32 %v1344_v58, %v1289_v16  ;;  %v1298_v58 = vadd.f32 %v1297_v30, %v1242_v48 }
 0x248   :  { %v3840_v51 = vpop.f32.mrf.mxu0 }
 0x249   :  { %4292 = vst [vmem:[#allocation7_spill] sm:$0xff] %v3840_v51  ;;  %v3842_v55 = vpop.f32.mrf.mxu1  ;;  %v4300_v48 = vld [vmem:[#allocation2_spill] sm:$0xff] }
 0x24a   :  { %4293 = vst [vmem:[#allocation5_spill] sm:$0xff] %v3842_v55  ;;  %v3875_v55 = vadd.f32 %v3531_v53, %v3526_v14  ;;  %v1236_v14 = vadd.f32 %v1235_v25, %v3754_v32  ;;  %v1432_v53 = vadd.f32 %v1431_v52, %v3856_v26  ;;  %v1481_v32 = vmul.f32 %v3887_v15, %v3887_v15 }
 0x24b   :  { %v3903_v25 = vadd.f32 %v3603_v50, %v3601_v44  ;;  %v1245_v50 = vadd.f32 %v1244_v23, %v3781_v62  ;;  %v1351_v62 = vadd.f32 %v3826_v31, %v1295_v24  ;;  %v1450_v31 = vadd.f32 %v3816_v35, %v3814_v28 }
 0x24c   :  { %v1479_v17 = vmul.f32 %v3875_v55, %v3875_v55  ;;  %v1433_v47 = vadd.f32 %v1432_v53, %v3866_v42  ;;  %v1292_v56 = vadd.f32 %v1291_v43, %v1236_v14  ;;  %v3924_v14 = vadd.f32 %v3820_v33, %v1345_v8 }
 0x24d   :  { %v1247_v59 = vpop.f32.mrf.mxu2  ;;  %v3858_v40 = vpop.f32.mrf.mxu3  ;;  %v1485_v44 = vmul.f32 %v3903_v25, %v3903_v25  ;;  %v1301_v23 = vadd.f32 %v3834_v22, %v1245_v50  ;;  %v1474_v33 = vmul.f32 %v3916_v27, %v3916_v27  ;;  %v1354_v22 = vadd.f32 %v3830_v41, %v1298_v58 }
 0x24e   :  { %v1434_v63 = vadd.f32 %v1433_v47, %v3875_v55  ;;  %v1499_v37 = vadd.f32 %v1498_v34, %v1479_v17  ;;  %v1348_v43 = vadd.f32 %v3822_v18, %v1292_v56  ;;  %v1248_v20 = vadd.f32 %v1247_v59, %v3790_v4  ;;  %v4296_v34 = vld [vmem:[#allocation14_spill] sm:$0xff]  ;;  %v4299_v56 = vld [vmem:[#allocation13_spill] sm:$0xff] }
 0x24f   :  { %v3932_v4 = vadd.f32 %v3624_v11, %v3622_v46  ;;  %v1470_v59 = vmul.f32 %v3814_v28, %v3814_v28  ;;  %v3948_v11 = vadd.f32 %v3645_v2, %v3643_v6  ;;  %v1476_v16 = vmul.f32 %v3924_v14, %v3924_v14  ;;  %v4298_v2 = vld [vmem:[#allocation12_spill] sm:$0xff] }
 0x250   :  { %v3877_v29 = vpop.f32.mrf.mxu0  ;;  %v1435_v49 = vadd.f32 %v1434_v63, %v3887_v15  ;;  %v1500_v9 = vadd.f32 %v1499_v37, %v1481_v32  ;;  %v3939_v53 = vadd.f32 %v3824_v1, %v1348_v43  ;;  %v3953_v1 = vadd.f32 %v3828_v21, %v1351_v62  ;;  %v4301_v43 = vld [vmem:[#allocation3_spill] sm:$0xff] }
 0x251   :  { %v3880_v51 = vpop.f32.mrf.mxu1  ;;  %v3957_v41 = vadd.f32 %v4296_v34, %v3683_v60  ;;  %v3964_v63 = vadd.f32 %v4299_v56, %v4298_v2  ;;  %v3970_v60 = vadd.f32 %v4300_v48, %v1354_v22  ;;  %v4303_v48 = vld [vmem:[#allocation4_spill] sm:$0xff] }
 0x252   :  { %v1436_v7 = vadd.f32 %v1435_v49, %v3895_v54  ;;  %v1501_v19 = vadd.f32 %v1500_v9, %v1483_v0  ;;  %v1478_v21 = vmul.f32 %v3939_v53, %v3939_v53  ;;  %v1480_v50 = vmul.f32 %v3953_v1, %v3953_v1 }
 0x254   :  { %v1437_v45 = vadd.f32 %v1436_v7, %v3903_v25  ;;  %v1502_v18 = vadd.f32 %v1501_v19, %v1485_v44  ;;  %v1442_v19 = vsel %vm1441_vm0, %v3957_v41, 0.0 }
 0x255   :  { %v1250_v5 = vpop.f32.mrf.mxu2  ;;  %v1306_v13 = vpop.f32.mrf.mxu3 }
 0x256   :  { %v1251_v30 = vadd.f32 %v1250_v5, %v3795_v39  ;;  %v1304_v39 = vadd.f32 %v3858_v40, %v1248_v20  ;;  %v1514_v5 = vadd.f32 %v1472_v61, %v1470_v59  ;;  %v1451_v40 = vadd.f32 %v1450_v31, %v3916_v27  ;;  %v4302_v20 = vld [vmem:[#allocation5_spill] sm:$0xff] }
 0x257   :  { %v1438_v6 = vadd.f32 %v1437_v45, %v3932_v4 }
 0x258   :  { %v1362_v57 = vpop.f32.mrf.mxu0  ;;  %v1307_v38 = vadd.f32 %v1306_v13, %v1251_v30  ;;  %v1515_v37 = vadd.f32 %v1514_v5, %v1474_v33  ;;  %v1452_v0 = vadd.f32 %v1451_v40, %v3924_v14  ;;  %v1360_v8 = vadd.f32 %v3877_v29, %v1304_v39 }
 0x259   :  { %v3909_v52 = vpop.f32.mrf.mxu1  ;;  %v1439_v9 = vadd.f32 %v1438_v6, %v3948_v11  ;;  %v1482_v30 = vmul.f32 %v3970_v60, %v3970_v60  ;;  %v1493_v39 = vmul.f32 %v3957_v41, %v3957_v41 }
 0x25a   :  { %v1516_v44 = vadd.f32 %v1515_v37, %v1476_v16  ;;  %v1453_v58 = vadd.f32 %v1452_v0, %v3939_v53  ;;  %v1363_v29 = vadd.f32 %v1362_v57, %v1307_v38  ;;  %v3990_v59 = vadd.f32 %v3880_v51, %v1360_v8 }
 0x25b   :  { %v1440_v61 = vadd.f32 %v1439_v9, %v3964_v63  ;;  %v1489_v57 = vmul.f32 %v3948_v11, %v3948_v11 }
 0x25c   :  { %v1517_v62 = vadd.f32 %v1516_v44, %v1478_v21  ;;  %v4000_v40 = vadd.f32 %v3909_v52, %v1363_v29  ;;  %v1486_v6 = vmul.f32 %v3990_v59, %v3990_v59  ;;  %v1506_v52 = vsel %vm1441_vm0, %v1493_v39, 0.0 }
 0x25d   :  { %v1253_v36 = vpop.f32.mrf.mxu2  ;;  %v1309_v10 = vpop.f32.mrf.mxu3  ;;  %v1443_v22 = vadd.f32 %v1442_v19, %v1440_v61 }
 0x25e   :  { %v1254_v17 = vadd.f32 %v1253_v36, %v3800_v12  ;;  %v4297_v12 = vld [vmem:[#allocation7_spill] sm:$0xff] }
 0x25f   :  { %v1357_v32 = vadd.f32 %v4297_v12, %v1301_v23  ;;  %v1454_v23 = vadd.f32 %v1453_v58, %v3953_v1  ;;  %v1491_v12 = vmul.f32 %v3964_v63, %v3964_v63  ;;  %v1444_v0 = vrot.slane %v1443_v22, 4 }
 0x260   :  { %v1365_v46 = vpop.f32.mrf.mxu0  ;;  %v1310_v24 = vadd.f32 %v1309_v10, %v1254_v17  ;;  %v1487_v10 = vmul.f32 %v3932_v4, %v3932_v4  ;;  %v1518_v17 = vadd.f32 %v1517_v62, %v1480_v50 }
 0x261   :  { %v1421_v47 = vpop.f32.mrf.mxu1  ;;  %v3981_v36 = vadd.f32 %v4302_v20, %v1357_v32  ;;  %v1455_v16 = vadd.f32 %v1454_v23, %v3970_v60  ;;  %v1445_v62 = vadd.f32 %v1444_v0, %v1443_v22 }
 0x262   :  { %v1366_v33 = vadd.f32 %v1365_v46, %v1310_v24  ;;  %v1503_v46 = vadd.f32 %v1502_v18, %v1487_v10  ;;  %v1519_v32 = vadd.f32 %v1518_v17, %v1482_v30 }
 0x263   :  { %v1484_v34 = vmul.f32 %v3981_v36, %v3981_v36  ;;  %v1456_v38 = vadd.f32 %v1455_v16, %v3981_v36 }
 0x264   :  { %v4007_v2 = vadd.f32 %v1421_v47, %v1366_v33  ;;  %v1504_v21 = vadd.f32 %v1503_v46, %v1489_v57 }
 0x265   :  { %v1256_v49 = vpop.f32.mrf.mxu2  ;;  %v1312_v13 = vpop.f32.mrf.mxu3  ;;  %v1520_v18 = vadd.f32 %v1519_v32, %v1484_v34  ;;  %v1457_v24 = vadd.f32 %v1456_v38, %v3990_v59 }
 0x266   :  { %v1257_v7 = vadd.f32 %v1256_v49, %v4301_v43  ;;  %v1488_v49 = vmul.f32 %v4000_v40, %v4000_v40  ;;  %v1505_v9 = vadd.f32 %v1504_v21, %v1491_v12  ;;  %v1490_v43 = vmul.f32 %v4007_v2, %v4007_v2 }
 0x267   :  { %v1521_v47 = vadd.f32 %v1520_v18, %v1486_v6  ;;  %v1458_v50 = vadd.f32 %v1457_v24, %v4000_v40 }
 0x268   :  { %v1313_v45 = vadd.f32 %v1312_v13, %v1257_v7  ;;  %v1368_v31 = vpop.f32.mrf.mxu0  ;;  %v1507_v19 = vadd.f32 %v1506_v52, %v1505_v9 }
 0x269   :  { %v1424_v5 = vpop.f32.mrf.mxu1  ;;  %v1522_v29 = vadd.f32 %v1521_v47, %v1488_v49  ;;  %v1459_v10 = vadd.f32 %v1458_v50, %v4007_v2 }
 0x26a   :  { %v1369_v51 = vadd.f32 %v1368_v31, %v1313_v45  ;;  %v1508_v57 = vrot.slane %v1507_v19, 4 }
 0x26b   :  { %v1523_v23 = vadd.f32 %v1522_v29, %v1490_v43 }
 0x26c   :  { %v4014_v13 = vadd.f32 %v1424_v5, %v1369_v51  ;;  %v1446_v5 = vrot.slane %v1445_v62, 2  ;;  %v1509_v32 = vadd.f32 %v1508_v57, %v1507_v19 }
 0x26d   :  { %v1259_v56 = vpop.f32.mrf.mxu2  ;;  %v1315_v37 = vpop.f32.mrf.mxu3 }
 0x26e   :  { %v1260_v8 = vadd.f32 %v1259_v56, %v4303_v48  ;;  %v1492_v61 = vmul.f32 %v4014_v13, %v4014_v13  ;;  %v1460_v30 = vadd.f32 %v1459_v10, %v4014_v13  ;;  %v1447_v46 = vadd.f32 %v1446_v5, %v1445_v62  ;;  %v1586_v5 = vld [vmem:[%s4252_s2] sm:$0x3] }
 0x26f   :  { %v1510_v21 = vrot.slane %v1509_v32, 2 }
 0x270   :  { %v1316_v44 = vadd.f32 %v1315_v37, %v1260_v8  ;;  %v1371_v7 = vpop.f32.mrf.mxu0  ;;  %v1524_v39 = vadd.f32 %v1523_v23, %v1492_v61  ;;  %v1448_v56 = vrot.slane %v1447_v46, 1 }
 0x271   :  { %v1427_v20 = vpop.f32.mrf.mxu1  ;;  %v1511_v24 = vadd.f32 %v1510_v21, %v1509_v32  ;;  %v1622_v32 = vld [vmem:[%s4253_s3] sm:$0x3] }
 0x272   :  { %v1372_v58 = vadd.f32 %v1371_v7, %v1316_v44  ;;  %v1449_v8 = vadd.f32 %v1448_v56, %v1447_v46  ;;  %v4040_v56 = vperm.slane %v1622_v32, 1 }
 0x273   :  { %v1512_v44 = vrot.slane %v1511_v24, 1 }
 0x274   :  { %v4022_v45 = vadd.f32 %v1427_v20, %v1372_v58 }
 0x275   :  { %v1513_v50 = vadd.f32 %v1512_v44, %v1511_v24 }
 0x276   :  { %v1461_v33 = vsel %vm1441_vm0, %v4022_v45, 0.0  ;;  %v1494_v31 = vmul.f32 %v4022_v45, %v4022_v45 }
 0x277   :  { %v1462_v17 = vadd.f32 %v1461_v33, %v1460_v30 }
 0x278   :  { %v1525_v16 = vsel %vm1441_vm0, %v1494_v31, 0.0 }
 0x279   :  { %v1463_v34 = vrot.slane %v1462_v17, 4  ;;  %v1526_v51 = vadd.f32 %v1525_v16, %v1524_v39 }
 0x27b   :  { %v1527_v22 = vrot.slane %v1526_v51, 4  ;;  %v1464_v12 = vadd.f32 %v1463_v34, %v1462_v17  ;;  %v1588_v34 = vperm.slane %v1586_v5, 0 }
 0x27d   :  { %v1465_v38 = vrot.slane %v1464_v12, 2  ;;  %v1528_v6 = vadd.f32 %v1527_v22, %v1526_v51  ;;  %v1589_v22 = vperm.slane %v1586_v5, 1 }
 0x27f   :  { %v1466_v37 = vadd.f32 %v1465_v38, %v1464_v12  ;;  %v1529_v0 = vrot.slane %v1528_v6, 2 }
 0x281   :  { %v1467_v52 = vrot.slane %v1466_v37, 1  ;;  %v1530_v48 = vadd.f32 %v1529_v0, %v1528_v6  ;;  %v4038_v6 = vperm.slane %v1622_v32, 0 }
 0x283   :  { %v1468_v18 = vadd.f32 %v1467_v52, %v1466_v37  ;;  %v1531_v9 = vrot.slane %v1530_v48, 1  ;;  %v4304_v52 = vld [vmem:[#allocation6_spill] sm:$0xff] }
 0x285   :  { %v1533_v49 = vadd.f32 %v1468_v18, %v1449_v8  ;;  %v1532_v47 = vadd.f32 %v1531_v9, %v1530_v48  ;;  %v4305_v18 = vld [vmem:[#allocation9_spill] sm:$0xff] }
 0x287   :  { %1534 = vrot.lane.b32.xlu0 %v1533_v49, %s1880_s0  ;;  %v1539_v43 = vadd.f32 %v1532_v47, %v1513_v50 }
 0x28f   :  { %1540 = vrot.lane.b32.xlu0 %v1539_v43, %s1880_s0 }
 0x2f9   :  { %v1535_v7 = vpop.permute.xlu0 %1534 }
 0x2fa   :  { %v1538_v19 = vadd.f32 %v1535_v7, %v1533_v49 }
 0x2fc   :  { %v1543_v20 = vmul.f32 0.0025510204, %v1538_v19 }
 0x2fe   :  { %v1545_v10 = vmul.f32 %v1543_v20, %v1543_v20  ;;  %v4033_v12 = vperm.slane %v1543_v20, 0 }
 0x300   :  { %v1549_v21 = vsub.f32 %v3846_v3, %v4033_v12  ;;  %v1550_v0 = vsub.f32 %v3814_v28, %v4033_v12  ;;  %v1551_v48 = vsub.f32 %v4304_v52, %v4033_v12  ;;  %v1552_v8 = vsub.f32 %v3816_v35, %v4033_v12 }
 0x301   :  { %v1541_v58 = vpop.permute.xlu0 %1540  ;;  %v1553_v24 = vsub.f32 %v4305_v18, %v4033_v12  ;;  %v1554_v49 = vsub.f32 %v3916_v27, %v4033_v12  ;;  %v1555_v9 = vsub.f32 %v3856_v26, %v4033_v12  ;;  %v1556_v3 = vsub.f32 %v3924_v14, %v4033_v12 }
 0x302   :  { %v1542_v29 = vadd.f32 %v1541_v58, %v1539_v43  ;;  %v1557_v28 = vsub.f32 %v3866_v42, %v4033_v12  ;;  %v1558_v44 = vsub.f32 %v3939_v53, %v4033_v12  ;;  %v1559_v35 = vsub.f32 %v3875_v55, %v4033_v12 }
 0x303   :  { %v1560_v50 = vsub.f32 %v3953_v1, %v4033_v12  ;;  %v1561_v27 = vsub.f32 %v3887_v15, %v4033_v12  ;;  %v1562_v26 = vsub.f32 %v3970_v60, %v4033_v12  ;;  %v1563_v42 = vsub.f32 %v3895_v54, %v4033_v12 }
 0x304   :  { %v1544_v61 = vmul.f32 0.0025510204, %v1542_v29  ;;  %v1564_v53 = vsub.f32 %v3981_v36, %v4033_v12  ;;  %v1565_v55 = vsub.f32 %v3903_v25, %v4033_v12  ;;  %v1566_v1 = vsub.f32 %v3990_v59, %v4033_v12 }
 0x305   :  { %v1567_v15 = vsub.f32 %v3932_v4, %v4033_v12  ;;  %v1568_v60 = vsub.f32 %v4000_v40, %v4033_v12  ;;  %v1569_v43 = vsub.f32 %v3948_v11, %v4033_v12  ;;  %v1570_v54 = vsub.f32 %v4007_v2, %v4033_v12 }
 0x306   :  { %v1546_v62 = vsub.f32 %v1544_v61, %v1545_v10  ;;  %v1571_v36 = vsub.f32 %v3964_v63, %v4033_v12  ;;  %v1572_v25 = vsub.f32 %v4014_v13, %v4033_v12  ;;  %v1573_v59 = vsub.f32 %v3957_v41, %v4033_v12 }
 0x307   :  { %v1574_v4 = vsub.f32 %v4022_v45, %v4033_v12 }
 0x308   :  { %v1547_v23 = vmax.f32 %v1546_v62, 0.0 }
 0x30a   :  { %v1575_v30 = vadd.f32 1e-05, %v1547_v23 }
 0x30c   :  { %1795 = vrsqrt.f32 %v1575_v30  ;;  %vm1582_vm2 = vweird.f32 %v1575_v30 }
 0x312   :  { %v1796_v33 = vpop.eup %1795 }
 0x313   :  { %v1577_v31 = vmul.f32 %v1796_v33, %v1575_v30  ;;  %vm1583_vm1 = vweird.f32 %v1796_v33 }
 0x314   :  { %vm1584_vm3 = vmor %vm1582_vm2, %vm1583_vm1 }
 0x315   :  { %v1578_v57 = vmul.f32 %v1796_v33, %v1577_v31 }
 0x317   :  { %v1579_v39 = vmul.f32 0.5, %v1578_v57 }
 0x319   :  { %v1580_v17 = vsub.f32 1.5, %v1579_v39 }
 0x31b   :  { %v1581_v16 = vmul.f32 %v1796_v33, %v1580_v17 }
 0x31d   :  { %v1585_v51 = vsel %vm1584_vm3, %v1796_v33, %v1581_v16 }
 0x31e   :  { %v1592_v46 = vmul.f32 %v1588_v34, %v1585_v51  ;;  %v1593_v38 = vmul.f32 %v1589_v22, %v1585_v51 }
 0x320   :  { %v4042_v37 = vperm.slane %v1592_v46, 0  ;;  %v1595_v47 = vperm.slane %v1593_v38, 0 }
 0x322   :  { %v1596_v14 = vmul.f32 %v4042_v37, %v1549_v21  ;;  %v1597_v7 = vmul.f32 %v1595_v47, %v1550_v0  ;;  %v1598_v40 = vmul.f32 %v4042_v37, %v1551_v48  ;;  %v1599_v19 = vmul.f32 %v1595_v47, %v1552_v8 }
 0x323   :  { %v1600_v2 = vmul.f32 %v4042_v37, %v1553_v24  ;;  %v1601_v58 = vmul.f32 %v1595_v47, %v1554_v49  ;;  %v1602_v63 = vmul.f32 %v4042_v37, %v1555_v9  ;;  %v1603_v20 = vmul.f32 %v1595_v47, %v1556_v3 }
 0x324   :  { %v1628_v11 = vadd.f32 %v4038_v6, %v1596_v14  ;;  %v1604_v13 = vmul.f32 %v4042_v37, %v1557_v28  ;;  %v1605_v29 = vmul.f32 %v1595_v47, %v1558_v44  ;;  %v1606_v41 = vmul.f32 %v4042_v37, %v1559_v35 }
 0x325   :  { %v1607_v10 = vmul.f32 %v1595_v47, %v1560_v50  ;;  %v1608_v61 = vmul.f32 %v4042_v37, %v1561_v27  ;;  %v1609_v45 = vmul.f32 %v1595_v47, %v1562_v26  ;;  %v1610_v62 = vmul.f32 %v4042_v37, %v1563_v42 }
 0x326   :  { %v1629_v23 = vadd.f32 %v4040_v56, %v1597_v7  ;;  %v1611_v30 = vmul.f32 %v1595_v47, %v1564_v53  ;;  %v1612_v33 = vmul.f32 %v4042_v37, %v1565_v55  ;;  %v1630_v31 = vadd.f32 %v4038_v6, %v1598_v40 }
 0x327   :  { %vm1654_vm4 = vcmp.ge.f32.partialorder %v1628_v11, 0.0  ;;  %v1613_v57 = vmul.f32 %v1595_v47, %v1566_v1  ;;  %v4109_v39 = vmul.f32 %v4042_v37, %v1567_v15  ;;  %v1631_v17 = vadd.f32 %v4040_v56, %v1599_v19 }
 0x328   :  { %v1680_v5 = vmul.f32 0.2, %v1628_v11  ;;  %v4112_v16 = vmul.f32 %v1595_v47, %v1568_v60  ;;  %v4115_v34 = vmul.f32 %v4042_v37, %v1569_v43  ;;  %v4117_v51 = vmul.f32 %v1595_v47, %v1570_v54 }
 0x329   :  { %v1632_v22 = vadd.f32 %v4038_v6, %v1600_v2  ;;  %v4121_v46 = vmul.f32 %v4042_v37, %v1571_v36  ;;  %v1633_v12 = vadd.f32 %v4040_v56, %v1601_v58  ;;  %v1681_v32 = vmul.f32 0.2, %v1629_v23 }
 0x32a   :  { %v1706_v38 = vsel %vm1654_vm4, %v1628_v11, %v1680_v5  ;;  %v4124_v21 = vmul.f32 %v1595_v47, %v1572_v25  ;;  %v1634_v0 = vadd.f32 %v4038_v6, %v1602_v63  ;;  %vm1655_vm5 = vcmp.ge.f32.partialorder %v1629_v23, 0.0 }
 0x32b   :  { %v1682_v52 = vmul.f32 0.2, %v1630_v31  ;;  %1732 = vst [vmem:[%s4254_s4] sm:$0xff] %v1706_v38  ;;  %v4131_v48 = vmul.f32 %v4042_v37, %v1573_v59  ;;  %v1635_v8 = vadd.f32 %v4040_v56, %v1603_v20  ;;  %vm1656_vm6 = vcmp.ge.f32.partialorder %v1630_v31, 0.0 }
 0x32c   :  { %v1683_v18 = vmul.f32 0.2, %v1631_v17  ;;  %v4134_v24 = vmul.f32 %v1595_v47, %v1574_v4  ;;  %v1636_v49 = vadd.f32 %v4038_v6, %v1604_v13  ;;  %vm1657_vm7 = vcmp.ge.f32.partialorder %v1631_v17, 0.0 }
 0x32d   :  { %v1684_v9 = vmul.f32 0.2, %v1632_v22  ;;  %v1637_v3 = vadd.f32 %v4040_v56, %v1605_v29  ;;  %vm1658_vm8 = vcmp.ge.f32.partialorder %v1632_v22, 0.0  ;;  %v1685_v28 = vmul.f32 0.2, %v1633_v12 }
 0x32e   :  { %v1707_v44 = vsel %vm1655_vm5, %v1629_v23, %v1681_v32  ;;  %v1638_v35 = vadd.f32 %v4038_v6, %v1606_v41  ;;  %vm1659_vm9 = vcmp.ge.f32.partialorder %v1633_v12, 0.0  ;;  %v1686_v37 = vmul.f32 0.2, %v1634_v0 }
 0x32f   :  { %v1708_v50 = vsel %vm1656_vm6, %v1630_v31, %v1682_v52  ;;  %v1639_v27 = vadd.f32 %v4040_v56, %v1607_v10  ;;  %vm1660_vm10 = vcmp.ge.f32.partialorder %v1634_v0, 0.0  ;;  %v1687_v26 = vmul.f32 0.2, %v1635_v8  ;;  %1733 = vst [vmem:[%s4254_s4 + $0x8] sm:$0xff] %v1707_v44 }
 0x330   :  { %v1709_v47 = vsel %vm1657_vm7, %v1631_v17, %v1683_v18  ;;  %v1640_v14 = vadd.f32 %v4038_v6, %v1608_v61  ;;  %vm1661_vm11 = vcmp.ge.f32.partialorder %v1635_v8, 0.0  ;;  %v1688_v42 = vmul.f32 0.2, %v1636_v49  ;;  %1734 = vst [vmem:[%s4254_s4 + $0x10] sm:$0xff] %v1708_v50 }
 0x331   :  { %v1710_v53 = vsel %vm1658_vm8, %v1632_v22, %v1684_v9  ;;  %v1641_v55 = vadd.f32 %v4040_v56, %v1609_v45  ;;  %vm1662_vm12 = vcmp.ge.f32.partialorder %v1636_v49, 0.0  ;;  %v1689_v1 = vmul.f32 0.2, %v1637_v3  ;;  %1735 = vst [vmem:[%s4254_s4 + $0x18] sm:$0xff] %v1709_v47 }
 0x332   :  { %v1711_v15 = vsel %vm1659_vm9, %v1633_v12, %v1685_v28  ;;  %v1642_v60 = vadd.f32 %v4038_v6, %v1610_v62  ;;  %vm1663_vm13 = vcmp.ge.f32.partialorder %v1637_v3, 0.0  ;;  %v1690_v43 = vmul.f32 0.2, %v1638_v35  ;;  %1736 = vst [vmem:[%s4254_s4 + $0x20] sm:$0xff] %v1710_v53 }
 0x333   :  { %v1712_v54 = vsel %vm1660_vm10, %v1634_v0, %v1686_v37  ;;  %v1643_v36 = vadd.f32 %v4040_v56, %v1611_v30  ;;  %vm1664_vm14 = vcmp.ge.f32.partialorder %v1638_v35, 0.0  ;;  %v1691_v25 = vmul.f32 0.2, %v1639_v27  ;;  %1737 = vst [vmem:[%s4254_s4 + $0x28] sm:$0xff] %v1711_v15 }
 0x334   :  { %v1713_v59 = vsel %vm1661_vm11, %v1635_v8, %v1687_v26  ;;  %v1644_v7 = vadd.f32 %v4038_v6, %v1612_v33  ;;  %vm1665_vm15 = vcmp.ge.f32.partialorder %v1639_v27, 0.0  ;;  %v1692_v4 = vmul.f32 0.2, %v1640_v14  ;;  %1738 = vst [vmem:[%s4254_s4 + $0x30] sm:$0xff] %v1712_v54 }
 0x335   :  { %v1714_v40 = vsel %vm1662_vm12, %v1636_v49, %v1688_v42  ;;  %v1645_v19 = vadd.f32 %v4040_v56, %v1613_v57  ;;  %vm1666_vm0 = vcmp.ge.f32.partialorder %v1640_v14, 0.0  ;;  %v1693_v11 = vmul.f32 0.2, %v1641_v55  ;;  %1739 = vst [vmem:[%s4254_s4 + $0x38] sm:$0xff] %v1713_v59 }
 0x336   :  { %v1715_v2 = vsel %vm1663_vm13, %v1637_v3, %v1689_v1  ;;  %v1646_v58 = vadd.f32 %v4038_v6, %v4109_v39  ;;  %vm1667_vm1 = vcmp.ge.f32.partialorder %v1641_v55, 0.0  ;;  %v1694_v63 = vmul.f32 0.2, %v1642_v60  ;;  %1740 = vst [vmem:[%s4254_s4 + $0x40] sm:$0xff] %v1714_v40 }
 0x337   :  { %v1716_v20 = vsel %vm1664_vm14, %v1638_v35, %v1690_v43  ;;  %v1647_v13 = vadd.f32 %v4040_v56, %v4112_v16  ;;  %vm1668_vm2 = vcmp.ge.f32.partialorder %v1642_v60, 0.0  ;;  %v1695_v29 = vmul.f32 0.2, %v1643_v36  ;;  %1741 = vst [vmem:[%s4254_s4 + $0x48] sm:$0xff] %v1715_v2 }
 0x338   :  { %v1717_v41 = vsel %vm1665_vm15, %v1639_v27, %v1691_v25  ;;  %v1648_v10 = vadd.f32 %v4038_v6, %v4115_v34  ;;  %vm1669_vm3 = vcmp.ge.f32.partialorder %v1643_v36, 0.0  ;;  %v1696_v61 = vmul.f32 0.2, %v1644_v7  ;;  %1742 = vst [vmem:[%s4254_s4 + $0x50] sm:$0xff] %v1716_v20 }
 0x339   :  { %v1718_v45 = vsel %vm1666_vm0, %v1640_v14, %v1692_v4  ;;  %v1649_v62 = vadd.f32 %v4040_v56, %v4117_v51  ;;  %vm1670_vm4 = vcmp.ge.f32.partialorder %v1644_v7, 0.0  ;;  %v1697_v23 = vmul.f32 0.2, %v1645_v19  ;;  %1743 = vst [vmem:[%s4254_s4 + $0x58] sm:$0xff] %v1717_v41 }
 0x33a   :  { %v1719_v30 = vsel %vm1667_vm1, %v1641_v55, %v1693_v11  ;;  %v1650_v33 = vadd.f32 %v4038_v6, %v4121_v46  ;;  %vm1671_vm5 = vcmp.ge.f32.partialorder %v1645_v19, 0.0  ;;  %v1698_v31 = vmul.f32 0.2, %v1646_v58  ;;  %1744 = vst [vmem:[%s4254_s4 + $0x60] sm:$0xff] %v1718_v45 }
 0x33b   :  { %v1720_v57 = vsel %vm1668_vm2, %v1642_v60, %v1694_v63  ;;  %v1651_v39 = vadd.f32 %v4040_v56, %v4124_v21  ;;  %vm1672_vm6 = vcmp.ge.f32.partialorder %v1646_v58, 0.0  ;;  %v1699_v17 = vmul.f32 0.2, %v1647_v13  ;;  %1745 = vst [vmem:[%s4254_s4 + $0x68] sm:$0xff] %v1719_v30 }
 0x33c   :  { %v1721_v5 = vsel %vm1669_vm3, %v1643_v36, %v1695_v29  ;;  %v1652_v16 = vadd.f32 %v4038_v6, %v4131_v48  ;;  %vm1673_vm7 = vcmp.ge.f32.partialorder %v1647_v13, 0.0  ;;  %v1700_v34 = vmul.f32 0.2, %v1648_v10  ;;  %1746 = vst [vmem:[%s4254_s4 + $0x70] sm:$0xff] %v1720_v57 }
 0x33d   :  { %v1722_v51 = vsel %vm1670_vm4, %v1644_v7, %v1696_v61  ;;  %v1653_v22 = vadd.f32 %v4040_v56, %v4134_v24  ;;  %vm1674_vm8 = vcmp.ge.f32.partialorder %v1648_v10, 0.0  ;;  %v1701_v46 = vmul.f32 0.2, %v1649_v62  ;;  %1747 = vst [vmem:[%s4254_s4 + $0x78] sm:$0xff] %v1721_v5 }
 0x33e   :  { %v1723_v12 = vsel %vm1671_vm5, %v1645_v19, %v1697_v23  ;;  %vm1675_vm9 = vcmp.ge.f32.partialorder %v1649_v62, 0.0  ;;  %v1702_v6 = vmul.f32 0.2, %v1650_v33  ;;  %v1724_v32 = vsel %vm1672_vm6, %v1646_v58, %v1698_v31  ;;  %1748 = vst [vmem:[%s4254_s4 + $0x80] sm:$0xff] %v1722_v51 }
 0x33f   :  { %vm1676_vm10 = vcmp.ge.f32.partialorder %v1650_v33, 0.0  ;;  %v1703_v38 = vmul.f32 0.2, %v1651_v39  ;;  %v1725_v21 = vsel %vm1673_vm7, %v1647_v13, %v1699_v17  ;;  %vm1677_vm11 = vcmp.ge.f32.partialorder %v1651_v39, 0.0  ;;  %1749 = vst [vmem:[%s4254_s4 + $0x88] sm:$0xff] %v1723_v12 }
 0x340   :  { %v1704_v56 = vmul.f32 0.2, %v1652_v16  ;;  %v1726_v0 = vsel %vm1674_vm8, %v1648_v10, %v1700_v34  ;;  %vm1678_vm12 = vcmp.ge.f32.partialorder %v1652_v16, 0.0  ;;  %v1705_v52 = vmul.f32 0.2, %v1653_v22  ;;  %1750 = vst [vmem:[%s4254_s4 + $0x90] sm:$0xff] %v1724_v32 }
 0x341   :  { %v1727_v48 = vsel %vm1675_vm9, %v1649_v62, %v1701_v46  ;;  %vm1679_vm13 = vcmp.ge.f32.partialorder %v1653_v22, 0.0  ;;  %v1728_v8 = vsel %vm1676_vm10, %v1650_v33, %v1702_v6  ;;  %1751 = vst [vmem:[%s4254_s4 + $0x98] sm:$0xff] %v1725_v21  ;;  %v1729_v18 = vsel %vm1677_vm11, %v1651_v39, %v1703_v38 }
 0x342   :  { %1752 = vst [vmem:[%s4254_s4 + $0xa0] sm:$0xff] %v1726_v0  ;;  %v1730_v24 = vsel %vm1678_vm12, %v1652_v16, %v1704_v56  ;;  %v1731_v49 = vsel %vm1679_vm13, %v1653_v22, %v1705_v52 }
 0x343   :  { %1753 = vst [vmem:[%s4254_s4 + $0xa8] sm:$0xff] %v1727_v48 }
 0x344   :  { %1754 = vst [vmem:[%s4254_s4 + $0xb0] sm:$0xff] %v1728_v8 }
 0x345   :  { %1755 = vst [vmem:[%s4254_s4 + $0xb8] sm:$0xff] %v1729_v18 }
 0x346   :  { %1756 = vst [vmem:[%s4254_s4 + $0xc0] sm:$0x3] %v1730_v24 }
 0x347   :  { %1757 = vst [vmem:[%s4254_s4 + $0xc8] sm:$0x3] %v1731_v49 }

// kernel: generator_forward.5
= control target key start
LH: loop header
LB: loop body
LE: loop exit
PB: predicated region body
PF: predicated region fallthrough
CT: control target
= control target key end

     0   :  { %s670_s12 = smov 0   ;;  %s977_s0 = inlined_call_operand.vmem [shape: f32[392,576], index: 0, kind: input, shape index: {}]   ;;  %s978_s1 = inlined_call_operand.vmem [shape: f32[576,128], index: 1, kind: input, shape index: {}]   ;;  %s979_s2 = inlined_call_operand.vmem [shape: f32[1,128], index: 2, kind: input, shape index: {}]   ;;  %s980_s3 = inlined_call_operand.vmem [shape: f32[392,128], index: 3, kind: output, shape index: {}]  }
   0x1 LB: > { %s570_s13 = sadd.s32 4294967295, %s648_s12   ;;  %p574_p0 = scmp.ge.s32.totalorder %s648_s12, 1  ;;  %s648_s12 = sphi %s670_s12, %s13_s12  }
   0x2   : > { %p139_p1 = scmp.lt.s32.totalorder %s648_s12, 8 }
   0x4   : > { %p140_p2 = pnand %p574_p0, %p139_p1 }
   0x5   : > { %s164_s7 = smul.u32 (!%p140_p2), 7, %s570_s13 }
   0x6   : > { %143 = sbr.rel (%p140_p2) target bundleno = 269 (0x10d), region = 32 }
   0x7   : > { %p165_p3 = scmp.lt.s32.totalorder (!%p140_p2), %s164_s7, 48 }
   0xb   : > { %v227_v0 = vld [vmem:[%s978_s1 + $0x78] sm:$0xff]  ;;  %v226_v1 = vld [vmem:[%s978_s1 + $0x70] sm:$0xff]  ;;  %v225_v2 = vld [vmem:[%s978_s1 + $0x68] sm:$0xff]  ;;  %s982_s7 = smov (!%p165_p3, %s164_s7), 48  ;;  %vm288_vm0 = vcmask 523264  }
   0xc   : > { %586 = vmatpush.msra.mxu1 %v227_v0  ;;  %587 = vmatpush.msra.mxu2 %v227_v0  ;;  %v224_v3 = vld [vmem:[%s978_s1 + $0x60] sm:$0xff]  ;;  %v223_v4 = vld [vmem:[%s978_s1 + $0x58] sm:$0xff]  ;;  %v274_v6 = vld [vmem:[%s978_s1 + $0x1f0] sm:$0xff]  ;;  %s618_s6 = smul.u32 40, %s982_s7 }
   0xd   : > { %310 = vmatpush.msra.mxu0 %v227_v0  ;;  %v275_v5 = vld [vmem:[%s978_s1 + $0x1f8] sm:$0xff]  ;;  %v222_v7 = vld [vmem:[%s978_s1 + $0x50] sm:$0xff]  ;;  %v273_v8 = vld [vmem:[%s978_s1 + $0x1e8] sm:$0xff] }
   0xe   : > { %588 = vmatpush.msra.mxu1 %v226_v1  ;;  %589 = vmatpush.msra.mxu2 %v226_v1  ;;  %v221_v9 = vld [vmem:[%s978_s1 + $0x48] sm:$0xff]  ;;  %v272_v10 = vld [vmem:[%s978_s1 + $0x1e0] sm:$0xff]  ;;  %v271_v12 = vld [vmem:[%s978_s1 + $0x1d8] sm:$0xff]  ;;  %s764_s19 = scalar_lea.vmem %s977_s0, %s618_s6 }
   0xf   : > { %311 = vmatpush.msra.mxu0 %v226_v1  ;;  %424 = vmatpush.msra.mxu3 %v275_v5  ;;  %v220_v11 = vld [vmem:[%s978_s1 + $0x40] sm:$0xff]  ;;  %v219_v13 = vld [vmem:[%s978_s1 + $0x38] sm:$0xff]  ;;  %v270_v14 = vld [vmem:[%s978_s1 + $0x1d0] sm:$0xff] }
  0x10   : > { %590 = vmatpush.msra.mxu1 %v225_v2  ;;  %591 = vmatpush.msra.mxu2 %v225_v2  ;;  %v218_v15 = vld [vmem:[%s978_s1 + $0x30] sm:$0xff]  ;;  %v269_v16 = vld [vmem:[%s978_s1 + $0x1c8] sm:$0xff]  ;;  %v268_v18 = vld [vmem:[%s978_s1 + $0x1c0] sm:$0xff] }
  0x11   : > { %312 = vmatpush.msra.mxu0 %v225_v2  ;;  %425 = vmatpush.msra.mxu3 %v274_v6  ;;  %v217_v17 = vld [vmem:[%s978_s1 + $0x28] sm:$0xff]  ;;  %v216_v19 = vld [vmem:[%s978_s1 + $0x20] sm:$0xff]  ;;  %v267_v20 = vld [vmem:[%s978_s1 + $0x1b8] sm:$0xff] }
  0x12   : > { %592 = vmatpush.msra.mxu1 %v224_v3  ;;  %593 = vmatpush.msra.mxu2 %v224_v3  ;;  %v215_v21 = vld [vmem:[%s978_s1 + $0x18] sm:$0xff]  ;;  %v266_v22 = vld [vmem:[%s978_s1 + $0x1b0] sm:$0xff]  ;;  %v265_v24 = vld [vmem:[%s978_s1 + $0x1a8] sm:$0xff] }
  0x13   : > { %313 = vmatpush.msra.mxu0 %v224_v3  ;;  %426 = vmatpush.msra.mxu3 %v273_v8  ;;  %v214_v23 = vld [vmem:[%s978_s1 + $0x10] sm:$0xff]  ;;  %v213_v25 = vld [vmem:[%s978_s1 + $0x8] sm:$0xff]  ;;  %v264_v26 = vld [vmem:[%s978_s1 + $0x1a0] sm:$0xff] }
  0x14   : > { %594 = vmatpush.msra.mxu1 %v223_v4  ;;  %595 = vmatpush.msra.mxu2 %v223_v4  ;;  %v212_v27 = vld [vmem:[%s978_s1] sm:$0xff]  ;;  %v187_v28 = vld [vmem:[%s764_s19 + $0x50] sm:$0xff]  ;;  %v259_v29 = vld [vmem:[%s978_s1 + $0x178] sm:$0xff] }
  0x15   : > { %314 = vmatpush.msra.mxu0 %v223_v4  ;;  %427 = vmatpush.msra.mxu3 %v272_v10  ;;  %v243_v30 = vld [vmem:[%s978_s1 + $0xf8] sm:$0xff]  ;;  %v207_v31 = vld [vmem:[%s764_s19 + $0xf0] sm:$0xff]  ;;  %v177_v34 = vld [vmem:[%s764_s19] sm:$0xff] }
  0x16   : > { %596 = vmatpush.msra.mxu1 %v222_v7  ;;  %597 = vmatpush.msra.mxu2 %v222_v7  ;;  %v258_v32 = vld [vmem:[%s978_s1 + $0x170] sm:$0xff]  ;;  %v257_v35 = vld [vmem:[%s978_s1 + $0x168] sm:$0xff]  ;;  %v283_v36 = vld [vmem:[%s978_s1 + $0x238] sm:$0xff] }
  0x17   : > { %315 = vmatpush.msra.mxu0 %v222_v7  ;;  %428 = vmatpush.msra.mxu3 %v271_v12  ;;  %v242_v33 = vld [vmem:[%s978_s1 + $0xf0] sm:$0xff]  ;;  %v241_v37 = vld [vmem:[%s978_s1 + $0xe8] sm:$0xff]  ;;  %v263_v38 = vld [vmem:[%s978_s1 + $0x198] sm:$0xff] }
  0x18   : > { %598 = vmatpush.msra.mxu1 %v221_v9  ;;  %599 = vmatpush.msra.mxu2 %v221_v9  ;;  %v256_v39 = vld [vmem:[%s978_s1 + $0x160] sm:$0xff]  ;;  %v282_v40 = vld [vmem:[%s978_s1 + $0x230] sm:$0xff]  ;;  %v192_v43 = vld [vmem:[%s764_s19 + $0x78] sm:$0xff] }
  0x19   : > { %316 = vmatpush.msra.mxu0 %v221_v9  ;;  %429 = vmatpush.msra.mxu3 %v270_v14  ;;  %v240_v41 = vld [vmem:[%s978_s1 + $0xe0] sm:$0xff]  ;;  %v262_v42 = vld [vmem:[%s978_s1 + $0x190] sm:$0xff]  ;;  %v255_v44 = vld [vmem:[%s978_s1 + $0x158] sm:$0xff] }
  0x1a   : > { %600 = vmatpush.msra.mxu1 %v220_v11  ;;  %601 = vmatpush.msra.mxu2 %v220_v11  ;;  %v239_v45 = vld [vmem:[%s978_s1 + $0xd8] sm:$0xff]  ;;  %v281_v46 = vld [vmem:[%s978_s1 + $0x228] sm:$0xff]  ;;  %v254_v47 = vld [vmem:[%s978_s1 + $0x150] sm:$0xff] }
  0x1b   : > { %317 = vmatpush.msra.mxu0 %v220_v11  ;;  %430 = vmatpush.msra.mxu3 %v269_v16  ;;  %v261_v48 = vld [vmem:[%s978_s1 + $0x188] sm:$0xff]  ;;  %v238_v49 = vld [vmem:[%s978_s1 + $0xd0] sm:$0xff]  ;;  %v280_v50 = vld [vmem:[%s978_s1 + $0x220] sm:$0xff] }
  0x1c   : > { %602 = vmatpush.msra.mxu1 %v219_v13  ;;  %603 = vmatpush.msra.mxu2 %v219_v13  ;;  %v253_v51 = vld [vmem:[%s978_s1 + $0x148] sm:$0xff]  ;;  %v260_v52 = vld [vmem:[%s978_s1 + $0x180] sm:$0xff]  ;;  %v180_v56 = vld [vmem:[%s764_s19 + $0x18] sm:$0xff] }
  0x1d   : > { %318 = vmatpush.msra.mxu0 %v219_v13  ;;  %431 = vmatpush.msra.mxu3 %v268_v18  ;;  %v237_v53 = vld [vmem:[%s978_s1 + $0xc8] sm:$0xff]  ;;  %v252_v55 = vld [vmem:[%s978_s1 + $0x140] sm:$0xff]  ;;  %v279_v58 = vld [vmem:[%s978_s1 + $0x218] sm:$0xff] }
  0x1e   : > { %604 = vmatpush.msra.mxu1 %v218_v15  ;;  %605 = vmatpush.msra.mxu2 %v218_v15  ;;  %v182_v54 = vld [vmem:[%s764_s19 + $0x28] sm:$0xff]  ;;  %v236_v57 = vld [vmem:[%s978_s1 + $0xc0] sm:$0xff]  ;;  %v251_v60 = vld [vmem:[%s978_s1 + $0x138] sm:$0xff] }
  0x1f   : > { %319 = vmatpush.msra.mxu0 %v218_v15  ;;  %432 = vmatpush.msra.mxu3 %v267_v20  ;;  %v197_v59 = vld [vmem:[%s764_s19 + $0xa0] sm:$0xff]  ;;  %v235_v61 = vld [vmem:[%s978_s1 + $0xb8] sm:$0xff]  ;;  %v278_v62 = vld [vmem:[%s978_s1 + $0x210] sm:$0xff] }
  0x20   : > { %606 = vmatpush.msra.mxu1 %v217_v17  ;;  %607 = vmatpush.msra.mxu2 %v217_v17  ;;  %v250_v63 = vld [vmem:[%s978_s1 + $0x130] sm:$0xff]  ;;  %v277_v1 = vld [vmem:[%s978_s1 + $0x208] sm:$0xff]  ;;  %v276_v4 = vld [vmem:[%s978_s1 + $0x200] sm:$0xff] }
  0x21   : > { %320 = vmatpush.msra.mxu0 %v217_v17  ;;  %433 = vmatpush.msra.mxu3 %v266_v22  ;;  %v234_v0 = vld [vmem:[%s978_s1 + $0xb0] sm:$0xff]  ;;  %v249_v2 = vld [vmem:[%s978_s1 + $0x128] sm:$0xff]  ;;  %v248_v5 = vld [vmem:[%s978_s1 + $0x120] sm:$0xff] }
  0x22   : > { %608 = vmatpush.msra.mxu1 %v216_v19  ;;  %609 = vmatpush.msra.mxu2 %v216_v19  ;;  %v233_v3 = vld [vmem:[%s978_s1 + $0xa8] sm:$0xff]  ;;  %v185_v6 = vld [vmem:[%s764_s19 + $0x40] sm:$0xff]  ;;  %v247_v10 = vld [vmem:[%s978_s1 + $0x118] sm:$0xff] }
  0x23   : > { %321 = vmatpush.msra.mxu0 %v216_v19  ;;  %434 = vmatpush.msra.mxu3 %v265_v24  ;;  %v232_v7 = vld [vmem:[%s978_s1 + $0xa0] sm:$0xff]  ;;  %v202_v9 = vld [vmem:[%s764_s19 + $0xc8] sm:$0xff]  ;;  %v231_v11 = vld [vmem:[%s978_s1 + $0x98] sm:$0xff] }
  0x24   : > { %610 = vmatpush.msra.mxu1 %v215_v21  ;;  %611 = vmatpush.msra.mxu2 %v215_v21  ;;  %v181_v8 = vld [vmem:[%s764_s19 + $0x20] sm:$0xff]  ;;  %v246_v12 = vld [vmem:[%s978_s1 + $0x110] sm:$0xff]  ;;  %v245_v14 = vld [vmem:[%s978_s1 + $0x108] sm:$0xff] }
  0x25   : > { %322 = vmatpush.msra.mxu0 %v215_v21  ;;  %435 = vmatpush.msra.mxu3 %v264_v26  ;;  %v230_v13 = vld [vmem:[%s978_s1 + $0x90] sm:$0xff]  ;;  %v229_v15 = vld [vmem:[%s978_s1 + $0x88] sm:$0xff]  ;;  %v244_v16 = vld [vmem:[%s978_s1 + $0x100] sm:$0xff] }
  0x26   : > { %612 = vmatpush.msra.mxu1 %v214_v23  ;;  %613 = vmatpush.msra.mxu2 %v214_v23  ;;  %v190_v17 = vld [vmem:[%s764_s19 + $0x68] sm:$0xff]  ;;  %v228_v18 = vld [vmem:[%s978_s1 + $0x80] sm:$0xff]  ;;  %v179_v19 = vld [vmem:[%s764_s19 + $0x10] sm:$0xff] }
  0x27   : > { %323 = vmatpush.msra.mxu0 %v214_v23  ;;  %436 = vmatpush.msra.mxu3 %v263_v38  ;;  %v178_v20 = vld [vmem:[%s764_s19 + $0x8] sm:$0xff]  ;;  %v195_v22 = vld [vmem:[%s764_s19 + $0x90] sm:$0xff]  ;;  %v184_v23 = vld [vmem:[%s764_s19 + $0x38] sm:$0xff] }
  0x28   : > { %614 = vmatpush.msra.mxu1 %v213_v25  ;;  %615 = vmatpush.msra.mxu2 %v213_v25  ;;  %v186_v21 = vld [vmem:[%s764_s19 + $0x48] sm:$0xff]  ;;  %v183_v24 = vld [vmem:[%s764_s19 + $0x30] sm:$0xff]  ;;  %v200_v26 = vld [vmem:[%s764_s19 + $0xb8] sm:$0xff] }
  0x29   : > { %324 = vmatpush.msra.mxu0 %v213_v25  ;;  %437 = vmatpush.msra.mxu3 %v262_v42  ;;  %v191_v25 = vld [vmem:[%s764_s19 + $0x70] sm:$0xff]  ;;  %v204_v38 = vld [vmem:[%s764_s19 + $0xd8] sm:$0xff] }
  0x2a   : > { %616 = vmatpush.msra.mxu1 %v212_v27  ;;  %617 = vmatpush.msra.mxu2 %v212_v27  ;;  %v208_v42 = vld [vmem:[%s764_s19 + $0xf8] sm:$0xff] }
  0x2b   : > { %332 = vmatmul.f32.vlgmr.msra.gmra.mxu1 %v187_v28  ;;  %344 = vmatmul.f32.vlgmr.msra.gmra.mxu2 %v207_v31  ;;  %v188_v28 = vld [vmem:[%s764_s19 + $0x58] sm:$0xff]  ;;  %v194_v31 = vld [vmem:[%s764_s19 + $0x88] sm:$0xff] }
  0x2c   : > { %386 = vmatpush.msrb.mxu2 %v259_v29  ;;  %348 = vmatpush.msrb.mxu1 %v243_v30  ;;  %v196_v29 = vld [vmem:[%s764_s19 + $0x98] sm:$0xff]  ;;  %v205_v30 = vld [vmem:[%s764_s19 + $0xe0] sm:$0xff] }
  0x2d   : > { %325 = vmatpush.msra.mxu0 %v212_v27  ;;  %438 = vmatpush.msra.mxu3 %v261_v48  ;;  %v189_v27 = vld [vmem:[%s764_s19 + $0x60] sm:$0xff] }
  0x2e   : > { %387 = vmatpush.msrb.mxu2 %v258_v32  ;;  %349 = vmatpush.msrb.mxu1 %v242_v33  ;;  %v193_v32 = vld [vmem:[%s764_s19 + $0x80] sm:$0xff] }
  0x2f   : > { %326 = vmatmul.f32.vlgmr.msra.gmra.mxu0 %v177_v34  ;;  %439 = vmatpush.msra.mxu3 %v260_v52  ;;  %v201_v33 = vld [vmem:[%s764_s19 + $0xc0] sm:$0xff]  ;;  %v210_v34 = vld [vmem:[%s764_s19 + $0x108] sm:$0xff] }
  0x30   : > { %388 = vmatpush.msrb.mxu2 %v257_v35  ;;  %470 = vmatpush.msrb.mxu0 %v283_v36  ;;  %v199_v35 = vld [vmem:[%s764_s19 + $0xb0] sm:$0xff]  ;;  %v198_v36 = vld [vmem:[%s764_s19 + $0xa8] sm:$0xff]  ;;  %v951_v52 = vld [vmem:[%s979_s2] ss:$0 sm:$0xff] }
  0x31   : > { %350 = vmatpush.msrb.mxu1 %v241_v37  ;;  %440 = vmatmul.f32.vlgmr.msra.gmra.mxu3 %v180_v56  ;;  %v206_v37 = vld [vmem:[%s764_s19 + $0xe8] sm:$0xff] }
  0x32   : > { %389 = vmatpush.msrb.mxu2 %v256_v39  ;;  %471 = vmatpush.msrb.mxu0 %v282_v40  ;;  %v203_v39 = vld [vmem:[%s764_s19 + $0xd0] sm:$0xff] }
  0x33   : > { %351 = vmatpush.msrb.mxu1 %v240_v41  ;;  %v211_v40 = vld [vmem:[%s764_s19 + $0x110] sm:$0xff]  ;;  %v209_v41 = vld [vmem:[%s764_s19 + $0x100] sm:$0xff]  ;;  %s576_s19 = sshll.u32 %s982_s7, 3 }
  0x34   : > { %335 = vmatmul.f32.gmra.mxu1 %v192_v43  ;;  %390 = vmatpush.msrb.mxu2 %v255_v44  ;;  %s959_s20 = scalar_lea.vmem %s980_s3, %s576_s19 }
  0x35   : > { %352 = vmatpush.msrb.mxu1 %v239_v45  ;;  %472 = vmatpush.msrb.mxu0 %v281_v46 }
  0x36   : > { %391 = vmatpush.msrb.mxu2 %v254_v47 }
  0x37   : > { %353 = vmatpush.msrb.mxu1 %v238_v49  ;;  %473 = vmatpush.msrb.mxu0 %v280_v50 }
  0x38   : > { %392 = vmatpush.msrb.mxu2 %v253_v51  ;;  %329 = vmatmul.f32.gmra.mxu0 %v182_v54 }
  0x39   : > { %354 = vmatpush.msrb.mxu1 %v237_v53  ;;  %474 = vmatpush.msrb.mxu0 %v279_v58 }
  0x3a   : > { %393 = vmatpush.msrb.mxu2 %v252_v55  ;;  %443 = vmatmul.f32.gmra.mxu3 %v185_v6 }
  0x3b   : > { %355 = vmatpush.msrb.mxu1 %v236_v57  ;;  %475 = vmatpush.msrb.mxu0 %v278_v62 }
  0x3c   : > { %338 = vmatmul.f32.gmra.mxu1 %v197_v59  ;;  %394 = vmatpush.msrb.mxu2 %v251_v60 }
  0x3d   : > { %356 = vmatpush.msrb.mxu1 %v235_v61  ;;  %476 = vmatpush.msrb.mxu0 %v277_v1 }
  0x3e   : > { %395 = vmatpush.msrb.mxu2 %v250_v63 }
  0x3f   : > { %357 = vmatpush.msrb.mxu1 %v234_v0  ;;  %477 = vmatpush.msrb.mxu0 %v276_v4 }
  0x40   : > { %396 = vmatpush.msrb.mxu2 %v249_v2  ;;  %577 = vmatmul.msk.f32.vlgmr.msrb.gmra.mxu0 %vm288_vm0, %v181_v8 }
  0x41   : > { %358 = vmatpush.msrb.mxu1 %v233_v3 }
  0x42   : > { %397 = vmatpush.msrb.mxu2 %v248_v5  ;;  %446 = vmatmul.f32.gmra.mxu3 %v190_v17 }
  0x43   : > { %359 = vmatpush.msrb.mxu1 %v232_v7 }
  0x44   : > { %341 = vmatmul.f32.gmra.mxu1 %v202_v9  ;;  %398 = vmatpush.msrb.mxu2 %v247_v10 }
  0x45   : > { %360 = vmatpush.msrb.mxu1 %v231_v11 }
  0x46   : > { %399 = vmatpush.msrb.mxu2 %v246_v12 }
  0x47   : > { %361 = vmatpush.msrb.mxu1 %v230_v13 }
  0x48   : > { %400 = vmatpush.msrb.mxu2 %v245_v14  ;;  %578 = vmatmul.msk.f32.gmra.mxu0 %vm288_vm0, %v186_v21 }
  0x49   : > { %362 = vmatpush.msrb.mxu1 %v229_v15 }
  0x4a   : > { %401 = vmatpush.msrb.mxu2 %v244_v16  ;;  %449 = vmatmul.f32.gmra.mxu3 %v195_v22 }
  0x4b   : > { %363 = vmatpush.msrb.mxu1 %v228_v18  ;;  %402 = vmatmul.f32.vlgmr.msrb.gmra.mxu2 %v179_v19 }
  0x4c   : > { %364 = vmatmul.f32.vlgmr.msrb.gmra.mxu1 %v178_v20 }
  0x50   : > { %579 = vmatmul.msk.f32.gmra.mxu0 %vm288_vm0, %v191_v25 }
  0x52   : > { %452 = vmatmul.f32.gmra.mxu3 %v200_v26 }
  0x53   : > { %405 = vmatmul.f32.gmra.mxu2 %v184_v23 }
  0x54   : > { %367 = vmatmul.f32.gmra.mxu1 %v183_v24 }
  0x58   : > { %580 = vmatmul.msk.f32.gmra.mxu0 %vm288_vm0, %v196_v29 }
  0x5a   : > { %455 = vmatmul.f32.gmra.mxu3 %v205_v30 }
  0x5b   : > { %408 = vmatmul.f32.gmra.mxu2 %v189_v27 }
  0x5c   : > { %370 = vmatmul.f32.gmra.mxu1 %v188_v28 }
  0x60   : > { %581 = vmatmul.msk.f32.gmra.mxu0 %vm288_vm0, %v201_v33 }
  0x62   : > { %458 = vmatmul.f32.gmra.mxu3 %v210_v34 }
  0x63   : > { %411 = vmatmul.f32.gmra.mxu2 %v194_v31 }
  0x64   : > { %373 = vmatmul.f32.gmra.mxu1 %v193_v32 }
  0x68   : > { %582 = vmatmul.msk.f32.gmra.mxu0 %vm288_vm0, %v206_v37 }
  0x6b   : > { %414 = vmatmul.f32.gmra.mxu2 %v199_v35 }
  0x6c   : > { %376 = vmatmul.f32.gmra.mxu1 %v198_v36 }
  0x70   : > { %583 = vmatmul.msk.f32.gmra.mxu0 %vm288_vm0, %v211_v40 }
  0x73   : > { %417 = vmatmul.f32.gmra.mxu2 %v204_v38 }
  0x74   : > { %379 = vmatmul.f32.gmra.mxu1 %v203_v39 }
  0x7b   : > { %420 = vmatmul.f32.gmra.mxu2 %v209_v41 }
  0x7c   : > { %382 = vmatmul.f32.gmra.mxu1 %v208_v42 }
  0xa8   : > { %v333_v43 = vpop.f32.mrf.mxu1 }
  0xa9   : > { %v334_v8 = vadd.f32 %v951_v52, %v333_v43 }
  0xac   : > { %v327_v44 = vpop.f32.mrf.mxu0 }
  0xad   : > { %v328_v54 = vadd.f32 %v951_v52, %v327_v44 }
  0xae   : > { %v946_v50 = vpop.f32.mrf.mxu2 }
  0xb1   : > { %v336_v45 = vpop.f32.mrf.mxu1 }
  0xb2   : > { %v337_v18 = vadd.f32 %v951_v52, %v336_v45 }
  0xb4   : > { %v441_v49 = vpop.f32.mrf.mxu3 }
  0xb5   : > { %v330_v47 = vpop.f32.mrf.mxu0 }
  0xb6   : > { %v331_v62 = vadd.f32 %v951_v52, %v330_v47 }
  0xb9   : > { %v339_v46 = vpop.f32.mrf.mxu1 }
  0xba   : > { %v340_v27 = vadd.f32 %v951_v52, %v339_v46  ;;  %v346_v46 = vadd.f32 %v951_v52, %v946_v50 }
  0xbd   : > { %v479_v51 = vpop.f32.mrf.mxu0  ;;  %v444_v55 = vpop.f32.mrf.mxu3 }
  0xc1   : > { %v342_v48 = vpop.f32.mrf.mxu1 }
  0xc2   : > { %v343_v36 = vadd.f32 %v951_v52, %v342_v48 }
  0xc5   : > { %v482_v58 = vpop.f32.mrf.mxu0  ;;  %v447_v2 = vpop.f32.mrf.mxu3 }
  0xc9   : > { %v365_v53 = vpop.f32.mrf.mxu1 }
  0xca   : > { %v366_v56 = vadd.f32 %v365_v53, %v328_v54 }
  0xcd   : > { %v485_v4 = vpop.f32.mrf.mxu0  ;;  %v450_v13 = vpop.f32.mrf.mxu3 }
  0xce   : > { %v403_v57 = vpop.f32.mrf.mxu2 }
  0xcf   : > { %v404_v59 = vadd.f32 %v403_v57, %v366_v56 }
  0xd1   : > { %v442_v60 = vadd.f32 %v441_v49, %v404_v59  ;;  %v368_v61 = vpop.f32.mrf.mxu1 }
  0xd2   : > { %v369_v0 = vadd.f32 %v368_v61, %v331_v62 }
  0xd3   : > { %v480_v63 = vadd.f32 %v479_v51, %v442_v60 }
  0xd5   : > { %628 = vtanh.f32 %v480_v63  ;;  %v488_v16 = vpop.f32.mrf.mxu0  ;;  %v453_v25 = vpop.f32.mrf.mxu3 }
  0xd6   : > { %v406_v1 = vpop.f32.mrf.mxu2 }
  0xd7   : > { %v407_v3 = vadd.f32 %v406_v1, %v369_v0 }
  0xd9   : > { %v445_v5 = vadd.f32 %v444_v55, %v407_v3  ;;  %v371_v6 = vpop.f32.mrf.mxu1 }
  0xda   : > { %v372_v10 = vadd.f32 %v371_v6, %v334_v8 }
  0xdb   : > { %v629_v7 = vpop.eup %628  ;;  %v483_v9 = vadd.f32 %v482_v58, %v445_v5 }
  0xdc   : > { %507 = vst [vmem:[%s959_s20] sm:$0xff] %v629_v7 }
  0xdd   : > { %630 = vtanh.f32 %v483_v9  ;;  %v491_v29 = vpop.f32.mrf.mxu0  ;;  %v456_v38 = vpop.f32.mrf.mxu3 }
  0xde   : > { %v409_v11 = vpop.f32.mrf.mxu2 }
  0xdf   : > { %v410_v12 = vadd.f32 %v409_v11, %v372_v10 }
  0xe1   : > { %v448_v14 = vadd.f32 %v447_v2, %v410_v12  ;;  %v374_v15 = vpop.f32.mrf.mxu1 }
  0xe2   : > { %v375_v20 = vadd.f32 %v374_v15, %v337_v18 }
  0xe3   : > { %v631_v17 = vpop.eup %630  ;;  %v486_v19 = vadd.f32 %v485_v4, %v448_v14 }
  0xe4   : > { %508 = vst [vmem:[%s959_s20 + $0x8] sm:$0xff] %v631_v17 }
  0xe5   : > { %632 = vtanh.f32 %v486_v19  ;;  %v494_v41 = vpop.f32.mrf.mxu0  ;;  %v459_v51 = vpop.f32.mrf.mxu3 }
  0xe6   : > { %v412_v21 = vpop.f32.mrf.mxu2 }
  0xe7   : > { %v413_v22 = vadd.f32 %v412_v21, %v375_v20 }
  0xe9   : > { %v451_v23 = vadd.f32 %v450_v13, %v413_v22  ;;  %v377_v24 = vpop.f32.mrf.mxu1 }
  0xea   : > { %v378_v30 = vadd.f32 %v377_v24, %v340_v27 }
  0xeb   : > { %v633_v26 = vpop.eup %632  ;;  %v489_v28 = vadd.f32 %v488_v16, %v451_v23 }
  0xec   : > { %509 = vst [vmem:[%s959_s20 + $0x10] sm:$0xff] %v633_v26 }
  0xed   : > { %634 = vtanh.f32 %v489_v28  ;;  %v497_v54 = vpop.f32.mrf.mxu0 }
  0xee   : > { %v415_v31 = vpop.f32.mrf.mxu2 }
  0xef   : > { %v416_v32 = vadd.f32 %v415_v31, %v378_v30 }
  0xf1   : > { %v454_v33 = vadd.f32 %v453_v25, %v416_v32  ;;  %v380_v34 = vpop.f32.mrf.mxu1 }
  0xf2   : > { %v381_v39 = vadd.f32 %v380_v34, %v343_v36 }
  0xf3   : > { %v635_v35 = vpop.eup %634  ;;  %v492_v37 = vadd.f32 %v491_v29, %v454_v33 }
  0xf4   : > { %510 = vst [vmem:[%s959_s20 + $0x18] sm:$0xff] %v635_v35 }
  0xf5   : > { %636 = vtanh.f32 %v492_v37 }
  0xf6   : > { %v418_v40 = vpop.f32.mrf.mxu2 }
  0xf7   : > { %v419_v42 = vadd.f32 %v418_v40, %v381_v39 }
  0xf9   : > { %v457_v43 = vadd.f32 %v456_v38, %v419_v42  ;;  %v383_v44 = vpop.f32.mrf.mxu1 }
  0xfa   : > { %v384_v49 = vadd.f32 %v383_v44, %v346_v46 }
  0xfb   : > { %v637_v45 = vpop.eup %636  ;;  %v495_v47 = vadd.f32 %v494_v41, %v457_v43 }
  0xfc   : > { %511 = vst [vmem:[%s959_s20 + $0x20] sm:$0xff] %v637_v45 }
  0xfd   : > { %638 = vtanh.f32 %v495_v47 }
  0xfe   : > { %v421_v48 = vpop.f32.mrf.mxu2 }
  0xff   : > { %v422_v53 = vadd.f32 %v421_v48, %v384_v49 }
 0x101   : > { %v460_v55 = vadd.f32 %v459_v51, %v422_v53 }
 0x103   : > { %v639_v56 = vpop.eup %638  ;;  %v498_v57 = vadd.f32 %v497_v54, %v460_v55 }
 0x104   : > { %512 = vst [vmem:[%s959_s20 + $0x28] sm:$0xff] %v639_v56 }
 0x105   : > { %640 = vtanh.f32 %v498_v57 }
 0x10b   : > { %v641_v58 = vpop.eup %640 }
 0x10c   : > { %513 = vst [vmem:[%s959_s20 + $0x30] sm:$0xff] %v641_v58 }
 0x10d PF: > { %s13_s12 = sadd.s32 1, %s648_s12  }
 0x10e   : > { %p10_p4 = scmp.ge.s32.totalorder %s13_s12, 9  }
 0x110   :  { %12 = sbr.rel (!%p10_p4) target bundleno = 1 (0x1), region = 62 }

// kernel: generator_forward.3
= control target key start
LH: loop header
LB: loop body
LE: loop exit
PB: predicated region body
PF: predicated region fallthrough
CT: control target
= control target key end

     0   :  { %s15800_s0 = inlined_call_operand.hbm [shape: f32[2,32], index: 0, kind: input, shape index: {}]   ;;  %s15801_s1 = inlined_call_operand.hbm [shape: f32[2,10], index: 1, kind: input, shape index: {}]   ;;  %s15802_s2 = inlined_call_operand.hbm [shape: f32[32,300], index: 2, kind: input, shape index: {}]   ;;  %s15803_s3 = inlined_call_operand.hbm [shape: f32[1,300], index: 3, kind: input, shape index: {}]   ;;  %s15804_s4 = inlined_call_operand.hbm [shape: f32[1,300], index: 4, kind: input, shape index: {}]   ;;  %s15805_s5 = inlined_call_operand.hbm [shape: f32[10,1500], index: 5, kind: input, shape index: {}]   ;;  %s15806_s6 = inlined_call_operand.hbm [shape: f32[1,1500], index: 6, kind: input, shape index: {}]   ;;  %s15807_s7 = inlined_call_operand.hbm [shape: f32[1,1500], index: 7, kind: input, shape index: {}]   ;;  %s15808_s8 = inlined_call_operand.hbm [shape: bf16[300,6272], index: 8, kind: input, shape index: {}]   ;;  %s15809_s9 = inlined_call_operand.hbm [shape: bf16[1500,6272], index: 9, kind: input, shape index: {}]   ;;  %s15810_s10 = inlined_call_operand.hbm [shape: f32[1,6272], index: 10, kind: input, shape index: {}]   ;;  %s15811_s11 = inlined_call_operand.vmem [shape: f32[2,6272], index: 11, kind: output, shape index: {}]  }
   0x1   :  { %15822 = sst [smem:[#allocation29_spill]] %s15800_s0 }
   0x2   :  { %15823 = sst [smem:[#allocation30_spill]] %s15801_s1 }
   0x3   :  { %15824 = sst [smem:[#allocation31_spill]] %s15803_s3 }
   0x4   :  { %15825 = sst [smem:[#allocation32_spill]] %s15805_s5 }
   0x5   :  { %15826 = sst [smem:[#allocation33_spill]] %s15811_s11 }
   0x6   :  { %16 = vsyncpa [#allocation3], 0 }
   0x7   :  { %17 = vsyncpa [#allocation5], 0 }
   0x8   :  { %18 = vsyncpa [#allocation8], 0 }
   0x9   :  { %19 = vsyncpa [#allocation11], 0 }
   0xa   :  { %20 = vsyncpa [#allocation14], 0  ;;  %s12957_s17 = smov 0   ;;  %s12959_s18 = smov 0  }
   0xb   :  { %s12961_s19 = smov 0   ;;  %s12963_s20 = smov 0  }
   0xc LB: > { %15827 = sst [smem:[#allocation24_spill]] %s12871_s18  ;;  %s12979_s24 = sadd.s32 4294967295, %s12879_s20   ;;  %s12879_s20 = sphi %s12963_s20, %s15884_s20   ;;  %s12875_s19 = sphi %s12961_s19, %s15887_s19   ;;  %s12871_s18 = sphi %s12959_s18, %s15886_s18   ;;  %s12867_s17 = sphi %s12957_s17, %s15885_s17  }
   0xd   : > { %15828 = sst [smem:[#allocation25_spill]] %s12875_s19  ;;  %p8297_p0 = scmp.ge.s32.totalorder %s12879_s20, 1 }
   0xe   : > { %s15829_s0 = sld [smem:[#allocation29_spill]]  ;;  %p215_p1 = scmp.eq.s32.totalorder %s12979_s24, 0 }
   0xf   : > { %p303_p2 = scmp.lt.s32.totalorder %s12879_s20, 8  ;;  %s12881_s26 = smov [#allocation2]  }
  0x10   : > { %s317_s27 = sshll.u32 %s12881_s26, 4  ;;  %s12997_s29 = sadd.s32 1, %s12879_s20   ;;  %s318_s27 = int_to_ptr.vmem [resolvable:$true] %s317_s27 }
  0x11   : > { %p12984_p3 = pnand %p8297_p0, %p303_p2  ;;  %15832 = sst [smem:[#allocation26_spill]] %s12997_s29 }
  0x12   : > { %s198_s30 = ssub.s32 %s12879_s20, %s12997_s29  ;;  %s201_s12 = sadd.s32 1, %s12875_s19 }
  0x13   : > { %p12363_p4 = pneg %p12984_p3  ;;  %p199_p6 = scmp.eq.s32.totalorder %s198_s30, 0 }
  0x14   : > { %s315_s23 = sshll.u32 %s15829_s0, 4  ;;  %p208_p7 = scmp.ne.s32.totalorder %s12875_s19, %s12871_s18  ;;  %s316_s23 = int_to_ptr.hbm [resolvable:$true] %s315_s23 }
  0x15   : > { %p12992_p5 = pnand %p12363_p4, %p215_p1  ;;  %p209_p8 = scmp.eq.s32.totalorder %s12879_s20, 0 }
  0x16   : > { %p214_p9 = scmp.ne.s32.totalorder %s12871_s18, %s12867_s17  ;;  %p12406_p12 = scmp.lt.s32.totalorder %s12879_s20, 7 }
  0x17   : > { %12366 = dma.hbm_to_vmem [thread:$0]  (!%p12992_p5), %s316_s23, 32, %s318_s27, [#allocation3]  }
  0x18   : > { %s13009_s13 = scalar_select %p199_p6, %s12875_s19, %s201_s12  }
  0x19   : > { %p210_p10 = por %p209_p8, %p208_p7  ;;  %p13013_p11 = por %p215_p1, %p214_p9 }
  0x1a   : > { %15833 = sst [smem:[#allocation27_spill]] %s13009_s13  ;;  %s416_s15 = sand.u32 1, %s12879_s20  }
  0x1b   : > { %s15834_s14 = scalar_select %p13013_p11, 1, 0 }
  0x1c   : > { %s13020_s16 = sand.u32 1, %s12875_s19   ;;  %p13023_p13 = pnand %p12406_p12, %p210_p10 }
  0x1d   : > { %15835 = sst [smem:[#allocation28_spill]] %s15834_s14  ;;  %s12319_s21 = smul.u32 1064, %s13020_s16 }
  0x1e   : > { %s15818_s17 = smul.u32 28, %s12879_s20  ;;  %s15837_s1 = sld [smem:[#allocation30_spill]] }
  0x1f   : > { %s420_s30 = scalar_lea.vmem [#allocation15], %s12319_s21  ;;  %s13036_s11 = scalar_lea.sflag [#allocation3], %s416_s15 }
  0x20   : > { %s425_s27 = scalar_lea.hbm %s15808_s8, %s15818_s17  ;;  %s428_s12 = sshll.u32 %s420_s30, 4  ;;  %s429_s12 = int_to_ptr.vmem [resolvable:$true] %s428_s12 }
  0x21   : > { %s426_s0 = sshll.u32 %s425_s27, 4  ;;  %p12529_p2 = pneg %p13023_p13  ;;  %s427_s0 = int_to_ptr.hbm [resolvable:$true] %s426_s0 }
  0x22   : > { %s12525_s14 = sshra.s32 %s427_s0, 4  ;;  %s12532_s26 = scalar_lea.hbm %s15808_s8, 7448  ;;  %s12526_s14 = int_to_ptr.hbm [resolvable:$true] %s12525_s14 }
  0x23   : > { %s12527_s18 = scalar_lea.hbm %s12526_s14, 1064  ;;  %p12533_p7 = scmp.lt.s32.totalorder %s12526_s14, %s15808_s8 }
  0x24   : > { %s327_s29 = sshll.u32 %s15837_s1, 4  ;;  %p12528_p0 = scmp.ne.s32.totalorder %s12526_s14, %s12527_s18  ;;  %s328_s29 = int_to_ptr.hbm [resolvable:$true] %s327_s29 }
  0x25   : > { %p12534_p8 = scmp.lt.s32.totalorder %s12532_s26, %s12527_s18 }
  0x26   : > { %p12530_p4 = pnand %p12529_p2, %p12528_p0 }
  0x27   : > { %p12535_p9 = por %p12534_p8, %p12533_p7 }
  0x28   : > { %p12531_p6 = pneg %p12530_p4 }
  0x2a   : > { %p12536_p10 = pnand %p12535_p9, %p12531_p6 }
  0x2c   : > { %12539 = shalt.err (!%p12536_p10)
}
  0x2d   : > { %s15819_s19 = smov 3136   ;;  %s15820_s13 = smov 448  }
  0x2e   : > { %s15821_s15 = smov 28   ;;  %s12885_s21 = smov [#allocation4]  }
  0x2f   : > { %12391 = dma.hbm_to_vmem [thread:$0]  (!%p13023_p13), %s427_s0, 17024, %s429_s12, %s13036_s11, %s15819_s19, %s15820_s13, %s15821_s15  }
  0x30   : > { %s329_s23 = sshll.u32 %s12885_s21, 4  ;;  %s15838_s3 = sld [smem:[#allocation31_spill]]  ;;  %s330_s23 = int_to_ptr.vmem [resolvable:$true] %s329_s23 }
  0x31   : > { %12369 = dma.hbm_to_vmem [thread:$0]  (!%p12992_p5), %s328_s29, 32, %s330_s23, [#allocation5]  }
  0x32   : > { %s15839_s5 = sld [smem:[#allocation32_spill]]  ;;  %s12886_s1 = smov [#allocation7]  }
  0x33   : > { %s355_s0 = sshll.u32 %s12886_s1, 4  ;;  %s12887_s12 = smov [#allocation10]   ;;  %s356_s0 = int_to_ptr.vmem [resolvable:$true] %s355_s0 }
  0x34   : > { %s378_s21 = sshll.u32 %s12887_s12, 4  ;;  %s12888_s14 = smov 1536   ;;  %s379_s21 = int_to_ptr.vmem [resolvable:$true] %s378_s21 }
  0x35   : > { %s12889_s18 = smov 96   ;;  %s12320_s19 = smul.u32 5264, %s13020_s16 }
  0x36   : > { %s353_s26 = sshll.u32 %s15838_s3, 4  ;;  %s15840_s29 = smul.u32 28, %s12879_s20  ;;  %s354_s26 = int_to_ptr.hbm [resolvable:$true] %s353_s26 }
  0x37   : > { %12375 = dma.hbm_to_vmem [thread:$0]  (!%p12992_p5), %s354_s26, 48, %s356_s0, [#allocation8]  }
  0x38   : > { %s376_s17 = sshll.u32 %s15839_s5, 4  ;;  %s447_s27 = scalar_lea.hbm %s15809_s9, %s15840_s29  ;;  %s377_s17 = int_to_ptr.hbm [resolvable:$true] %s376_s17 }
  0x39   : > { %12381 = dma.hbm_to_vmem [thread:$0]  (!%p12992_p5), %s377_s17, 3072, %s379_s21, [#allocation11], %s12888_s14, %s12888_s14, %s12889_s18  }
  0x3a   : > { %s448_s30 = sshll.u32 %s447_s27, 4  ;;  %s338_s3 = sshll.u32 %s15802_s2, 4  ;;  %s449_s30 = int_to_ptr.hbm [resolvable:$true] %s448_s30  ;;  %s339_s3 = int_to_ptr.hbm [resolvable:$true] %s338_s3 }
  0x3b   : > { %s442_s26 = scalar_lea.vmem [#allocation16], %s12320_s19  ;;  %s12645_s12 = sshra.s32 %s449_s30, 4  ;;  %s12646_s12 = int_to_ptr.hbm [resolvable:$true] %s12645_s12 }
  0x3c   : > { %s450_s0 = sshll.u32 %s442_s26, 4  ;;  %s12647_s5 = scalar_lea.hbm %s12646_s12, 5264  ;;  %s451_s0 = int_to_ptr.vmem [resolvable:$true] %s450_s0 }
  0x3d   : > { %p12648_p12 = scmp.ne.s32.totalorder %s12646_s12, %s12647_s5  ;;  %s12652_s21 = scalar_lea.hbm %s15809_s9, 36848 }
  0x3e   : > { %p12653_p6 = scmp.lt.s32.totalorder %s12646_s12, %s15809_s9  ;;  %p12654_p7 = scmp.lt.s32.totalorder %s12652_s21, %s12647_s5 }
  0x3f   : > { %p12650_p0 = pnand %p12648_p12, %p12529_p2 }
  0x40   : > { %p12655_p8 = por %p12654_p7, %p12653_p6 }
  0x41   : > { %p12651_p4 = pneg %p12650_p0 }
  0x43   : > { %p12656_p9 = pnand %p12655_p8, %p12651_p4 }
  0x45   : > { %12659 = shalt.err (!%p12656_p9)
}
  0x46   : > { %s15841_s19 = smov 28   ;;  %s15842_s18 = smov 448  }
  0x47   : > { %s15843_s29 = smov 3136   ;;  %s12890_s23 = smov [#allocation6]  }
  0x48   : > { %12394 = dma.hbm_to_vmem [thread:$0]  (!%p13023_p13), %s449_s30, 84224, %s451_s0, %s13036_s11, %s15843_s29, %s15842_s18, %s15841_s19  }
  0x49   : > { %s340_s27 = sshll.u32 %s12890_s23, 4  ;;  %s12891_s1 = smov 384   ;;  %s341_s27 = int_to_ptr.vmem [resolvable:$true] %s340_s27 }
  0x4a   : > { %s12892_s26 = smov 24   ;;  %s365_s17 = sshll.u32 %s15804_s4, 4  ;;  %s366_s17 = int_to_ptr.hbm [resolvable:$true] %s365_s17 }
  0x4b   : > { %12372 = dma.hbm_to_vmem [thread:$0]  (!%p12992_p5), %s339_s3, 1536, %s341_s27, [#allocation5], %s12891_s1, %s12891_s1, %s12892_s26  }
  0x4c   : > { %s12893_s13 = smov [#allocation9]   ;;  %s391_s14 = sshll.u32 %s15806_s6, 4  ;;  %s392_s14 = int_to_ptr.hbm [resolvable:$true] %s391_s14 }
  0x4d   : > { %s367_s21 = sshll.u32 %s12893_s13, 4  ;;  %s12894_s15 = smov [#allocation12]   ;;  %s368_s21 = int_to_ptr.vmem [resolvable:$true] %s367_s21 }
  0x4e   : > { %12378 = dma.hbm_to_vmem [thread:$0]  (!%p12992_p5), %s366_s17, 48, %s368_s21, [#allocation8]  }
  0x4f   : > { %s393_s19 = sshll.u32 %s12894_s15, 4  ;;  %s403_s29 = sshll.u32 %s15807_s7, 4  ;;  %s394_s19 = int_to_ptr.vmem [resolvable:$true] %s393_s19  ;;  %s404_s29 = int_to_ptr.hbm [resolvable:$true] %s403_s29 }
  0x50   : > { %12384 = dma.hbm_to_vmem [thread:$0]  (!%p12992_p5), %s392_s14, 192, %s394_s19, [#allocation11]  }
  0x51   : > { %s12321_s23 = smul.u32 7, %s13020_s16  ;;  %s12895_s27 = smov [#allocation13]  }
  0x52   : > { %s405_s1 = sshll.u32 %s12895_s27, 4  ;;  %s465_s26 = smul.u32 7, %s12879_s20  ;;  %s406_s1 = int_to_ptr.vmem [resolvable:$true] %s405_s1 }
  0x53   : > { %12387 = dma.hbm_to_vmem [thread:$0]  (!%p12992_p5), %s404_s29, 192, %s406_s1, [#allocation14]  }
  0x54   : > { %s468_s17 = scalar_lea.hbm %s15810_s10, %s465_s26  ;;  %s464_s13 = scalar_lea.vmem [#allocation17], %s12321_s23 }
  0x55   : > { %s472_s21 = sshll.u32 %s464_s13, 4  ;;  %s470_s30 = sshll.u32 %s468_s17, 4  ;;  %s473_s21 = int_to_ptr.vmem [resolvable:$true] %s472_s21  ;;  %s471_s30 = int_to_ptr.hbm [resolvable:$true] %s470_s30 }
  0x56   : > { %s12795_s0 = sshra.s32 %s471_s30, 4  ;;  %s12802_s16 = scalar_lea.hbm %s15810_s10, 49  ;;  %s12796_s0 = int_to_ptr.hbm [resolvable:$true] %s12795_s0 }
  0x57   : > { %s12797_s14 = scalar_lea.hbm %s12796_s0, 7  ;;  %p12803_p5 = scmp.lt.s32.totalorder %s12796_s0, %s15810_s10 }
  0x58   : > { %p12798_p10 = scmp.ne.s32.totalorder %s12796_s0, %s12797_s14  ;;  %p12804_p4 = scmp.lt.s32.totalorder %s12802_s16, %s12797_s14 }
  0x5a   : > { %p12800_p12 = pnand %p12798_p10, %p12529_p2  ;;  %p12805_p6 = por %p12804_p4, %p12803_p5 }
  0x5c   : > { %p12801_p0 = pneg %p12800_p12 }
  0x5e   : > { %p12806_p7 = pnand %p12805_p6, %p12801_p0 }
  0x60   : > { %12809 = shalt.err (!%p12806_p7)
}
  0x61   : > { %12397 = dma.hbm_to_vmem [thread:$0]  (!%p13023_p13), %s471_s30, 112, %s473_s21, %s13036_s11  }
  0x62   : > { %481 = sbr.rel (%p12984_p3) target bundleno = 1271 (0x4f7), region = 64 }
  0x67   : > { %12842 = dma.done.wait (%p215_p1), [#allocation3], 32  }
  0x68   : > { %12844 = vsyncadd (%p215_p1), [#allocation3], 4294967264 }
  0x69   : > { %12846 = dma.done.wait (%p215_p1), [#allocation5], 1568  }
  0x6a   : > { %12848 = vsyncadd (%p215_p1), [#allocation5], 4294965728 }
  0x6b   : > { %12850 = dma.done.wait (%p215_p1), [#allocation8], 96  }
  0x6c   : > { %12852 = vsyncadd (%p215_p1), [#allocation8], 4294967200 }
  0x6d   : > { %12854 = dma.done.wait (%p215_p1), [#allocation11], 3264  }
  0x6e   : > { %12856 = vsyncadd (%p215_p1), [#allocation11], 4294964032 }
  0x6f   : > { %12858 = dma.done.wait (%p215_p1), [#allocation14], 192  }
  0x70   : > { %12860 = vsyncadd (%p215_p1), [#allocation14], 4294967104  ;;  %s15844_s11 = sld [smem:[#allocation24_spill]]  ;;  %s523_s22 = sand.u32 1, %s12979_s24  }
  0x71   : > { %s524_s29 = scalar_lea.sflag [#allocation3], %s523_s22 }
  0x76   : > { %s13149_s3 = sand.u32 1, %s15844_s11  }
  0x77   : > { %s12322_s18 = smul.u32 1064, %s13149_s3 }
  0x79   : > { %s13152_s23 = scalar_lea.vmem [#allocation15], %s12322_s18 }
  0x7a   : > { %12862 = dma.done.wait (%p13013_p11), %s524_s29, 101360  }
  0x7b   : > { %12864 = vsyncadd (%p13013_p11), %s524_s29, 4294865936  ;;  %vm686_vm0 = vcmask 1041408   ;;  %v617_v0 = vld [vmem:[#allocation6 + $0x48] sm:$0xff]  ;;  %v841_v2 = vld [vmem:[#allocation10 + $0x70] sm:$0x3]  ;;  %vm851_vm1 = vcmask 80896  }
  0x7c   : > { %v839_v1 = vld [vmem:[#allocation10 + $0x60] sm:$0x3]  ;;  %636 = vmatpush.msra.mxu1 %v617_v0  ;;  %v619_v3 = vld [vmem:[#allocation6 + $0x58] sm:$0xff]  ;;  %v614_v4 = vld [vmem:[#allocation6 + $0x30] sm:$0xff]  ;;  %8326 = vmatpush.msk.msra.mxu0 %vm686_vm0, %v841_v2  ;;  %vm620_vm2 = vcmask 261120   ;;  %s12323_s27 = smul.u32 5264, %s13149_s3 }
  0x7d   : > { %8322 = vmatpush.msk.msra.mxu3 %vm686_vm0, %v839_v1  ;;  %v827_v5 = vld [vmem:[#allocation10] sm:$0xff]  ;;  %676 = vmatpush.msra.mxu2 %v619_v3  ;;  %v829_v6 = vld [vmem:[#allocation10 + $0x10] sm:$0xff]  ;;  %v616_v7 = vld [vmem:[#allocation6 + $0x40] sm:$0xff]  ;;  %v12896_v56 = vmov 2.0   ;;  %s12324_s26 = smul.u32 7, %s13149_s3  ;;  %s15883_s21 = sld [smem:[#allocation33_spill]] }
  0x7e   : > { %v13160_v8 = vld [vmem:[#allocation4] sm:$0x3]  ;;  %637 = vmatpush.msra.mxu1 %v614_v4  ;;  %v613_v10 = vld [vmem:[#allocation6 + $0x28] sm:$0xff]  ;;  %946 = vmatpush.msra.mxu0 %v829_v6  ;;  %v608_v11 = vld [vmem:[#allocation6] sm:$0xff]  ;;  %s13179_s1 = scalar_lea.vmem [#allocation16], %s12323_s27  ;;  %12463 = vrcp.f32 %v12896_v56  ;;  %s600_s12 = smul.u32 7, %s12979_s24 }
  0x7f   : > { %906 = vmatpush.msra.mxu3 %v827_v5  ;;  %v611_v9 = vld [vmem:[#allocation6 + $0x18] sm:$0xff]  ;;  %677 = vmatpush.msra.mxu2 %v616_v7  ;;  %v610_v12 = vld [vmem:[#allocation6 + $0x10] sm:$0xff]  ;;  %v843_v14 = vld [vmem:[#allocation10 + $0x80] sm:$0x3]  ;;  %s547_s5 = scalar_lea.vmem [#allocation17], %s12324_s26 }
  0x80   : > { %8323 = vmatmul.msk.f32.vlgmr.msra.gmra.mxu3 %vm851_vm1, %v13160_v8  ;;  %8327 = vmatmul.msk.f32.vlgmr.msra.gmra.mxu0 %vm851_vm1, %v13160_v8  ;;  %v840_v13 = vld [vmem:[#allocation10 + $0x68] sm:$0x3]  ;;  %v607_v15 = vld [vmem:[#allocation2] sm:$0x3]  ;;  %v831_v18 = vld [vmem:[#allocation10 + $0x20] sm:$0xff]  ;;  %p601_p1 = scmp.lt.s32.totalorder %s600_s12, 48 }
  0x81   : > { %638 = vmatpush.msra.mxu1 %v611_v9  ;;  %678 = vmatpush.msra.mxu2 %v613_v10  ;;  %v618_v16 = vld [vmem:[#allocation6 + $0x50] sm:$0xff]  ;;  %v847_v19 = vld [vmem:[#allocation10 + $0xa0] sm:$0x3]  ;;  %v615_v20 = vld [vmem:[#allocation6 + $0x38] sm:$0xff] }
  0x82   : > { %8324 = vmatpush.msk.msrb.mxu3 %vm686_vm0, %v840_v13  ;;  %8330 = vmatpush.msk.msrb.mxu0 %vm686_vm0, %v843_v14  ;;  %v828_v17 = vld [vmem:[#allocation10 + $0x8] sm:$0xff]  ;;  %v612_v22 = vld [vmem:[#allocation6 + $0x20] sm:$0xff]  ;;  %v835_v23 = vld [vmem:[#allocation10 + $0x40] sm:$0xff]  ;;  %s15889_s12 = smov (!%p601_p1, %s600_s12), 48 }
  0x83   : > { %639 = vmatpush.msra.mxu1 %v608_v11  ;;  %679 = vmatpush.msra.mxu2 %v610_v12  ;;  %v844_v21 = vld [vmem:[#allocation10 + $0x88] sm:$0x3]  ;;  %v845_v24 = vld [vmem:[#allocation10 + $0x90] sm:$0x3]  ;;  %v609_v26 = vld [vmem:[#allocation6 + $0x8] sm:$0xff]  ;;  %s8318_s24 = sshll.u32 %s15889_s12, 1 }
  0x84   : > { %8319 = vmatmul.msk.f32.vlgmr.msra.gmra.mxu1 %vm620_vm2, %v607_v15  ;;  %8321 = vmatmul.msk.f32.vlgmr.msra.gmra.mxu2 %vm620_vm2, %v607_v15  ;;  %v832_v25 = vld [vmem:[#allocation10 + $0x28] sm:$0xff]  ;;  %v833_v28 = vld [vmem:[#allocation10 + $0x30] sm:$0xff]  ;;  %v842_v29 = vld [vmem:[#allocation10 + $0x78] sm:$0x3]  ;;  %v12464_v62 = vpop.eup %12463  ;;  %s15774_s30 = scalar_lea.vmem %s15883_s21, %s8318_s24 }
  0x85   : > { %656 = vmatpush.msrb.mxu1 %v618_v16  ;;  %926 = vmatpush.msrb.mxu3 %v828_v17  ;;  %v848_v27 = vld [vmem:[#allocation10 + $0xa8] sm:$0x3]  ;;  %v849_v31 = vld [vmem:[#allocation10 + $0xb0] sm:$0x3]  ;;  %v11825_v33 = vld [vmem:[%s13179_s1 + $0x520] sm:$0xf0]  ;;  %vm714_vm3 = vweird.f32 %v12464_v62 }
  0x86   : > { %986 = vmatpush.msrb.mxu0 %v831_v18  ;;  %8338 = vmatpush.msk.msrb.mxu2 %vm686_vm0, %v847_v19  ;;  %v836_v30 = vld [vmem:[#allocation10 + $0x48] sm:$0xff]  ;;  %v8992_v32 = vld [vmem:[%s13179_s1 + $0x508] sm:$0xf]  ;;  %v830_v34 = vld [vmem:[#allocation10 + $0x18] sm:$0xff]  ;;  %v710_v0 = vmul.f32 2.0, %v12464_v62 }
  0x87   : > { %657 = vmatpush.msrb.mxu1 %v615_v20  ;;  %8332 = vmatpush.msk.msra.mxu3 %vm686_vm0, %v844_v21  ;;  %v846_v35 = vld [vmem:[#allocation10 + $0x98] sm:$0x3]  ;;  %v837_v36 = vld [vmem:[#allocation10 + $0x50] sm:$0xff]  ;;  %v8993_v37 = vor.u32 %v11825_v33, %v8992_v32  ;;  %v11713_v45 = vld [vmem:[%s13179_s1 + $0x1a0] sm:$0xf0] }
  0x88   : > { %8325 = vmatmul.msk.f32.vlgmr.msrb.gmra.mxu3 %vm851_vm1, %v13160_v8  ;;  %8331 = vmatmul.msk.f32.vlgmr.msrb.gmra.mxu0 %vm851_vm1, %v13160_v8  ;;  %v834_v38 = vld [vmem:[#allocation10 + $0x38] sm:$0xff]  ;;  %v11818_v42 = vld [vmem:[%s13179_s1 + $0x4e8] sm:$0xf0]  ;;  %v8544_v44 = vld [vmem:[%s13179_s1 + $0x188] sm:$0xf]  ;;  %v711_v2 = vsub.f32 1.0, %v710_v0 }
  0x89   : > { %658 = vmatpush.msrb.mxu1 %v612_v22  ;;  %1066 = vmatpush.msrb.mxu2 %v835_v23  ;;  %v850_v39 = vld [vmem:[#allocation10 + $0xb8] sm:$0x3]  ;;  %v8545_v46 = vor.u32 %v11713_v45, %v8544_v44  ;;  %v8936_v47 = vld [vmem:[%s13179_s1 + $0x498] sm:$0xf]  ;;  %v11811_v48 = vld [vmem:[%s13179_s1 + $0x4b0] sm:$0xf0] }
  0x8a   : > { %8334 = vmatpush.msk.msra.mxu0 %vm686_vm0, %v845_v24  ;;  %1006 = vmatpush.msra.mxu3 %v832_v25  ;;  %v838_v40 = vld [vmem:[#allocation10 + $0x58] sm:$0xff]  ;;  %v8937_v49 = vor.u32 %v11811_v48, %v8936_v47  ;;  %v11706_v51 = vld [vmem:[%s13179_s1 + $0x168] sm:$0xf0]  ;;  %v11804_v54 = vld [vmem:[%s13179_s1 + $0x478] sm:$0xf0]  ;;  %v712_v12 = vmul.f32 %v12464_v62, %v711_v2 }
  0x8b   : > { %659 = vmatpush.msrb.mxu1 %v609_v26  ;;  %v8964_v41 = vld [vmem:[%s13179_s1 + $0x4d0] sm:$0xf]  ;;  %5978 = vmatpush.bf16.msra.mxu2 %v8545_v46  ;;  %v8908_v53 = vld [vmem:[%s13179_s1 + $0x460] sm:$0xf]  ;;  %v8488_v57 = vld [vmem:[%s13179_s1 + $0x118] sm:$0xf] }
  0x8c   : > { %8340 = vmatpush.msk.msrb.mxu3 %vm686_vm0, %v848_v27  ;;  %8320 = vmatmul.msk.f32.vlgmr.msrb.gmra.mxu1 %vm620_vm2, %v607_v15  ;;  %v8965_v43 = vor.u32 %v11818_v42, %v8964_v41  ;;  %v8516_v50 = vld [vmem:[%s13179_s1 + $0x150] sm:$0xf]  ;;  %v8909_v55 = vor.u32 %v11804_v54, %v8908_v53  ;;  %v11699_v58 = vld [vmem:[%s13179_s1 + $0x130] sm:$0xf0]  ;;  %v8768_v59 = vld [vmem:[%s13179_s1 + $0x348] sm:$0xf]  ;;  %v713_v21 = vadd.f32 %v12464_v62, %v712_v12 }
  0x8d   : > { %8339 = vmatmul.msk.f32.vlgmr.msrb.gmra.mxu2 %vm851_vm1, %v13160_v8  ;;  %1026 = vmatpush.msra.mxu0 %v833_v28  ;;  %v8517_v52 = vor.u32 %v11706_v51, %v8516_v50  ;;  %v8489_v60 = vor.u32 %v11699_v58, %v8488_v57  ;;  %v11769_v61 = vld [vmem:[%s13179_s1 + $0x360] sm:$0xf0]  ;;  %v8880_v6 = vld [vmem:[%s13179_s1 + $0x428] sm:$0xf] }
  0x8e   : > { %8328 = vmatpush.msk.msra.mxu1 %vm686_vm0, %v842_v29  ;;  %1086 = vmatpush.msrb.mxu3 %v836_v30  ;;  %v8769_v63 = vor.u32 %v11769_v61, %v8768_v59  ;;  %v11797_v7 = vld [vmem:[%s13179_s1 + $0x440] sm:$0xf0]  ;;  %v13238_v32 = vsel %vm714_vm3, %v12464_v62, %v713_v21 }
  0x8f   : > { %8342 = vmatpush.msk.msrb.mxu0 %vm686_vm0, %v849_v31  ;;  %5979 = vmatpush.bf16.msra.mxu2 %v8517_v52  ;;  %v8881_v9 = vor.u32 %v11797_v7, %v8880_v6 }
  0x90   : > { %966 = vmatpush.msra.mxu1 %v830_v34  ;;  %8333 = vmatmul.msk.f32.vlgmr.msra.gmra.mxu3 %vm851_vm1, %v13160_v8 }
  0x91   : > { %8335 = vmatmul.msk.f32.vlgmr.msra.gmra.mxu0 %vm851_vm1, %v13160_v8  ;;  %5991 = vmatpush.bf16.msra.mxu3 %v8769_v63 }
  0x92   : > { %8336 = vmatpush.msk.msrb.mxu1 %vm686_vm0, %v846_v35  ;;  %1106 = vmatpush.msrb.mxu0 %v837_v36 }
  0x93   : > { %5980 = vmatpush.bf16.msra.mxu2 %v8489_v60 }
  0x94   : > { %6004 = vmatpush.bf16.msra.mxu0 %v8993_v37  ;;  %1046 = vmatpush.msrb.mxu1 %v834_v38 }
  0x95   : > { %8329 = vmatmul.msk.f32.vlgmr.msra.gmra.mxu1 %vm851_vm1, %v13160_v8 }
  0x96   : > { %8344 = vmatpush.msk.msra.mxu1 %vm686_vm0, %v850_v39 }
  0x98   : > { %1126 = vmatpush.msra.mxu1 %v838_v40  ;;  %8341 = vmatmul.msk.f32.vlgmr.msrb.gmra.mxu3 %vm851_vm1, %v13160_v8 }
  0x99   : > { %8343 = vmatmul.msk.f32.vlgmr.msrb.gmra.mxu0 %vm851_vm1, %v13160_v8 }
  0x9a   : > { %6005 = vmatpush.bf16.msra.mxu0 %v8965_v43 }
  0x9d   : > { %8337 = vmatmul.msk.f32.vlgmr.msrb.gmra.mxu1 %vm851_vm1, %v13160_v8 }
  0x9e   : > { %6006 = vmatpush.bf16.msra.mxu0 %v8937_v49 }
  0xa2   : > { %6007 = vmatpush.bf16.msra.mxu0 %v8909_v55 }
  0xa5   : > { %8345 = vmatmul.msk.f32.vlgmr.msra.gmra.mxu1 %vm851_vm1, %v13160_v8 }
  0xa6   : > { %6008 = vmatpush.bf16.msra.mxu0 %v8881_v9 }
  0xfd   : > { %v13218_v1 = vpop.f32.mrf.mxu0 }
  0xfe   : > { %v1149_v3 = vsel %vm686_vm0, %v13218_v1, 0.0  ;;  %v1234_v4 = vmul.f32 %v13218_v1, %v13218_v1 }
  0xff   : > { %v1150_v5 = vrot.slane %v1149_v3, 4 }
 0x100   : > { %v1258_v8 = vsel %vm686_vm0, %v1234_v4, 0.0 }
 0x101   : > { %v1151_v10 = vadd.f32 %v1150_v5, %v1149_v3  ;;  %v1259_v11 = vrot.slane %v1258_v8, 4 }
 0x103   : > { %v1152_v13 = vrot.slane %v1151_v10, 2  ;;  %v1260_v14 = vadd.f32 %v1259_v11, %v1258_v8  ;;  %v13227_v15 = vpop.f32.mrf.mxu3 }
 0x104   : > { %v1135_v16 = vsel %vm686_vm0, %v13227_v15, 0.0  ;;  %v1232_v17 = vmul.f32 %v13227_v15, %v13227_v15 }
 0x105   : > { %v1153_v18 = vadd.f32 %v1152_v13, %v1151_v10  ;;  %v1261_v19 = vrot.slane %v1260_v14, 2  ;;  %v13233_v20 = vpop.f32.mrf.mxu0  ;;  %v1136_v22 = vrot.slane %v1135_v16, 4 }
 0x106   : > { %v1244_v23 = vsel %vm686_vm0, %v1232_v17, 0.0  ;;  %v1163_v28 = vsel %vm686_vm0, %v13233_v20, 0.0  ;;  %v1236_v37 = vmul.f32 %v13233_v20, %v13233_v20 }
 0x107   : > { %v1154_v24 = vrot.slane %v1153_v18, 1  ;;  %v1262_v25 = vadd.f32 %v1261_v19, %v1260_v14  ;;  %v1245_v26 = vrot.slane %v1244_v23, 4  ;;  %v1137_v27 = vadd.f32 %v1136_v22, %v1135_v16 }
 0x108   : > { %v1164_v34 = vrot.slane %v1163_v28, 4  ;;  %v1272_v45 = vsel %vm686_vm0, %v1236_v37, 0.0 }
 0x109   : > { %v1155_v29 = vadd.f32 %v1154_v24, %v1153_v18  ;;  %v1263_v30 = vrot.slane %v1262_v25, 1  ;;  %v1246_v31 = vadd.f32 %v1245_v26, %v1244_v23  ;;  %v1138_v33 = vrot.slane %v1137_v27, 2  ;;  %v13282_v23 = vpop.f32.mrf.mxu2  ;;  %v8460_v24 = vld [vmem:[%s13179_s1 + $0xe0] sm:$0xf] }
 0x10a   : > { %v1165_v42 = vadd.f32 %v1164_v34, %v1163_v28  ;;  %v1273_v51 = vrot.slane %v1272_v45, 4 }
 0x10b   : > { %v1139_v35 = vadd.f32 %v1138_v33, %v1137_v27  ;;  %v1247_v36 = vrot.slane %v1246_v31, 2  ;;  %v13243_v38 = vmul.f32 %v1155_v29, %v13238_v32  ;;  %v1264_v39 = vadd.f32 %v1263_v30, %v1262_v25  ;;  %v13257_v3 = vpop.f32.mrf.mxu3  ;;  %v11692_v25 = vld [vmem:[%s13179_s1 + $0xf8] sm:$0xf0]  ;;  %v8740_v30 = vld [vmem:[%s13179_s1 + $0x310] sm:$0xf] }
 0x10c   : > { %v1166_v50 = vrot.slane %v1165_v42, 2  ;;  %v1274_v55 = vadd.f32 %v1273_v51, %v1272_v45  ;;  %v1142_v7 = vsel %vm686_vm0, %v13257_v3, 0.0  ;;  %v1233_v18 = vmul.f32 %v13257_v3, %v13257_v3 }
 0x10d   : > { %v1140_v40 = vrot.slane %v1139_v35, 1  ;;  %v1248_v41 = vadd.f32 %v1247_v36, %v1246_v31  ;;  %v1330_v46 = vmul.f32 %v1264_v39, %v13238_v32  ;;  %v1342_v47 = vmul.f32 %v13243_v38, %v13243_v38  ;;  %v11762_v31 = vld [vmem:[%s13179_s1 + $0x328] sm:$0xf0] }
 0x10e   : > { %v1167_v56 = vadd.f32 %v1166_v50, %v1165_v42  ;;  %v1275_v57 = vrot.slane %v1274_v55, 2  ;;  %v1143_v8 = vrot.slane %v1142_v7, 4  ;;  %v1251_v27 = vsel %vm686_vm0, %v1233_v18, 0.0  ;;  %v13295_v45 = vpop.f32.mrf.mxu0 }
 0x10f   : > { %v1141_v43 = vadd.f32 %v1140_v40, %v1139_v35  ;;  %v1249_v44 = vrot.slane %v1248_v41, 1  ;;  %v1354_v52 = vsub.f32 %v1330_v46, %v1342_v47  ;;  %v1252_v35 = vrot.slane %v1251_v27, 4  ;;  %v13292_v40 = vpop.f32.mrf.mxu1  ;;  %v8852_v46 = vld [vmem:[%s13179_s1 + $0x3f0] sm:$0xf]  ;;  %v11790_v47 = vld [vmem:[%s13179_s1 + $0x408] sm:$0xf0] }
 0x110   : > { %v1168_v60 = vrot.slane %v1167_v56, 1  ;;  %v1276_v61 = vadd.f32 %v1275_v57, %v1274_v55  ;;  %v1144_v13 = vadd.f32 %v1143_v8, %v1142_v7  ;;  %v8461_v36 = vor.u32 %v11692_v25, %v8460_v24 }
 0x111   : > { %v13250_v48 = vmul.f32 %v1141_v43, %v13238_v32  ;;  %v1250_v49 = vadd.f32 %v1249_v44, %v1248_v41  ;;  %v1366_v58 = vmax.f32 %v1354_v52, 0.0  ;;  %v1253_v37 = vadd.f32 %v1252_v35, %v1251_v27  ;;  %v9216_v52 = vld [vmem:[%s13179_s1 + $0x6c8] sm:$0xf] }
 0x112   : > { %v1169_v0 = vadd.f32 %v1168_v60, %v1167_v56  ;;  %v1277_v2 = vrot.slane %v1276_v61, 1  ;;  %v1145_v17 = vrot.slane %v1144_v13, 2  ;;  %5981 = vmatpush.bf16.msra.mxu2 %v8461_v36  ;;  %v8741_v39 = vor.u32 %v11762_v31, %v8740_v30  ;;  %v8432_v30 = vld [vmem:[%s13179_s1 + $0xa8] sm:$0xf]  ;;  %v11685_v31 = vld [vmem:[%s13179_s1 + $0xc0] sm:$0xf0] }
 0x113   : > { %v1328_v53 = vmul.f32 %v1250_v49, %v13238_v32  ;;  %v1340_v54 = vmul.f32 %v13250_v48, %v13250_v48  ;;  %v13255_v62 = vadd.f32 1e-05, %v1366_v58  ;;  %v1254_v44 = vrot.slane %v1253_v37, 2  ;;  %v13299_v49 = vld [vmem:[#allocation12] sm:$0xff] }
 0x114   : > { %v13263_v5 = vmul.f32 %v1169_v0, %v13238_v32  ;;  %v1278_v6 = vadd.f32 %v1277_v2, %v1276_v61  ;;  %v1146_v26 = vadd.f32 %v1145_v17, %v1144_v13  ;;  %5992 = vmatpush.bf16.msra.mxu3 %v8741_v39  ;;  %v1177_v57 = vsel %vm686_vm0, %v13295_v45, 0.0 }
 0x115   : > { %v1352_v59 = vsub.f32 %v1328_v53, %v1340_v54  ;;  %12465 = vrsqrt.f32 %v13255_v62  ;;  %vm1426_vm4 = vweird.f32 %v13255_v62  ;;  %v1255_v51 = vadd.f32 %v1254_v44, %v1253_v37  ;;  %v11881_v53 = vld [vmem:[%s13179_s1 + $0x6e0] sm:$0xf0]  ;;  %v13307_v54 = vpop.f32.mrf.mxu2 }
 0x116   : > { %v1332_v10 = vmul.f32 %v1278_v6, %v13238_v32  ;;  %v1344_v11 = vmul.f32 %v13263_v5, %v13263_v5  ;;  %v1147_v34 = vrot.slane %v1146_v26, 1  ;;  %v1238_v60 = vmul.f32 %v13295_v45, %v13295_v45 }
 0x117   : > { %v1364_v63 = vmax.f32 %v1352_v59, 0.0  ;;  %v1256_v58 = vrot.slane %v1255_v51, 1  ;;  %v1178_v59 = vrot.slane %v1177_v57, 4  ;;  %v8853_v61 = vor.u32 %v11790_v47, %v8852_v46 }
 0x118   : > { %v1356_v16 = vsub.f32 %v1332_v10, %v1344_v11  ;;  %v1148_v41 = vadd.f32 %v1147_v34, %v1146_v26  ;;  %v1524_v0 = vperm.slane %v13299_v49, 2  ;;  %v9217_v2 = vor.u32 %v11881_v53, %v9216_v52  ;;  %v13356_v53 = vld [vmem:[#allocation13] sm:$0xff] }
 0x119   : > { %v13260_v4 = vadd.f32 1e-05, %v1364_v63  ;;  %v1191_v6 = vsel %vm686_vm0, %v13307_v54, 0.0  ;;  %v1257_v8 = vadd.f32 %v1256_v58, %v1255_v51  ;;  %v1179_v11 = vadd.f32 %v1178_v59, %v1177_v57  ;;  %6009 = vmatpush.bf16.msra.mxu0 %v8853_v61  ;;  %v8712_v61 = vld [vmem:[%s13179_s1 + $0x2d8] sm:$0xf] }
 0x11a   : > { %v1368_v22 = vmax.f32 %v1356_v16, 0.0  ;;  %v13303_v50 = vmul.f32 %v1148_v41, %v13238_v32  ;;  %6017 = vmatpush.bf16.msrb.mxu1 %v9217_v2  ;;  %v1522_v35 = vperm.slane %v13299_v49, 0  ;;  %v8433_v46 = vor.u32 %v11685_v31, %v8432_v30  ;;  %v9188_v30 = vld [vmem:[%s13179_s1 + $0x690] sm:$0xf]  ;;  %v11874_v31 = vld [vmem:[%s13179_s1 + $0x6a8] sm:$0xf0] }
 0x11b   : > { %12467 = vrsqrt.f32 %v13260_v4  ;;  %v13268_v9 = vpop.eup %12465  ;;  %vm1406_vm8 = vweird.f32 %v13260_v4  ;;  %v1378_v57 = vsub.f32 %v13218_v1, %v13243_v38 }
 0x11c   : > { %v1421_v12 = vmul.f32 %v13268_v9, %v13255_v62  ;;  %v13290_v33 = vadd.f32 1e-05, %v1368_v22  ;;  %vm1427_vm5 = vweird.f32 %v13268_v9  ;;  %v1341_v10 = vmul.f32 %v13303_v50, %v13303_v50  ;;  %5982 = vmatpush.bf16.msra.mxu2 %v8433_v46 }
 0x11d   : > { %vm13322_vm6 = vmor %vm1426_vm4, %vm1427_vm5  ;;  %v1192_v62 = vrot.slane %v1191_v6, 4  ;;  %v1180_v22 = vrot.slane %v1179_v11, 2 }
 0x11e   : > { %v1422_v19 = vmul.f32 %v13268_v9, %v1421_v12  ;;  %12469 = vrsqrt.f32 %v13290_v33  ;;  %v1286_v12 = vsel %vm686_vm0, %v1238_v60, 0.0  ;;  %vm1446_vm10 = vweird.f32 %v13290_v33 }
 0x11f   : > { %v1287_v16 = vrot.slane %v1286_v12, 4  ;;  %v1181_v26 = vadd.f32 %v1180_v22, %v1179_v11  ;;  %v1376_v22 = vsub.f32 %v13227_v15, %v13250_v48 }
 0x120   : > { %v1423_v28 = vmul.f32 0.5, %v1422_v19  ;;  %v13336_v19 = vpop.f32.mrf.mxu1 }
 0x121   : > { %v13275_v14 = vpop.eup %12467  ;;  %v1288_v24 = vadd.f32 %v1287_v16, %v1286_v12  ;;  %v1584_v16 = vperm.slane %v13356_v53, 0 }
 0x122   : > { %v1401_v21 = vmul.f32 %v13275_v14, %v13260_v4  ;;  %v1424_v42 = vsub.f32 1.5, %v1423_v28  ;;  %vm1407_vm7 = vweird.f32 %v13275_v14  ;;  %v1182_v4 = vrot.slane %v1181_v26, 1 }
 0x123   : > { %vm13340_vm9 = vmor %vm1406_vm8, %vm1407_vm7  ;;  %v1289_v28 = vrot.slane %v1288_v24, 2 }
 0x124   : > { %v1402_v29 = vmul.f32 %v13275_v14, %v1401_v21  ;;  %v1425_v55 = vmul.f32 %v13268_v9, %v1424_v42  ;;  %v13315_v63 = vpop.eup %12469  ;;  %v1329_v21 = vmul.f32 %v1257_v8, %v13238_v32  ;;  %v1240_v42 = vmul.f32 %v13307_v54, %v13307_v54 }
 0x125   : > { %v1441_v18 = vmul.f32 %v13315_v63, %v13290_v33  ;;  %v1290_v39 = vadd.f32 %v1289_v28, %v1288_v24  ;;  %v1183_v47 = vadd.f32 %v1182_v4, %v1181_v26  ;;  %v1586_v8 = vperm.slane %v13356_v53, 2  ;;  %v11783_v26 = vld [vmem:[%s13179_s1 + $0x3d0] sm:$0xf0] }
 0x126   : > { %v1403_v43 = vmul.f32 0.5, %v1402_v29  ;;  %v1429_v13 = vsel %vm13322_vm6, %v13268_v9, %v1425_v55  ;;  %v1353_v9 = vsub.f32 %v1329_v21, %v1341_v10  ;;  %v1193_v29 = vadd.f32 %v1192_v62, %v1191_v6 }
 0x127   : > { %v1548_v25 = vmul.f32 %v1524_v0, %v1429_v13  ;;  %v1442_v36 = vmul.f32 %v13315_v63, %v1441_v18  ;;  %v1291_v51 = vrot.slane %v1290_v39, 1  ;;  %v1300_v52 = vsel %vm686_vm0, %v1240_v42, 0.0  ;;  %v11755_v0 = vld [vmem:[%s13179_s1 + $0x2f0] sm:$0xf0] }
 0x128   : > { %v1404_v56 = vsub.f32 1.5, %v1403_v43  ;;  %v1365_v37 = vmax.f32 %v1353_v9, 0.0  ;;  %v1194_v41 = vrot.slane %v1193_v29, 2  ;;  %v13362_v58 = vmul.f32 %v1183_v47, %v13238_v32  ;;  %v13366_v6 = vpop.f32.mrf.mxu1  ;;  %v8824_v9 = vld [vmem:[%s13179_s1 + $0x3b8] sm:$0xf] }
 0x129   : > { %v1560_v43 = vperm.slane %v1548_v25, 0  ;;  %v1292_v59 = vadd.f32 %v1291_v51, %v1290_v39  ;;  %v1301_v2 = vrot.slane %v1300_v52, 4  ;;  %v8713_v13 = vor.u32 %v11755_v0, %v8712_v61  ;;  %v13402_v51 = vpop.f32.mrf.mxu3 }
 0x12a   : > { %v1405_v17 = vmul.f32 %v13275_v14, %v1404_v56  ;;  %v13353_v44 = vadd.f32 1e-05, %v1365_v37  ;;  %v1443_v56 = vmul.f32 0.5, %v1442_v36  ;;  %v1346_v11 = vmul.f32 %v13362_v58, %v13362_v58 }
 0x12b   : > { %v1572_v7 = vmul.f32 %v1560_v43, %v1378_v57  ;;  %v1334_v10 = vmul.f32 %v1292_v59, %v13238_v32  ;;  %v1302_v12 = vadd.f32 %v1301_v2, %v1300_v52  ;;  %v1156_v18 = vsel %vm686_vm0, %v13366_v6, 0.0  ;;  %5993 = vmatpush.bf16.msra.mxu3 %v8713_v13  ;;  %v8404_v59 = vld [vmem:[%s13179_s1 + $0x70] sm:$0xf]  ;;  %v11776_v13 = vld [vmem:[%s13179_s1 + $0x398] sm:$0xf0] }
 0x12c   : > { %v1409_v34 = vsel %vm13340_vm9, %v13275_v14, %v1405_v17  ;;  %v1195_v14 = vadd.f32 %v1194_v41, %v1193_v29  ;;  %12471 = vrsqrt.f32 %v13353_v44  ;;  %v1444_v38 = vsub.f32 1.5, %v1443_v56 }
 0x12d   : > { %v1546_v55 = vmul.f32 %v1522_v35, %v1409_v34  ;;  %v1358_v62 = vsub.f32 %v1334_v10, %v1346_v11  ;;  %v1303_v24 = vrot.slane %v1302_v12, 2  ;;  %v1157_v25 = vrot.slane %v1156_v18, 4 }
 0x12e   : > { %v1196_v60 = vrot.slane %v1195_v14, 1  ;;  %v1610_v27 = vadd.f32 %v1586_v8, %v1572_v7  ;;  %vm1447_vm11 = vweird.f32 %v13315_v63  ;;  %v1445_v35 = vmul.f32 %v13315_v63, %v1444_v38  ;;  %v8684_v7 = vld [vmem:[%s13179_s1 + $0x2a0] sm:$0xf]  ;;  %v11748_v8 = vld [vmem:[%s13179_s1 + $0x2b8] sm:$0xf0] }
 0x12f   : > { %v1558_v1 = vperm.slane %v1546_v55, 0  ;;  %v1370_v29 = vmax.f32 %v1358_v62, 0.0  ;;  %v1304_v15 = vadd.f32 %v1303_v24, %v1302_v12  ;;  %v1158_v48 = vadd.f32 %v1157_v25, %v1156_v18  ;;  %vm13398_vm12 = vmor %vm1446_vm10, %vm1447_vm11  ;;  %v8796_v12 = vld [vmem:[%s13179_s1 + $0x380] sm:$0xf] }
 0x130   : > { %v1197_v17 = vadd.f32 %v1196_v60, %v1195_v14  ;;  %v1235_v39 = vmul.f32 %v13366_v6, %v13366_v6  ;;  %v8825_v46 = vor.u32 %v11783_v26, %v8824_v9  ;;  %v9189_v47 = vor.u32 %v11874_v31, %v9188_v30  ;;  %v11678_v60 = vld [vmem:[%s13179_s1 + $0x88] sm:$0xf0] }
 0x131   : > { %v1570_v34 = vmul.f32 %v1558_v1, %v1376_v22  ;;  %v13389_v37 = vadd.f32 1e-05, %v1370_v29  ;;  %v1305_v42 = vrot.slane %v1304_v15, 1  ;;  %v1159_v43 = vrot.slane %v1158_v48, 2 }
 0x132   : > { %v13375_v21 = vpop.eup %12471  ;;  %v13392_v4 = vmul.f32 %v1197_v17, %v13238_v32  ;;  %vm1622_vm13 = vcmp.ge.f32.partialorder %v1610_v27, 0.0  ;;  %v1634_v14 = vmul.f32 0.2, %v1610_v27  ;;  %v1526_v52 = vperm.slane %v13299_v49, 4  ;;  %6010 = vmatpush.bf16.msra.mxu0 %v8825_v46  ;;  %6018 = vmatpush.bf16.msrb.mxu1 %v9189_v47  ;;  %v11867_v46 = vld [vmem:[%s13179_s1 + $0x670] sm:$0xf0] }
 0x133   : > { %v1411_v28 = vmul.f32 %v13375_v21, %v13353_v44  ;;  %v13405_v55 = vadd.f32 %v1584_v16, %v1570_v34  ;;  %v1306_v56 = vadd.f32 %v1305_v42, %v1304_v15  ;;  %v1160_v57 = vadd.f32 %v1159_v43, %v1158_v48  ;;  %v9888_v47 = vld [vmem:[%s13179_s1 + $0xc08] sm:$0xf] }
 0x134   : > { %v1449_v61 = vsel %vm13398_vm12, %v13315_v63, %v1445_v35  ;;  %12473 = vrsqrt.f32 %v13389_v37  ;;  %v1265_v0 = vsel %vm686_vm0, %v1235_v39, 0.0  ;;  %v1170_v2 = vsel %vm686_vm0, %v13402_v51, 0.0  ;;  %v9160_v39 = vld [vmem:[%s13179_s1 + $0x658] sm:$0xf] }
 0x135   : > { %v1412_v36 = vmul.f32 %v13375_v21, %v1411_v28  ;;  %v1336_v10 = vmul.f32 %v1306_v56, %v13238_v32  ;;  %v1348_v11 = vmul.f32 %v13392_v4, %v13392_v4  ;;  %v1161_v1 = vrot.slane %v1160_v57, 1  ;;  %v12049_v56 = vld [vmem:[%s13179_s1 + $0xc20] sm:$0xf0] }
 0x136   : > { %v1266_v38 = vrot.slane %v1265_v0, 4  ;;  %v1646_v63 = vsel %vm1622_vm13, %v1610_v27, %v1634_v14  ;;  %v1171_v16 = vrot.slane %v1170_v2, 4  ;;  %v1237_v62 = vmul.f32 %v13402_v51, %v13402_v51 }
 0x137   : > { %v1413_v33 = vmul.f32 0.5, %v1412_v36  ;;  %v8405_v17 = vor.u32 %v11678_v60, %v8404_v59  ;;  %v1550_v18 = vmul.f32 %v1526_v52, %v1449_v61  ;;  %v8685_v25 = vor.u32 %v11748_v8, %v8684_v7  ;;  %v11671_v59 = vld [vmem:[%s13179_s1 + $0x50] sm:$0xf0]  ;;  %v11741_v7 = vld [vmem:[%s13179_s1 + $0x280] sm:$0xf0] }
 0x138   : > { %v1267_v24 = vadd.f32 %v1266_v38, %v1265_v0  ;;  %v1588_v9 = vperm.slane %v13356_v53, 4  ;;  %v1172_v26 = vadd.f32 %v1171_v16, %v1170_v2  ;;  %v1279_v28 = vsel %vm686_vm0, %v1237_v62, 0.0  ;;  %v8656_v2 = vld [vmem:[%s13179_s1 + $0x268] sm:$0xf] }
 0x139   : > { %v1414_v22 = vsub.f32 1.5, %v1413_v33  ;;  %5983 = vmatpush.bf16.msra.mxu2 %v8405_v17  ;;  %v8797_v29 = vor.u32 %v11776_v13, %v8796_v12  ;;  %v13428_v30 = vpack.c.bf16 %v1646_v63, %v1646_v63  ;;  %v1632_v27 = vmul.f32 0.2, %v13405_v55  ;;  %5994 = vmatpush.bf16.msra.mxu3 %v8685_v25  ;;  %v13463_v17 = vpop.f32.mrf.mxu1 }
 0x13a   : > { %v1360_v31 = vsub.f32 %v1336_v10, %v1348_v11  ;;  %v1162_v34 = vadd.f32 %v1161_v1, %v1160_v57  ;;  %v13431_v35 = vpop.eup %12473  ;;  %vm1620_vm14 = vcmp.ge.f32.partialorder %v13405_v55, 0.0  ;;  %v1268_v15 = vrot.slane %v1267_v24, 2  ;;  %v8376_v57 = vld [vmem:[%s13179_s1 + $0x38] sm:$0xf] }
 0x13b   : > { %v1173_v48 = vrot.slane %v1172_v26, 2  ;;  %v1280_v36 = vrot.slane %v1279_v28, 4  ;;  %6011 = vmatpush.bf16.msra.mxu0 %v8797_v29  ;;  %v1562_v41 = vperm.slane %v1550_v18, 0  ;;  %v1415_v42 = vmul.f32 %v13375_v21, %v1414_v22 }
 0x13c   : > { %vm1417_vm15 = vweird.f32 %v13375_v21  ;;  %v1523_v43 = vperm.slane %v13299_v49, 1  ;;  %v1380_v14 = vsub.f32 %v13233_v20, %v13263_v5  ;;  %v1269_v52 = vadd.f32 %v1268_v15, %v1267_v24  ;;  %v9132_v15 = vld [vmem:[%s13179_s1 + $0x620] sm:$0xf] }
 0x13d   : > { %v1174_v33 = vadd.f32 %v1173_v48, %v1172_v26  ;;  %vm1416_vm1 = vweird.f32 %v13353_v44  ;;  %v1461_v60 = vmul.f32 %v13431_v35, %v13389_v37  ;;  %v1372_v61 = vmax.f32 %v1360_v31, 0.0 }
 0x13e   : > { %v13449_v0 = vmul.f32 %v1162_v34, %v13238_v32  ;;  %6012 = vmatmul.bf16.vlgmr.msra.gmra.mxu0 %v13428_v30  ;;  %vm13456_vm2 = vmor %vm1416_vm1, %vm1417_vm15  ;;  %v1270_v5 = vrot.slane %v1269_v52, 1  ;;  %v1281_v44 = vadd.f32 %v1280_v36, %v1279_v28  ;;  %v9161_v10 = vor.u32 %v11867_v46, %v9160_v39 }
 0x13f   : > { %v1175_v8 = vrot.slane %v1174_v33, 1  ;;  %v1574_v11 = vmul.f32 %v1562_v41, %v1380_v14  ;;  %v1419_v1 = vsel %vm13456_vm2, %v13375_v21, %v1415_v42  ;;  %v9889_v38 = vor.u32 %v12049_v56, %v9888_v47  ;;  %v11860_v41 = vld [vmem:[%s13179_s1 + $0x638] sm:$0xf0]  ;;  %v9860_v42 = vld [vmem:[%s13179_s1 + $0xbd0] sm:$0xf] }
 0x140   : > { %v8377_v12 = vor.u32 %v11671_v59, %v8376_v57  ;;  %v1271_v13 = vadd.f32 %v1270_v5, %v1269_v52  ;;  %v1282_v16 = vrot.slane %v1281_v44, 2  ;;  %6019 = vmatpush.bf16.msrb.mxu1 %v9161_v10  ;;  %v8657_v62 = vor.u32 %v11741_v7, %v8656_v2  ;;  %v12042_v52 = vld [vmem:[%s13179_s1 + $0xbe8] sm:$0xf0]  ;;  %v13497_v59 = vpop.f32.mrf.mxu0 }
 0x141   : > { %v1176_v63 = vadd.f32 %v1175_v8, %v1174_v33  ;;  %v1644_v18 = vsel %vm1620_vm14, %v13405_v55, %v1632_v27  ;;  %v13468_v22 = vadd.f32 1e-05, %v1372_v61  ;;  %v1343_v24 = vmul.f32 %v13449_v0, %v13449_v0  ;;  %6056 = vmatpush.bf16.msrb.mxu0 %v9889_v38 }
 0x142   : > { %5984 = vmatpush.bf16.msra.mxu2 %v8377_v12  ;;  %v1547_v21 = vmul.f32 %v1523_v43, %v1419_v1  ;;  %v1462_v25 = vmul.f32 %v13431_v35, %v1461_v60  ;;  %v1331_v26 = vmul.f32 %v1271_v13, %v13238_v32  ;;  %v1283_v28 = vadd.f32 %v1282_v16, %v1281_v44  ;;  %v13515_v16 = vld [vmem:[#allocation12 + $0x8] sm:$0xf] }
 0x143   : > { %5995 = vmatpush.bf16.msra.mxu3 %v8657_v62  ;;  %v13475_v29 = vmul.f32 %v1176_v63, %v13238_v32  ;;  %v1184_v55 = vsel %vm686_vm0, %v13463_v17, 0.0  ;;  %v1239_v27 = vmul.f32 %v13463_v17, %v13463_v17  ;;  %v13481_v31 = vpack.c.bf16 %v1644_v18, %v1644_v18 }
 0x144   : > { %v13485_v34 = vadd.f32 %v1588_v9, %v1574_v11  ;;  %v1377_v48 = vsub.f32 %v13257_v3, %v13303_v50  ;;  %12475 = vrsqrt.f32 %v13468_v22  ;;  %v1355_v36 = vsub.f32 %v1331_v26, %v1343_v24  ;;  %v8348_v26 = vld [vmem:[%s13179_s1] sm:$0xf] }
 0x145   : > { %v1284_v39 = vrot.slane %v1283_v28, 1  ;;  %v1559_v43 = vperm.slane %v1547_v21, 0  ;;  %v1463_v46 = vmul.f32 0.5, %v1462_v25  ;;  %v1185_v47 = vrot.slane %v1184_v55, 4 }
 0x146   : > { %v1293_v14 = vsel %vm686_vm0, %v1239_v27, 0.0  ;;  %v1367_v33 = vmax.f32 %v1355_v36, 0.0  ;;  %v1345_v9 = vmul.f32 %v13475_v29, %v13475_v29  ;;  %v13500_v3 = vmul.f32 0.2, %v13485_v34  ;;  %v13522_v27 = vld [vmem:[#allocation13 + $0x8] sm:$0xf] }
 0x147   : > { %v1285_v56 = vadd.f32 %v1284_v39, %v1283_v28  ;;  %v1294_v57 = vrot.slane %v1293_v14, 4  ;;  %v1585_v50 = vperm.slane %v13356_v53, 1  ;;  %v1186_v60 = vadd.f32 %v1185_v47, %v1184_v55  ;;  %v11664_v28 = vld [vmem:[%s13179_s1 + $0x18] sm:$0xf0] }
 0x148   : > { %v9133_v61 = vor.u32 %v11860_v41, %v9132_v15  ;;  %v13503_v2 = vadd.f32 1e-05, %v1367_v33  ;;  %v9861_v5 = vor.u32 %v12042_v52, %v9860_v42  ;;  %v1464_v8 = vsub.f32 1.5, %v1463_v46 }
 0x149   : > { %v1333_v7 = vmul.f32 %v1285_v56, %v13238_v32  ;;  %v1295_v20 = vadd.f32 %v1294_v57, %v1293_v14  ;;  %v1528_v44 = vperm.slane %v13299_v49, 6  ;;  %v1187_v10 = vrot.slane %v1186_v60, 2 }
 0x14a   : > { %6020 = vmatpush.bf16.msrb.mxu1 %v9133_v61  ;;  %v1205_v11 = vsel %vm686_vm0, %v13497_v59, 0.0  ;;  %v13509_v1 = vpop.eup %12475  ;;  %v1571_v38 = vmul.f32 %v1559_v43, %v1377_v48  ;;  %12477 = vrsqrt.f32 %v13503_v2  ;;  %6057 = vmatpush.bf16.msrb.mxu0 %v9861_v5  ;;  %vm1466_vm3 = vweird.f32 %v13389_v37 }
 0x14b   : > { %v1357_v12 = vsub.f32 %v1333_v7, %v1345_v9  ;;  %v1296_v13 = vrot.slane %v1295_v20, 2  ;;  %vm1467_vm4 = vweird.f32 %v13431_v35  ;;  %v1188_v62 = vadd.f32 %v1187_v10, %v1186_v60  ;;  %v11734_v60 = vld [vmem:[%s13179_s1 + $0x248] sm:$0xf0]  ;;  %v11937_v10 = vld [vmem:[%s13179_s1 + $0x8a0] sm:$0xf0] }
 0x14c   : > { %v1382_v18 = vsub.f32 %v13295_v45, %v13362_v58  ;;  %v1206_v25 = vrot.slane %v1205_v11, 4  ;;  %v1465_v55 = vmul.f32 %v13431_v35, %v1464_v8  ;;  %v1481_v15 = vmul.f32 %v13509_v1, %v13468_v22  ;;  %vm13534_vm5 = vmor %vm1466_vm3, %vm1467_vm4  ;;  %v9440_v8 = vld [vmem:[%s13179_s1 + $0x888] sm:$0xf]  ;;  %v11839_v45 = vld [vmem:[%s13179_s1 + $0x590] sm:$0xf0] }
 0x14d   : > { %v1369_v24 = vmax.f32 %v1357_v12, 0.0  ;;  %v1297_v21 = vadd.f32 %v1296_v13, %v1295_v20  ;;  %v1189_v48 = vrot.slane %v1188_v62, 1  ;;  %v1242_v36 = vmul.f32 %v13497_v59, %v13497_v59 }
 0x14e   : > { %v13528_v39 = vadd.f32 %v1585_v50, %v1571_v38  ;;  %v1207_v14 = vadd.f32 %v1206_v25, %v1205_v11  ;;  %v8349_v33 = vor.u32 %v11664_v28, %v8348_v26  ;;  %v1525_v9 = vperm.slane %v13299_v49, 3  ;;  %v8628_v50 = vld [vmem:[%s13179_s1 + $0x230] sm:$0xf]  ;;  %v13567_v25 = vpop.f32.mrf.mxu3 }
 0x14f   : > { %v13539_v43 = vadd.f32 1e-05, %v1369_v24  ;;  %v1298_v46 = vrot.slane %v1297_v21, 1  ;;  %v1190_v47 = vadd.f32 %v1189_v48, %v1188_v62  ;;  %v1314_v52 = vsel %vm686_vm0, %v1242_v36, 0.0 }
 0x150   : > { %v13542_v56 = vpop.eup %12477  ;;  %v1469_v61 = vsel %vm13534_vm5, %v13431_v35, %v1465_v55  ;;  %v1482_v7 = vmul.f32 %v13509_v1, %v1481_v15  ;;  %5985 = vmatpush.bf16.msra.mxu2 %v8349_v33  ;;  %v1379_v11 = vsub.f32 %v13366_v6, %v13449_v0  ;;  %v1208_v12 = vrot.slane %v1207_v14, 2 }
 0x151   : > { %12479 = vrsqrt.f32 %v13539_v43  ;;  %v1299_v57 = vadd.f32 %v1298_v46, %v1297_v21  ;;  %v1431_v20 = vmul.f32 %v13542_v56, %v13503_v2  ;;  %v13556_v5 = vmul.f32 %v1190_v47, %v13238_v32 }
 0x152   : > { %v1315_v13 = vrot.slane %v1314_v52, 4  ;;  %v1633_v35 = vmul.f32 0.2, %v13528_v39  ;;  %v8629_v21 = vor.u32 %v11734_v60, %v8628_v50  ;;  %v1552_v26 = vmul.f32 %v1528_v44, %v1469_v61 }
 0x153   : > { %v1335_v38 = vmul.f32 %v1299_v57, %v13238_v32  ;;  %v1432_v62 = vmul.f32 %v13542_v56, %v1431_v20  ;;  %v1347_v24 = vmul.f32 %v13556_v5, %v13556_v5  ;;  %v1209_v28 = vadd.f32 %v1208_v12, %v1207_v14  ;;  %5986 = vmatmul.bf16.vlgmr.msra.gmra.mxu2 %v13481_v31  ;;  %v9104_v12 = vld [vmem:[%s13179_s1 + $0x5e8] sm:$0xf] }
 0x154   : > { %v1316_v55 = vadd.f32 %v1315_v13, %v1314_v52  ;;  %v9441_v15 = vor.u32 %v11937_v10, %v9440_v8  ;;  %v1483_v48 = vmul.f32 0.5, %v1482_v7  ;;  %vm1486_vm6 = vweird.f32 %v13468_v22  ;;  %5996 = vmatpush.bf16.msra.mxu3 %v8629_v21 }
 0x155   : > { %v1433_v36 = vmul.f32 0.5, %v1432_v62  ;;  %vm1436_vm7 = vweird.f32 %v13503_v2  ;;  %v1359_v41 = vsub.f32 %v1335_v38, %v1347_v24  ;;  %vm1437_vm8 = vweird.f32 %v13542_v56  ;;  %v9832_v2 = vld [vmem:[%s13179_s1 + $0xb98] sm:$0xf] }
 0x156   : > { %v1210_v47 = vrot.slane %v1209_v28, 1  ;;  %v1317_v44 = vrot.slane %v1316_v55, 2  ;;  %6030 = vmatpush.bf16.msrb.mxu2 %v9441_v15  ;;  %v1241_v14 = vmul.f32 %v13567_v25, %v13567_v25  ;;  %v1198_v50 = vsel %vm686_vm0, %v13567_v25, 0.0  ;;  %vm1438_vm10 = vmor %vm1436_vm7, %vm1437_vm8 }
 0x157   : > { %v13572_v46 = vpop.eup %12479  ;;  %v1434_v52 = vsub.f32 1.5, %v1433_v36  ;;  %v1371_v57 = vmax.f32 %v1359_v41, 0.0  ;;  %vm1621_vm9 = vcmp.ge.f32.partialorder %v13528_v39, 0.0  ;;  %v1564_v20 = vperm.slane %v1552_v26, 0  ;;  %v11853_v26 = vld [vmem:[%s13179_s1 + $0x600] sm:$0xf0] }
 0x158   : > { %v1451_v33 = vmul.f32 %v13572_v46, %v13539_v43  ;;  %v1211_v61 = vadd.f32 %v1210_v47, %v1209_v28  ;;  %v1318_v7 = vadd.f32 %v1317_v44, %v1316_v55  ;;  %v1199_v24 = vrot.slane %v1198_v50, 4  ;;  %v12035_v36 = vld [vmem:[%s13179_s1 + $0xbb0] sm:$0xf0] }
 0x159   : > { %v1435_v8 = vmul.f32 %v13542_v56, %v1434_v52  ;;  %v13585_v38 = vadd.f32 1e-05, %v1371_v57  ;;  %v1307_v21 = vsel %vm686_vm0, %v1241_v14, 0.0  ;;  %v1645_v28 = vsel %vm1621_vm9, %v13528_v39, %v1633_v35  ;;  %v8600_v35 = vld [vmem:[%s13179_s1 + $0x1f8] sm:$0xf] }
 0x15a   : > { %v1452_v10 = vmul.f32 %v13572_v46, %v1451_v33  ;;  %v13593_v13 = vmul.f32 %v1211_v61, %v13238_v32  ;;  %v1319_v62 = vrot.slane %v1318_v7, 1  ;;  %v1484_v55 = vsub.f32 1.5, %v1483_v48  ;;  %v11727_v48 = vld [vmem:[%s13179_s1 + $0x210] sm:$0xf0]  ;;  %v9412_v33 = vld [vmem:[%s13179_s1 + $0x850] sm:$0xf] }
 0x15b   : > { %v1439_v15 = vsel %vm1438_vm10, %v13542_v56, %v1435_v8  ;;  %12481 = vrsqrt.f32 %v13585_v38  ;;  %vm1487_vm11 = vweird.f32 %v13509_v1  ;;  %v1576_v56 = vmul.f32 %v1564_v20, %v1382_v18  ;;  %v11930_v57 = vld [vmem:[%s13179_s1 + $0x868] sm:$0xf0] }
 0x15c   : > { %v1549_v41 = vmul.f32 %v1525_v9, %v1439_v15  ;;  %v1320_v47 = vadd.f32 %v1319_v62, %v1318_v7  ;;  %v1350_v39 = vmul.f32 %v13593_v13, %v13593_v13  ;;  %v1453_v44 = vmul.f32 0.5, %v1452_v10  ;;  %v9076_v7 = vld [vmem:[%s13179_s1 + $0x5b0] sm:$0xf]  ;;  %v11846_v62 = vld [vmem:[%s13179_s1 + $0x5c8] sm:$0xf0]  ;;  %vm13622_vm12 = vmor %vm1486_vm6, %vm1487_vm11 }
 0x15d   : > { %v1200_v14 = vadd.f32 %v1199_v24, %v1198_v50  ;;  %v1308_v52 = vrot.slane %v1307_v21, 4  ;;  %v9105_v9 = vor.u32 %v11853_v26, %v9104_v12  ;;  %v9833_v15 = vor.u32 %v12035_v36, %v9832_v2  ;;  %v12028_v2 = vld [vmem:[%s13179_s1 + $0xb78] sm:$0xf0]  ;;  %v10084_v26 = vld [vmem:[%s13179_s1 + $0xd90] sm:$0xf] }
 0x15e   : > { %v1561_v61 = vperm.slane %v1549_v41, 0  ;;  %v1338_v8 = vmul.f32 %v1320_v47, %v13238_v32  ;;  %v1485_v37 = vmul.f32 %v13509_v1, %v1484_v55  ;;  %v8601_v63 = vor.u32 %v11727_v48, %v8600_v35  ;;  %v8572_v47 = vld [vmem:[%s13179_s1 + $0x1c0] sm:$0xf] }
 0x15f   : > { %v1201_v42 = vrot.slane %v1200_v14, 2  ;;  %v1309_v60 = vadd.f32 %v1308_v52, %v1307_v21  ;;  %v1527_v18 = vperm.slane %v13299_v49, 5  ;;  %6021 = vmatpush.bf16.msrb.mxu1 %v9105_v9  ;;  %6058 = vmatpush.bf16.msrb.mxu0 %v9833_v15  ;;  %v9413_v20 = vor.u32 %v11930_v57, %v9412_v33  ;;  %v9664_v33 = vld [vmem:[%s13179_s1 + $0xa48] sm:$0xf] }
 0x160   : > { %v1573_v58 = vmul.f32 %v1561_v61, %v1379_v11  ;;  %v1362_v50 = vsub.f32 %v1338_v8, %v1350_v39  ;;  %v13632_v12 = vpack.c.bf16 %v1645_v28, %v1645_v28  ;;  %5997 = vmatpush.bf16.msra.mxu3 %v8601_v63  ;;  %v9077_v21 = vor.u32 %v11846_v62, %v9076_v7  ;;  %v9804_v28 = vld [vmem:[%s13179_s1 + $0xb60] sm:$0xf]  ;;  %v11720_v39 = vld [vmem:[%s13179_s1 + $0x1d8] sm:$0xf0]  ;;  %v11993_v7 = vld [vmem:[%s13179_s1 + $0xa60] sm:$0xf0] }
 0x161   : > { %v13630_v10 = vpop.eup %12481  ;;  %v1202_v22 = vadd.f32 %v1201_v42, %v1200_v14  ;;  %v1310_v24 = vrot.slane %v1309_v60, 2  ;;  %v15858_v6 = vperm.slane %v13356_v53, 6  ;;  %v1454_v11 = vsub.f32 1.5, %v1453_v44  ;;  %6031 = vmatpush.bf16.msrb.mxu2 %v9413_v20  ;;  %v9048_v62 = vld [vmem:[%s13179_s1 + $0x578] sm:$0xf] }
 0x162   : > { %v1471_v55 = vmul.f32 %v13630_v10, %v13585_v38  ;;  %v1489_v63 = vsel %vm13622_vm12, %v13509_v1, %v1485_v37  ;;  %v1374_v42 = vmax.f32 %v1362_v50, 0.0  ;;  %v15859_v35 = vperm.slane %v13356_v53, 3  ;;  %v9384_v1 = vld [vmem:[%s13179_s1 + $0x818] sm:$0xf]  ;;  %v11923_v37 = vld [vmem:[%s13179_s1 + $0x830] sm:$0xf0] }
 0x163   : > { %v13636_v0 = vadd.f32 %v15858_v6, %v1576_v56  ;;  %v1203_v36 = vrot.slane %v1202_v22, 1  ;;  %v1311_v41 = vadd.f32 %v1310_v24, %v1309_v60  ;;  %vm1456_vm13 = vweird.f32 %v13539_v43  ;;  %6022 = vmatpush.bf16.msrb.mxu1 %v9077_v21  ;;  %v9776_v24 = vld [vmem:[%s13179_s1 + $0xb28] sm:$0xf]  ;;  %v12021_v43 = vld [vmem:[%s13179_s1 + $0xb40] sm:$0xf0] }
 0x164   : > { %v1611_v48 = vadd.f32 %v15859_v35, %v1573_v58  ;;  %vm1457_vm14 = vweird.f32 %v13572_v46  ;;  %v1472_v56 = vmul.f32 %v13630_v10, %v1471_v55  ;;  %v13655_v44 = vadd.f32 1e-05, %v1374_v42  ;;  %v9356_v42 = vld [vmem:[%s13179_s1 + $0x7e0] sm:$0xf] }
 0x165   : > { %v1204_v60 = vadd.f32 %v1203_v36, %v1202_v22  ;;  %v1312_v14 = vrot.slane %v1311_v41, 1  ;;  %v9805_v52 = vor.u32 %v12028_v2, %v9804_v28  ;;  %v15860_v57 = vperm.slane %v13515_v16, 0  ;;  %vm13675_vm15 = vmor %vm1456_vm13, %vm1457_vm14  ;;  %v11916_v36 = vld [vmem:[%s13179_s1 + $0x7f8] sm:$0xf0] }
 0x166   : > { %v1381_v8 = vsub.f32 %v13402_v51, %v13475_v29  ;;  %v1455_v9 = vmul.f32 %v13572_v46, %v1454_v11  ;;  %v8573_v15 = vor.u32 %v11720_v39, %v8572_v47  ;;  %v13669_v58 = vmul.f32 0.2, %v13636_v0  ;;  %v13686_v11 = vpop.f32.mrf.mxu1  ;;  %v10756_v51 = vld [vmem:[%s13179_s1 + $0x12d0] sm:$0xf]  ;;  %v12266_v29 = vld [vmem:[%s13179_s1 + $0x12e8] sm:$0xf0] }
 0x167   : > { %v13660_v61 = vmul.f32 %v15860_v57, %v1489_v63  ;;  %12483 = vrsqrt.f32 %v13655_v44  ;;  %v13682_v22 = vmul.f32 %v1204_v60, %v13238_v32  ;;  %6059 = vmatpush.bf16.msrb.mxu0 %v9805_v52  ;;  %vm1623_vm1 = vcmp.ge.f32.partialorder %v1611_v48, 0.0  ;;  %v11986_v60 = vld [vmem:[%s13179_s1 + $0xa28] sm:$0xf0] }
 0x168   : > { %v1635_v21 = vmul.f32 0.2, %v1611_v48  ;;  %v1313_v6 = vadd.f32 %v1312_v14, %v1311_v41  ;;  %5998 = vmatpush.bf16.msra.mxu3 %v8573_v15  ;;  %vm1212_vm2 = vcmask 746496   ;;  %vm1626_vm3 = vcmp.ge.f32.partialorder %v13636_v0, 0.0  ;;  %v12007_v41 = vld [vmem:[%s13179_s1 + $0xad0] sm:$0xf0] }
 0x169   : > { %v1473_v55 = vmul.f32 0.5, %v1472_v56  ;;  %v1349_v28 = vmul.f32 %v13682_v22, %v13682_v22  ;;  %v9385_v2 = vor.u32 %v11923_v37, %v9384_v1  ;;  %v9665_v63 = vor.u32 %v11993_v7, %v9664_v33  ;;  %v9636_v56 = vld [vmem:[%s13179_s1 + $0xa10] sm:$0xf]  ;;  %v9020_v33 = vld [vmem:[%s13179_s1 + $0x540] sm:$0xf] }
 0x16a   : > { %v1459_v47 = vsel %vm13675_vm15, %v13572_v46, %v1455_v9  ;;  %v1337_v35 = vmul.f32 %v1313_v6, %v13238_v32  ;;  %v9049_v1 = vor.u32 %v11839_v45, %v9048_v62  ;;  %v9777_v37 = vor.u32 %v12021_v43, %v9776_v24  ;;  %v11832_v46 = vld [vmem:[%s13179_s1 + $0x558] sm:$0xf0]  ;;  %v9748_v7 = vld [vmem:[%s13179_s1 + $0xaf0] sm:$0xf]  ;;  %v12014_v62 = vld [vmem:[%s13179_s1 + $0xb08] sm:$0xf0] }
 0x16b   : > { %6032 = vmatpush.bf16.msrb.mxu2 %v9385_v2  ;;  %v1213_v14 = vsel %vm1212_vm2, %v13686_v11, 0.0  ;;  %v1243_v52 = vmul.f32 %v13686_v11, %v13686_v11  ;;  %v1647_v57 = vsel %vm1623_vm1, %v1611_v48, %v1635_v21  ;;  %vm1476_vm4 = vweird.f32 %v13585_v38  ;;  %5999 = vmatmul.bf16.vlgmr.msra.gmra.mxu3 %v13632_v12  ;;  %v10112_v6 = vld [vmem:[%s13179_s1 + $0xdc8] sm:$0xf]  ;;  %v12105_v43 = vld [vmem:[%s13179_s1 + $0xde0] sm:$0xf0] }
 0x16c   : > { %6043 = vmatpush.bf16.msrb.mxu3 %v9665_v63  ;;  %v1361_v9 = vsub.f32 %v1337_v35, %v1349_v28  ;;  %v1214_v15 = vrot.slane %v1213_v14, 4  ;;  %v13716_v50 = vmul.f32 %v1527_v18, %v1459_v47  ;;  %v1474_v24 = vsub.f32 1.5, %v1473_v55  ;;  %6023 = vmatpush.bf16.msrb.mxu1 %v9049_v1  ;;  %v9328_v18 = vld [vmem:[%s13179_s1 + $0x7a8] sm:$0xf]  ;;  %v11909_v47 = vld [vmem:[%s13179_s1 + $0x7c0] sm:$0xf0] }
 0x16d   : > { %v13712_v45 = vpop.eup %12483  ;;  %6060 = vmatpush.bf16.msrb.mxu0 %v9777_v37  ;;  %v1321_v48 = vsel %vm1212_vm2, %v1243_v52, 0.0  ;;  %v9357_v21 = vor.u32 %v11916_v36, %v9356_v42  ;;  %vm1477_vm5 = vweird.f32 %v13630_v10  ;;  %v9608_v55 = vld [vmem:[%s13179_s1 + $0x9d8] sm:$0xf]  ;;  %v11979_v35 = vld [vmem:[%s13179_s1 + $0x9f0] sm:$0xf0]  ;;  %v13728_v1 = vpack.c.bf16 %v1647_v57, %v1647_v57 }
 0x16e   : > { %v1501_v28 = vmul.f32 %v13712_v45, %v13655_v44  ;;  %v1373_v2 = vmax.f32 %v1361_v9, 0.0  ;;  %v1215_v63 = vadd.f32 %v1214_v15, %v1213_v14  ;;  %v1322_v37 = vrot.slane %v1321_v48, 4  ;;  %v9720_v52 = vld [vmem:[%s13179_s1 + $0xab8] sm:$0xf]  ;;  %vm13744_vm6 = vmor %vm1476_vm4, %vm1477_vm5 }
 0x16f   : > { %6033 = vmatpush.bf16.msrb.mxu2 %v9357_v21  ;;  %v9637_v42 = vor.u32 %v11986_v60, %v9636_v56  ;;  %v9021_v36 = vor.u32 %v11832_v46, %v9020_v33  ;;  %v9749_v15 = vor.u32 %v12014_v62, %v9748_v7  ;;  %v1475_v57 = vmul.f32 %v13630_v10, %v1474_v24  ;;  %v12098_v56 = vld [vmem:[%s13179_s1 + $0xda8] sm:$0xf0]  ;;  %v9300_v60 = vld [vmem:[%s13179_s1 + $0x770] sm:$0xf]  ;;  %v12091_v62 = vld [vmem:[%s13179_s1 + $0xd70] sm:$0xf0] }
 0x170   : > { %v1502_v39 = vmul.f32 %v13712_v45, %v1501_v28  ;;  %v13733_v9 = vadd.f32 1e-05, %v1373_v2  ;;  %v1216_v14 = vrot.slane %v1215_v63, 2  ;;  %v1323_v20 = vadd.f32 %v1322_v37, %v1321_v48  ;;  %v11902_v33 = vld [vmem:[%s13179_s1 + $0x788] sm:$0xf0] }
 0x171   : > { %6044 = vmatpush.bf16.msrb.mxu3 %v9637_v42  ;;  %6024 = vmatpush.bf16.msrb.mxu1 %v9021_v36  ;;  %v10113_v21 = vor.u32 %v12105_v43, %v10112_v6  ;;  %v9580_v48 = vld [vmem:[%s13179_s1 + $0x9a0] sm:$0xf]  ;;  %v11972_v6 = vld [vmem:[%s13179_s1 + $0x9b8] sm:$0xf0]  ;;  %vm1624_vm7 = vcmp.ge.f32.partialorder %v13485_v34, 0.0  ;;  %v1563_v38 = vperm.slane %v13716_v50, 0  ;;  %v9329_v28 = vor.u32 %v11909_v47, %v9328_v18 }
 0x172   : > { %v1503_v7 = vmul.f32 0.5, %v1502_v39  ;;  %12485 = vrsqrt.f32 %v13733_v9  ;;  %v1217_v24 = vadd.f32 %v1216_v14, %v1215_v63  ;;  %6061 = vmatpush.bf16.msrb.mxu0 %v9749_v15  ;;  %v1324_v43 = vrot.slane %v1323_v20, 2  ;;  %v9692_v39 = vld [vmem:[%s13179_s1 + $0xa80] sm:$0xf]  ;;  %v12000_v37 = vld [vmem:[%s13179_s1 + $0xa98] sm:$0xf0] }
 0x173   : > { %v9609_v2 = vor.u32 %v11979_v35, %v9608_v55  ;;  %v1650_v63 = vsel %vm1626_vm3, %v13636_v0, %v13669_v58  ;;  %v9721_v14 = vor.u32 %v12007_v41, %v9720_v52  ;;  %v10056_v15 = vld [vmem:[%s13179_s1 + $0xd58] sm:$0xf]  ;;  %v1479_v50 = vsel %vm13744_vm6, %v13630_v10, %v1475_v57  ;;  %6034 = vmatpush.bf16.msrb.mxu2 %v9329_v28  ;;  %v10784_v58 = vld [vmem:[%s13179_s1 + $0x1308] sm:$0xf]  ;;  %v12273_v41 = vld [vmem:[%s13179_s1 + $0x1320] sm:$0xf0] }
 0x174   : > { %v1504_v42 = vsub.f32 1.5, %v1503_v7  ;;  %v1218_v36 = vrot.slane %v1217_v24, 1  ;;  %6025 = vmatmul.bf16.vlgmr.msrb.gmra.mxu1 %v13728_v1  ;;  %vm1506_vm8 = vweird.f32 %v13655_v44  ;;  %v1325_v18 = vadd.f32 %v1324_v43, %v1323_v20  ;;  %v9272_v52 = vld [vmem:[%s13179_s1 + $0x738] sm:$0xf]  ;;  %v11895_v10 = vld [vmem:[%s13179_s1 + $0x750] sm:$0xf0] }
 0x175   : > { %6069 = vmatpush.bf16.msra.mxu1 %v10113_v21  ;;  %6045 = vmatpush.bf16.msrb.mxu3 %v9609_v2  ;;  %v10085_v0 = vor.u32 %v12098_v56, %v10084_v26  ;;  %vm1507_vm9 = vweird.f32 %v13712_v45  ;;  %v9301_v55 = vor.u32 %v11902_v33, %v9300_v60  ;;  %v9581_v35 = vor.u32 %v11972_v6, %v9580_v48  ;;  %v9552_v57 = vld [vmem:[%s13179_s1 + $0x968] sm:$0xf]  ;;  %v11965_v46 = vld [vmem:[%s13179_s1 + $0x980] sm:$0xf0]  ;;  %v10028_v7 = vld [vmem:[%s13179_s1 + $0xd20] sm:$0xf] }
 0x176   : > { %v1219_v47 = vadd.f32 %v1218_v36, %v1217_v24  ;;  %6062 = vmatpush.bf16.msrb.mxu0 %v9721_v14  ;;  %v1575_v26 = vmul.f32 %v1563_v38, %v1381_v8  ;;  %v1326_v20 = vrot.slane %v1325_v18, 1  ;;  %v9693_v21 = vor.u32 %v12000_v37, %v9692_v39  ;;  %v12084_v6 = vld [vmem:[%s13179_s1 + $0xd38] sm:$0xf0]  ;;  %vm13793_vm10 = vmor %vm1506_vm8, %vm1507_vm9  ;;  %v9524_v36 = vld [vmem:[%s13179_s1 + $0x930] sm:$0xf] }
 0x177   : > { %v10057_v56 = vor.u32 %v12091_v62, %v10056_v15  ;;  %v1505_v33 = vmul.f32 %v13712_v45, %v1504_v42  ;;  %v10785_v48 = vor.u32 %v12273_v41, %v10784_v58  ;;  %v15865_v8 = vperm.slane %v13299_v49, 7  ;;  %6035 = vmatpush.bf16.msrb.mxu2 %v9301_v55  ;;  %v9244_v49 = vld [vmem:[%s13179_s1 + $0x700] sm:$0xf]  ;;  %v11888_v39 = vld [vmem:[%s13179_s1 + $0x718] sm:$0xf0] }
 0x178   : > { %v13778_v60 = vpop.eup %12485  ;;  %v13782_v24 = vmul.f32 %v1219_v47, %v13238_v32  ;;  %v1594_v43 = vperm.slane %v13522_v27, 2  ;;  %v1327_v2 = vadd.f32 %v1326_v20, %v1325_v18  ;;  %v13802_v37 = vpack.c.bf16 %v1650_v63, %v1650_v63  ;;  %v11958_v14 = vld [vmem:[%s13179_s1 + $0x948] sm:$0xf0]  ;;  %v10336_v15 = vld [vmem:[%s13179_s1 + $0xf88] sm:$0xf] }
 0x179   : > { %6070 = vmatpush.bf16.msra.mxu1 %v10085_v0  ;;  %v1553_v62 = vmul.f32 %v15865_v8, %v1479_v50  ;;  %v1491_v28 = vmul.f32 %v13778_v60, %v13733_v9  ;;  %6046 = vmatpush.bf16.msrb.mxu3 %v9581_v35  ;;  %v9273_v42 = vor.u32 %v11895_v10, %v9272_v52  ;;  %v15868_v50 = vperm.slane %v13356_v53, 5  ;;  %v12161_v58 = vld [vmem:[%s13179_s1 + $0xfa0] sm:$0xf0]  ;;  %v10000_v41 = vld [vmem:[%s13179_s1 + $0xce8] sm:$0xf] }
 0x17a   : > { %v1351_v44 = vmul.f32 %v13782_v24, %v13782_v24  ;;  %6063 = vmatpush.bf16.msrb.mxu0 %v9693_v21  ;;  %v1339_v0 = vmul.f32 %v1327_v2, %v13238_v32  ;;  %v9553_v63 = vor.u32 %v11965_v46, %v9552_v57  ;;  %v12077_v47 = vld [vmem:[%s13179_s1 + $0xd00] sm:$0xf0]  ;;  %v1509_v55 = vsel %vm13793_vm10, %v13712_v45, %v1505_v33  ;;  %v12259_v20 = vld [vmem:[%s13179_s1 + $0x12b0] sm:$0xf0]  ;;  %v9496_v21 = vld [vmem:[%s13179_s1 + $0x8f8] sm:$0xf] }
 0x17b   : > { %v13811_v18 = vadd.f32 %v15868_v50, %v1575_v26  ;;  %v1492_v35 = vmul.f32 %v13778_v60, %v1491_v28  ;;  %v10029_v52 = vor.u32 %v12084_v6, %v10028_v7  ;;  %v10757_v10 = vor.u32 %v12266_v29, %v10756_v51  ;;  %v10728_v26 = vld [vmem:[%s13179_s1 + $0x1298] sm:$0xf]  ;;  %6036 = vmatpush.bf16.msrb.mxu2 %v9273_v42  ;;  %v11951_v8 = vld [vmem:[%s13179_s1 + $0x910] sm:$0xf0]  ;;  %v10308_v45 = vld [vmem:[%s13179_s1 + $0xf50] sm:$0xf] }
 0x17c   : > { %v1565_v57 = vperm.slane %v1553_v62, 0  ;;  %v9245_v46 = vor.u32 %v11888_v39, %v9244_v49  ;;  %v1648_v7 = vsel %vm1624_vm7, %v13485_v34, %v13500_v3  ;;  %v1383_v33 = vsub.f32 %v13463_v17, %v13556_v5  ;;  %v12154_v51 = vld [vmem:[%s13179_s1 + $0xf68] sm:$0xf0]  ;;  %v9972_v29 = vld [vmem:[%s13179_s1 + $0xcb0] sm:$0xf] }
 0x17d   : > { %6071 = vmatpush.bf16.msra.mxu1 %v10057_v56  ;;  %v1363_v56 = vsub.f32 %v1339_v0, %v1351_v44  ;;  %6047 = vmatpush.bf16.msrb.mxu3 %v9553_v63  ;;  %v10337_v6 = vor.u32 %v12161_v58, %v10336_v15  ;;  %v12070_v62 = vld [vmem:[%s13179_s1 + $0xcc8] sm:$0xf0]  ;;  %v15869_v38 = vperm.slane %v13515_v16, 2  ;;  %v10001_v49 = vor.u32 %v12077_v47, %v10000_v41  ;;  %v10700_v34 = vld [vmem:[%s13179_s1 + $0x1260] sm:$0xf] }
 0x17e   : > { %6108 = vmatpush.bf16.msra.mxu0 %v10785_v48  ;;  %v9525_v48 = vor.u32 %v11958_v14, %v9524_v36  ;;  %v10729_v39 = vor.u32 %v12259_v20, %v10728_v26  ;;  %v12252_v3 = vld [vmem:[%s13179_s1 + $0x1278] sm:$0xf0]  ;;  %vm1625_vm11 = vcmp.ge.f32.partialorder %v13811_v18, 0.0  ;;  %v1637_v17 = vmul.f32 0.2, %v13811_v18 }
 0x17f   : > { %6064 = vmatmul.bf16.vlgmr.msrb.gmra.mxu0 %v13802_v37  ;;  %v1556_v28 = vmul.f32 %v15869_v38, %v1509_v55  ;;  %v1375_v2 = vmax.f32 %v1363_v56, 0.0  ;;  %v1531_v5 = vperm.slane %v13515_v16, 1  ;;  %v9468_v44 = vld [vmem:[%s13179_s1 + $0x8c0] sm:$0xf]  ;;  %v1577_v42 = vmul.f32 %v1565_v57, %v1383_v33  ;;  %6037 = vmatpush.bf16.msrb.mxu2 %v9245_v46  ;;  %v11944_v50 = vld [vmem:[%s13179_s1 + $0x8d8] sm:$0xf0] }
 0x180   : > { %v1493_v36 = vmul.f32 0.5, %v1492_v35  ;;  %v9497_v15 = vor.u32 %v11951_v8, %v9496_v21  ;;  %v13847_v0 = vpack.c.bf16 %v1648_v7, %v1648_v7  ;;  %v1386_v63 = vsub.f32 %v13497_v59, %v13593_v13  ;;  %v10280_v41 = vld [vmem:[%s13179_s1 + $0xf18] sm:$0xf]  ;;  %v12147_v47 = vld [vmem:[%s13179_s1 + $0xf30] sm:$0xf0] }
 0x181   : > { %6072 = vmatpush.bf16.msra.mxu1 %v10029_v52  ;;  %v13844_v14 = vadd.f32 1e-05, %v1375_v2  ;;  %6048 = vmatpush.bf16.msrb.mxu3 %v9525_v48  ;;  %v10309_v58 = vor.u32 %v12154_v51, %v10308_v45  ;;  %v10560_v55 = vld [vmem:[%s13179_s1 + $0x1148] sm:$0xf]  ;;  %v1568_v35 = vperm.slane %v1556_v28, 0  ;;  %v9973_v52 = vor.u32 %v12070_v62, %v9972_v29 }
 0x182   : > { %6109 = vmatpush.bf16.msra.mxu0 %v10757_v10  ;;  %v10701_v10 = vor.u32 %v12252_v3, %v10700_v34  ;;  %v12217_v26 = vld [vmem:[%s13179_s1 + $0x1160] sm:$0xf0]  ;;  %v9944_v20 = vld [vmem:[%s13179_s1 + $0xc78] sm:$0xf]  ;;  %v1384_v59 = vsub.f32 %v13307_v54, %v13392_v4  ;;  %v12063_v13 = vld [vmem:[%s13179_s1 + $0xc90] sm:$0xf0]  ;;  %6038 = vmatmul.bf16.vlgmr.msrb.gmra.mxu2 %v13847_v0  ;;  %v1649_v56 = vsel %vm1625_vm11, %v13811_v18, %v1637_v17  ;;  %vm1496_vm12 = vweird.f32 %v13733_v9 }
 0x183   : > { %6082 = vmatpush.bf16.msra.mxu2 %v10337_v6  ;;  %12487 = vrsqrt.f32 %v13844_v14  ;;  %v10672_v21 = vld [vmem:[%s13179_s1 + $0x1228] sm:$0xf]  ;;  %v12245_v57 = vld [vmem:[%s13179_s1 + $0x1240] sm:$0xf0]  ;;  %v15870_v46 = vperm.slane %v13356_v53, 7  ;;  %v1494_v8 = vsub.f32 1.5, %v1493_v36  ;;  %v9469_v45 = vor.u32 %v11944_v50, %v9468_v44 }
 0x184   : > { %v10252_v54 = vld [vmem:[%s13179_s1 + $0xee0] sm:$0xf]  ;;  %v10281_v4 = vor.u32 %v12147_v47, %v10280_v41  ;;  %v10561_v7 = vor.u32 %v12217_v26, %v10560_v55  ;;  %v12140_v33 = vld [vmem:[%s13179_s1 + $0xef8] sm:$0xf0]  ;;  %v10952_v18 = vld [vmem:[%s13179_s1 + $0x1458] sm:$0xf]  ;;  %v1580_v53 = vmul.f32 %v1568_v35, %v1386_v63  ;;  %vm1497_vm13 = vweird.f32 %v13778_v60 }
 0x185   : > { %6073 = vmatpush.bf16.msra.mxu1 %v10001_v49  ;;  %v1615_v48 = vadd.f32 %v15870_v46, %v1577_v42  ;;  %6049 = vmatpush.bf16.msrb.mxu3 %v9497_v15  ;;  %v12315_v6 = vld [vmem:[%s13179_s1 + $0x1470] sm:$0x30]  ;;  %v9945_v51 = vor.u32 %v12063_v13, %v9944_v20  ;;  %v10673_v29 = vor.u32 %v12245_v57, %v10672_v21  ;;  %v10532_v62 = vld [vmem:[%s13179_s1 + $0x1110] sm:$0xf]  ;;  %v12210_v38 = vld [vmem:[%s13179_s1 + $0x1128] sm:$0xf0]  ;;  %vm1516_vm2 = vweird.f32 %v13844_v14 }
 0x186   : > { %6110 = vmatpush.bf16.msra.mxu0 %v10729_v39  ;;  %v9916_v28 = vld [vmem:[%s13179_s1 + $0xc40] sm:$0xf]  ;;  %v15871_v2 = vperm.slane %v13660_v61, 0  ;;  %v13879_v39 = vpack.c.bf16 %v1649_v56, %v1649_v56  ;;  %v12056_v34 = vld [vmem:[%s13179_s1 + $0xc58] sm:$0xf0]  ;;  %v1495_v36 = vmul.f32 %v13778_v60, %v1494_v8  ;;  %v10953_v15 = vor.u32 %v12315_v6, %v10952_v18  ;;  %vm13891_vm15 = vmor %vm1496_vm12, %vm1497_vm13 }
 0x187   : > { %6083 = vmatpush.bf16.msra.mxu2 %v10309_v58  ;;  %v10644_v3 = vld [vmem:[%s13179_s1 + $0x11f0] sm:$0xf]  ;;  %v12238_v17 = vld [vmem:[%s13179_s1 + $0x1208] sm:$0xf0]  ;;  %vm1627_vm14 = vcmp.ge.f32.partialorder %v1615_v48, 0.0  ;;  %v10253_v63 = vor.u32 %v12140_v33, %v10252_v54  ;;  %v10533_v58 = vor.u32 %v12210_v38, %v10532_v62  ;;  %vm5956_vm1 = vcmask 1045504  }
 0x188   : > { %v1578_v49 = vmul.f32 %v15871_v2, %v1384_v59  ;;  %v1639_v42 = vmul.f32 0.2, %v1615_v48  ;;  %v10224_v41 = vld [vmem:[%s13179_s1 + $0xea8] sm:$0xf]  ;;  %v12133_v47 = vld [vmem:[%s13179_s1 + $0xec0] sm:$0xf0]  ;;  %v1618_v9 = vadd.f32 %v1594_v43, %v1580_v53  ;;  %v9917_v55 = vor.u32 %v12056_v34, %v9916_v28 }
 0x189   : > { %6074 = vmatpush.bf16.msra.mxu1 %v9973_v52  ;;  %v13884_v44 = vpop.eup %12487  ;;  %6050 = vmatpush.bf16.msrb.mxu3 %v9469_v45  ;;  %v10645_v35 = vor.u32 %v12238_v17, %v10644_v3  ;;  %v10504_v52 = vld [vmem:[%s13179_s1 + $0x10d8] sm:$0xf]  ;;  %v15874_v20 = vperm.slane %v13522_v27, 0  ;;  %v12231_v21 = vld [vmem:[%s13179_s1 + $0x11d0] sm:$0xf0]  ;;  %v1499_v46 = vsel %vm13891_vm15, %v13778_v60, %v1495_v36  ;;  %v5958_v8 = vsel %vm5956_vm1, %v10953_v15, 0 }
 0x18a   : > { %6111 = vmatpush.bf16.msra.mxu0 %v10701_v10  ;;  %v1511_v50 = vmul.f32 %v13884_v44, %v13844_v14  ;;  %v12203_v10 = vld [vmem:[%s13179_s1 + $0x10f0] sm:$0xf0]  ;;  %v10616_v26 = vld [vmem:[%s13179_s1 + $0x11b8] sm:$0xf]  ;;  %v10924_v57 = vld [vmem:[%s13179_s1 + $0x1420] sm:$0xf]  ;;  %v1651_v56 = vsel %vm1627_vm14, %v1615_v48, %v1639_v42  ;;  %vm1517_vm3 = vweird.f32 %v13884_v44 }
 0x18b   : > { %6084 = vmatpush.bf16.msra.mxu2 %v10281_v4  ;;  %v13906_v59 = vadd.f32 %v15874_v20, %v1578_v49  ;;  %v12308_v43 = vld [vmem:[%s13179_s1 + $0x1438] sm:$0xf0]  ;;  %v10196_v45 = vld [vmem:[%s13179_s1 + $0xe70] sm:$0xf]  ;;  %v12126_v54 = vld [vmem:[%s13179_s1 + $0xe88] sm:$0xf0]  ;;  %v10505_v48 = vor.u32 %v12203_v10, %v10504_v52  ;;  %v10617_v6 = vor.u32 %v12231_v21, %v10616_v26  ;;  %v13930_v49 = vpack.c.bf16 %v1651_v56, %v1651_v56 }
 0x18c   : > { %v1512_v13 = vmul.f32 %v13884_v44, %v1511_v50  ;;  %6051 = vmatmul.bf16.vlgmr.msrb.gmra.mxu3 %v13879_v39  ;;  %v10476_v33 = vld [vmem:[%s13179_s1 + $0x10a0] sm:$0xf]  ;;  %v12196_v18 = vld [vmem:[%s13179_s1 + $0x10b8] sm:$0xf0]  ;;  %v1642_v60 = vmul.f32 0.2, %v1618_v9  ;;  %v10925_v38 = vor.u32 %v12308_v43, %v10924_v57  ;;  %vm13936_vm5 = vmor %vm1516_vm2, %vm1517_vm3  ;;  %v10197_v15 = vor.u32 %v12126_v54, %v10196_v45 }
 0x18d   : > { %6095 = vmatpush.bf16.msra.mxu3 %v10561_v7  ;;  %6075 = vmatpush.bf16.msra.mxu1 %v9945_v51  ;;  %v10225_v7 = vor.u32 %v12133_v47, %v10224_v41  ;;  %v10588_v53 = vld [vmem:[%s13179_s1 + $0x1180] sm:$0xf]  ;;  %v12224_v51 = vld [vmem:[%s13179_s1 + $0x1198] sm:$0xf0]  ;;  %vm1630_vm4 = vcmp.ge.f32.partialorder %v1618_v9, 0.0  ;;  %v10477_v14 = vor.u32 %v12196_v18, %v10476_v33  ;;  %vm1628_vm6 = vcmp.ge.f32.partialorder %v13906_v59, 0.0 }
 0x18e   : > { %6112 = vmatpush.bf16.msra.mxu0 %v10673_v29  ;;  %v1513_v4 = vmul.f32 0.5, %v1512_v13  ;;  %v1555_v29 = vmul.f32 %v1531_v5, %v1499_v46  ;;  %v10896_v28 = vld [vmem:[%s13179_s1 + $0x13e8] sm:$0xf]  ;;  %v12301_v2 = vld [vmem:[%s13179_s1 + $0x1400] sm:$0xf0]  ;;  %v1533_v5 = vperm.slane %v13515_v16, 3  ;;  %v1654_v50 = vsel %vm1630_vm4, %v1618_v9, %v1642_v60 }
 0x18f   : > { %6085 = vmatpush.bf16.msra.mxu2 %v10253_v63  ;;  %v11878_v3 = vld [vmem:[%s13179_s1 + $0x6cc] sm:$0xf]  ;;  %v9218_v17 = vld [vmem:[%s13179_s1 + $0x6e4] sm:$0xf0]  ;;  %v1640_v42 = vmul.f32 0.2, %v13906_v59  ;;  %v1385_v63 = vsub.f32 %v13567_v25, %v13682_v22  ;;  %v10589_v16 = vor.u32 %v12224_v51, %v10588_v53  ;;  %v10897_v9 = vor.u32 %v12301_v2, %v10896_v28 }
 0x190   : > { %v1514_v62 = vsub.f32 1.5, %v1513_v4  ;;  %v10168_v61 = vld [vmem:[%s13179_s1 + $0xe38] sm:$0xf]  ;;  %v10448_v41 = vld [vmem:[%s13179_s1 + $0x1068] sm:$0xf]  ;;  %v9221_v52 = vor.u32 %v11878_v3, %v9218_v17  ;;  %v1387_v22 = vsub.f32 %v13686_v11, %v13782_v24  ;;  %v1593_v21 = vperm.slane %v13522_v27, 1 }
 0x191   : > { %6096 = vmatpush.bf16.msra.mxu3 %v10533_v58  ;;  %6076 = vmatpush.bf16.msra.mxu1 %v9917_v55  ;;  %v12119_v58 = vld [vmem:[%s13179_s1 + $0xe50] sm:$0xf0]  ;;  %v12189_v47 = vld [vmem:[%s13179_s1 + $0x1080] sm:$0xf0]  ;;  %v1567_v55 = vperm.slane %v1555_v29, 0  ;;  %v13966_v11 = vpack.c.bf16 %v1654_v50, %v1654_v50  ;;  %v1595_v46 = vperm.slane %v13522_v27, 3 }
 0x192   : > { %6113 = vmatpush.bf16.msra.mxu0 %v10645_v35  ;;  %v1515_v36 = vmul.f32 %v13884_v44, %v1514_v62  ;;  %v10868_v25 = vld [vmem:[%s13179_s1 + $0x13b0] sm:$0xf]  ;;  %v12294_v26 = vld [vmem:[%s13179_s1 + $0x13c8] sm:$0xf0]  ;;  %v11871_v20 = vld [vmem:[%s13179_s1 + $0x694] sm:$0xf]  ;;  %v10449_v57 = vor.u32 %v12189_v47, %v10448_v41 }
 0x193   : > { %6086 = vmatpush.bf16.msra.mxu2 %v10225_v7  ;;  %v9190_v13 = vld [vmem:[%s13179_s1 + $0x6ac] sm:$0xf0]  ;;  %v10140_v43 = vld [vmem:[%s13179_s1 + $0xe00] sm:$0xf]  ;;  %v12112_v56 = vld [vmem:[%s13179_s1 + $0xe18] sm:$0xf0]  ;;  %v1579_v54 = vmul.f32 %v1567_v55, %v1385_v63  ;;  %v10869_v4 = vor.u32 %v12294_v26, %v10868_v25 }
 0x194   : > { %6077 = vmatmul.bf16.vlgmr.msra.gmra.mxu1 %v13930_v49  ;;  %v1519_v35 = vsel %vm13936_vm5, %v13884_v44, %v1515_v36  ;;  %v10169_v44 = vor.u32 %v12119_v58, %v10168_v61  ;;  %v12182_v45 = vld [vmem:[%s13179_s1 + $0x1048] sm:$0xf0]  ;;  %v9193_v7 = vor.u32 %v11871_v20, %v9190_v13  ;;  %v8770_v33 = vld [vmem:[%s13179_s1 + $0x364] sm:$0xf0]  ;;  %v10840_v18 = vld [vmem:[%s13179_s1 + $0x1378] sm:$0xf]  ;;  %v10141_v27 = vor.u32 %v12112_v56, %v10140_v43 }
 0x195   : > { %6123 = vmatpush.bf16.msrb.mxu1 %v5958_v8  ;;  %6097 = vmatpush.bf16.msra.mxu3 %v10505_v48  ;;  %v1557_v10 = vmul.f32 %v1533_v5, %v1519_v35  ;;  %v10420_v8 = vld [vmem:[%s13179_s1 + $0x1030] sm:$0xf]  ;;  %v11766_v48 = vld [vmem:[%s13179_s1 + $0x34c] sm:$0xf]  ;;  %v11864_v53 = vld [vmem:[%s13179_s1 + $0x65c] sm:$0xf]  ;;  %v1617_v17 = vadd.f32 %v1593_v21, %v1579_v54 }
 0x196   : > { %6114 = vmatpush.bf16.msra.mxu0 %v10617_v6  ;;  %v12287_v6 = vld [vmem:[%s13179_s1 + $0x1390] sm:$0xf0]  ;;  %v9162_v51 = vld [vmem:[%s13179_s1 + $0x674] sm:$0xf0]  ;;  %v10421_v29 = vor.u32 %v12182_v45, %v10420_v8  ;;  %v8773_v2 = vor.u32 %v11766_v48, %v8770_v33  ;;  %v8742_v3 = vld [vmem:[%s13179_s1 + $0x32c] sm:$0xf0] }
 0x197   : > { %6087 = vmatpush.bf16.msra.mxu2 %v10197_v15  ;;  %v1569_v24 = vperm.slane %v1557_v10, 0  ;;  %v10392_v62 = vld [vmem:[%s13179_s1 + $0xff8] sm:$0xf]  ;;  %v12175_v34 = vld [vmem:[%s13179_s1 + $0x1010] sm:$0xf0]  ;;  %v10841_v36 = vor.u32 %v12287_v6, %v10840_v18  ;;  %v9165_v15 = vor.u32 %v11864_v53, %v9162_v51  ;;  %vm1629_vm8 = vcmp.ge.f32.partialorder %v1617_v17, 0.0 }
 0x198   : > { %v11759_v5 = vld [vmem:[%s13179_s1 + $0x314] sm:$0xf]  ;;  %v8546_v61 = vld [vmem:[%s13179_s1 + $0x1a4] sm:$0xf0]  ;;  %v11857_v50 = vld [vmem:[%s13179_s1 + $0x624] sm:$0xf] }
 0x199   : > { %6124 = vmatpush.bf16.msrb.mxu1 %v10925_v38  ;;  %6098 = vmatpush.bf16.msra.mxu3 %v10477_v14  ;;  %v1581_v60 = vmul.f32 %v1569_v24, %v1387_v22  ;;  %v1652_v38 = vsel %vm1628_vm6, %v13906_v59, %v1640_v42  ;;  %v10812_v14 = vld [vmem:[%s13179_s1 + $0x1340] sm:$0xf]  ;;  %v12280_v59 = vld [vmem:[%s13179_s1 + $0x1358] sm:$0xf0]  ;;  %v11710_v42 = vld [vmem:[%s13179_s1 + $0x18c] sm:$0xf] }
 0x19a   : > { %6115 = vmatpush.bf16.msra.mxu0 %v10589_v16  ;;  %v9134_v63 = vld [vmem:[%s13179_s1 + $0x63c] sm:$0xf0]  ;;  %v10393_v16 = vor.u32 %v12175_v34, %v10392_v62  ;;  %v12168_v41 = vld [vmem:[%s13179_s1 + $0xfd8] sm:$0xf0]  ;;  %v13994_v55 = vpack.c.bf16 %v1652_v38, %v1652_v38  ;;  %v11822_v25 = vld [vmem:[%s13179_s1 + $0x50c] sm:$0xf]  ;;  %v10813_v10 = vor.u32 %v12280_v59, %v10812_v14  ;;  %v8549_v13 = vor.u32 %v11710_v42, %v8546_v61 }
 0x19b   : > { %6088 = vmatpush.bf16.msra.mxu2 %v10169_v44  ;;  %v1619_v28 = vadd.f32 %v1595_v46, %v1581_v60  ;;  %v10364_v58 = vld [vmem:[%s13179_s1 + $0xfc0] sm:$0xf]  ;;  %v11752_v47 = vld [vmem:[%s13179_s1 + $0x2dc] sm:$0xf]  ;;  %v1641_v22 = vmul.f32 0.2, %v1617_v17  ;;  %v9137_v26 = vor.u32 %v11857_v50, %v9134_v63 }
 0x19c   : > { %v8994_v20 = vld [vmem:[%s13179_s1 + $0x524] sm:$0xf0]  ;;  %v11850_v21 = vld [vmem:[%s13179_s1 + $0x5ec] sm:$0xf]  ;;  %v11703_v43 = vld [vmem:[%s13179_s1 + $0x154] sm:$0xf] }
 0x19d   : > { %6125 = vmatpush.bf16.msrb.mxu1 %v10897_v9  ;;  %6099 = vmatpush.bf16.msra.mxu3 %v10449_v57  ;;  %v1643_v35 = vmul.f32 0.2, %v1619_v28  ;;  %v8745_v9 = vor.u32 %v11759_v5, %v8742_v3  ;;  %vm1631_vm7 = vcmp.ge.f32.partialorder %v1619_v28, 0.0  ;;  %v9106_v44 = vld [vmem:[%s13179_s1 + $0x604] sm:$0xf0]  ;;  %v10365_v57 = vor.u32 %v12168_v41, %v10364_v58 }
 0x19e   : > { %6173 = vmatpush.bf16.msrb.mxu0 %v9221_v52  ;;  %v8714_v52 = vld [vmem:[%s13179_s1 + $0x2f4] sm:$0xf0]  ;;  %v8518_v56 = vld [vmem:[%s13179_s1 + $0x16c] sm:$0xf0]  ;;  %v8997_v8 = vor.u32 %v11822_v25, %v8994_v20  ;;  %v11745_v45 = vld [vmem:[%s13179_s1 + $0x2a4] sm:$0xf]  ;;  %v1653_v54 = vsel %vm1629_vm8, %v1617_v17, %v1641_v22 }
 0x19f   : > { %6116 = vmatmul.bf16.vlgmr.msra.gmra.mxu0 %v13966_v11  ;;  %6089 = vmatpush.bf16.msra.mxu2 %v10141_v27  ;;  %v1655_v24 = vsel %vm1631_vm7, %v1619_v28, %v1643_v35  ;;  %v8717_v46 = vor.u32 %v11752_v47, %v8714_v52  ;;  %v11815_v48 = vld [vmem:[%s13179_s1 + $0x4d4] sm:$0xf]  ;;  %v8966_v33 = vld [vmem:[%s13179_s1 + $0x4ec] sm:$0xf0]  ;;  %v8521_v18 = vor.u32 %v11703_v43, %v8518_v56  ;;  %vm5952_vm9 = vcmask 752640  }
 0x1a0   : > { %v11843_v60 = vld [vmem:[%s13179_s1 + $0x5b4] sm:$0xf]  ;;  %v9078_v6 = vld [vmem:[%s13179_s1 + $0x5cc] sm:$0xf0]  ;;  %v14010_v53 = vpack.c.bf16 %v1655_v24, %v1655_v24  ;;  %v11696_v51 = vld [vmem:[%s13179_s1 + $0x11c] sm:$0xf]  ;;  %v8969_v38 = vor.u32 %v11815_v48, %v8966_v33 }
 0x1a1   : > { %6126 = vmatpush.bf16.msrb.mxu1 %v10869_v4  ;;  %6100 = vmatpush.bf16.msra.mxu3 %v10421_v29  ;;  %v9109_v4 = vor.u32 %v11850_v21, %v9106_v44  ;;  %v8490_v27 = vld [vmem:[%s13179_s1 + $0x134] sm:$0xf0]  ;;  %v14014_v29 = vpack.c.bf16 %v1653_v54, %v1653_v54  ;;  %v11738_v28 = vld [vmem:[%s13179_s1 + $0x26c] sm:$0xf]  ;;  %v8658_v34 = vld [vmem:[%s13179_s1 + $0x284] sm:$0xf0] }
 0x1a2   : > { %6174 = vmatpush.bf16.msrb.mxu0 %v9193_v7  ;;  %6090 = vmatmul.bf16.vlgmr.msra.gmra.mxu2 %v13994_v55  ;;  %v8686_v7 = vld [vmem:[%s13179_s1 + $0x2bc] sm:$0xf0]  ;;  %v11808_v5 = vld [vmem:[%s13179_s1 + $0x49c] sm:$0xf]  ;;  %v8938_v3 = vld [vmem:[%s13179_s1 + $0x4b4] sm:$0xf0]  ;;  %v8493_v17 = vor.u32 %v11696_v51, %v8490_v27  ;;  %v8661_v42 = vor.u32 %v11738_v28, %v8658_v34 }
 0x1a3   : > { %6147 = vmatpush.bf16.msrb.mxu2 %v8773_v2  ;;  %v8689_v62 = vor.u32 %v11745_v45, %v8686_v7  ;;  %v9081_v2 = vor.u32 %v11843_v60, %v9078_v6  ;;  %v11689_v14 = vld [vmem:[%s13179_s1 + $0xe4] sm:$0xf]  ;;  %v8462_v59 = vld [vmem:[%s13179_s1 + $0xfc] sm:$0xf0]  ;;  %v8941_v61 = vor.u32 %v11808_v5, %v8938_v3  ;;  %v11731_v50 = vld [vmem:[%s13179_s1 + $0x234] sm:$0xf] }
 0x1a4   : > { %v11801_v58 = vld [vmem:[%s13179_s1 + $0x464] sm:$0xf]  ;;  %v8910_v41 = vld [vmem:[%s13179_s1 + $0x47c] sm:$0xf0]  ;;  %v8465_v47 = vor.u32 %v11689_v14, %v8462_v59  ;;  %v11682_v35 = vld [vmem:[%s13179_s1 + $0xac] sm:$0xf] }
 0x1a5   : > { %6127 = vmatpush.bf16.msrb.mxu1 %v10841_v36  ;;  %6101 = vmatpush.bf16.msra.mxu3 %v10393_v16  ;;  %v11836_v36 = vld [vmem:[%s13179_s1 + $0x57c] sm:$0xf]  ;;  %v8630_v16 = vld [vmem:[%s13179_s1 + $0x24c] sm:$0xf0]  ;;  %v9022_v52 = vld [vmem:[%s13179_s1 + $0x55c] sm:$0xf0]  ;;  %v8913_v20 = vor.u32 %v11801_v58, %v8910_v41 }
 0x1a6   : > { %6175 = vmatpush.bf16.msrb.mxu0 %v9165_v15  ;;  %v9050_v15 = vld [vmem:[%s13179_s1 + $0x594] sm:$0xf0]  ;;  %v8434_v25 = vld [vmem:[%s13179_s1 + $0xc4] sm:$0xf0]  ;;  %v12102_v22 = vld [vmem:[%s13179_s1 + $0xdcc] sm:$0xf] }
 0x1a7   : > { %6148 = vmatpush.bf16.msrb.mxu2 %v8745_v9  ;;  %v9053_v63 = vor.u32 %v11836_v36, %v9050_v15  ;;  %v11829_v9 = vld [vmem:[%s13179_s1 + $0x544] sm:$0xf]  ;;  %v8602_v44 = vld [vmem:[%s13179_s1 + $0x214] sm:$0xf0]  ;;  %v8882_v43 = vld [vmem:[%s13179_s1 + $0x444] sm:$0xf0]  ;;  %v8437_v56 = vor.u32 %v11682_v35, %v8434_v25 }
 0x1a8   : > { %v9025_v21 = vor.u32 %v11829_v9, %v9022_v52  ;;  %v12095_v45 = vld [vmem:[%s13179_s1 + $0xd94] sm:$0xf]  ;;  %v10086_v54 = vld [vmem:[%s13179_s1 + $0xdac] sm:$0xf0]  ;;  %v11717_v48 = vld [vmem:[%s13179_s1 + $0x1c4] sm:$0xf] }
 0x1a9   : > { %6128 = vmatpush.bf16.msrb.mxu1 %v10813_v10  ;;  %6102 = vmatpush.bf16.msra.mxu3 %v10365_v57  ;;  %v10114_v10 = vld [vmem:[%s13179_s1 + $0xde4] sm:$0xf0]  ;;  %v11794_v57 = vld [vmem:[%s13179_s1 + $0x42c] sm:$0xf]  ;;  %v8574_v33 = vld [vmem:[%s13179_s1 + $0x1dc] sm:$0xf0]  ;;  %v10089_v51 = vor.u32 %v12095_v45, %v10086_v54 }
 0x1aa   : > { %6176 = vmatpush.bf16.msrb.mxu0 %v9137_v26  ;;  %v8633_v26 = vor.u32 %v11731_v50, %v8630_v16  ;;  %v10117_v24 = vor.u32 %v12102_v22, %v10114_v10  ;;  %v8885_v7 = vor.u32 %v11794_v57, %v8882_v43  ;;  %v8854_v60 = vld [vmem:[%s13179_s1 + $0x40c] sm:$0xf0]  ;;  %v11990_v27 = vld [vmem:[%s13179_s1 + $0xa4c] sm:$0xf]  ;;  %v8378_v28 = vld [vmem:[%s13179_s1 + $0x54] sm:$0xf0]  ;;  %v8577_v5 = vor.u32 %v11717_v48, %v8574_v33 }
 0x1ab   : > { %6149 = vmatpush.bf16.msrb.mxu2 %v8717_v46  ;;  %v11675_v46 = vld [vmem:[%s13179_s1 + $0x74] sm:$0xf]  ;;  %v10058_v34 = vld [vmem:[%s13179_s1 + $0xd74] sm:$0xf0]  ;;  %v11780_v36 = vld [vmem:[%s13179_s1 + $0x3bc] sm:$0xf] }
 0x1ac   : > { %10978 = vmatmul.msk.bf16.vlgmr.msrb.gmra.mxu1 %vm5952_vm9, %v14010_v53  ;;  %6103 = vmatmul.bf16.vlgmr.msra.gmra.mxu3 %v14014_v29  ;;  %v8826_v15 = vld [vmem:[%s13179_s1 + $0x3d4] sm:$0xf0]  ;;  %v11661_v50 = vld [vmem:[%s13179_s1 + $0x4] sm:$0xf]  ;;  %v10030_v58 = vld [vmem:[%s13179_s1 + $0xd3c] sm:$0xf0] }
 0x1ad   : > { %6134 = vmatpush.bf16.msra.mxu1 %v8549_v13  ;;  %6160 = vmatpush.bf16.msrb.mxu3 %v8997_v8  ;;  %v11724_v13 = vld [vmem:[%s13179_s1 + $0x1fc] sm:$0xf]  ;;  %v8406_v8 = vld [vmem:[%s13179_s1 + $0x8c] sm:$0xf0]  ;;  %v12081_v16 = vld [vmem:[%s13179_s1 + $0xd24] sm:$0xf]  ;;  %v8829_v41 = vor.u32 %v11780_v36, %v8826_v15 }
 0x1ae   : > { %6177 = vmatpush.bf16.msrb.mxu0 %v9109_v4  ;;  %v8605_v4 = vor.u32 %v11724_v13, %v8602_v44  ;;  %v8409_v6 = vor.u32 %v11675_v46, %v8406_v8  ;;  %v9442_v35 = vld [vmem:[%s13179_s1 + $0x8a4] sm:$0xf0]  ;;  %v11773_v52 = vld [vmem:[%s13179_s1 + $0x384] sm:$0xf]  ;;  %v8798_v25 = vld [vmem:[%s13179_s1 + $0x39c] sm:$0xf0]  ;;  %v10033_v10 = vor.u32 %v12081_v16, %v10030_v58 }
 0x1af   : > { %6150 = vmatpush.bf16.msrb.mxu2 %v8689_v62  ;;  %v9666_v62 = vld [vmem:[%s13179_s1 + $0xa64] sm:$0xf0]  ;;  %v12046_v13 = vld [vmem:[%s13179_s1 + $0xc0c] sm:$0xf]  ;;  %v9414_v46 = vld [vmem:[%s13179_s1 + $0x86c] sm:$0xf0] }
 0x1b0   : > { %v9890_v44 = vld [vmem:[%s13179_s1 + $0xc24] sm:$0xf0]  ;;  %v12074_v57 = vld [vmem:[%s13179_s1 + $0xcec] sm:$0xf]  ;;  %v12039_v48 = vld [vmem:[%s13179_s1 + $0xbd4] sm:$0xf] }
 0x1b1   : > { %6135 = vmatpush.bf16.msra.mxu1 %v8521_v18  ;;  %6161 = vmatpush.bf16.msrb.mxu3 %v8969_v38  ;;  %v11787_v18 = vld [vmem:[%s13179_s1 + $0x3f4] sm:$0xf]  ;;  %v11668_v38 = vld [vmem:[%s13179_s1 + $0x3c] sm:$0xf]  ;;  %v10002_v43 = vld [vmem:[%s13179_s1 + $0xd04] sm:$0xf0]  ;;  %v9893_v45 = vor.u32 %v12046_v13, %v9890_v44 }
 0x1b2   : > { %6178 = vmatpush.bf16.msrb.mxu0 %v9081_v2  ;;  %v12088_v2 = vld [vmem:[%s13179_s1 + $0xd5c] sm:$0xf]  ;;  %v8857_v3 = vor.u32 %v11787_v18, %v8854_v60  ;;  %v8381_v14 = vor.u32 %v11668_v38, %v8378_v28  ;;  %v10005_v54 = vor.u32 %v12074_v57, %v10002_v43  ;;  %v9862_v18 = vld [vmem:[%s13179_s1 + $0xbec] sm:$0xf0]  ;;  %v12067_v60 = vld [vmem:[%s13179_s1 + $0xcb4] sm:$0xf] }
 0x1b3   : > { %6151 = vmatpush.bf16.msrb.mxu2 %v8661_v42  ;;  %v10061_v59 = vor.u32 %v12088_v2, %v10058_v34  ;;  %v11983_v42 = vld [vmem:[%s13179_s1 + $0xa14] sm:$0xf]  ;;  %v11962_v38 = vld [vmem:[%s13179_s1 + $0x96c] sm:$0xf]  ;;  %v9865_v28 = vor.u32 %v12039_v48, %v9862_v18  ;;  %v9554_v34 = vld [vmem:[%s13179_s1 + $0x984] sm:$0xf0] }
 0x1b4   : > { %v11913_v36 = vld [vmem:[%s13179_s1 + $0x7e4] sm:$0xf]  ;;  %v12060_v15 = vld [vmem:[%s13179_s1 + $0xc7c] sm:$0xf]  ;;  %v11955_v58 = vld [vmem:[%s13179_s1 + $0x934] sm:$0xf] }
 0x1b5   : > { %6136 = vmatpush.bf16.msra.mxu1 %v8493_v17  ;;  %6162 = vmatpush.bf16.msrb.mxu3 %v8941_v61  ;;  %v9669_v17 = vor.u32 %v11990_v27, %v9666_v62  ;;  %v9638_v61 = vld [vmem:[%s13179_s1 + $0xa2c] sm:$0xf0]  ;;  %v9386_v27 = vld [vmem:[%s13179_s1 + $0x834] sm:$0xf0]  ;;  %v11948_v44 = vld [vmem:[%s13179_s1 + $0x8fc] sm:$0xf] }
 0x1b6   : > { %6179 = vmatpush.bf16.msrb.mxu0 %v9053_v63  ;;  %v8350_v63 = vld [vmem:[%s13179_s1 + $0x1c] sm:$0xf0]  ;;  %v9641_v9 = vor.u32 %v11983_v42, %v9638_v61  ;;  %v12312_v42 = vld [vmem:[%s13179_s1 + $0x145c] sm:$0xf]  ;;  %v10954_v61 = vld [vmem:[%s13179_s1 + $0x1474] sm:$0x30] }
 0x1b7   : > { %6152 = vmatpush.bf16.msrb.mxu2 %v8633_v26  ;;  %v8353_v22 = vor.u32 %v11661_v50, %v8350_v63  ;;  %v11976_v26 = vld [vmem:[%s13179_s1 + $0x9dc] sm:$0xf]  ;;  %v9557_v50 = vor.u32 %v11962_v38, %v9554_v34  ;;  %v9498_v57 = vld [vmem:[%s13179_s1 + $0x914] sm:$0xf0]  ;;  %v12018_v43 = vld [vmem:[%s13179_s1 + $0xb2c] sm:$0xf] }
 0x1b8   : > { %v11941_v48 = vld [vmem:[%s13179_s1 + $0x8c4] sm:$0xf]  ;;  %v9470_v18 = vld [vmem:[%s13179_s1 + $0x8dc] sm:$0xf0]  ;;  %v10562_v38 = vld [vmem:[%s13179_s1 + $0x1164] sm:$0xf0] }
 0x1b9   : > { %6137 = vmatpush.bf16.msra.mxu1 %v8465_v47  ;;  %6163 = vmatpush.bf16.msrb.mxu3 %v8913_v20  ;;  %v11934_v47 = vld [vmem:[%s13179_s1 + $0x88c] sm:$0xf]  ;;  %v9610_v20 = vld [vmem:[%s13179_s1 + $0x9f4] sm:$0xf0]  ;;  %vm701_vm10 = vcmask 353280   ;;  %vm7747_vm8 = vcmask 359424  }
 0x1ba   : > { %6180 = vmatpush.bf16.msrb.mxu0 %v9025_v21  ;;  %v9445_v21 = vor.u32 %v11934_v47, %v9442_v35  ;;  %v9613_v8 = vor.u32 %v11976_v26, %v9610_v20  ;;  %v12025_v47 = vld [vmem:[%s13179_s1 + $0xb64] sm:$0xf]  ;;  %v9330_v26 = vld [vmem:[%s13179_s1 + $0x7c4] sm:$0xf0]  ;;  %v12298_v34 = vld [vmem:[%s13179_s1 + $0x13ec] sm:$0xf] }
 0x1bb   : > { %6153 = vmatpush.bf16.msrb.mxu2 %v8605_v4  ;;  %v11969_v4 = vld [vmem:[%s13179_s1 + $0x9a4] sm:$0xf] }
 0x1bd   : > { %6138 = vmatpush.bf16.msra.mxu1 %v8437_v56  ;;  %6164 = vmatpush.bf16.msrb.mxu3 %v8885_v7  ;;  %v8801_v56 = vor.u32 %v11773_v52, %v8798_v25  ;;  %v9582_v7 = vld [vmem:[%s13179_s1 + $0x9bc] sm:$0xf0]  ;;  %v12053_v52 = vld [vmem:[%s13179_s1 + $0xc44] sm:$0xf] }
 0x1be   : > { %6225 = vmatpush.bf16.msra.mxu0 %v10117_v24  ;;  %v11927_v24 = vld [vmem:[%s13179_s1 + $0x854] sm:$0xf]  ;;  %v9585_v62 = vor.u32 %v11969_v4, %v9582_v7  ;;  %v9918_v25 = vld [vmem:[%s13179_s1 + $0xc5c] sm:$0xf0]  ;;  %v9501_v7 = vor.u32 %v11948_v44, %v9498_v57  ;;  %v12270_v57 = vld [vmem:[%s13179_s1 + $0x130c] sm:$0xf] }
 0x1bf   : > { %6181 = vmatmul.bf16.vlgmr.msrb.gmra.mxu0 %v13728_v1  ;;  %6154 = vmatpush.bf16.msrb.mxu2 %v8577_v5  ;;  %v9417_v33 = vor.u32 %v11927_v24, %v9414_v46  ;;  %v12032_v5 = vld [vmem:[%s13179_s1 + $0xb9c] sm:$0xf]  ;;  %v9778_v46 = vld [vmem:[%s13179_s1 + $0xb44] sm:$0xf0]  ;;  %v10926_v4 = vld [vmem:[%s13179_s1 + $0x143c] sm:$0xf0] }
 0x1c1   : > { %6139 = vmatpush.bf16.msra.mxu1 %v8409_v6  ;;  %6165 = vmatpush.bf16.msrb.mxu3 %v8857_v3  ;;  %v9974_v6 = vld [vmem:[%s13179_s1 + $0xccc] sm:$0xf0]  ;;  %v9834_v3 = vld [vmem:[%s13179_s1 + $0xbb4] sm:$0xf0] }
 0x1c2   : > { %6226 = vmatpush.bf16.msra.mxu0 %v10089_v51  ;;  %6155 = vmatmul.bf16.vlgmr.msrb.gmra.mxu2 %v13632_v12  ;;  %v11920_v51 = vld [vmem:[%s13179_s1 + $0x81c] sm:$0xf]  ;;  %v9977_v2 = vor.u32 %v12067_v60, %v9974_v6  ;;  %v9837_v63 = vor.u32 %v12032_v5, %v9834_v3  ;;  %v12011_v60 = vld [vmem:[%s13179_s1 + $0xaf4] sm:$0xf]  ;;  %v9750_v6 = vld [vmem:[%s13179_s1 + $0xb0c] sm:$0xf0]  ;;  %v9473_v3 = vor.u32 %v11941_v48, %v9470_v18 }
 0x1c3   : > { %6199 = vmatpush.bf16.msra.mxu2 %v9669_v17  ;;  %v9389_v17 = vor.u32 %v11920_v51, %v9386_v27  ;;  %v10898_v5 = vld [vmem:[%s13179_s1 + $0x1404] sm:$0xf0]  ;;  %v10478_v48 = vld [vmem:[%s13179_s1 + $0x10bc] sm:$0xf0] }
 0x1c5   : > { %6140 = vmatpush.bf16.msra.mxu1 %v8381_v14  ;;  %6166 = vmatpush.bf16.msrb.mxu3 %v8829_v41  ;;  %v9946_v14 = vld [vmem:[%s13179_s1 + $0xc94] sm:$0xf0]  ;;  %v9526_v41 = vld [vmem:[%s13179_s1 + $0x94c] sm:$0xf0] }
 0x1c6   : > { %6227 = vmatpush.bf16.msra.mxu0 %v10061_v59  ;;  %v9358_v59 = vld [vmem:[%s13179_s1 + $0x7fc] sm:$0xf0]  ;;  %v9949_v16 = vor.u32 %v12060_v15, %v9946_v14  ;;  %v9529_v20 = vor.u32 %v11955_v58, %v9526_v41  ;;  %v12004_v15 = vld [vmem:[%s13179_s1 + $0xabc] sm:$0xf]  ;;  %v9722_v14 = vld [vmem:[%s13179_s1 + $0xad4] sm:$0xf0] }
 0x1c7   : > { %6200 = vmatpush.bf16.msra.mxu2 %v9641_v9  ;;  %v9361_v35 = vor.u32 %v11913_v36, %v9358_v59  ;;  %v9806_v9 = vld [vmem:[%s13179_s1 + $0xb7c] sm:$0xf0]  ;;  %v12291_v58 = vld [vmem:[%s13179_s1 + $0x13b4] sm:$0xf]  ;;  %v10870_v41 = vld [vmem:[%s13179_s1 + $0x13cc] sm:$0xf0] }
 0x1c8   : > { %v9809_v13 = vor.u32 %v12025_v47, %v9806_v9  ;;  %v12158_v47 = vld [vmem:[%s13179_s1 + $0xf8c] sm:$0xf]  ;;  %v9725_v9 = vor.u32 %v12004_v15, %v9722_v14  ;;  %v10450_v14 = vld [vmem:[%s13179_s1 + $0x1084] sm:$0xf0] }
 0x1c9   : > { %6141 = vmatpush.bf16.msra.mxu1 %v8353_v22  ;;  %6167 = vmatpush.bf16.msrb.mxu3 %v8801_v56  ;;  %v10957_v22 = vor.u32 %v12312_v42, %v10954_v61  ;;  %v10901_v42 = vor.u32 %v12298_v34, %v10898_v5  ;;  %v12207_v61 = vld [vmem:[%s13179_s1 + $0x1114] sm:$0xf] }
 0x1ca   : > { %6228 = vmatpush.bf16.msra.mxu0 %v10033_v10  ;;  %v11906_v10 = vld [vmem:[%s13179_s1 + $0x7ac] sm:$0xf] }
 0x1cb   : > { %6201 = vmatpush.bf16.msra.mxu2 %v9613_v8  ;;  %v9333_v56 = vor.u32 %v11906_v10, %v9330_v26  ;;  %v5961_v24 = vsel %vm5956_vm1, %v10957_v22, 0  ;;  %v11899_v8 = vld [vmem:[%s13179_s1 + $0x774] sm:$0xf]  ;;  %v14136_v22 = vpop.f32.mrf.mxu0  ;;  %v10873_v26 = vor.u32 %v12291_v58, %v10870_v41  ;;  %v8524_v58 = vld [vmem:[%s13179_s1 + $0x158] sm:$0xf] }
 0x1cc   : > { %6142 = vmatmul.bf16.vlgmr.msra.gmra.mxu1 %v13481_v31  ;;  %6168 = vmatmul.bf16.vlgmr.msrb.gmra.mxu3 %v13428_v30  ;;  %v11707_v41 = vld [vmem:[%s13179_s1 + $0x170] sm:$0xf0] }
 0x1cd   : > { %6186 = vmatpush.bf16.msrb.mxu1 %v9445_v21  ;;  %6212 = vmatpush.bf16.msra.mxu3 %v9893_v45  ;;  %v9921_v21 = vor.u32 %v12053_v52, %v9918_v25  ;;  %v9302_v45 = vld [vmem:[%s13179_s1 + $0x78c] sm:$0xf0]  ;;  %v11997_v25 = vld [vmem:[%s13179_s1 + $0xa84] sm:$0xf] }
 0x1ce   : > { %6229 = vmatpush.bf16.msra.mxu0 %v10005_v54  ;;  %v12305_v54 = vld [vmem:[%s13179_s1 + $0x1424] sm:$0xf]  ;;  %v9305_v51 = vor.u32 %v11899_v8, %v9302_v45  ;;  %v10842_v8 = vld [vmem:[%s13179_s1 + $0x1394] sm:$0xf0] }
 0x1cf   : > { %6202 = vmatpush.bf16.msra.mxu2 %v9585_v62  ;;  %v10929_v27 = vor.u32 %v12305_v54, %v10926_v4  ;;  %v12214_v62 = vld [vmem:[%s13179_s1 + $0x114c] sm:$0xf] }
 0x1d0   : > { %v10565_v36 = vor.u32 %v12214_v62, %v10562_v38  ;;  %v12277_v62 = vld [vmem:[%s13179_s1 + $0x1344] sm:$0xf]  ;;  %v10814_v38 = vld [vmem:[%s13179_s1 + $0x135c] sm:$0xf0] }
 0x1d1   : > { %6187 = vmatpush.bf16.msrb.mxu1 %v9417_v33  ;;  %6213 = vmatpush.bf16.msra.mxu3 %v9865_v28  ;;  %v9781_v33 = vor.u32 %v12018_v43, %v9778_v46  ;;  %v11892_v28 = vld [vmem:[%s13179_s1 + $0x73c] sm:$0xf]  ;;  %v10786_v43 = vld [vmem:[%s13179_s1 + $0x1324] sm:$0xf0]  ;;  %v10817_v15 = vor.u32 %v12277_v62, %v10814_v38  ;;  %v10366_v62 = vld [vmem:[%s13179_s1 + $0xfdc] sm:$0xf0] }
 0x1d2   : > { %6230 = vmatpush.bf16.msra.mxu0 %v9977_v2  ;;  %v9274_v2 = vld [vmem:[%s13179_s1 + $0x754] sm:$0xf0]  ;;  %v12284_v46 = vld [vmem:[%s13179_s1 + $0x137c] sm:$0xf]  ;;  %v10789_v4 = vor.u32 %v12270_v57, %v10786_v43 }
 0x1d3   : > { %6203 = vmatpush.bf16.msra.mxu2 %v9557_v50  ;;  %v9277_v59 = vor.u32 %v11892_v28, %v9274_v2  ;;  %v10534_v50 = vld [vmem:[%s13179_s1 + $0x112c] sm:$0xf0]  ;;  %v10845_v18 = vor.u32 %v12284_v46, %v10842_v8  ;;  %v11714_v2 = vld [vmem:[%s13179_s1 + $0x1a8] sm:$0xf0]  ;;  %v6015_v34 = vpop.f32.mrf.mxu0  ;;  %v11700_v57 = vld [vmem:[%s13179_s1 + $0x138] sm:$0xf0] }
 0x1d4   : > { %v10537_v52 = vor.u32 %v12207_v61, %v10534_v50  ;;  %v8552_v28 = vld [vmem:[%s13179_s1 + $0x190] sm:$0xf]  ;;  %v12137_v50 = vld [vmem:[%s13179_s1 + $0xee4] sm:$0xf]  ;;  %v10394_v8 = vld [vmem:[%s13179_s1 + $0x1014] sm:$0xf0] }
 0x1d5   : > { %6188 = vmatpush.bf16.msrb.mxu1 %v9389_v17  ;;  %6214 = vmatpush.bf16.msra.mxu3 %v9837_v63  ;;  %v9753_v17 = vor.u32 %v12011_v60, %v9750_v6  ;;  %v11885_v63 = vld [vmem:[%s13179_s1 + $0x704] sm:$0xf]  ;;  %v12263_v60 = vld [vmem:[%s13179_s1 + $0x12d4] sm:$0xf]  ;;  %v10758_v6 = vld [vmem:[%s13179_s1 + $0x12ec] sm:$0xf0]  ;;  %v8553_v61 = vor.u32 %v11714_v2, %v8552_v28 }
 0x1d6   : > { %6231 = vmatpush.bf16.msra.mxu0 %v9949_v16  ;;  %v9246_v16 = vld [vmem:[%s13179_s1 + $0x71c] sm:$0xf0]  ;;  %v12235_v28 = vld [vmem:[%s13179_s1 + $0x11f4] sm:$0xf]  ;;  %v10646_v2 = vld [vmem:[%s13179_s1 + $0x120c] sm:$0xf0] }
 0x1d7   : > { %6204 = vmatpush.bf16.msra.mxu2 %v9529_v20  ;;  %v9249_v10 = vor.u32 %v11885_v63, %v9246_v16  ;;  %v9694_v20 = vld [vmem:[%s13179_s1 + $0xa9c] sm:$0xf0]  ;;  %v5987_v16 = vpop.f32.mrf.mxu2  ;;  %v9000_v34 = vld [vmem:[%s13179_s1 + $0x510] sm:$0xf] }
 0x1d8   : > { %v9697_v45 = vor.u32 %v11997_v25, %v9694_v20  ;;  %v10254_v63 = vld [vmem:[%s13179_s1 + $0xefc] sm:$0xf0]  ;;  %v10422_v25 = vld [vmem:[%s13179_s1 + $0x104c] sm:$0xf0]  ;;  %v8525_v20 = vor.u32 %v11707_v41, %v8524_v58  ;;  %v12228_v58 = vld [vmem:[%s13179_s1 + $0x11bc] sm:$0xf] }
 0x1d9   : > { %6189 = vmatpush.bf16.msrb.mxu1 %v9361_v35  ;;  %6215 = vmatpush.bf16.msra.mxu3 %v9809_v13  ;;  %v10338_v35 = vld [vmem:[%s13179_s1 + $0xfa4] sm:$0xf0]  ;;  %v12200_v13 = vld [vmem:[%s13179_s1 + $0x10dc] sm:$0xf] }
 0x1da   : > { %6232 = vmatpush.bf16.msra.mxu0 %v9921_v21  ;;  %v10506_v21 = vld [vmem:[%s13179_s1 + $0x10f4] sm:$0xf0]  ;;  %v10341_v44 = vor.u32 %v12158_v47, %v10338_v35 }
 0x1db   : > { %6205 = vmatpush.bf16.msra.mxu2 %v9501_v7  ;;  %v10509_v54 = vor.u32 %v12200_v13, %v10506_v21  ;;  %v12193_v7 = vld [vmem:[%s13179_s1 + $0x10a4] sm:$0xf]  ;;  %v12130_v13 = vld [vmem:[%s13179_s1 + $0xeac] sm:$0xf]  ;;  %v10226_v21 = vld [vmem:[%s13179_s1 + $0xec4] sm:$0xf0] }
 0x1dc   : > { %v10481_v5 = vor.u32 %v12193_v7, %v10478_v48  ;;  %v10229_v46 = vor.u32 %v12130_v13, %v10226_v21  ;;  %v12123_v7 = vld [vmem:[%s13179_s1 + $0xe74] sm:$0xf]  ;;  %v10198_v48 = vld [vmem:[%s13179_s1 + $0xe8c] sm:$0xf0] }
 0x1dd   : > { %6190 = vmatpush.bf16.msrb.mxu1 %v9333_v56  ;;  %6233 = vmatmul.bf16.vlgmr.msra.gmra.mxu0 %v13930_v49  ;;  %v12151_v56 = vld [vmem:[%s13179_s1 + $0xf54] sm:$0xf]  ;;  %v10201_v38 = vor.u32 %v12123_v7, %v10198_v48  ;;  %v9224_v48 = vld [vmem:[%s13179_s1 + $0x6d0] sm:$0xf] }
 0x1de   : > { %6279 = vmatpush.bf16.msrb.mxu0 %v5961_v24  ;;  %6216 = vmatpush.bf16.msra.mxu3 %v9781_v33  ;;  %v10310_v24 = vld [vmem:[%s13179_s1 + $0xf6c] sm:$0xf0]  ;;  %v11679_v21 = vld [vmem:[%s13179_s1 + $0x90] sm:$0xf0] }
 0x1df   : > { %6206 = vmatpush.bf16.msra.mxu2 %v9473_v3  ;;  %v10313_v33 = vor.u32 %v12151_v56, %v10310_v24  ;;  %v10761_v3 = vor.u32 %v12263_v60, %v10758_v6  ;;  %v12172_v24 = vld [vmem:[%s13179_s1 + $0xffc] sm:$0xf]  ;;  %v11693_v60 = vld [vmem:[%s13179_s1 + $0x100] sm:$0xf0] }
 0x1e0   : > { %v10397_v6 = vor.u32 %v12172_v24, %v10394_v8  ;;  %v8944_v8 = vld [vmem:[%s13179_s1 + $0x4a0] sm:$0xf] }
 0x1e1   : > { %6191 = vmatpush.bf16.msrb.mxu1 %v9305_v51  ;;  %v12144_v51 = vld [vmem:[%s13179_s1 + $0xf1c] sm:$0xf] }
 0x1e2   : > { %6280 = vmatpush.bf16.msrb.mxu0 %v10929_v27  ;;  %6217 = vmatpush.bf16.msra.mxu3 %v9753_v17  ;;  %v10282_v27 = vld [vmem:[%s13179_s1 + $0xf34] sm:$0xf0]  ;;  %v12186_v17 = vld [vmem:[%s13179_s1 + $0x106c] sm:$0xf] }
 0x1e3   : > { %6251 = vmatpush.bf16.msrb.mxu2 %v10565_v36  ;;  %v10285_v36 = vor.u32 %v12144_v51, %v10282_v27  ;;  %v10453_v47 = vor.u32 %v12186_v17, %v10450_v14  ;;  %v12165_v27 = vld [vmem:[%s13179_s1 + $0xfc4] sm:$0xf]  ;;  %v11826_v17 = vld [vmem:[%s13179_s1 + $0x528] sm:$0xf0] }
 0x1e4   : > { %6207 = vmatmul.bf16.vlgmr.msra.gmra.mxu2 %v13879_v39 }
 0x1e5   : > { %6192 = vmatpush.bf16.msrb.mxu1 %v9277_v59  ;;  %v12256_v59 = vld [vmem:[%s13179_s1 + $0x129c] sm:$0xf] }
 0x1e6   : > { %6281 = vmatpush.bf16.msrb.mxu0 %v10901_v42  ;;  %6218 = vmatpush.bf16.msra.mxu3 %v9725_v9  ;;  %v10730_v42 = vld [vmem:[%s13179_s1 + $0x12b4] sm:$0xf0]  ;;  %v12179_v9 = vld [vmem:[%s13179_s1 + $0x1034] sm:$0xf] }
 0x1e7   : > { %6252 = vmatpush.bf16.msrb.mxu2 %v10537_v52  ;;  %v10733_v35 = vor.u32 %v12256_v59, %v10730_v42  ;;  %v10257_v52 = vor.u32 %v12137_v50, %v10254_v63  ;;  %v10425_v43 = vor.u32 %v12179_v9, %v10422_v25  ;;  %v8440_v59 = vld [vmem:[%s13179_s1 + $0xb0] sm:$0xf]  ;;  %v11686_v42 = vld [vmem:[%s13179_s1 + $0xc8] sm:$0xf0]  ;;  %v10369_v50 = vor.u32 %v12165_v27, %v10366_v62  ;;  %v8972_v9 = vld [vmem:[%s13179_s1 + $0x4d8] sm:$0xf] }
 0x1e8   : > { %v10649_v63 = vor.u32 %v12235_v28, %v10646_v2  ;;  %v8441_v25 = vor.u32 %v11686_v42, %v8440_v59  ;;  %v8916_v2 = vld [vmem:[%s13179_s1 + $0x468] sm:$0xf]  ;;  %v11665_v59 = vld [vmem:[%s13179_s1 + $0x20] sm:$0xf0]  ;;  %v8720_v42 = vld [vmem:[%s13179_s1 + $0x2e0] sm:$0xf] }
 0x1e9   : > { %6193 = vmatpush.bf16.msrb.mxu1 %v9249_v10  ;;  %v12249_v10 = vld [vmem:[%s13179_s1 + $0x1264] sm:$0xf] }
 0x1ea   : > { %6282 = vmatpush.bf16.msrb.mxu0 %v10873_v26  ;;  %6219 = vmatpush.bf16.msra.mxu3 %v9697_v45  ;;  %v10702_v26 = vld [vmem:[%s13179_s1 + $0x127c] sm:$0xf0]  ;;  %v12242_v45 = vld [vmem:[%s13179_s1 + $0x122c] sm:$0xf] }
 0x1eb   : > { %6253 = vmatpush.bf16.msrb.mxu2 %v10509_v54  ;;  %v10705_v56 = vor.u32 %v12249_v10, %v10702_v26  ;;  %v10674_v54 = vld [vmem:[%s13179_s1 + $0x1244] sm:$0xf0]  ;;  %v12109_v10 = vld [vmem:[%s13179_s1 + $0xe04] sm:$0xf]  ;;  %v10142_v26 = vld [vmem:[%s13179_s1 + $0xe1c] sm:$0xf0] }
 0x1ec   : > { %6194 = vmatmul.bf16.vlgmr.msrb.gmra.mxu1 %v13847_v0  ;;  %v10677_v51 = vor.u32 %v12242_v45, %v10674_v54  ;;  %v10145_v24 = vor.u32 %v12109_v10, %v10142_v26  ;;  %v11812_v45 = vld [vmem:[%s13179_s1 + $0x4b8] sm:$0xf0]  ;;  %v8692_v26 = vld [vmem:[%s13179_s1 + $0x2a8] sm:$0xf] }
 0x1ed   : > { %6238 = vmatpush.bf16.msra.mxu1 %v10341_v44  ;;  %6220 = vmatmul.bf16.vlgmr.msra.gmra.mxu3 %v13802_v37  ;;  %v8496_v44 = vld [vmem:[%s13179_s1 + $0x120] sm:$0xf] }
 0x1ee   : > { %6264 = vmatpush.bf16.msrb.mxu3 %v10789_v4  ;;  %6283 = vmatpush.bf16.msrb.mxu0 %v10845_v18  ;;  %v8497_v4 = vor.u32 %v11700_v57, %v8496_v44  ;;  %v8468_v18 = vld [vmem:[%s13179_s1 + $0xe8] sm:$0xf]  ;;  %v8776_v44 = vld [vmem:[%s13179_s1 + $0x350] sm:$0xf] }
 0x1ef   : > { %6254 = vmatpush.bf16.msrb.mxu2 %v10481_v5  ;;  %v6000_v5 = vpop.f32.mrf.mxu3 }
 0x1f0   : > { %v6001_v14 = vadd.f32 %v6000_v5, %v5987_v16  ;;  %v10618_v16 = vld [vmem:[%s13179_s1 + $0x11d4] sm:$0xf0] }
 0x1f1   : > { %6239 = vmatpush.bf16.msra.mxu1 %v10313_v33  ;;  %v5989_v33 = vpop.f32.mrf.mxu2  ;;  %v10621_v57 = vor.u32 %v12228_v58, %v10618_v16 }
 0x1f2   : > { %6265 = vmatpush.bf16.msrb.mxu3 %v10761_v3  ;;  %6284 = vmatpush.bf16.msrb.mxu0 %v10817_v15  ;;  %v8469_v3 = vor.u32 %v11693_v60, %v8468_v18  ;;  %v10170_v15 = vld [vmem:[%s13179_s1 + $0xe54] sm:$0xf0]  ;;  %v6014_v41 = vadd.f32 %v14136_v22, %v6001_v14  ;;  %v11770_v22 = vld [vmem:[%s13179_s1 + $0x368] sm:$0xf0]  ;;  %v8384_v18 = vld [vmem:[%s13179_s1 + $0x40] sm:$0xf] }
 0x1f3   : > { %6255 = vmatpush.bf16.msrb.mxu2 %v10453_v47  ;;  %v9001_v47 = vor.u32 %v11826_v17, %v9000_v34  ;;  %v8777_v7 = vor.u32 %v11770_v22, %v8776_v44  ;;  %v11882_v33 = vld [vmem:[%s13179_s1 + $0x6e8] sm:$0xf0]  ;;  %v11672_v60 = vld [vmem:[%s13179_s1 + $0x58] sm:$0xf0]  ;;  %v11805_v34 = vld [vmem:[%s13179_s1 + $0x480] sm:$0xf0] }
 0x1f4   : > { %v9225_v28 = vor.u32 %v11882_v33, %v9224_v48  ;;  %v8356_v14 = vld [vmem:[%s13179_s1 + $0x8] sm:$0xf]  ;;  %v8917_v58 = vor.u32 %v11805_v34, %v8916_v2  ;;  %v11931_v44 = vld [vmem:[%s13179_s1 + $0x870] sm:$0xf0]  ;;  %v9392_v48 = vld [vmem:[%s13179_s1 + $0x820] sm:$0xf] }
 0x1f5   : > { %6240 = vmatpush.bf16.msra.mxu1 %v10285_v36  ;;  %10979 = vmatmul.msk.bf16.vlgmr.msrb.gmra.mxu0 %vm5952_vm9, %v14010_v53  ;;  %v12116_v36 = vld [vmem:[%s13179_s1 + $0xe3c] sm:$0xf] }
 0x1f6   : > { %6290 = vmatpush.bf16.msra.mxu0 %v8553_v61  ;;  %6266 = vmatpush.bf16.msrb.mxu3 %v10733_v35  ;;  %v6026_v61 = vpop.f32.mrf.mxu1  ;;  %v10173_v35 = vor.u32 %v12116_v36, %v10170_v15  ;;  %v9196_v36 = vld [vmem:[%s13179_s1 + $0x698] sm:$0xf]  ;;  %v11875_v15 = vld [vmem:[%s13179_s1 + $0x6b0] sm:$0xf0]  ;;  %v11924_v33 = vld [vmem:[%s13179_s1 + $0x838] sm:$0xf0] }
 0x1f7   : > { %6256 = vmatpush.bf16.msrb.mxu2 %v10425_v43  ;;  %v14204_v13 = vadd.f32 %v6026_v61, %v6014_v41  ;;  %v12221_v43 = vld [vmem:[%s13179_s1 + $0x1184] sm:$0xf]  ;;  %v6002_v54 = vpop.f32.mrf.mxu3  ;;  %v11756_v61 = vld [vmem:[%s13179_s1 + $0x2f8] sm:$0xf0]  ;;  %v9197_v41 = vor.u32 %v11875_v15, %v9196_v36  ;;  %v9393_v34 = vor.u32 %v11924_v33, %v9392_v48  ;;  %v9364_v36 = vld [vmem:[%s13179_s1 + $0x7e8] sm:$0xf] }
 0x1f8   : > { %v8721_v16 = vor.u32 %v11756_v61, %v8720_v42  ;;  %v11917_v15 = vld [vmem:[%s13179_s1 + $0x800] sm:$0xf0]  ;;  %v8804_v42 = vld [vmem:[%s13179_s1 + $0x388] sm:$0xf]  ;;  %v9672_v48 = vld [vmem:[%s13179_s1 + $0xa50] sm:$0xf] }
 0x1f9   : > { %6241 = vmatpush.bf16.msra.mxu1 %v10257_v52  ;;  %v11819_v52 = vld [vmem:[%s13179_s1 + $0x4f0] sm:$0xf0]  ;;  %v11777_v61 = vld [vmem:[%s13179_s1 + $0x3a0] sm:$0xf0]  ;;  %v11994_v33 = vld [vmem:[%s13179_s1 + $0xa68] sm:$0xf0] }
 0x1fa   : > { %6291 = vmatpush.bf16.msra.mxu0 %v8525_v20  ;;  %6267 = vmatpush.bf16.msrb.mxu3 %v10705_v56  ;;  %v8412_v20 = vld [vmem:[%s13179_s1 + $0x78] sm:$0xf]  ;;  %v8973_v56 = vor.u32 %v11819_v52, %v8972_v9  ;;  %v11798_v9 = vld [vmem:[%s13179_s1 + $0x448] sm:$0xf0]  ;;  %v9168_v52 = vld [vmem:[%s13179_s1 + $0x660] sm:$0xf] }
 0x1fb   : > { %6257 = vmatpush.bf16.msrb.mxu2 %v10397_v6  ;;  %v8748_v6 = vld [vmem:[%s13179_s1 + $0x318] sm:$0xf] }
 0x1fc   : > { %v14222_v5 = vpop.f32.mrf.mxu0 }
 0x1fd   : > { %6242 = vmatpush.bf16.msra.mxu1 %v10229_v46  ;;  %v10590_v46 = vld [vmem:[%s13179_s1 + $0x119c] sm:$0xf0] }
 0x1fe   : > { %6292 = vmatpush.bf16.msra.mxu0 %v8497_v4  ;;  %6268 = vmatpush.bf16.msrb.mxu3 %v10677_v51  ;;  %v8413_v4 = vor.u32 %v11679_v21, %v8412_v20  ;;  %v11763_v51 = vld [vmem:[%s13179_s1 + $0x330] sm:$0xf0]  ;;  %v6028_v27 = vpop.f32.mrf.mxu1  ;;  %v10593_v62 = vor.u32 %v12221_v43, %v10590_v46  ;;  %v11749_v20 = vld [vmem:[%s13179_s1 + $0x2c0] sm:$0xf0]  ;;  %v9420_v21 = vld [vmem:[%s13179_s1 + $0x858] sm:$0xf] }
 0x1ff   : > { %6258 = vmatpush.bf16.msrb.mxu2 %v10369_v50  ;;  %v8749_v17 = vor.u32 %v11763_v51, %v8748_v6  ;;  %v9448_v50 = vld [vmem:[%s13179_s1 + $0x890] sm:$0xf]  ;;  %v8860_v43 = vld [vmem:[%s13179_s1 + $0x3f8] sm:$0xf]  ;;  %v11791_v46 = vld [vmem:[%s13179_s1 + $0x410] sm:$0xf0]  ;;  %v9421_v54 = vor.u32 %v11931_v44, %v9420_v21 }
 0x200   : > { %v8832_v6 = vld [vmem:[%s13179_s1 + $0x3c0] sm:$0xf] }
 0x201   : > { %6243 = vmatpush.bf16.msra.mxu1 %v10201_v38  ;;  %v8945_v38 = vor.u32 %v11812_v45, %v8944_v8  ;;  %v9140_v8 = vld [vmem:[%s13179_s1 + $0x628] sm:$0xf]  ;;  %v11861_v45 = vld [vmem:[%s13179_s1 + $0x640] sm:$0xf0] }
 0x202   : > { %6293 = vmatpush.bf16.msra.mxu0 %v8469_v3  ;;  %6269 = vmatpush.bf16.msrb.mxu3 %v10649_v63  ;;  %v8385_v3 = vor.u32 %v11672_v60, %v8384_v18  ;;  %v11938_v63 = vld [vmem:[%s13179_s1 + $0x8a8] sm:$0xf0]  ;;  %v8861_v18 = vor.u32 %v11791_v46, %v8860_v43  ;;  %v9141_v60 = vor.u32 %v11861_v45, %v9140_v8  ;;  %v9868_v43 = vld [vmem:[%s13179_s1 + $0xbd8] sm:$0xf]  ;;  %v8580_v45 = vld [vmem:[%s13179_s1 + $0x1c8] sm:$0xf] }
 0x203   : > { %6316 = vmatpush.bf16.msra.mxu2 %v9001_v47  ;;  %v8888_v47 = vld [vmem:[%s13179_s1 + $0x430] sm:$0xf]  ;;  %v9449_v10 = vor.u32 %v11938_v63, %v9448_v50  ;;  %v9084_v50 = vld [vmem:[%s13179_s1 + $0x5b8] sm:$0xf]  ;;  %v11847_v63 = vld [vmem:[%s13179_s1 + $0x5d0] sm:$0xf0] }
 0x204   : > { %6259 = vmatmul.bf16.vlgmr.msrb.gmra.mxu2 %v14014_v29  ;;  %v8889_v22 = vor.u32 %v11798_v9, %v8888_v47  ;;  %v12050_v47 = vld [vmem:[%s13179_s1 + $0xc28] sm:$0xf0]  ;;  %v9336_v9 = vld [vmem:[%s13179_s1 + $0x7b0] sm:$0xf] }
 0x205   : > { %6244 = vmatpush.bf16.msra.mxu1 %v10173_v35  ;;  %v8357_v35 = vor.u32 %v11665_v59, %v8356_v14  ;;  %v6039_v51 = vpop.f32.mrf.mxu2 }
 0x206   : > { %6294 = vmatpush.bf16.msra.mxu0 %v8441_v25  ;;  %6270 = vmatpush.bf16.msrb.mxu3 %v10621_v57  ;;  %v11868_v25 = vld [vmem:[%s13179_s1 + $0x678] sm:$0xf0]  ;;  %v6040_v2 = vadd.f32 %v6039_v51, %v14204_v13 }
 0x207   : > { %6317 = vmatpush.bf16.msra.mxu2 %v8973_v56  ;;  %v9169_v57 = vor.u32 %v11868_v25, %v9168_v52  ;;  %v6067_v56 = vpop.f32.mrf.mxu0  ;;  %v11910_v52 = vld [vmem:[%s13179_s1 + $0x7c8] sm:$0xf0]  ;;  %v8805_v25 = vor.u32 %v11777_v61, %v8804_v42 }
 0x208   : > { %v12043_v56 = vld [vmem:[%s13179_s1 + $0xbf0] sm:$0xf0]  ;;  %v9337_v8 = vor.u32 %v11910_v52, %v9336_v9  ;;  %v10092_v9 = vld [vmem:[%s13179_s1 + $0xd98] sm:$0xf] }
 0x209   : > { %6245 = vmatpush.bf16.msra.mxu1 %v10145_v24  ;;  %v8693_v24 = vor.u32 %v11749_v20, %v8692_v26  ;;  %v9056_v26 = vld [vmem:[%s13179_s1 + $0x580] sm:$0xf]  ;;  %v9869_v51 = vor.u32 %v12043_v56, %v9868_v43  ;;  %v12099_v52 = vld [vmem:[%s13179_s1 + $0xdb0] sm:$0xf0]  ;;  %v9784_v43 = vld [vmem:[%s13179_s1 + $0xb30] sm:$0xf] }
 0x20a   : > { %6295 = vmatpush.bf16.msra.mxu0 %v8413_v4  ;;  %6271 = vmatpush.bf16.msrb.mxu3 %v10593_v62  ;;  %v8664_v4 = vld [vmem:[%s13179_s1 + $0x270] sm:$0xf]  ;;  %v11784_v62 = vld [vmem:[%s13179_s1 + $0x3d8] sm:$0xf0] }
 0x20b   : > { %6318 = vmatpush.bf16.msra.mxu2 %v8945_v38  ;;  %v9112_v38 = vld [vmem:[%s13179_s1 + $0x5f0] sm:$0xf]  ;;  %v8833_v14 = vor.u32 %v11784_v62, %v8832_v6  ;;  %v9028_v6 = vld [vmem:[%s13179_s1 + $0x548] sm:$0xf]  ;;  %v11833_v62 = vld [vmem:[%s13179_s1 + $0x560] sm:$0xf0] }
 0x20c   : > { %6246 = vmatmul.bf16.vlgmr.msra.gmra.mxu1 %v13994_v55  ;;  %v9029_v42 = vor.u32 %v11833_v62, %v9028_v6  ;;  %v12015_v62 = vld [vmem:[%s13179_s1 + $0xb10] sm:$0xf0] }
 0x20d   : > { %6303 = vmatpush.bf16.msrb.mxu1 %v8777_v7  ;;  %6272 = vmatmul.bf16.vlgmr.msrb.gmra.mxu3 %v13966_v11  ;;  %v11742_v7 = vld [vmem:[%s13179_s1 + $0x288] sm:$0xf0]  ;;  %v6041_v20 = vpop.f32.mrf.mxu2 }
 0x20e   : > { %6329 = vmatpush.bf16.msra.mxu3 %v9225_v28  ;;  %6296 = vmatpush.bf16.msra.mxu0 %v8385_v3  ;;  %v8665_v27 = vor.u32 %v11742_v7, %v8664_v4  ;;  %v11854_v28 = vld [vmem:[%s13179_s1 + $0x608] sm:$0xf0]  ;;  %v8636_v3 = vld [vmem:[%s13179_s1 + $0x238] sm:$0xf]  ;;  %v11903_v7 = vld [vmem:[%s13179_s1 + $0x790] sm:$0xf0] }
 0x20f   : > { %6319 = vmatpush.bf16.msra.mxu2 %v8917_v58  ;;  %v9113_v59 = vor.u32 %v11854_v28, %v9112_v38  ;;  %v9896_v58 = vld [vmem:[%s13179_s1 + $0xc10] sm:$0xf]  ;;  %v6052_v21 = vpop.f32.mrf.mxu3  ;;  %v9308_v4 = vld [vmem:[%s13179_s1 + $0x778] sm:$0xf]  ;;  %v9840_v38 = vld [vmem:[%s13179_s1 + $0xba0] sm:$0xf] }
 0x210   : > { %v9897_v44 = vor.u32 %v12050_v47, %v9896_v58  ;;  %v12036_v28 = vld [vmem:[%s13179_s1 + $0xbb8] sm:$0xf0]  ;;  %v9812_v58 = vld [vmem:[%s13179_s1 + $0xb68] sm:$0xf] }
 0x211   : > { %6304 = vmatpush.bf16.msrb.mxu1 %v8749_v17  ;;  %v11735_v17 = vld [vmem:[%s13179_s1 + $0x250] sm:$0xf0]  ;;  %v6078_v46 = vpop.f32.mrf.mxu1  ;;  %v11980_v20 = vld [vmem:[%s13179_s1 + $0x9f8] sm:$0xf0] }
 0x212   : > { %6330 = vmatpush.bf16.msra.mxu3 %v9197_v41  ;;  %6297 = vmatpush.bf16.msra.mxu0 %v8357_v35  ;;  %v8637_v13 = vor.u32 %v11735_v17, %v8636_v3  ;;  %v9365_v41 = vor.u32 %v11917_v15, %v9364_v36  ;;  %v8608_v35 = vld [vmem:[%s13179_s1 + $0x200] sm:$0xf]  ;;  %v10120_v3 = vld [vmem:[%s13179_s1 + $0xdd0] sm:$0xf]  ;;  %v12106_v17 = vld [vmem:[%s13179_s1 + $0xde8] sm:$0xf0] }
 0x213   : > { %6320 = vmatpush.bf16.msra.mxu2 %v8889_v22  ;;  %v9280_v36 = vld [vmem:[%s13179_s1 + $0x740] sm:$0xf]  ;;  %v11896_v15 = vld [vmem:[%s13179_s1 + $0x758] sm:$0xf0] }
 0x215   : > { %6305 = vmatpush.bf16.msrb.mxu1 %v8721_v16  ;;  %6298 = vmatmul.bf16.vlgmr.msra.gmra.mxu0 %v13481_v31  ;;  %v11728_v16 = vld [vmem:[%s13179_s1 + $0x218] sm:$0xf0] }
 0x216   : > { %6342 = vmatpush.bf16.msrb.mxu0 %v9449_v10  ;;  %6331 = vmatpush.bf16.msra.mxu3 %v9169_v57  ;;  %v9085_v10 = vor.u32 %v11847_v63, %v9084_v50  ;;  %v8609_v22 = vor.u32 %v11728_v16, %v8608_v35  ;;  %v11840_v57 = vld [vmem:[%s13179_s1 + $0x598] sm:$0xf0]  ;;  %v9841_v50 = vor.u32 %v12036_v28, %v9840_v38  ;;  %v10036_v38 = vld [vmem:[%s13179_s1 + $0xd28] sm:$0xf]  ;;  %v12085_v28 = vld [vmem:[%s13179_s1 + $0xd40] sm:$0xf0] }
 0x217   : > { %6321 = vmatpush.bf16.msra.mxu2 %v8861_v18  ;;  %v6054_v61 = vpop.f32.mrf.mxu3  ;;  %v10121_v63 = vor.u32 %v12106_v17, %v10120_v3  ;;  %v9281_v35 = vor.u32 %v11896_v15, %v9280_v36  ;;  %v11966_v3 = vld [vmem:[%s13179_s1 + $0x988] sm:$0xf0]  ;;  %v10288_v17 = vld [vmem:[%s13179_s1 + $0xf20] sm:$0xf]  ;;  %v12148_v36 = vld [vmem:[%s13179_s1 + $0xf38] sm:$0xf0] }
 0x219   : > { %6306 = vmatpush.bf16.msrb.mxu1 %v8693_v24  ;;  %v6053_v24 = vadd.f32 %v6052_v21, %v6040_v2  ;;  %v6080_v47 = vpop.f32.mrf.mxu1  ;;  %v10344_v21 = vld [vmem:[%s13179_s1 + $0xf90] sm:$0xf] }
 0x21a   : > { %6343 = vmatpush.bf16.msrb.mxu0 %v9421_v54  ;;  %6332 = vmatpush.bf16.msra.mxu3 %v9141_v60  ;;  %v11721_v54 = vld [vmem:[%s13179_s1 + $0x1e0] sm:$0xf0]  ;;  %v9057_v60 = vor.u32 %v11840_v57, %v9056_v26  ;;  %v9616_v26 = vld [vmem:[%s13179_s1 + $0x9e0] sm:$0xf]  ;;  %v10093_v57 = vor.u32 %v12099_v52, %v10092_v9  ;;  %v11959_v9 = vld [vmem:[%s13179_s1 + $0x950] sm:$0xf0] }
 0x21b   : > { %6322 = vmatpush.bf16.msra.mxu2 %v8833_v14  ;;  %v6066_v18 = vadd.f32 %v14222_v5, %v6053_v24  ;;  %v9309_v5 = vor.u32 %v11903_v7, %v9308_v4  ;;  %v9644_v14 = vld [vmem:[%s13179_s1 + $0xa18] sm:$0xf]  ;;  %v9617_v24 = vor.u32 %v11980_v20, %v9616_v26  ;;  %v9588_v4 = vld [vmem:[%s13179_s1 + $0x9a8] sm:$0xf]  ;;  %v11973_v7 = vld [vmem:[%s13179_s1 + $0x9c0] sm:$0xf0] }
 0x21c   : > { %v10260_v52 = vld [vmem:[%s13179_s1 + $0xee8] sm:$0xf]  ;;  %v12001_v20 = vld [vmem:[%s13179_s1 + $0xaa0] sm:$0xf0] }
 0x21d   : > { %6307 = vmatpush.bf16.msrb.mxu1 %v8665_v27  ;;  %v8581_v27 = vor.u32 %v11721_v54, %v8580_v45  ;;  %v14285_v2 = vadd.f32 %v6078_v46, %v6066_v18  ;;  %v12022_v46 = vld [vmem:[%s13179_s1 + $0xb48] sm:$0xf0]  ;;  %v12092_v45 = vld [vmem:[%s13179_s1 + $0xd78] sm:$0xf0]  ;;  %v9700_v26 = vld [vmem:[%s13179_s1 + $0xa88] sm:$0xf] }
 0x21e   : > { %6344 = vmatpush.bf16.msrb.mxu0 %v9393_v34  ;;  %6333 = vmatpush.bf16.msra.mxu3 %v9113_v59  ;;  %v9673_v34 = vor.u32 %v11994_v33, %v9672_v48  ;;  %v11987_v59 = vld [vmem:[%s13179_s1 + $0xa30] sm:$0xf0]  ;;  %v10316_v48 = vld [vmem:[%s13179_s1 + $0xf58] sm:$0xf] }
 0x21f   : > { %6323 = vmatpush.bf16.msra.mxu2 %v8805_v25  ;;  %v9645_v16 = vor.u32 %v11987_v59, %v9644_v14  ;;  %v9252_v25 = vld [vmem:[%s13179_s1 + $0x708] sm:$0xf]  ;;  %v12155_v33 = vld [vmem:[%s13179_s1 + $0xf70] sm:$0xf0]  ;;  %v10037_v59 = vor.u32 %v12085_v28, %v10036_v38 }
 0x220   : > { %v9476_v28 = vld [vmem:[%s13179_s1 + $0x8c8] sm:$0xf] }
 0x221   : > { %6308 = vmatpush.bf16.msrb.mxu1 %v8637_v13  ;;  %v14294_v13 = vpop.f32.mrf.mxu0 }
 0x222   : > { %6345 = vmatpush.bf16.msrb.mxu0 %v9365_v41  ;;  %6334 = vmatpush.bf16.msra.mxu3 %v9085_v10  ;;  %v12029_v41 = vld [vmem:[%s13179_s1 + $0xb80] sm:$0xf0] }
 0x223   : > { %6368 = vmatpush.bf16.msrb.mxu2 %v9897_v44  ;;  %v11889_v10 = vld [vmem:[%s13179_s1 + $0x720] sm:$0xf0]  ;;  %v12162_v44 = vld [vmem:[%s13179_s1 + $0xfa8] sm:$0xf0] }
 0x224   : > { %6324 = vmatmul.bf16.vlgmr.msra.gmra.mxu2 %v13428_v30  ;;  %v9253_v56 = vor.u32 %v11889_v10, %v9252_v25  ;;  %v10345_v54 = vor.u32 %v12162_v44, %v10344_v21  ;;  %v12141_v25 = vld [vmem:[%s13179_s1 + $0xf00] sm:$0xf0]  ;;  %v9980_v44 = vld [vmem:[%s13179_s1 + $0xcb8] sm:$0xf] }
 0x225   : > { %6309 = vmatpush.bf16.msrb.mxu1 %v8609_v22  ;;  %v9813_v22 = vor.u32 %v12029_v41, %v9812_v58  ;;  %v6091_v15 = vpop.f32.mrf.mxu2  ;;  %v10008_v58 = vld [vmem:[%s13179_s1 + $0xcf0] sm:$0xf]  ;;  %v12078_v41 = vld [vmem:[%s13179_s1 + $0xd08] sm:$0xf0] }
 0x226   : > { %6346 = vmatpush.bf16.msrb.mxu0 %v9337_v8  ;;  %6335 = vmatpush.bf16.msra.mxu3 %v9057_v60  ;;  %v10064_v8 = vld [vmem:[%s13179_s1 + $0xd60] sm:$0xf]  ;;  %v9785_v60 = vor.u32 %v12022_v46, %v9784_v43  ;;  %v6092_v61 = vadd.f32 %v6091_v15, %v14285_v2  ;;  %v10009_v10 = vor.u32 %v12078_v41, %v10008_v58  ;;  %v11952_v46 = vld [vmem:[%s13179_s1 + $0x918] sm:$0xf0]  ;;  %v9924_v41 = vld [vmem:[%s13179_s1 + $0xc48] sm:$0xf] }
 0x227   : > { %6369 = vmatpush.bf16.msrb.mxu2 %v9869_v51  ;;  %v10065_v6 = vor.u32 %v12092_v45, %v10064_v8  ;;  %v9756_v51 = vld [vmem:[%s13179_s1 + $0xaf8] sm:$0xf]  ;;  %v10261_v43 = vor.u32 %v12141_v25, %v10260_v52  ;;  %v10232_v8 = vld [vmem:[%s13179_s1 + $0xeb0] sm:$0xf]  ;;  %v12134_v45 = vld [vmem:[%s13179_s1 + $0xec8] sm:$0xf0] }
 0x228   : > { %v9757_v14 = vor.u32 %v12015_v62, %v9756_v51  ;;  %v12267_v62 = vld [vmem:[%s13179_s1 + $0x12f0] sm:$0xf0]  ;;  %v10736_v52 = vld [vmem:[%s13179_s1 + $0x12a0] sm:$0xf]  ;;  %v12260_v25 = vld [vmem:[%s13179_s1 + $0x12b8] sm:$0xf0] }
 0x229   : > { %6310 = vmatpush.bf16.msrb.mxu1 %v8581_v27  ;;  %v6119_v18 = vpop.f32.mrf.mxu0  ;;  %v9589_v27 = vor.u32 %v11973_v7, %v9588_v4  ;;  %v6130_v47 = vpop.f32.mrf.mxu1  ;;  %v9701_v7 = vor.u32 %v12001_v20, %v9700_v26  ;;  %v12211_v26 = vld [vmem:[%s13179_s1 + $0x1130] sm:$0xf0] }
 0x22a   : > { %6347 = vmatpush.bf16.msrb.mxu0 %v9309_v5  ;;  %6336 = vmatpush.bf16.msra.mxu3 %v9029_v42  ;;  %v10317_v5 = vor.u32 %v12155_v33, %v10316_v48  ;;  %v9728_v42 = vld [vmem:[%s13179_s1 + $0xac0] sm:$0xf]  ;;  %v12064_v18 = vld [vmem:[%s13179_s1 + $0xc98] sm:$0xf0] }
 0x22b   : > { %6370 = vmatpush.bf16.msrb.mxu2 %v9841_v50  ;;  %v9952_v33 = vld [vmem:[%s13179_s1 + $0xc80] sm:$0xf] }
 0x22c   : > { %6311 = vmatmul.bf16.vlgmr.msrb.gmra.mxu1 %v13632_v12 }
 0x22d   : > { %6355 = vmatpush.bf16.msra.mxu1 %v9673_v34  ;;  %6337 = vmatmul.bf16.vlgmr.msra.gmra.mxu3 %v13728_v1  ;;  %v9560_v34 = vld [vmem:[%s13179_s1 + $0x970] sm:$0xf] }
 0x22e   : > { %6381 = vmatpush.bf16.msrb.mxu3 %v10121_v63  ;;  %6348 = vmatpush.bf16.msrb.mxu0 %v9281_v35  ;;  %v9561_v50 = vor.u32 %v11966_v3, %v9560_v34  ;;  %v12008_v63 = vld [vmem:[%s13179_s1 + $0xad8] sm:$0xf0]  ;;  %v10289_v35 = vor.u32 %v12148_v36, %v10288_v17  ;;  %v10233_v34 = vor.u32 %v12134_v45, %v10232_v8  ;;  %v10204_v3 = vld [vmem:[%s13179_s1 + $0xe78] sm:$0xf]  ;;  %v10960_v17 = vld [vmem:[%s13179_s1 + $0x1460] sm:$0xf] }
 0x22f   : > { %6371 = vmatpush.bf16.msrb.mxu2 %v9813_v22  ;;  %v9729_v2 = vor.u32 %v12008_v63, %v9728_v42  ;;  %v12071_v22 = vld [vmem:[%s13179_s1 + $0xcd0] sm:$0xf0]  ;;  %v6104_v4 = vpop.f32.mrf.mxu3  ;;  %v12316_v36 = vld [vmem:[%s13179_s1 + $0x1478] sm:$0x30]  ;;  %v12218_v42 = vld [vmem:[%s13179_s1 + $0x1168] sm:$0xf0] }
 0x230   : > { %v9981_v48 = vor.u32 %v12071_v22, %v9980_v44  ;;  %v10737_v22 = vor.u32 %v12260_v25, %v10736_v52  ;;  %v10932_v8 = vld [vmem:[%s13179_s1 + $0x1428] sm:$0xf]  ;;  %v12309_v45 = vld [vmem:[%s13179_s1 + $0x1440] sm:$0xf0]  ;;  %v8722_v25 = vld [vmem:[%s13179_s1 + $0x2fc] sm:$0xf0] }
 0x231   : > { %6356 = vmatpush.bf16.msra.mxu1 %v9645_v16  ;;  %v9532_v16 = vld [vmem:[%s13179_s1 + $0x938] sm:$0xf]  ;;  %v6132_v38 = vpop.f32.mrf.mxu1  ;;  %v11753_v52 = vld [vmem:[%s13179_s1 + $0x2e4] sm:$0xf] }
 0x232   : > { %6382 = vmatpush.bf16.msrb.mxu3 %v10093_v57  ;;  %6349 = vmatpush.bf16.msrb.mxu0 %v9253_v56  ;;  %v9533_v21 = vor.u32 %v11959_v9, %v9532_v16  ;;  %v10792_v57 = vld [vmem:[%s13179_s1 + $0x1310] sm:$0xf]  ;;  %v12274_v56 = vld [vmem:[%s13179_s1 + $0x1328] sm:$0xf0] }
 0x233   : > { %6372 = vmatpush.bf16.msrb.mxu2 %v9785_v60  ;;  %v10764_v60 = vld [vmem:[%s13179_s1 + $0x12d8] sm:$0xf]  ;;  %v10793_v51 = vor.u32 %v12274_v56, %v10792_v57  ;;  %v12253_v56 = vld [vmem:[%s13179_s1 + $0x1280] sm:$0xf0]  ;;  %v12246_v38 = vld [vmem:[%s13179_s1 + $0x1248] sm:$0xf0] }
 0x235   : > { %6357 = vmatpush.bf16.msra.mxu1 %v9617_v24  ;;  %6350 = vmatmul.bf16.vlgmr.msrb.gmra.mxu0 %v13847_v0  ;;  %v9504_v24 = vld [vmem:[%s13179_s1 + $0x900] sm:$0xf] }
 0x236   : > { %6394 = vmatpush.bf16.msra.mxu0 %v10345_v54  ;;  %6383 = vmatpush.bf16.msrb.mxu3 %v10065_v6  ;;  %v6093_v54 = vpop.f32.mrf.mxu2  ;;  %v6105_v6 = vadd.f32 %v6104_v4, %v6092_v61  ;;  %v9953_v61 = vor.u32 %v12064_v18, %v9952_v33  ;;  %v12113_v4 = vld [vmem:[%s13179_s1 + $0xe20] sm:$0xf0]  ;;  %v11767_v33 = vld [vmem:[%s13179_s1 + $0x354] sm:$0xf]  ;;  %v8778_v18 = vld [vmem:[%s13179_s1 + $0x36c] sm:$0xf0] }
 0x237   : > { %6373 = vmatpush.bf16.msrb.mxu2 %v9757_v14  ;;  %v12127_v14 = vld [vmem:[%s13179_s1 + $0xe90] sm:$0xf0]  ;;  %v6106_v20 = vpop.f32.mrf.mxu3  ;;  %v10148_v54 = vld [vmem:[%s13179_s1 + $0xe08] sm:$0xf] }
 0x238   : > { %v6118_v15 = vadd.f32 %v14294_v13, %v6105_v6  ;;  %v12057_v13 = vld [vmem:[%s13179_s1 + $0xc60] sm:$0xf0]  ;;  %v10205_v16 = vor.u32 %v12127_v14, %v10204_v3  ;;  %v10933_v6 = vor.u32 %v12309_v45, %v10932_v8  ;;  %v10484_v3 = vld [vmem:[%s13179_s1 + $0x10a8] sm:$0xf]  ;;  %v10624_v20 = vld [vmem:[%s13179_s1 + $0x11c0] sm:$0xf] }
 0x239   : > { %6358 = vmatpush.bf16.msra.mxu1 %v9589_v27  ;;  %v9505_v27 = vor.u32 %v11952_v46, %v9504_v24  ;;  %v12183_v8 = vld [vmem:[%s13179_s1 + $0x1050] sm:$0xf0]  ;;  %v11746_v45 = vld [vmem:[%s13179_s1 + $0x2ac] sm:$0xf] }
 0x23a   : > { %6395 = vmatpush.bf16.msra.mxu0 %v10317_v5  ;;  %6384 = vmatpush.bf16.msrb.mxu3 %v10037_v59  ;;  %v11945_v5 = vld [vmem:[%s13179_s1 + $0x8e0] sm:$0xf0]  ;;  %v10568_v59 = vld [vmem:[%s13179_s1 + $0x1150] sm:$0xf]  ;;  %v14357_v63 = vadd.f32 %v6130_v47, %v6118_v15  ;;  %v10540_v47 = vld [vmem:[%s13179_s1 + $0x1118] sm:$0xf] }
 0x23b   : > { %6374 = vmatpush.bf16.msrb.mxu2 %v9729_v2  ;;  %v9477_v58 = vor.u32 %v11945_v5, %v9476_v28  ;;  %v10569_v9 = vor.u32 %v12218_v42, %v10568_v59  ;;  %v10176_v2 = vld [vmem:[%s13179_s1 + $0xe40] sm:$0xf]  ;;  %v10541_v46 = vor.u32 %v12211_v26, %v10540_v47  ;;  %v10904_v28 = vld [vmem:[%s13179_s1 + $0x13f0] sm:$0xf]  ;;  %v12302_v5 = vld [vmem:[%s13179_s1 + $0x1408] sm:$0xf0] }
 0x23c   : > { %v14368_v44 = vpop.f32.mrf.mxu0  ;;  %v8750_v15 = vld [vmem:[%s13179_s1 + $0x334] sm:$0xf0]  ;;  %v10905_v42 = vor.u32 %v12302_v5, %v10904_v28  ;;  %v9226_v28 = vld [vmem:[%s13179_s1 + $0x6ec] sm:$0xf0]  ;;  %v10400_v5 = vld [vmem:[%s13179_s1 + $0x1000] sm:$0xf] }
 0x23d   : > { %6359 = vmatpush.bf16.msra.mxu1 %v9561_v50  ;;  %v10765_v50 = vor.u32 %v12267_v62, %v10764_v60 }
 0x23e   : > { %6396 = vmatpush.bf16.msra.mxu0 %v10289_v35  ;;  %6385 = vmatpush.bf16.msrb.mxu3 %v10009_v10  ;;  %v10961_v35 = vor.u32 %v12316_v36, %v10960_v17  ;;  %v12120_v10 = vld [vmem:[%s13179_s1 + $0xe58] sm:$0xf0]  ;;  %v12197_v17 = vld [vmem:[%s13179_s1 + $0x10c0] sm:$0xf0] }
 0x23f   : > { %6375 = vmatpush.bf16.msrb.mxu2 %v9701_v7  ;;  %v10177_v24 = vor.u32 %v12120_v10, %v10176_v2  ;;  %v10512_v7 = vld [vmem:[%s13179_s1 + $0x10e0] sm:$0xf]  ;;  %v11760_v36 = vld [vmem:[%s13179_s1 + $0x31c] sm:$0xf] }
 0x240   : > { %v5964_v57 = vsel %vm5956_vm1, %v10961_v35, 0  ;;  %v8753_v35 = vor.u32 %v11760_v36, %v8750_v15 }
 0x241   : > { %6360 = vmatpush.bf16.msra.mxu1 %v9533_v21  ;;  %v9925_v21 = vor.u32 %v12057_v13, %v9924_v41  ;;  %v10876_v41 = vld [vmem:[%s13179_s1 + $0x13b8] sm:$0xf]  ;;  %v12295_v13 = vld [vmem:[%s13179_s1 + $0x13d0] sm:$0xf0] }
 0x242   : > { %6397 = vmatpush.bf16.msra.mxu0 %v10261_v43  ;;  %6386 = vmatpush.bf16.msrb.mxu3 %v9981_v48  ;;  %v10708_v43 = vld [vmem:[%s13179_s1 + $0x1268] sm:$0xf]  ;;  %v12204_v48 = vld [vmem:[%s13179_s1 + $0x10f8] sm:$0xf0]  ;;  %v10877_v26 = vor.u32 %v12295_v13, %v10876_v41  ;;  %v8526_v41 = vld [vmem:[%s13179_s1 + $0x174] sm:$0xf0] }
 0x243   : > { %6420 = vmatpush.bf16.msra.mxu2 %v10793_v51  ;;  %v10709_v60 = vor.u32 %v12253_v56, %v10708_v43  ;;  %v10680_v51 = vld [vmem:[%s13179_s1 + $0x1230] sm:$0xf]  ;;  %v10513_v62 = vor.u32 %v12204_v48, %v10512_v7  ;;  %v10848_v43 = vld [vmem:[%s13179_s1 + $0x1380] sm:$0xf]  ;;  %v12288_v56 = vld [vmem:[%s13179_s1 + $0x1398] sm:$0xf0] }
 0x244   : > { %6376 = vmatmul.bf16.vlgmr.msrb.gmra.mxu2 %v13802_v37  ;;  %v6184_v14 = vpop.f32.mrf.mxu0  ;;  %v10681_v59 = vor.u32 %v12246_v38, %v10680_v51  ;;  %v10849_v7 = vor.u32 %v12288_v56, %v10848_v43  ;;  %v10596_v48 = vld [vmem:[%s13179_s1 + $0x1188] sm:$0xf]  ;;  %v11711_v51 = vld [vmem:[%s13179_s1 + $0x194] sm:$0xf] }
 0x245   : > { %6361 = vmatpush.bf16.msra.mxu1 %v9505_v27  ;;  %v10149_v27 = vor.u32 %v12113_v4, %v10148_v54  ;;  %v6156_v10 = vpop.f32.mrf.mxu2  ;;  %v8694_v54 = vld [vmem:[%s13179_s1 + $0x2c4] sm:$0xf0]  ;;  %v11879_v38 = vld [vmem:[%s13179_s1 + $0x6d4] sm:$0xf] }
 0x246   : > { %6398 = vmatpush.bf16.msra.mxu0 %v10233_v34  ;;  %6387 = vmatpush.bf16.msrb.mxu3 %v9953_v61  ;;  %v8781_v34 = vor.u32 %v11767_v33, %v8778_v18  ;;  %v10652_v61 = vld [vmem:[%s13179_s1 + $0x11f8] sm:$0xf]  ;;  %v12225_v33 = vld [vmem:[%s13179_s1 + $0x11a0] sm:$0xf0]  ;;  %v10820_v18 = vld [vmem:[%s13179_s1 + $0x1348] sm:$0xf] }
 0x247   : > { %6421 = vmatpush.bf16.msra.mxu2 %v10765_v50  ;;  %v10485_v50 = vor.u32 %v12197_v17, %v10484_v3  ;;  %v11739_v3 = vld [vmem:[%s13179_s1 + $0x274] sm:$0xf]  ;;  %v8666_v17 = vld [vmem:[%s13179_s1 + $0x28c] sm:$0xf0]  ;;  %v10597_v14 = vor.u32 %v12225_v33, %v10596_v48  ;;  %v11816_v48 = vld [vmem:[%s13179_s1 + $0x4dc] sm:$0xf] }
 0x248   : > { %v8974_v33 = vld [vmem:[%s13179_s1 + $0x4f4] sm:$0xf0] }
 0x249   : > { %6362 = vmatpush.bf16.msra.mxu1 %v9477_v58  ;;  %v12239_v58 = vld [vmem:[%s13179_s1 + $0x1210] sm:$0xf0]  ;;  %v6143_v2 = vpop.f32.mrf.mxu1 }
 0x24a   : > { %6399 = vmatpush.bf16.msra.mxu0 %v10205_v16  ;;  %6388 = vmatpush.bf16.msrb.mxu3 %v9925_v21  ;;  %v10456_v16 = vld [vmem:[%s13179_s1 + $0x1070] sm:$0xf]  ;;  %v10653_v47 = vor.u32 %v12239_v58, %v10652_v61  ;;  %v6157_v21 = vadd.f32 %v6156_v10, %v6143_v2  ;;  %v11704_v58 = vld [vmem:[%s13179_s1 + $0x15c] sm:$0xf]  ;;  %v12169_v2 = vld [vmem:[%s13179_s1 + $0xfe0] sm:$0xf0] }
 0x24b   : > { %6422 = vmatpush.bf16.msra.mxu2 %v10737_v22  ;;  %v11732_v10 = vld [vmem:[%s13179_s1 + $0x23c] sm:$0xf] }
 0x24c   : > { %6363 = vmatmul.bf16.vlgmr.msra.gmra.mxu1 %v13879_v39 }
 0x24d   : > { %6407 = vmatpush.bf16.msrb.mxu1 %v10569_v9  ;;  %6389 = vmatmul.bf16.vlgmr.msrb.gmra.mxu3 %v13930_v49  ;;  %v12190_v9 = vld [vmem:[%s13179_s1 + $0x1088] sm:$0xf0]  ;;  %v6158_v15 = vpop.f32.mrf.mxu2 }
 0x24e   : > { %6435 = vmatpush.bf16.msra.mxu3 %v5964_v57  ;;  %6400 = vmatpush.bf16.msra.mxu0 %v10177_v24  ;;  %v10457_v22 = vor.u32 %v12190_v9, %v10456_v16  ;;  %v12232_v57 = vld [vmem:[%s13179_s1 + $0x11d8] sm:$0xf0]  ;;  %v8725_v24 = vor.u32 %v11753_v52, %v8722_v25  ;;  %v8669_v16 = vor.u32 %v11739_v3, %v8666_v17  ;;  %v9198_v52 = vld [vmem:[%s13179_s1 + $0x6b4] sm:$0xf0]  ;;  %v10372_v25 = vld [vmem:[%s13179_s1 + $0xfc8] sm:$0xf] }
 0x24f   : > { %6423 = vmatpush.bf16.msra.mxu2 %v10709_v60  ;;  %v10625_v4 = vor.u32 %v12232_v57, %v10624_v20  ;;  %v11872_v9 = vld [vmem:[%s13179_s1 + $0x69c] sm:$0xf]  ;;  %v9002_v20 = vld [vmem:[%s13179_s1 + $0x52c] sm:$0xf0]  ;;  %v10373_v43 = vor.u32 %v12169_v2, %v10372_v25  ;;  %v8582_v3 = vld [vmem:[%s13179_s1 + $0x1e4] sm:$0xf0] }
 0x250   : > { %v9201_v57 = vor.u32 %v11872_v9, %v9198_v52  ;;  %v11809_v17 = vld [vmem:[%s13179_s1 + $0x4a4] sm:$0xf]  ;;  %v11991_v15 = vld [vmem:[%s13179_s1 + $0xa54] sm:$0xf]  ;;  %v11802_v9 = vld [vmem:[%s13179_s1 + $0x46c] sm:$0xf] }
 0x251   : > { %6408 = vmatpush.bf16.msrb.mxu1 %v10541_v46  ;;  %v10428_v46 = vld [vmem:[%s13179_s1 + $0x1038] sm:$0xf]  ;;  %v6145_v36 = vpop.f32.mrf.mxu1  ;;  %v8918_v25 = vld [vmem:[%s13179_s1 + $0x484] sm:$0xf0]  ;;  %v11984_v2 = vld [vmem:[%s13179_s1 + $0xa1c] sm:$0xf] }
 0x252   : > { %6436 = vmatpush.bf16.msra.mxu3 %v10933_v6  ;;  %6401 = vmatpush.bf16.msra.mxu0 %v10149_v27  ;;  %v10429_v60 = vor.u32 %v12183_v8, %v10428_v46  ;;  %v12281_v6 = vld [vmem:[%s13179_s1 + $0x1360] sm:$0xf0]  ;;  %v8554_v27 = vld [vmem:[%s13179_s1 + $0x1ac] sm:$0xf0]  ;;  %v8498_v46 = vld [vmem:[%s13179_s1 + $0x13c] sm:$0xf0] }
 0x253   : > { %6424 = vmatpush.bf16.msra.mxu2 %v10681_v59  ;;  %v10821_v59 = vor.u32 %v12281_v6, %v10820_v18  ;;  %v8557_v61 = vor.u32 %v11711_v51, %v8554_v27  ;;  %v11865_v8 = vld [vmem:[%s13179_s1 + $0x664] sm:$0xf]  ;;  %v11690_v6 = vld [vmem:[%s13179_s1 + $0xec] sm:$0xf]  ;;  %v8946_v36 = vld [vmem:[%s13179_s1 + $0x4bc] sm:$0xf0] }
 0x255   : > { %6409 = vmatpush.bf16.msrb.mxu1 %v10513_v62  ;;  %6402 = vmatmul.bf16.vlgmr.msra.gmra.mxu0 %v13994_v55  ;;  %v8697_v62 = vor.u32 %v11746_v45, %v8694_v54  ;;  %v9170_v45 = vld [vmem:[%s13179_s1 + $0x67c] sm:$0xf0]  ;;  %v11725_v54 = vld [vmem:[%s13179_s1 + $0x204] sm:$0xf] }
 0x256   : > { %6459 = vmatpush.bf16.msrb.mxu0 %v8781_v34  ;;  %6437 = vmatpush.bf16.msra.mxu3 %v10905_v42  ;;  %v12176_v34 = vld [vmem:[%s13179_s1 + $0x1018] sm:$0xf0]  ;;  %v6169_v42 = vpop.f32.mrf.mxu3  ;;  %v9173_v51 = vor.u32 %v11865_v8, %v9170_v45  ;;  %v8890_v8 = vld [vmem:[%s13179_s1 + $0x44c] sm:$0xf0]  ;;  %v9618_v45 = vld [vmem:[%s13179_s1 + $0x9fc] sm:$0xf0] }
 0x257   : > { %6425 = vmatpush.bf16.msra.mxu2 %v10653_v47  ;;  %v6170_v13 = vadd.f32 %v6169_v42, %v6157_v21  ;;  %v8638_v47 = vld [vmem:[%s13179_s1 + $0x254] sm:$0xf0]  ;;  %v8529_v21 = vor.u32 %v11704_v58, %v8526_v41  ;;  %v8442_v58 = vld [vmem:[%s13179_s1 + $0xcc] sm:$0xf0]  ;;  %v8949_v41 = vor.u32 %v11809_v17, %v8946_v36  ;;  %v11662_v36 = vld [vmem:[%s13179_s1 + $0xc] sm:$0xf] }
 0x258   : > { %v8641_v56 = vor.u32 %v11732_v10, %v8638_v47  ;;  %v9646_v10 = vld [vmem:[%s13179_s1 + $0xa34] sm:$0xf0] }
 0x259   : > { %6410 = vmatpush.bf16.msrb.mxu1 %v10485_v50  ;;  %v9229_v50 = vor.u32 %v11879_v38, %v9226_v28  ;;  %v11858_v38 = vld [vmem:[%s13179_s1 + $0x62c] sm:$0xf]  ;;  %v9142_v28 = vld [vmem:[%s13179_s1 + $0x644] sm:$0xf0] }
 0x25a   : > { %6460 = vmatpush.bf16.msrb.mxu0 %v8753_v35  ;;  %6438 = vmatpush.bf16.msra.mxu3 %v10877_v26  ;;  %v10401_v35 = vor.u32 %v12176_v34, %v10400_v5  ;;  %v11823_v26 = vld [vmem:[%s13179_s1 + $0x514] sm:$0xf]  ;;  %v8977_v5 = vor.u32 %v11816_v48, %v8974_v33  ;;  %v11718_v34 = vld [vmem:[%s13179_s1 + $0x1cc] sm:$0xf]  ;;  %v9145_v42 = vor.u32 %v11858_v38, %v9142_v28  ;;  %v9058_v38 = vld [vmem:[%s13179_s1 + $0x59c] sm:$0xf0] }
 0x25b   : > { %6426 = vmatpush.bf16.msra.mxu2 %v10625_v4  ;;  %v8610_v4 = vld [vmem:[%s13179_s1 + $0x21c] sm:$0xf0]  ;;  %v11788_v28 = vld [vmem:[%s13179_s1 + $0x3fc] sm:$0xf] }
 0x25c   : > { %v8613_v27 = vor.u32 %v11725_v54, %v8610_v4 }
 0x25d   : > { %6411 = vmatpush.bf16.msrb.mxu1 %v10457_v22  ;;  %v14431_v22 = vadd.f32 %v14368_v44, %v6170_v13  ;;  %v9005_v44 = vor.u32 %v11823_v26, %v9002_v20  ;;  %v11676_v20 = vld [vmem:[%s13179_s1 + $0x7c] sm:$0xf] }
 0x25e   : > { %6461 = vmatpush.bf16.msrb.mxu0 %v8725_v24  ;;  %6439 = vmatpush.bf16.msra.mxu3 %v10849_v7  ;;  %v11697_v24 = vld [vmem:[%s13179_s1 + $0x124] sm:$0xf]  ;;  %v14442_v7 = vpop.f32.mrf.mxu0  ;;  %v6171_v18 = vpop.f32.mrf.mxu3 }
 0x25f   : > { %6427 = vmatpush.bf16.msra.mxu2 %v10597_v14  ;;  %v9674_v14 = vld [vmem:[%s13179_s1 + $0xa6c] sm:$0xf0] }
 0x260   : > { %v9677_v13 = vor.u32 %v11991_v15, %v9674_v14  ;;  %v8358_v14 = vld [vmem:[%s13179_s1 + $0x24] sm:$0xf0] }
 0x261   : > { %6412 = vmatpush.bf16.msrb.mxu1 %v10429_v60  ;;  %v8501_v60 = vor.u32 %v11697_v24, %v8498_v46  ;;  %v9086_v24 = vld [vmem:[%s13179_s1 + $0x5d4] sm:$0xf0]  ;;  %v11795_v46 = vld [vmem:[%s13179_s1 + $0x434] sm:$0xf] }
 0x262   : > { %6462 = vmatpush.bf16.msrb.mxu0 %v8697_v62  ;;  %6440 = vmatpush.bf16.msra.mxu3 %v10821_v59  ;;  %v8470_v62 = vld [vmem:[%s13179_s1 + $0x104] sm:$0xf0] }
 0x263   : > { %6485 = vmatpush.bf16.msrb.mxu2 %v9229_v50  ;;  %v8473_v59 = vor.u32 %v11690_v6, %v8470_v62  ;;  %v11683_v50 = vld [vmem:[%s13179_s1 + $0xb4] sm:$0xf]  ;;  %v8386_v6 = vld [vmem:[%s13179_s1 + $0x5c] sm:$0xf0]  ;;  %v11837_v62 = vld [vmem:[%s13179_s1 + $0x584] sm:$0xf] }
 0x264   : > { %6428 = vmatmul.bf16.vlgmr.msra.gmra.mxu2 %v13966_v11  ;;  %v8445_v47 = vor.u32 %v11683_v50, %v8442_v58  ;;  %v9061_v15 = vor.u32 %v11837_v62, %v9058_v38  ;;  %v11935_v58 = vld [vmem:[%s13179_s1 + $0x894] sm:$0xf] }
 0x265   : > { %6413 = vmatpush.bf16.msrb.mxu1 %v10401_v35  ;;  %10980 = vmatmul.msk.bf16.vlgmr.msra.gmra.mxu3 %vm5952_vm9, %v14010_v53  ;;  %v11851_v35 = vld [vmem:[%s13179_s1 + $0x5f4] sm:$0xf] }
 0x266   : > { %6446 = vmatpush.bf16.msrb.mxu3 %v8557_v61  ;;  %6463 = vmatpush.bf16.msrb.mxu0 %v8669_v16  ;;  %v8585_v61 = vor.u32 %v11718_v34, %v8582_v3  ;;  %v9114_v16 = vld [vmem:[%s13179_s1 + $0x60c] sm:$0xf0]  ;;  %v6236_v52 = vpop.f32.mrf.mxu0  ;;  %v8862_v34 = vld [vmem:[%s13179_s1 + $0x414] sm:$0xf0]  ;;  %v11970_v3 = vld [vmem:[%s13179_s1 + $0x9ac] sm:$0xf] }
 0x267   : > { %6486 = vmatpush.bf16.msrb.mxu2 %v9201_v57  ;;  %v9117_v26 = vor.u32 %v11851_v35, %v9114_v16  ;;  %v8921_v57 = vor.u32 %v11802_v9, %v8918_v25  ;;  %v6208_v4 = vpop.f32.mrf.mxu2  ;;  %v10122_v35 = vld [vmem:[%s13179_s1 + $0xdec] sm:$0xf0]  ;;  %v11781_v16 = vld [vmem:[%s13179_s1 + $0x3c4] sm:$0xf]  ;;  %v8834_v9 = vld [vmem:[%s13179_s1 + $0x3dc] sm:$0xf0] }
 0x269   : > { %6414 = vmatpush.bf16.msrb.mxu1 %v10373_v43  ;;  %v9649_v43 = vor.u32 %v11984_v2, %v9646_v10  ;;  %v6195_v54 = vpop.f32.mrf.mxu1  ;;  %v8361_v2 = vor.u32 %v11662_v36, %v8358_v14  ;;  %v11963_v10 = vld [vmem:[%s13179_s1 + $0x974] sm:$0xf]  ;;  %v9506_v36 = vld [vmem:[%s13179_s1 + $0x91c] sm:$0xf0]  ;;  %v9870_v14 = vld [vmem:[%s13179_s1 + $0xbf4] sm:$0xf0] }
 0x26a   : > { %6447 = vmatpush.bf16.msrb.mxu3 %v8529_v21  ;;  %6464 = vmatpush.bf16.msrb.mxu0 %v8641_v56  ;;  %v8414_v21 = vld [vmem:[%s13179_s1 + $0x94] sm:$0xf0]  ;;  %v11844_v56 = vld [vmem:[%s13179_s1 + $0x5bc] sm:$0xf]  ;;  %v6196_v33 = vadd.f32 %v6195_v54, %v14431_v22  ;;  %v9590_v22 = vld [vmem:[%s13179_s1 + $0x9c4] sm:$0xf0] }
 0x26b   : > { %6487 = vmatpush.bf16.msrb.mxu2 %v9173_v51  ;;  %v8417_v48 = vor.u32 %v11676_v20, %v8414_v21  ;;  %v9089_v18 = vor.u32 %v11844_v56, %v9086_v24  ;;  %v8893_v51 = vor.u32 %v11795_v46, %v8890_v8  ;;  %v9593_v50 = vor.u32 %v11970_v3, %v9590_v22  ;;  %v9422_v8 = vld [vmem:[%s13179_s1 + $0x874] sm:$0xf0]  ;;  %v12089_v3 = vld [vmem:[%s13179_s1 + $0xd64] sm:$0xf]  ;;  %v10066_v22 = vld [vmem:[%s13179_s1 + $0xd7c] sm:$0xf0] }
 0x26c   : > { %6415 = vmatmul.bf16.vlgmr.msrb.gmra.mxu1 %v14014_v29  ;;  %v8837_v46 = vor.u32 %v11781_v16, %v8834_v9  ;;  %v12082_v16 = vld [vmem:[%s13179_s1 + $0xd2c] sm:$0xf]  ;;  %v10038_v9 = vld [vmem:[%s13179_s1 + $0xd44] sm:$0xf0] }
 0x26d   : > { %6472 = vmatpush.bf16.msra.mxu1 %v9005_v44  ;;  %v11977_v44 = vld [vmem:[%s13179_s1 + $0x9e4] sm:$0xf] }
 0x26e   : > { %6448 = vmatpush.bf16.msrb.mxu3 %v8501_v60  ;;  %6465 = vmatpush.bf16.msrb.mxu0 %v8613_v27  ;;  %v11669_v60 = vld [vmem:[%s13179_s1 + $0x44] sm:$0xf]  ;;  %v9621_v27 = vor.u32 %v11977_v44, %v9618_v45  ;;  %v12096_v44 = vld [vmem:[%s13179_s1 + $0xd9c] sm:$0xf]  ;;  %v10094_v45 = vld [vmem:[%s13179_s1 + $0xdb4] sm:$0xf0] }
 0x26f   : > { %6488 = vmatpush.bf16.msrb.mxu2 %v9145_v42  ;;  %v8389_v17 = vor.u32 %v11669_v60, %v8386_v6  ;;  %v9030_v42 = vld [vmem:[%s13179_s1 + $0x564] sm:$0xf0]  ;;  %v6210_v25 = vpop.f32.mrf.mxu2  ;;  %v12047_v60 = vld [vmem:[%s13179_s1 + $0xc14] sm:$0xf]  ;;  %v9898_v6 = vld [vmem:[%s13179_s1 + $0xc2c] sm:$0xf0]  ;;  %v10097_v62 = vor.u32 %v12096_v44, %v10094_v45 }
 0x270   : > { %v9478_v25 = vld [vmem:[%s13179_s1 + $0x8e4] sm:$0xf0]  ;;  %v10010_v44 = vld [vmem:[%s13179_s1 + $0xd0c] sm:$0xf0] }
 0x271   : > { %6473 = vmatpush.bf16.msra.mxu1 %v8977_v5  ;;  %v6209_v5 = vadd.f32 %v6208_v4, %v6196_v33  ;;  %v6197_v52 = vpop.f32.mrf.mxu1  ;;  %v11774_v4 = vld [vmem:[%s13179_s1 + $0x38c] sm:$0xf]  ;;  %v11956_v33 = vld [vmem:[%s13179_s1 + $0x93c] sm:$0xf] }
 0x272   : > { %6449 = vmatpush.bf16.msrb.mxu3 %v8473_v59  ;;  %6466 = vmatpush.bf16.msrb.mxu0 %v8585_v61  ;;  %v11830_v59 = vld [vmem:[%s13179_s1 + $0x54c] sm:$0xf]  ;;  %v8865_v61 = vor.u32 %v11788_v28, %v8862_v34  ;;  %v14496_v56 = vpop.f32.mrf.mxu0  ;;  %v11921_v28 = vld [vmem:[%s13179_s1 + $0x824] sm:$0xf] }
 0x273   : > { %6489 = vmatpush.bf16.msrb.mxu2 %v9117_v26  ;;  %v6221_v26 = vpop.f32.mrf.mxu3  ;;  %v9033_v20 = vor.u32 %v11830_v59, %v9030_v42  ;;  %v11942_v52 = vld [vmem:[%s13179_s1 + $0x8cc] sm:$0xf] }
 0x275   : > { %6474 = vmatpush.bf16.msra.mxu1 %v8949_v41  ;;  %6467 = vmatmul.bf16.vlgmr.msrb.gmra.mxu0 %v13632_v12  ;;  %v9450_v41 = vld [vmem:[%s13179_s1 + $0x8ac] sm:$0xf0] }
 0x276   : > { %6511 = vmatpush.bf16.msra.mxu0 %v9677_v13  ;;  %6450 = vmatpush.bf16.msrb.mxu3 %v8445_v47  ;;  %v12103_v13 = vld [vmem:[%s13179_s1 + $0xdd4] sm:$0xf]  ;;  %v9562_v47 = vld [vmem:[%s13179_s1 + $0x98c] sm:$0xf0]  ;;  %v9453_v21 = vor.u32 %v11935_v58, %v9450_v41  ;;  %v11914_v58 = vld [vmem:[%s13179_s1 + $0x7ec] sm:$0xf] }
 0x277   : > { %6490 = vmatpush.bf16.msrb.mxu2 %v9089_v18  ;;  %v10125_v24 = vor.u32 %v12103_v13, %v10122_v35  ;;  %v9565_v54 = vor.u32 %v11963_v10, %v9562_v47  ;;  %v9534_v18 = vld [vmem:[%s13179_s1 + $0x954] sm:$0xf0]  ;;  %v9366_v41 = vld [vmem:[%s13179_s1 + $0x804] sm:$0xf0]  ;;  %v9842_v10 = vld [vmem:[%s13179_s1 + $0xbbc] sm:$0xf0] }
 0x278   : > { %v9537_v34 = vor.u32 %v11956_v33, %v9534_v18  ;;  %v9369_v47 = vor.u32 %v11914_v58, %v9366_v41  ;;  %v12208_v33 = vld [vmem:[%s13179_s1 + $0x111c] sm:$0xf]  ;;  %v10542_v18 = vld [vmem:[%s13179_s1 + $0x1134] sm:$0xf0]  ;;  %v9954_v41 = vld [vmem:[%s13179_s1 + $0xc9c] sm:$0xf0] }
 0x279   : > { %6475 = vmatpush.bf16.msra.mxu1 %v8921_v57  ;;  %v11928_v57 = vld [vmem:[%s13179_s1 + $0x85c] sm:$0xf] }
 0x27a   : > { %6512 = vmatpush.bf16.msra.mxu0 %v9649_v43  ;;  %6451 = vmatpush.bf16.msrb.mxu3 %v8417_v48  ;;  %v6222_v43 = vadd.f32 %v6221_v26, %v6209_v5  ;;  %v8806_v48 = vld [vmem:[%s13179_s1 + $0x3a4] sm:$0xf0]  ;;  %v9394_v5 = vld [vmem:[%s13179_s1 + $0x83c] sm:$0xf0]  ;;  %v12215_v26 = vld [vmem:[%s13179_s1 + $0x1154] sm:$0xf] }
 0x27b   : > { %6491 = vmatpush.bf16.msrb.mxu2 %v9061_v15  ;;  %v8809_v38 = vor.u32 %v11774_v4, %v8806_v48  ;;  %v12040_v15 = vld [vmem:[%s13179_s1 + $0xbdc] sm:$0xf]  ;;  %v6223_v59 = vpop.f32.mrf.mxu3  ;;  %v9397_v42 = vor.u32 %v11921_v28, %v9394_v5  ;;  %v9814_v4 = vld [vmem:[%s13179_s1 + $0xb84] sm:$0xf0]  ;;  %v9982_v28 = vld [vmem:[%s13179_s1 + $0xcd4] sm:$0xf0]  ;;  %v10545_v5 = vor.u32 %v12208_v33, %v10542_v18 }
 0x27c   : > { %v9873_v35 = vor.u32 %v12040_v15, %v9870_v14  ;;  %v12187_v33 = vld [vmem:[%s13179_s1 + $0x1074] sm:$0xf]  ;;  %v10458_v18 = vld [vmem:[%s13179_s1 + $0x108c] sm:$0xf0] }
 0x27d   : > { %6476 = vmatpush.bf16.msra.mxu1 %v8893_v51  ;;  %v14508_v51 = vadd.f32 %v14442_v7, %v6222_v43  ;;  %v9901_v7 = vor.u32 %v12047_v60, %v9898_v6  ;;  %v9338_v43 = vld [vmem:[%s13179_s1 + $0x7cc] sm:$0xf0]  ;;  %v11900_v6 = vld [vmem:[%s13179_s1 + $0x77c] sm:$0xf] }
 0x27e   : > { %6513 = vmatpush.bf16.msra.mxu0 %v9621_v27  ;;  %6452 = vmatpush.bf16.msrb.mxu3 %v8389_v17  ;;  %v9425_v27 = vor.u32 %v11928_v57, %v9422_v8  ;;  %v11949_v17 = vld [vmem:[%s13179_s1 + $0x904] sm:$0xf]  ;;  %v11907_v57 = vld [vmem:[%s13179_s1 + $0x7b4] sm:$0xf] }
 0x27f   : > { %6492 = vmatpush.bf16.msrb.mxu2 %v9033_v20  ;;  %v9509_v13 = vor.u32 %v11949_v17, %v9506_v36  ;;  %v10570_v20 = vld [vmem:[%s13179_s1 + $0x116c] sm:$0xf0]  ;;  %v12075_v8 = vld [vmem:[%s13179_s1 + $0xcf4] sm:$0xf]  ;;  %v9341_v48 = vor.u32 %v11907_v57, %v9338_v43  ;;  %v12201_v17 = vld [vmem:[%s13179_s1 + $0x10e4] sm:$0xf] }
 0x280   : > { %v10573_v45 = vor.u32 %v12215_v26, %v10570_v20  ;;  %v10013_v60 = vor.u32 %v12075_v8, %v10010_v44  ;;  %v10514_v36 = vld [vmem:[%s13179_s1 + $0x10fc] sm:$0xf0]  ;;  %v11886_v26 = vld [vmem:[%s13179_s1 + $0x70c] sm:$0xf]  ;;  %v9254_v20 = vld [vmem:[%s13179_s1 + $0x724] sm:$0xf0] }
 0x281   : > { %6477 = vmatpush.bf16.msra.mxu1 %v8865_v61  ;;  %v6288_v61 = vpop.f32.mrf.mxu0  ;;  %v10346_v8 = vld [vmem:[%s13179_s1 + $0xfac] sm:$0xf0] }
 0x282   : > { %6514 = vmatpush.bf16.msra.mxu0 %v9593_v50  ;;  %6453 = vmatpush.bf16.msrb.mxu3 %v8361_v2  ;;  %v10069_v50 = vor.u32 %v12089_v3, %v10066_v22  ;;  %v12033_v2 = vld [vmem:[%s13179_s1 + $0xba4] sm:$0xf]  ;;  %v9282_v61 = vld [vmem:[%s13179_s1 + $0x75c] sm:$0xf0] }
 0x283   : > { %6537 = vmatpush.bf16.msra.mxu2 %v10125_v24  ;;  %v9481_v24 = vor.u32 %v11942_v52, %v9478_v25  ;;  %v9758_v52 = vld [vmem:[%s13179_s1 + $0xb14] sm:$0xf0] }
 0x284   : > { %6493 = vmatmul.bf16.vlgmr.msrb.gmra.mxu2 %v13728_v1 }
 0x285   : > { %6478 = vmatpush.bf16.msra.mxu1 %v8837_v46  ;;  %6454 = vmatmul.bf16.vlgmr.msrb.gmra.mxu3 %v13481_v31  ;;  %v9845_v46 = vor.u32 %v12033_v2, %v9842_v10  ;;  %v12194_v2 = vld [vmem:[%s13179_s1 + $0x10ac] sm:$0xf]  ;;  %v10486_v10 = vld [vmem:[%s13179_s1 + $0x10c4] sm:$0xf0] }
 0x286   : > { %6498 = vmatpush.bf16.msra.mxu3 %v9453_v21  ;;  %6515 = vmatpush.bf16.msra.mxu0 %v9565_v54  ;;  %v10041_v21 = vor.u32 %v12082_v16, %v10038_v9  ;;  %v12026_v54 = vld [vmem:[%s13179_s1 + $0xb6c] sm:$0xf]  ;;  %v12012_v9 = vld [vmem:[%s13179_s1 + $0xafc] sm:$0xf]  ;;  %v10489_v44 = vor.u32 %v12194_v2, %v10486_v10  ;;  %v12173_v2 = vld [vmem:[%s13179_s1 + $0x1004] sm:$0xf] }
 0x287   : > { %6538 = vmatpush.bf16.msra.mxu2 %v10097_v62  ;;  %v9817_v62 = vor.u32 %v12026_v54, %v9814_v4  ;;  %v6260_v14 = vpop.f32.mrf.mxu2  ;;  %v9761_v43 = vor.u32 %v12012_v9, %v9758_v52  ;;  %v9730_v54 = vld [vmem:[%s13179_s1 + $0xadc] sm:$0xf0]  ;;  %v12299_v52 = vld [vmem:[%s13179_s1 + $0x13f4] sm:$0xf] }
 0x288   : > { %v10402_v10 = vld [vmem:[%s13179_s1 + $0x101c] sm:$0xf0] }
 0x289   : > { %6479 = vmatpush.bf16.msra.mxu1 %v8809_v38  ;;  %v12068_v38 = vld [vmem:[%s13179_s1 + $0xcbc] sm:$0xf]  ;;  %v6247_v3 = vpop.f32.mrf.mxu1 }
 0x28a   : > { %6499 = vmatpush.bf16.msra.mxu3 %v9425_v27  ;;  %6516 = vmatpush.bf16.msra.mxu0 %v9537_v34  ;;  %v9310_v27 = vld [vmem:[%s13179_s1 + $0x794] sm:$0xf0]  ;;  %v12019_v34 = vld [vmem:[%s13179_s1 + $0xb34] sm:$0xf]  ;;  %v6248_v15 = vadd.f32 %v6247_v3, %v14508_v51  ;;  %v9985_v59 = vor.u32 %v12068_v38, %v9982_v28  ;;  %v10517_v51 = vor.u32 %v12201_v17, %v10514_v36  ;;  %v12152_v28 = vld [vmem:[%s13179_s1 + $0xf5c] sm:$0xf] }
 0x28b   : > { %6539 = vmatpush.bf16.msra.mxu2 %v10069_v50  ;;  %v9313_v22 = vor.u32 %v11900_v6, %v9310_v27  ;;  %v12061_v50 = vld [vmem:[%s13179_s1 + $0xc84] sm:$0xf]  ;;  %v10318_v3 = vld [vmem:[%s13179_s1 + $0xf74] sm:$0xf0]  ;;  %v10934_v17 = vld [vmem:[%s13179_s1 + $0x1444] sm:$0xf0]  ;;  %v10461_v36 = vor.u32 %v12187_v33, %v10458_v18 }
 0x28c   : > { %6480 = vmatmul.bf16.vlgmr.msra.gmra.mxu1 %v13428_v30  ;;  %v6261_v16 = vadd.f32 %v6260_v14, %v6248_v15  ;;  %v11998_v15 = vld [vmem:[%s13179_s1 + $0xa8c] sm:$0xf]  ;;  %v9702_v14 = vld [vmem:[%s13179_s1 + $0xaa4] sm:$0xf0]  ;;  %v12257_v33 = vld [vmem:[%s13179_s1 + $0x12a4] sm:$0xf] }
 0x28d   : > { %6524 = vmatpush.bf16.msrb.mxu1 %v9901_v7  ;;  %v9786_v7 = vld [vmem:[%s13179_s1 + $0xb4c] sm:$0xf0]  ;;  %v10738_v18 = vld [vmem:[%s13179_s1 + $0x12bc] sm:$0xf0] }
 0x28e   : > { %6500 = vmatpush.bf16.msra.mxu3 %v9397_v42  ;;  %6517 = vmatpush.bf16.msra.mxu0 %v9509_v13  ;;  %v11893_v42 = vld [vmem:[%s13179_s1 + $0x744] sm:$0xf]  ;;  %v9789_v58 = vor.u32 %v12019_v34, %v9786_v7 }
 0x28f   : > { %6540 = vmatpush.bf16.msra.mxu2 %v10041_v21  ;;  %v12313_v13 = vld [vmem:[%s13179_s1 + $0x1464] sm:$0xf]  ;;  %v9285_v25 = vor.u32 %v11893_v42, %v9282_v61  ;;  %v12054_v21 = vld [vmem:[%s13179_s1 + $0xc4c] sm:$0xf]  ;;  %v10430_v42 = vld [vmem:[%s13179_s1 + $0x1054] sm:$0xf0] }
 0x290   : > { %v6273_v6 = vpop.f32.mrf.mxu3  ;;  %v12271_v61 = vld [vmem:[%s13179_s1 + $0x1314] sm:$0xf] }
 0x291   : > { %6525 = vmatpush.bf16.msrb.mxu1 %v9873_v35  ;;  %v10962_v35 = vld [vmem:[%s13179_s1 + $0x147c] sm:$0x30]  ;;  %v6249_v4 = vpop.f32.mrf.mxu1 }
 0x292   : > { %6501 = vmatpush.bf16.msra.mxu3 %v9369_v47  ;;  %6518 = vmatpush.bf16.msra.mxu0 %v9481_v24  ;;  %v9957_v47 = vor.u32 %v12061_v50, %v9954_v41  ;;  %v10965_v57 = vor.u32 %v12313_v13, %v10962_v35  ;;  %v9926_v24 = vld [vmem:[%s13179_s1 + $0xc64] sm:$0xf0]  ;;  %v14571_v34 = vpop.f32.mrf.mxu0  ;;  %v10794_v50 = vld [vmem:[%s13179_s1 + $0x132c] sm:$0xf0]  ;;  %v10321_v41 = vor.u32 %v12152_v28, %v10318_v3  ;;  %v12166_v4 = vld [vmem:[%s13179_s1 + $0xfcc] sm:$0xf] }
 0x293   : > { %6541 = vmatpush.bf16.msra.mxu2 %v10013_v60  ;;  %v6262_v60 = vpop.f32.mrf.mxu2  ;;  %v9929_v27 = vor.u32 %v12054_v21, %v9926_v24  ;;  %v9705_v35 = vor.u32 %v11998_v15, %v9702_v14  ;;  %v12138_v24 = vld [vmem:[%s13179_s1 + $0xeec] sm:$0xf]  ;;  %v10234_v28 = vld [vmem:[%s13179_s1 + $0xecc] sm:$0xf0]  ;;  %v12285_v3 = vld [vmem:[%s13179_s1 + $0x1384] sm:$0xf] }
 0x294   : > { %v5967_v38 = vsel %vm5956_vm1, %v10965_v57, 0  ;;  %v10710_v15 = vld [vmem:[%s13179_s1 + $0x1284] sm:$0xf0] }
 0x295   : > { %6526 = vmatpush.bf16.msrb.mxu1 %v9845_v46  ;;  %6519 = vmatmul.bf16.vlgmr.msra.gmra.mxu0 %v13879_v39  ;;  %v12159_v46 = vld [vmem:[%s13179_s1 + $0xf94] sm:$0xf] }
 0x296   : > { %6563 = vmatpush.bf16.msrb.mxu0 %v10573_v45  ;;  %6502 = vmatpush.bf16.msra.mxu3 %v9341_v48  ;;  %v12005_v45 = vld [vmem:[%s13179_s1 + $0xac4] sm:$0xf]  ;;  %v9257_v48 = vor.u32 %v11886_v26, %v9254_v20  ;;  %v10766_v26 = vld [vmem:[%s13179_s1 + $0x12f4] sm:$0xf0] }
 0x297   : > { %6542 = vmatpush.bf16.msra.mxu2 %v9985_v59  ;;  %v9733_v7 = vor.u32 %v12005_v45, %v9730_v54  ;;  %v12180_v59 = vld [vmem:[%s13179_s1 + $0x103c] sm:$0xf]  ;;  %v10878_v54 = vld [vmem:[%s13179_s1 + $0x13d4] sm:$0xf0] }
 0x298   : > { %v10433_v9 = vor.u32 %v12180_v59, %v10430_v42  ;;  %v6275_v20 = vpop.f32.mrf.mxu3  ;;  %v12292_v45 = vld [vmem:[%s13179_s1 + $0x13bc] sm:$0xf]  ;;  %v8980_v59 = vld [vmem:[%s13179_s1 + $0x4e0] sm:$0xf] }
 0x299   : > { %6527 = vmatpush.bf16.msrb.mxu1 %v9817_v62  ;;  %v10349_v62 = vor.u32 %v12159_v46, %v10346_v8  ;;  %v10262_v46 = vld [vmem:[%s13179_s1 + $0xf04] sm:$0xf0]  ;;  %v10405_v8 = vor.u32 %v12173_v2, %v10402_v10  ;;  %v11820_v42 = vld [vmem:[%s13179_s1 + $0x4f8] sm:$0xf0] }
 0x29a   : > { %6564 = vmatpush.bf16.msrb.mxu0 %v10545_v5  ;;  %6503 = vmatpush.bf16.msra.mxu3 %v9313_v22  ;;  %v6274_v5 = vadd.f32 %v6273_v6, %v6261_v16  ;;  %v12306_v22 = vld [vmem:[%s13179_s1 + $0x142c] sm:$0xf]  ;;  %v12145_v16 = vld [vmem:[%s13179_s1 + $0xf24] sm:$0xf]  ;;  %v6301_v57 = vpop.f32.mrf.mxu0  ;;  %v10265_v60 = vor.u32 %v12138_v24, %v10262_v46  ;;  %v9008_v6 = vld [vmem:[%s13179_s1 + $0x518] sm:$0xf] }
 0x29b   : > { %6543 = vmatpush.bf16.msra.mxu2 %v9957_v47  ;;  %v10937_v13 = vor.u32 %v12306_v22, %v10934_v17  ;;  %v12264_v47 = vld [vmem:[%s13179_s1 + $0x12dc] sm:$0xf]  ;;  %v10850_v22 = vld [vmem:[%s13179_s1 + $0x139c] sm:$0xf0] }
 0x29c   : > { %v10178_v24 = vld [vmem:[%s13179_s1 + $0xe5c] sm:$0xf0] }
 0x29d   : > { %6528 = vmatpush.bf16.msrb.mxu1 %v9789_v58  ;;  %v14583_v58 = vadd.f32 %v14496_v56, %v6274_v5  ;;  %v10797_v56 = vor.u32 %v12271_v61, %v10794_v50  ;;  %v10853_v61 = vor.u32 %v12285_v3, %v10850_v22  ;;  %v12124_v50 = vld [vmem:[%s13179_s1 + $0xe7c] sm:$0xf]  ;;  %v11701_v22 = vld [vmem:[%s13179_s1 + $0x140] sm:$0xf0] }
 0x29e   : > { %6565 = vmatpush.bf16.msrb.mxu0 %v10517_v51  ;;  %6504 = vmatpush.bf16.msra.mxu3 %v9285_v25  ;;  %v10290_v51 = vld [vmem:[%s13179_s1 + $0xf3c] sm:$0xf0]  ;;  %v10906_v25 = vld [vmem:[%s13179_s1 + $0x140c] sm:$0xf0] }
 0x29f   : > { %6544 = vmatpush.bf16.msra.mxu2 %v9929_v27  ;;  %v10293_v21 = vor.u32 %v12145_v16, %v10290_v51  ;;  %v11827_v27 = vld [vmem:[%s13179_s1 + $0x530] sm:$0xf0]  ;;  %v10822_v16 = vld [vmem:[%s13179_s1 + $0x1364] sm:$0xf0]  ;;  %v8560_v51 = vld [vmem:[%s13179_s1 + $0x198] sm:$0xf] }
 0x2a0   : > { %v9009_v17 = vor.u32 %v11827_v27, %v9008_v6  ;;  %v12110_v6 = vld [vmem:[%s13179_s1 + $0xe0c] sm:$0xf]  ;;  %v10150_v27 = vld [vmem:[%s13179_s1 + $0xe24] sm:$0xf0] }
 0x2a1   : > { %6529 = vmatpush.bf16.msrb.mxu1 %v9761_v43  ;;  %v10909_v43 = vor.u32 %v12299_v52, %v10906_v25  ;;  %v12243_v52 = vld [vmem:[%s13179_s1 + $0x1234] sm:$0xf]  ;;  %v10682_v25 = vld [vmem:[%s13179_s1 + $0x124c] sm:$0xf0] }
 0x2a2   : > { %6566 = vmatpush.bf16.msrb.mxu0 %v10489_v44  ;;  %6505 = vmatpush.bf16.msra.mxu3 %v9257_v48  ;;  %v10769_v44 = vor.u32 %v12264_v47, %v10766_v26  ;;  %v10374_v48 = vld [vmem:[%s13179_s1 + $0xfe4] sm:$0xf0]  ;;  %v11813_v26 = vld [vmem:[%s13179_s1 + $0x4c0] sm:$0xf0] }
 0x2a3   : > { %6591 = vmatpush.bf16.msrb.mxu2 %v5967_v38  ;;  %v12131_v38 = vld [vmem:[%s13179_s1 + $0xeb4] sm:$0xf]  ;;  %v10377_v5 = vor.u32 %v12166_v4, %v10374_v48  ;;  %v8952_v47 = vld [vmem:[%s13179_s1 + $0x4a8] sm:$0xf]  ;;  %v12236_v4 = vld [vmem:[%s13179_s1 + $0x11fc] sm:$0xf] }
 0x2a4   : > { %6545 = vmatmul.bf16.vlgmr.msra.gmra.mxu2 %v13930_v49  ;;  %v10237_v14 = vor.u32 %v12131_v38, %v10234_v28  ;;  %v10654_v48 = vld [vmem:[%s13179_s1 + $0x1214] sm:$0xf0]  ;;  %v8504_v28 = vld [vmem:[%s13179_s1 + $0x128] sm:$0xf] }
 0x2a5   : > { %6530 = vmatpush.bf16.msrb.mxu1 %v9733_v7  ;;  %6506 = vmatmul.bf16.vlgmr.msra.gmra.mxu3 %v13847_v0  ;;  %v10741_v7 = vor.u32 %v12257_v33, %v10738_v18  ;;  %v8924_v18 = vld [vmem:[%s13179_s1 + $0x470] sm:$0xf]  ;;  %v10657_v38 = vor.u32 %v12236_v4, %v10654_v48  ;;  %v8448_v4 = vld [vmem:[%s13179_s1 + $0xb8] sm:$0xf]  ;;  %v11687_v48 = vld [vmem:[%s13179_s1 + $0xd0] sm:$0xf0] }
 0x2a6   : > { %6550 = vmatpush.bf16.msrb.mxu3 %v10349_v62  ;;  %6567 = vmatpush.bf16.msrb.mxu0 %v10461_v36  ;;  %v10881_v62 = vor.u32 %v12292_v45, %v10878_v54  ;;  %v12250_v36 = vld [vmem:[%s13179_s1 + $0x126c] sm:$0xf]  ;;  %v8953_v54 = vor.u32 %v11813_v26, %v8952_v47  ;;  %v10598_v47 = vld [vmem:[%s13179_s1 + $0x11a4] sm:$0xf0]  ;;  %v8868_v26 = vld [vmem:[%s13179_s1 + $0x400] sm:$0xf] }
 0x2a7   : > { %6592 = vmatpush.bf16.msrb.mxu2 %v10937_v13  ;;  %v10713_v13 = vor.u32 %v12250_v36, %v10710_v15  ;;  %v10626_v36 = vld [vmem:[%s13179_s1 + $0x11dc] sm:$0xf0] }
 0x2a9   : > { %6531 = vmatpush.bf16.msrb.mxu1 %v9705_v35  ;;  %v12278_v35 = vld [vmem:[%s13179_s1 + $0x134c] sm:$0xf]  ;;  %v6312_v2 = vpop.f32.mrf.mxu1 }
 0x2aa   : > { %6551 = vmatpush.bf16.msrb.mxu3 %v10321_v41  ;;  %6568 = vmatpush.bf16.msrb.mxu0 %v10433_v9  ;;  %v10206_v41 = vld [vmem:[%s13179_s1 + $0xe94] sm:$0xf0]  ;;  %v8981_v9 = vor.u32 %v11820_v42, %v8980_v59  ;;  %v6313_v20 = vadd.f32 %v6312_v2, %v14571_v34  ;;  %v10825_v57 = vor.u32 %v12278_v35, %v10822_v16  ;;  %v11708_v34 = vld [vmem:[%s13179_s1 + $0x178] sm:$0xf0]  ;;  %v11799_v42 = vld [vmem:[%s13179_s1 + $0x450] sm:$0xf0] }
 0x2ab   : > { %6593 = vmatpush.bf16.msrb.mxu2 %v10909_v43  ;;  %v10209_v10 = vor.u32 %v12124_v50, %v10206_v41  ;;  %v12117_v43 = vld [vmem:[%s13179_s1 + $0xe44] sm:$0xf]  ;;  %v8896_v59 = vld [vmem:[%s13179_s1 + $0x438] sm:$0xf] }
 0x2ac   : > { %6532 = vmatmul.bf16.vlgmr.msrb.gmra.mxu1 %v13802_v37  ;;  %v10181_v33 = vor.u32 %v12117_v43, %v10178_v24  ;;  %v8897_v2 = vor.u32 %v11799_v42, %v8896_v59  ;;  %v11883_v43 = vld [vmem:[%s13179_s1 + $0x6f0] sm:$0xf0]  ;;  %v9176_v59 = vld [vmem:[%s13179_s1 + $0x668] sm:$0xf]  ;;  %v11869_v42 = vld [vmem:[%s13179_s1 + $0x680] sm:$0xf0] }
 0x2ad   : > { %6576 = vmatpush.bf16.msra.mxu1 %v10797_v56  ;;  %v11715_v56 = vld [vmem:[%s13179_s1 + $0x1b0] sm:$0xf0] }
 0x2ae   : > { %6552 = vmatpush.bf16.msrb.mxu3 %v10293_v21  ;;  %6569 = vmatpush.bf16.msrb.mxu0 %v10405_v8  ;;  %v6325_v21 = vpop.f32.mrf.mxu2  ;;  %v8561_v46 = vor.u32 %v11715_v56, %v8560_v51  ;;  %v10685_v8 = vor.u32 %v12243_v52, %v10682_v25  ;;  %v8505_v51 = vor.u32 %v11701_v22, %v8504_v28  ;;  %v11694_v56 = vld [vmem:[%s13179_s1 + $0x108] sm:$0xf0]  ;;  %v8756_v52 = vld [vmem:[%s13179_s1 + $0x320] sm:$0xf]  ;;  %v11764_v25 = vld [vmem:[%s13179_s1 + $0x338] sm:$0xf0] }
 0x2af   : > { %6594 = vmatpush.bf16.msrb.mxu2 %v10881_v62  ;;  %v6326_v45 = vadd.f32 %v6325_v21, %v6313_v20  ;;  %v11792_v21 = vld [vmem:[%s13179_s1 + $0x418] sm:$0xf0]  ;;  %v8757_v24 = vor.u32 %v11764_v25, %v8756_v52  ;;  %v8449_v28 = vor.u32 %v11687_v48, %v8448_v4  ;;  %v11673_v52 = vld [vmem:[%s13179_s1 + $0x60] sm:$0xf0]  ;;  %v9120_v4 = vld [vmem:[%s13179_s1 + $0x5f8] sm:$0xf] }
 0x2b0   : > { %v6338_v50 = vpop.f32.mrf.mxu3  ;;  %v11855_v48 = vld [vmem:[%s13179_s1 + $0x610] sm:$0xf0] }
 0x2b1   : > { %6577 = vmatpush.bf16.msra.mxu1 %v10769_v44  ;;  %v8532_v44 = vld [vmem:[%s13179_s1 + $0x160] sm:$0xf]  ;;  %v6314_v15 = vpop.f32.mrf.mxu1  ;;  %v6339_v35 = vadd.f32 %v6338_v50, %v6326_v45  ;;  %v11757_v45 = vld [vmem:[%s13179_s1 + $0x300] sm:$0xf0]  ;;  %v9904_v50 = vld [vmem:[%s13179_s1 + $0xc18] sm:$0xf] }
 0x2b2   : > { %6553 = vmatpush.bf16.msrb.mxu3 %v10265_v60  ;;  %6570 = vmatpush.bf16.msrb.mxu0 %v10377_v5  ;;  %v11806_v60 = vld [vmem:[%s13179_s1 + $0x488] sm:$0xf0]  ;;  %v8533_v62 = vor.u32 %v11708_v34, %v8532_v44  ;;  %v8784_v5 = vld [vmem:[%s13179_s1 + $0x358] sm:$0xf]  ;;  %v6351_v16 = vpop.f32.mrf.mxu0  ;;  %v8728_v44 = vld [vmem:[%s13179_s1 + $0x2e8] sm:$0xf] }
 0x2b3   : > { %6595 = vmatpush.bf16.msrb.mxu2 %v10853_v61  ;;  %v8925_v3 = vor.u32 %v11806_v60, %v8924_v18  ;;  %v14653_v20 = vadd.f32 %v6351_v16, %v6339_v35  ;;  %v11785_v18 = vld [vmem:[%s13179_s1 + $0x3e0] sm:$0xf0]  ;;  %v9204_v60 = vld [vmem:[%s13179_s1 + $0x6a0] sm:$0xf]  ;;  %v8812_v15 = vld [vmem:[%s13179_s1 + $0x390] sm:$0xf] }
 0x2b4   : > { %v8672_v35 = vld [vmem:[%s13179_s1 + $0x278] sm:$0xf]  ;;  %v11743_v16 = vld [vmem:[%s13179_s1 + $0x290] sm:$0xf0] }
 0x2b5   : > { %6578 = vmatpush.bf16.msra.mxu1 %v10741_v7  ;;  %6571 = vmatmul.bf16.vlgmr.msrb.gmra.mxu0 %v14014_v29  ;;  %v11771_v7 = vld [vmem:[%s13179_s1 + $0x370] sm:$0xf0] }
 0x2b6   : > { %6628 = vmatpush.bf16.msra.mxu0 %v9009_v17  ;;  %6554 = vmatpush.bf16.msrb.mxu3 %v10237_v14  ;;  %v12229_v17 = vld [vmem:[%s13179_s1 + $0x11c4] sm:$0xf]  ;;  %v10153_v14 = vor.u32 %v12110_v6, %v10150_v27  ;;  %v6327_v61 = vpop.f32.mrf.mxu2  ;;  %v8785_v41 = vor.u32 %v11771_v7, %v8784_v5  ;;  %v11876_v6 = vld [vmem:[%s13179_s1 + $0x6b8] sm:$0xf0]  ;;  %v8700_v5 = vld [vmem:[%s13179_s1 + $0x2b0] sm:$0xf] }
 0x2b7   : > { %6596 = vmatpush.bf16.msrb.mxu2 %v10825_v57  ;;  %v9232_v57 = vld [vmem:[%s13179_s1 + $0x6d8] sm:$0xf]  ;;  %v11750_v7 = vld [vmem:[%s13179_s1 + $0x2c8] sm:$0xf0]  ;;  %v9205_v22 = vor.u32 %v11876_v6, %v9204_v60  ;;  %v9848_v60 = vld [vmem:[%s13179_s1 + $0xba8] sm:$0xf] }
 0x2b8   : > { %v9233_v34 = vor.u32 %v11883_v43, %v9232_v57  ;;  %v6340_v27 = vpop.f32.mrf.mxu3  ;;  %v8701_v61 = vor.u32 %v11750_v7, %v8700_v5  ;;  %v8644_v43 = vld [vmem:[%s13179_s1 + $0x240] sm:$0xf]  ;;  %v12037_v6 = vld [vmem:[%s13179_s1 + $0xbc0] sm:$0xf0] }
 0x2b9   : > { %6579 = vmatpush.bf16.msra.mxu1 %v10713_v13  ;;  %v8476_v13 = vld [vmem:[%s13179_s1 + $0xf0] sm:$0xf]  ;;  %v11729_v5 = vld [vmem:[%s13179_s1 + $0x220] sm:$0xf0] }
 0x2ba   : > { %6629 = vmatpush.bf16.msra.mxu0 %v8981_v9  ;;  %6555 = vmatpush.bf16.msrb.mxu3 %v10209_v10  ;;  %v10629_v9 = vor.u32 %v12229_v17, %v10626_v36  ;;  %v12222_v10 = vld [vmem:[%s13179_s1 + $0x118c] sm:$0xf]  ;;  %v8420_v17 = vld [vmem:[%s13179_s1 + $0x80] sm:$0xf]  ;;  %v11680_v36 = vld [vmem:[%s13179_s1 + $0x98] sm:$0xf0] }
 0x2bb   : > { %6602 = vmatpush.bf16.msra.mxu2 %v8561_v46  ;;  %v8477_v46 = vor.u32 %v11694_v56, %v8476_v13  ;;  %v8421_v13 = vor.u32 %v11680_v36, %v8420_v17  ;;  %v8392_v56 = vld [vmem:[%s13179_s1 + $0x48] sm:$0xf]  ;;  %v9849_v36 = vor.u32 %v12037_v6, %v9848_v60  ;;  %v11834_v60 = vld [vmem:[%s13179_s1 + $0x568] sm:$0xf0]  ;;  %v9764_v6 = vld [vmem:[%s13179_s1 + $0xb00] sm:$0xf] }
 0x2bc   : > { %10981 = vmatmul.msk.bf16.vlgmr.msrb.gmra.mxu2 %vm5952_vm9, %v14010_v53  ;;  %v8393_v57 = vor.u32 %v11673_v52, %v8392_v56  ;;  %v11925_v52 = vld [vmem:[%s13179_s1 + $0x840] sm:$0xf0] }
 0x2bd   : > { %6580 = vmatpush.bf16.msra.mxu1 %v10685_v8  ;;  %v10601_v8 = vor.u32 %v12222_v10, %v10598_v47  ;;  %v11862_v10 = vld [vmem:[%s13179_s1 + $0x648] sm:$0xf0]  ;;  %v8673_v47 = vor.u32 %v11743_v16, %v8672_v35  ;;  %v9400_v16 = vld [vmem:[%s13179_s1 + $0x828] sm:$0xf] }
 0x2be   : > { %6630 = vmatpush.bf16.msra.mxu0 %v8953_v54  ;;  %6556 = vmatpush.bf16.msrb.mxu3 %v10181_v33  ;;  %v8869_v54 = vor.u32 %v11792_v21, %v8868_v26  ;;  %v8840_v33 = vld [vmem:[%s13179_s1 + $0x3c8] sm:$0xf]  ;;  %v9876_v26 = vld [vmem:[%s13179_s1 + $0xbe0] sm:$0xf]  ;;  %v12044_v21 = vld [vmem:[%s13179_s1 + $0xbf8] sm:$0xf0] }
 0x2bf   : > { %6603 = vmatpush.bf16.msra.mxu2 %v8533_v62  ;;  %v8729_v62 = vor.u32 %v11757_v45, %v8728_v44  ;;  %v11666_v44 = vld [vmem:[%s13179_s1 + $0x28] sm:$0xf0]  ;;  %v9456_v45 = vld [vmem:[%s13179_s1 + $0x898] sm:$0xf] }
 0x2c1   : > { %6581 = vmatpush.bf16.msra.mxu1 %v10657_v38  ;;  %v6353_v38 = vpop.f32.mrf.mxu0 }
 0x2c2   : > { %6631 = vmatpush.bf16.msra.mxu0 %v8925_v3  ;;  %6557 = vmatpush.bf16.msrb.mxu3 %v10153_v14  ;;  %v8841_v3 = vor.u32 %v11785_v18, %v8840_v33  ;;  %v11778_v14 = vld [vmem:[%s13179_s1 + $0x3a8] sm:$0xf0] }
 0x2c3   : > { %6604 = vmatpush.bf16.msra.mxu2 %v8505_v51  ;;  %v8813_v51 = vor.u32 %v11778_v14, %v8812_v15  ;;  %v9092_v15 = vld [vmem:[%s13179_s1 + $0x5c0] sm:$0xf]  ;;  %v11848_v14 = vld [vmem:[%s13179_s1 + $0x5d8] sm:$0xf0] }
 0x2c4   : > { %v9093_v35 = vor.u32 %v11848_v14, %v9092_v15  ;;  %v9344_v15 = vld [vmem:[%s13179_s1 + $0x7b8] sm:$0xf]  ;;  %v11911_v14 = vld [vmem:[%s13179_s1 + $0x7d0] sm:$0xf0] }
 0x2c5   : > { %6582 = vmatpush.bf16.msra.mxu1 %v10629_v9  ;;  %6558 = vmatmul.bf16.vlgmr.msrb.gmra.mxu3 %v13994_v55  ;;  %v9177_v9 = vor.u32 %v11869_v42, %v9176_v59  ;;  %v9820_v42 = vld [vmem:[%s13179_s1 + $0xb70] sm:$0xf] }
 0x2c6   : > { %6615 = vmatpush.bf16.msra.mxu3 %v8785_v41  ;;  %6632 = vmatpush.bf16.msra.mxu0 %v8897_v2  ;;  %v12051_v41 = vld [vmem:[%s13179_s1 + $0xc30] sm:$0xf0]  ;;  %v9148_v2 = vld [vmem:[%s13179_s1 + $0x630] sm:$0xf] }
 0x2c7   : > { %6605 = vmatpush.bf16.msra.mxu2 %v8477_v46  ;;  %v9905_v25 = vor.u32 %v12051_v41, %v9904_v50  ;;  %v9149_v46 = vor.u32 %v11862_v10, %v9148_v2  ;;  %v8588_v50 = vld [vmem:[%s13179_s1 + $0x1d0] sm:$0xf]  ;;  %v11722_v41 = vld [vmem:[%s13179_s1 + $0x1e8] sm:$0xf0]  ;;  %v11841_v2 = vld [vmem:[%s13179_s1 + $0x5a0] sm:$0xf0] }
 0x2c9   : > { %6583 = vmatpush.bf16.msra.mxu1 %v10601_v8  ;;  %v8364_v8 = vld [vmem:[%s13179_s1 + $0x10] sm:$0xf]  ;;  %v6364_v33 = vpop.f32.mrf.mxu1 }
 0x2ca   : > { %6616 = vmatpush.bf16.msra.mxu3 %v8757_v24  ;;  %6633 = vmatpush.bf16.msra.mxu0 %v8869_v54  ;;  %v11736_v24 = vld [vmem:[%s13179_s1 + $0x258] sm:$0xf0]  ;;  %v9877_v54 = vor.u32 %v12044_v21, %v9876_v26  ;;  %v6365_v27 = vadd.f32 %v6364_v33, %v14653_v20  ;;  %v8365_v38 = vor.u32 %v11666_v44, %v8364_v8  ;;  %v9792_v26 = vld [vmem:[%s13179_s1 + $0xb38] sm:$0xf]  ;;  %v12023_v21 = vld [vmem:[%s13179_s1 + $0xb50] sm:$0xf0] }
 0x2cb   : > { %6606 = vmatpush.bf16.msra.mxu2 %v8449_v28  ;;  %v8645_v18 = vor.u32 %v11736_v24, %v8644_v43  ;;  %v8616_v28 = vld [vmem:[%s13179_s1 + $0x208] sm:$0xf]  ;;  %v11932_v20 = vld [vmem:[%s13179_s1 + $0x878] sm:$0xf0]  ;;  %v9793_v33 = vor.u32 %v12023_v21, %v9792_v26  ;;  %v12093_v21 = vld [vmem:[%s13179_s1 + $0xd80] sm:$0xf0] }
 0x2cc   : > { %6584 = vmatmul.bf16.vlgmr.msra.gmra.mxu1 %v13966_v11  ;;  %v8617_v59 = vor.u32 %v11729_v5, %v8616_v28  ;;  %v12107_v28 = vld [vmem:[%s13179_s1 + $0xdf0] sm:$0xf0]  ;;  %v10072_v26 = vld [vmem:[%s13179_s1 + $0xd68] sm:$0xf] }
 0x2cd   : > { %6641 = vmatpush.bf16.msrb.mxu1 %v9233_v34  ;;  %v11939_v34 = vld [vmem:[%s13179_s1 + $0x8b0] sm:$0xf0] }
 0x2ce   : > { %6617 = vmatpush.bf16.msra.mxu3 %v8729_v62  ;;  %6634 = vmatpush.bf16.msra.mxu0 %v8841_v3  ;;  %v6377_v62 = vpop.f32.mrf.mxu2  ;;  %v9457_v7 = vor.u32 %v11939_v34, %v9456_v45  ;;  %v9121_v3 = vor.u32 %v11855_v48, %v9120_v4  ;;  %v9401_v45 = vor.u32 %v11925_v52, %v9400_v16  ;;  %v11918_v34 = vld [vmem:[%s13179_s1 + $0x808] sm:$0xf0]  ;;  %v9652_v4 = vld [vmem:[%s13179_s1 + $0xa20] sm:$0xf]  ;;  %v11988_v48 = vld [vmem:[%s13179_s1 + $0xa38] sm:$0xf0] }
 0x2cf   : > { %6607 = vmatpush.bf16.msra.mxu2 %v8421_v13  ;;  %v6378_v17 = vadd.f32 %v6377_v62, %v6365_v27  ;;  %v12016_v62 = vld [vmem:[%s13179_s1 + $0xb18] sm:$0xf0]  ;;  %v9653_v5 = vor.u32 %v11988_v48, %v9652_v4  ;;  %v9345_v16 = vor.u32 %v11911_v14, %v9344_v15  ;;  %v11897_v4 = vld [vmem:[%s13179_s1 + $0x760] sm:$0xf0]  ;;  %v10016_v15 = vld [vmem:[%s13179_s1 + $0xcf8] sm:$0xf] }
 0x2d0   : > { %v6390_v43 = vpop.f32.mrf.mxu3  ;;  %v12079_v14 = vld [vmem:[%s13179_s1 + $0xd10] sm:$0xf0] }
 0x2d1   : > { %6642 = vmatpush.bf16.msrb.mxu1 %v9205_v22  ;;  %v9428_v22 = vld [vmem:[%s13179_s1 + $0x860] sm:$0xf]  ;;  %v6366_v10 = vpop.f32.mrf.mxu1  ;;  %v6391_v8 = vadd.f32 %v6390_v43, %v6378_v17  ;;  %v11981_v17 = vld [vmem:[%s13179_s1 + $0xa00] sm:$0xf0]  ;;  %v10800_v43 = vld [vmem:[%s13179_s1 + $0x1318] sm:$0xf] }
 0x2d2   : > { %6618 = vmatpush.bf16.msra.mxu3 %v8701_v61  ;;  %6635 = vmatpush.bf16.msra.mxu0 %v8813_v51  ;;  %v12030_v61 = vld [vmem:[%s13179_s1 + $0xb88] sm:$0xf0]  ;;  %v9429_v13 = vor.u32 %v11932_v20, %v9428_v22  ;;  %v9680_v51 = vld [vmem:[%s13179_s1 + $0xa58] sm:$0xf]  ;;  %v6403_v44 = vpop.f32.mrf.mxu0  ;;  %v9624_v22 = vld [vmem:[%s13179_s1 + $0x9e8] sm:$0xf] }
 0x2d3   : > { %6608 = vmatpush.bf16.msra.mxu2 %v8393_v57  ;;  %v9821_v56 = vor.u32 %v12030_v61, %v9820_v42  ;;  %v14724_v27 = vadd.f32 %v6403_v44, %v6391_v8  ;;  %v12009_v42 = vld [vmem:[%s13179_s1 + $0xae0] sm:$0xf0]  ;;  %v10100_v61 = vld [vmem:[%s13179_s1 + $0xda0] sm:$0xf]  ;;  %v9708_v10 = vld [vmem:[%s13179_s1 + $0xa90] sm:$0xf] }
 0x2d4   : > { %v9568_v8 = vld [vmem:[%s13179_s1 + $0x978] sm:$0xf]  ;;  %v11967_v44 = vld [vmem:[%s13179_s1 + $0x990] sm:$0xf0] }
 0x2d5   : > { %6643 = vmatpush.bf16.msrb.mxu1 %v9177_v9  ;;  %6636 = vmatmul.bf16.vlgmr.msra.gmra.mxu0 %v13428_v30  ;;  %v11995_v9 = vld [vmem:[%s13179_s1 + $0xa70] sm:$0xf0] }
 0x2d6   : > { %6680 = vmatpush.bf16.msrb.mxu0 %v9905_v25  ;;  %6619 = vmatpush.bf16.msra.mxu3 %v8673_v47  ;;  %v9064_v25 = vld [vmem:[%s13179_s1 + $0x588] sm:$0xf]  ;;  %v8589_v47 = vor.u32 %v11722_v41, %v8588_v50  ;;  %v6379_v57 = vpop.f32.mrf.mxu2  ;;  %v9681_v24 = vor.u32 %v11995_v9, %v9680_v51  ;;  %v12100_v50 = vld [vmem:[%s13179_s1 + $0xdb8] sm:$0xf0]  ;;  %v9596_v51 = vld [vmem:[%s13179_s1 + $0x9b0] sm:$0xf] }
 0x2d7   : > { %6609 = vmatpush.bf16.msra.mxu2 %v8365_v38  ;;  %v10128_v38 = vld [vmem:[%s13179_s1 + $0xdd8] sm:$0xf]  ;;  %v11974_v9 = vld [vmem:[%s13179_s1 + $0x9c8] sm:$0xf0]  ;;  %v10101_v52 = vor.u32 %v12100_v50, %v10100_v61  ;;  %v12261_v61 = vld [vmem:[%s13179_s1 + $0x12c0] sm:$0xf0] }
 0x2d8   : > { %v10129_v20 = vor.u32 %v12107_v28, %v10128_v38  ;;  %v6392_v41 = vpop.f32.mrf.mxu3  ;;  %v9597_v57 = vor.u32 %v11974_v9, %v9596_v51  ;;  %v9540_v28 = vld [vmem:[%s13179_s1 + $0x940] sm:$0xf] }
 0x2d9   : > { %6644 = vmatpush.bf16.msrb.mxu1 %v9149_v46  ;;  %v9372_v46 = vld [vmem:[%s13179_s1 + $0x7f0] sm:$0xf] }
 0x2da   : > { %6681 = vmatpush.bf16.msrb.mxu0 %v9877_v54  ;;  %6620 = vmatpush.bf16.msra.mxu3 %v8645_v18  ;;  %v9065_v54 = vor.u32 %v11841_v2, %v9064_v25  ;;  %v9036_v18 = vld [vmem:[%s13179_s1 + $0x550] sm:$0xf]  ;;  %v9316_v25 = vld [vmem:[%s13179_s1 + $0x780] sm:$0xf]  ;;  %v11904_v2 = vld [vmem:[%s13179_s1 + $0x798] sm:$0xf0] }
 0x2db   : > { %6654 = vmatpush.bf16.msrb.mxu2 %v9457_v7  ;;  %v9373_v7 = vor.u32 %v11918_v34, %v9372_v46  ;;  %v9317_v46 = vor.u32 %v11904_v2, %v9316_v25  ;;  %v9288_v34 = vld [vmem:[%s13179_s1 + $0x748] sm:$0xf]  ;;  %v10324_v25 = vld [vmem:[%s13179_s1 + $0xf60] sm:$0xf] }
 0x2dc   : > { %6610 = vmatmul.bf16.vlgmr.msra.gmra.mxu2 %v13481_v31  ;;  %v9289_v38 = vor.u32 %v11897_v4, %v9288_v34  ;;  %v12149_v34 = vld [vmem:[%s13179_s1 + $0xf40] sm:$0xf0]  ;;  %v10576_v4 = vld [vmem:[%s13179_s1 + $0x1158] sm:$0xf] }
 0x2dd   : > { %6645 = vmatpush.bf16.msrb.mxu1 %v9121_v3  ;;  %v9037_v3 = vor.u32 %v11834_v60, %v9036_v18  ;;  %v12086_v18 = vld [vmem:[%s13179_s1 + $0xd48] sm:$0xf0]  ;;  %v9569_v60 = vor.u32 %v11967_v44, %v9568_v8  ;;  %v10296_v8 = vld [vmem:[%s13179_s1 + $0xf28] sm:$0xf] }
 0x2de   : > { %6682 = vmatpush.bf16.msrb.mxu0 %v9849_v36  ;;  %6621 = vmatpush.bf16.msra.mxu3 %v8617_v59  ;;  %v9765_v36 = vor.u32 %v12016_v62, %v9764_v6  ;;  %v9736_v59 = vld [vmem:[%s13179_s1 + $0xac8] sm:$0xf]  ;;  %v10772_v6 = vld [vmem:[%s13179_s1 + $0x12e0] sm:$0xf]  ;;  %v12268_v62 = vld [vmem:[%s13179_s1 + $0x12f8] sm:$0xf0] }
 0x2df   : > { %6655 = vmatpush.bf16.msrb.mxu2 %v9429_v13  ;;  %v9625_v13 = vor.u32 %v11981_v17, %v9624_v22  ;;  %v11890_v22 = vld [vmem:[%s13179_s1 + $0x728] sm:$0xf0]  ;;  %v10352_v17 = vld [vmem:[%s13179_s1 + $0xf98] sm:$0xf] }
 0x2e1   : > { %6646 = vmatpush.bf16.msrb.mxu1 %v9093_v35  ;;  %v6405_v35 = vpop.f32.mrf.mxu0 }
 0x2e2   : > { %6683 = vmatpush.bf16.msrb.mxu0 %v9821_v56  ;;  %6622 = vmatpush.bf16.msra.mxu3 %v8589_v47  ;;  %v9737_v56 = vor.u32 %v12009_v42, %v9736_v59  ;;  %v12002_v47 = vld [vmem:[%s13179_s1 + $0xaa8] sm:$0xf0]  ;;  %v10744_v42 = vld [vmem:[%s13179_s1 + $0x12a8] sm:$0xf] }
 0x2e3   : > { %6656 = vmatpush.bf16.msrb.mxu2 %v9401_v45  ;;  %v9709_v45 = vor.u32 %v12002_v47, %v9708_v10  ;;  %v9512_v35 = vld [vmem:[%s13179_s1 + $0x908] sm:$0xf]  ;;  %v10745_v2 = vor.u32 %v12261_v61, %v10744_v42  ;;  %v12156_v10 = vld [vmem:[%s13179_s1 + $0xf78] sm:$0xf0]  ;;  %v9988_v47 = vld [vmem:[%s13179_s1 + $0xcc0] sm:$0xf] }
 0x2e4   : > { %v12212_v42 = vld [vmem:[%s13179_s1 + $0x1138] sm:$0xf0] }
 0x2e5   : > { %6647 = vmatpush.bf16.msrb.mxu1 %v9065_v54  ;;  %6623 = vmatmul.bf16.vlgmr.msra.gmra.mxu3 %v13632_v12  ;;  %v10073_v54 = vor.u32 %v12093_v21, %v10072_v26  ;;  %v12072_v26 = vld [vmem:[%s13179_s1 + $0xcd8] sm:$0xf0] }
 0x2e6   : > { %6667 = vmatpush.bf16.msrb.mxu3 %v9681_v24  ;;  %6684 = vmatpush.bf16.msrb.mxu0 %v9793_v33  ;;  %v12275_v24 = vld [vmem:[%s13179_s1 + $0x1330] sm:$0xf0]  ;;  %v10044_v33 = vld [vmem:[%s13179_s1 + $0xd30] sm:$0xf] }
 0x2e7   : > { %6657 = vmatpush.bf16.msrb.mxu2 %v9373_v7  ;;  %v10801_v48 = vor.u32 %v12275_v24, %v10800_v43  ;;  %v10045_v7 = vor.u32 %v12086_v18, %v10044_v33  ;;  %v6429_v41 = vpop.f32.mrf.mxu2  ;;  %v12254_v43 = vld [vmem:[%s13179_s1 + $0x1288] sm:$0xf0]  ;;  %v9484_v24 = vld [vmem:[%s13179_s1 + $0x8d0] sm:$0xf]  ;;  %v9960_v18 = vld [vmem:[%s13179_s1 + $0xc88] sm:$0xf] }
 0x2e8   : > { %v6442_v9 = vpop.f32.mrf.mxu3 }
 0x2e9   : > { %6648 = vmatpush.bf16.msrb.mxu1 %v9037_v3  ;;  %v9260_v3 = vld [vmem:[%s13179_s1 + $0x710] sm:$0xf]  ;;  %v6416_v50 = vpop.f32.mrf.mxu1 }
 0x2ea   : > { %6668 = vmatpush.bf16.msrb.mxu3 %v9653_v5  ;;  %6685 = vmatpush.bf16.msrb.mxu0 %v9765_v36  ;;  %v11960_v5 = vld [vmem:[%s13179_s1 + $0x958] sm:$0xf0]  ;;  %v10773_v36 = vor.u32 %v12268_v62, %v10772_v6  ;;  %v6417_v51 = vadd.f32 %v6416_v50, %v14724_v27  ;;  %v10716_v27 = vld [vmem:[%s13179_s1 + $0x1270] sm:$0xf]  ;;  %v10688_v6 = vld [vmem:[%s13179_s1 + $0x1238] sm:$0xf] }
 0x2eb   : > { %6658 = vmatpush.bf16.msrb.mxu2 %v9345_v16  ;;  %v9541_v59 = vor.u32 %v11960_v5, %v9540_v28  ;;  %v11953_v16 = vld [vmem:[%s13179_s1 + $0x920] sm:$0xf0]  ;;  %v10717_v33 = vor.u32 %v12254_v43, %v10716_v27  ;;  %v10968_v28 = vld [vmem:[%s13179_s1 + $0x1468] sm:$0xf]  ;;  %v12142_v50 = vld [vmem:[%s13179_s1 + $0xf08] sm:$0xf0] }
 0x2ec   : > { %6649 = vmatmul.bf16.vlgmr.msrb.gmra.mxu1 %v13728_v1  ;;  %v6430_v21 = vadd.f32 %v6429_v41, %v6417_v51  ;;  %v12317_v5 = vld [vmem:[%s13179_s1 + $0x1480] sm:$0x30]  ;;  %v9932_v41 = vld [vmem:[%s13179_s1 + $0xc50] sm:$0xf]  ;;  %v12240_v51 = vld [vmem:[%s13179_s1 + $0x1218] sm:$0xf0] }
 0x2ed   : > { %6693 = vmatpush.bf16.msra.mxu1 %v10129_v20  ;;  %v12163_v20 = vld [vmem:[%s13179_s1 + $0xfb0] sm:$0xf0]  ;;  %v12233_v27 = vld [vmem:[%s13179_s1 + $0x11e0] sm:$0xf0]  ;;  %v10940_v43 = vld [vmem:[%s13179_s1 + $0x1430] sm:$0xf] }
 0x2ee   : > { %6669 = vmatpush.bf16.msrb.mxu3 %v9625_v13  ;;  %6686 = vmatpush.bf16.msrb.mxu0 %v9737_v56  ;;  %v9261_v13 = vor.u32 %v11890_v22, %v9260_v3  ;;  %v10353_v56 = vor.u32 %v12163_v20, %v10352_v17  ;;  %v14780_v44 = vadd.f32 %v6442_v9, %v6430_v21  ;;  %v12135_v21 = vld [vmem:[%s13179_s1 + $0xed0] sm:$0xf0] }
 0x2ef   : > { %6659 = vmatpush.bf16.msrb.mxu2 %v9317_v46  ;;  %v11946_v46 = vld [vmem:[%s13179_s1 + $0x8e8] sm:$0xf0]  ;;  %v6431_v3 = vpop.f32.mrf.mxu2  ;;  %v10297_v20 = vor.u32 %v12149_v34, %v10296_v8 }
 0x2f0   : > { %v9485_v62 = vor.u32 %v11946_v46, %v9484_v24  ;;  %v6444_v17 = vpop.f32.mrf.mxu3  ;;  %v12310_v24 = vld [vmem:[%s13179_s1 + $0x1448] sm:$0xf0] }
 0x2f1   : > { %6694 = vmatpush.bf16.msra.mxu1 %v10101_v52  ;;  %v10017_v52 = vor.u32 %v12079_v14, %v10016_v15  ;;  %v10268_v14 = vld [vmem:[%s13179_s1 + $0xef0] sm:$0xf]  ;;  %v12198_v34 = vld [vmem:[%s13179_s1 + $0x10c8] sm:$0xf0]  ;;  %v12191_v17 = vld [vmem:[%s13179_s1 + $0x1090] sm:$0xf0] }
 0x2f2   : > { %6670 = vmatpush.bf16.msrb.mxu3 %v9597_v57  ;;  %6687 = vmatpush.bf16.msrb.mxu0 %v9709_v45  ;;  %v9513_v57 = vor.u32 %v11953_v16, %v9512_v35  ;;  %v10325_v45 = vor.u32 %v12156_v10, %v10324_v25  ;;  %v10969_v35 = vor.u32 %v12317_v5, %v10968_v28  ;;  %v10660_v16 = vld [vmem:[%s13179_s1 + $0x1200] sm:$0xf]  ;;  %v10240_v25 = vld [vmem:[%s13179_s1 + $0xeb8] sm:$0xf]  ;;  %v12205_v10 = vld [vmem:[%s13179_s1 + $0x1100] sm:$0xf0] }
 0x2f3   : > { %6660 = vmatpush.bf16.msrb.mxu2 %v9289_v38  ;;  %v12247_v38 = vld [vmem:[%s13179_s1 + $0x1250] sm:$0xf0]  ;;  %v11880_v5 = vld [vmem:[%s13179_s1 + $0x6dc] sm:$0xf] }
 0x2f4   : > { %v10689_v61 = vor.u32 %v12247_v38, %v10688_v6  ;;  %v12226_v6 = vld [vmem:[%s13179_s1 + $0x11a8] sm:$0xf0]  ;;  %v12303_v38 = vld [vmem:[%s13179_s1 + $0x1410] sm:$0xf0] }
 0x2f5   : > { %6695 = vmatpush.bf16.msra.mxu1 %v10073_v54  ;;  %6688 = vmatmul.bf16.vlgmr.msrb.gmra.mxu0 %v13802_v37  ;;  %v9989_v54 = vor.u32 %v12072_v26, %v9988_v47  ;;  %v10661_v47 = vor.u32 %v12240_v51, %v10660_v16  ;;  %v5970_v26 = vsel %vm5956_vm1, %v10969_v35, 0  ;;  %v9206_v35 = vld [vmem:[%s13179_s1 + $0x6bc] sm:$0xf0] }
 0x2f6   : > { %6732 = vmatpush.bf16.msra.mxu0 %v10801_v48  ;;  %6671 = vmatpush.bf16.msrb.mxu3 %v9569_v60  ;;  %v12219_v48 = vld [vmem:[%s13179_s1 + $0x1170] sm:$0xf0]  ;;  %v12065_v60 = vld [vmem:[%s13179_s1 + $0xca0] sm:$0xf0]  ;;  %v10436_v51 = vld [vmem:[%s13179_s1 + $0x1040] sm:$0xf] }
 0x2f7   : > { %6661 = vmatpush.bf16.msrb.mxu2 %v9261_v13  ;;  %v10577_v22 = vor.u32 %v12219_v48, %v10576_v4  ;;  %v9961_v15 = vor.u32 %v12065_v60, %v9960_v18  ;;  %v12058_v13 = vld [vmem:[%s13179_s1 + $0xc68] sm:$0xf0]  ;;  %v10941_v48 = vor.u32 %v12310_v24, %v10940_v43  ;;  %v12128_v18 = vld [vmem:[%s13179_s1 + $0xe98] sm:$0xf0]  ;;  %v10604_v60 = vld [vmem:[%s13179_s1 + $0x1190] sm:$0xf] }
 0x2f8   : > { %v9178_v43 = vld [vmem:[%s13179_s1 + $0x684] sm:$0xf0] }
 0x2f9   : > { %6696 = vmatpush.bf16.msra.mxu1 %v10045_v7  ;;  %v6418_v7 = vpop.f32.mrf.mxu1 }
 0x2fa   : > { %6733 = vmatpush.bf16.msra.mxu0 %v10773_v36  ;;  %6672 = vmatpush.bf16.msrb.mxu3 %v9541_v59  ;;  %v14792_v36 = vpop.f32.mrf.mxu0  ;;  %v10548_v59 = vld [vmem:[%s13179_s1 + $0x1120] sm:$0xf]  ;;  %v9234_v7 = vld [vmem:[%s13179_s1 + $0x6f4] sm:$0xf0] }
 0x2fb   : > { %6706 = vmatpush.bf16.msra.mxu2 %v10353_v56  ;;  %v10549_v9 = vor.u32 %v12212_v42, %v10548_v59  ;;  %v10269_v56 = vor.u32 %v12142_v50, %v10268_v14  ;;  %v10184_v14 = vld [vmem:[%s13179_s1 + $0xe48] sm:$0xf]  ;;  %v12121_v59 = vld [vmem:[%s13179_s1 + $0xe60] sm:$0xf0]  ;;  %v9237_v42 = vor.u32 %v11880_v5, %v9234_v7  ;;  %v12296_v50 = vld [vmem:[%s13179_s1 + $0x13d8] sm:$0xf0] }
 0x2fc   : > { %6662 = vmatmul.bf16.vlgmr.msrb.gmra.mxu2 %v13847_v0  ;;  %v10185_v16 = vor.u32 %v12121_v59, %v10184_v14  ;;  %v8562_v7 = vld [vmem:[%s13179_s1 + $0x1b4] sm:$0xf0] }
 0x2fd   : > { %6697 = vmatpush.bf16.msra.mxu1 %v10017_v52  ;;  %v9933_v52 = vor.u32 %v12058_v13, %v9932_v41  ;;  %v11873_v13 = vld [vmem:[%s13179_s1 + $0x6a4] sm:$0xf] }
 0x2fe   : > { %6734 = vmatpush.bf16.msra.mxu0 %v10745_v2  ;;  %6673 = vmatpush.bf16.msrb.mxu3 %v9513_v57  ;;  %v10520_v2 = vld [vmem:[%s13179_s1 + $0x10e8] sm:$0xf] }
 0x2ff   : > { %6707 = vmatpush.bf16.msra.mxu2 %v10325_v45  ;;  %v10632_v57 = vld [vmem:[%s13179_s1 + $0x11c8] sm:$0xf]  ;;  %v10521_v46 = vor.u32 %v12205_v10, %v10520_v2  ;;  %v10241_v45 = vor.u32 %v12135_v21, %v10240_v25  ;;  %v12114_v25 = vld [vmem:[%s13179_s1 + $0xe28] sm:$0xf0]  ;;  %v11768_v2 = vld [vmem:[%s13179_s1 + $0x35c] sm:$0xf]  ;;  %v9209_v10 = vor.u32 %v11873_v13, %v9206_v35 }
 0x300   : > { %v10633_v4 = vor.u32 %v12233_v27, %v10632_v57  ;;  %v12289_v21 = vld [vmem:[%s13179_s1 + $0x13a0] sm:$0xf0]  ;;  %v11866_v27 = vld [vmem:[%s13179_s1 + $0x66c] sm:$0xf]  ;;  %v8730_v35 = vld [vmem:[%s13179_s1 + $0x304] sm:$0xf0] }
 0x301   : > { %6698 = vmatpush.bf16.msra.mxu1 %v9989_v54  ;;  %v10492_v54 = vld [vmem:[%s13179_s1 + $0x10b0] sm:$0xf]  ;;  %v11754_v13 = vld [vmem:[%s13179_s1 + $0x2ec] sm:$0xf] }
 0x302   : > { %6735 = vmatpush.bf16.msra.mxu0 %v10717_v33  ;;  %6674 = vmatpush.bf16.msrb.mxu3 %v9485_v62  ;;  %v6470_v8 = vpop.f32.mrf.mxu0  ;;  %v10212_v33 = vld [vmem:[%s13179_s1 + $0xe80] sm:$0xf]  ;;  %v10912_v62 = vld [vmem:[%s13179_s1 + $0x13f8] sm:$0xf]  ;;  %v10493_v28 = vor.u32 %v12198_v34, %v10492_v54  ;;  %v12177_v54 = vld [vmem:[%s13179_s1 + $0x1020] sm:$0xf0] }
 0x303   : > { %6708 = vmatpush.bf16.msra.mxu2 %v10297_v20  ;;  %v10213_v3 = vor.u32 %v12128_v18, %v10212_v33  ;;  %v10605_v20 = vor.u32 %v12226_v6, %v10604_v60  ;;  %v11761_v18 = vld [vmem:[%s13179_s1 + $0x324] sm:$0xf]  ;;  %v8758_v60 = vld [vmem:[%s13179_s1 + $0x33c] sm:$0xf0]  ;;  %v9181_v6 = vor.u32 %v11866_v27, %v9178_v43 }
 0x304   : > { %v8761_v14 = vor.u32 %v11761_v18, %v8758_v60  ;;  %v8982_v27 = vld [vmem:[%s13179_s1 + $0x4fc] sm:$0xf0]  ;;  %v11810_v18 = vld [vmem:[%s13179_s1 + $0x4ac] sm:$0xf]  ;;  %v8954_v60 = vld [vmem:[%s13179_s1 + $0x4c4] sm:$0xf0] }
 0x305   : > { %6699 = vmatpush.bf16.msra.mxu1 %v9961_v15  ;;  %6675 = vmatmul.bf16.vlgmr.msrb.gmra.mxu3 %v13879_v39  ;;  %v10913_v15 = vor.u32 %v12303_v38, %v10912_v62  ;;  %v10828_v62 = vld [vmem:[%s13179_s1 + $0x1350] sm:$0xf]  ;;  %v12282_v38 = vld [vmem:[%s13179_s1 + $0x1368] sm:$0xf0] }
 0x306   : > { %6719 = vmatpush.bf16.msra.mxu3 %v10577_v22  ;;  %6736 = vmatpush.bf16.msra.mxu0 %v10689_v61  ;;  %v10464_v22 = vld [vmem:[%s13179_s1 + $0x1078] sm:$0xf]  ;;  %v10884_v61 = vld [vmem:[%s13179_s1 + $0x13c0] sm:$0xf]  ;;  %v10829_v59 = vor.u32 %v12282_v38, %v10828_v62  ;;  %v11740_v62 = vld [vmem:[%s13179_s1 + $0x27c] sm:$0xf] }
 0x307   : > { %6709 = vmatpush.bf16.msra.mxu2 %v10269_v56  ;;  %v10465_v41 = vor.u32 %v12191_v17, %v10464_v22  ;;  %v10885_v56 = vor.u32 %v12296_v50, %v10884_v61  ;;  %v9150_v22 = vld [vmem:[%s13179_s1 + $0x64c] sm:$0xf0]  ;;  %v9010_v61 = vld [vmem:[%s13179_s1 + $0x534] sm:$0xf0] }
 0x308   : > { %v6455_v24 = vpop.f32.mrf.mxu3  ;;  %v10380_v17 = vld [vmem:[%s13179_s1 + $0xfd0] sm:$0xf]  ;;  %v8674_v38 = vld [vmem:[%s13179_s1 + $0x294] sm:$0xf0] }
 0x309   : > { %6700 = vmatpush.bf16.msra.mxu1 %v9933_v52  ;;  %v10156_v52 = vld [vmem:[%s13179_s1 + $0xe10] sm:$0xf]  ;;  %v6469_v34 = vadd.f32 %v14792_v36, %v6455_v24  ;;  %v11747_v24 = vld [vmem:[%s13179_s1 + $0x2b4] sm:$0xf] }
 0x30a   : > { %6720 = vmatpush.bf16.msra.mxu3 %v10549_v9  ;;  %6737 = vmatpush.bf16.msra.mxu0 %v10661_v47  ;;  %v12184_v9 = vld [vmem:[%s13179_s1 + $0x1058] sm:$0xf0]  ;;  %v8786_v47 = vld [vmem:[%s13179_s1 + $0x374] sm:$0xf0]  ;;  %v10157_v8 = vor.u32 %v12114_v25, %v10156_v52 }
 0x30b   : > { %6710 = vmatpush.bf16.msra.mxu2 %v10241_v45  ;;  %v10437_v57 = vor.u32 %v12184_v9, %v10436_v51  ;;  %v10408_v45 = vld [vmem:[%s13179_s1 + $0x1008] sm:$0xf]  ;;  %v11705_v51 = vld [vmem:[%s13179_s1 + $0x164] sm:$0xf]  ;;  %v8534_v9 = vld [vmem:[%s13179_s1 + $0x17c] sm:$0xf0] }
 0x30c   : > { %6701 = vmatmul.bf16.vlgmr.msra.gmra.mxu1 %v13930_v49  ;;  %v10409_v36 = vor.u32 %v12177_v54, %v10408_v45  ;;  %v8537_v43 = vor.u32 %v11705_v51, %v8534_v9  ;;  %v11698_v45 = vld [vmem:[%s13179_s1 + $0x12c] sm:$0xf]  ;;  %v8506_v54 = vld [vmem:[%s13179_s1 + $0x144] sm:$0xf0]  ;;  %v11831_v51 = vld [vmem:[%s13179_s1 + $0x554] sm:$0xf] }
 0x30d   : > { %6747 = vmatpush.bf16.msrb.mxu1 %v5970_v26  ;;  %v10856_v26 = vld [vmem:[%s13179_s1 + $0x1388] sm:$0xf]  ;;  %v9038_v9 = vld [vmem:[%s13179_s1 + $0x56c] sm:$0xf0] }
 0x30e   : > { %6721 = vmatpush.bf16.msra.mxu3 %v10521_v46  ;;  %6738 = vmatpush.bf16.msra.mxu0 %v10633_v4  ;;  %v6481_v46 = vpop.f32.mrf.mxu1  ;;  %v6494_v4 = vpop.f32.mrf.mxu2  ;;  %v10857_v33 = vor.u32 %v12289_v21, %v10856_v26  ;;  %v8733_v21 = vor.u32 %v11754_v13, %v8730_v35  ;;  %v11684_v13 = vld [vmem:[%s13179_s1 + $0xbc] sm:$0xf]  ;;  %v8450_v35 = vld [vmem:[%s13179_s1 + $0xd4] sm:$0xf0] }
 0x30f   : > { %6711 = vmatpush.bf16.msra.mxu2 %v10213_v3  ;;  %v6482_v5 = vadd.f32 %v6481_v46, %v6469_v34  ;;  %v11859_v3 = vld [vmem:[%s13179_s1 + $0x634] sm:$0xf]  ;;  %v8702_v46 = vld [vmem:[%s13179_s1 + $0x2cc] sm:$0xf0] }
 0x311   : > { %6748 = vmatpush.bf16.msrb.mxu1 %v10941_v48  ;;  %v8789_v48 = vor.u32 %v11768_v2, %v8786_v47  ;;  %v11852_v2 = vld [vmem:[%s13179_s1 + $0x5fc] sm:$0xf] }
 0x312   : > { %6722 = vmatpush.bf16.msra.mxu3 %v10493_v28  ;;  %6739 = vmatpush.bf16.msra.mxu0 %v10605_v20  ;;  %v11712_v28 = vld [vmem:[%s13179_s1 + $0x19c] sm:$0xf]  ;;  %v12170_v20 = vld [vmem:[%s13179_s1 + $0xfe8] sm:$0xf0]  ;;  %v14866_v26 = vpop.f32.mrf.mxu0 }
 0x313   : > { %6712 = vmatpush.bf16.msra.mxu2 %v10185_v16  ;;  %v8565_v50 = vor.u32 %v11712_v28, %v8562_v7  ;;  %v10381_v16 = vor.u32 %v12170_v20, %v10380_v17  ;;  %v8957_v7 = vor.u32 %v11810_v18, %v8954_v60  ;;  %v8677_v20 = vor.u32 %v11740_v62, %v8674_v38  ;;  %v11719_v18 = vld [vmem:[%s13179_s1 + $0x1d4] sm:$0xf]  ;;  %v8590_v60 = vld [vmem:[%s13179_s1 + $0x1ec] sm:$0xf0]  ;;  %v9682_v62 = vld [vmem:[%s13179_s1 + $0xa74] sm:$0xf0] }
 0x314   : > { %v11670_v38 = vld [vmem:[%s13179_s1 + $0x4c] sm:$0xf] }
 0x315   : > { %6749 = vmatpush.bf16.msrb.mxu1 %v10913_v15  ;;  %6740 = vmatmul.bf16.vlgmr.msra.gmra.mxu0 %v13966_v11  ;;  %v14855_v15 = vadd.f32 %v6494_v4, %v6482_v5  ;;  %v11845_v4 = vld [vmem:[%s13179_s1 + $0x5c4] sm:$0xf]  ;;  %v11691_v5 = vld [vmem:[%s13179_s1 + $0xf4] sm:$0xf] }
 0x316   : > { %6797 = vmatpush.bf16.msrb.mxu0 %v9237_v42  ;;  %6723 = vmatpush.bf16.msra.mxu3 %v10465_v41  ;;  %v11824_v42 = vld [vmem:[%s13179_s1 + $0x51c] sm:$0xf]  ;;  %v9153_v41 = vor.u32 %v11859_v3, %v9150_v22  ;;  %v6483_v52 = vpop.f32.mrf.mxu1  ;;  %v6496_v47 = vpop.f32.mrf.mxu2  ;;  %v11838_v3 = vld [vmem:[%s13179_s1 + $0x58c] sm:$0xf]  ;;  %v9066_v22 = vld [vmem:[%s13179_s1 + $0x5a4] sm:$0xf0] }
 0x317   : > { %6713 = vmatpush.bf16.msra.mxu2 %v10157_v8  ;;  %v9013_v25 = vor.u32 %v11824_v42, %v9010_v61  ;;  %v11733_v61 = vld [vmem:[%s13179_s1 + $0x244] sm:$0xf]  ;;  %v8453_v47 = vor.u32 %v11684_v13, %v8450_v35  ;;  %v9654_v35 = vld [vmem:[%s13179_s1 + $0xa3c] sm:$0xf0] }
 0x318   : > { %v11985_v13 = vld [vmem:[%s13179_s1 + $0xa24] sm:$0xf] }
 0x319   : > { %6750 = vmatpush.bf16.msrb.mxu1 %v10885_v56  ;;  %v6457_v56 = vpop.f32.mrf.mxu3 }
 0x31a   : > { %6798 = vmatpush.bf16.msrb.mxu0 %v9209_v10  ;;  %6724 = vmatpush.bf16.msra.mxu3 %v10437_v57  ;;  %v9122_v10 = vld [vmem:[%s13179_s1 + $0x614] sm:$0xf0]  ;;  %v11817_v57 = vld [vmem:[%s13179_s1 + $0x4e4] sm:$0xf]  ;;  %v6522_v17 = vpop.f32.mrf.mxu0  ;;  %v12104_v56 = vld [vmem:[%s13179_s1 + $0xddc] sm:$0xf] }
 0x31b   : > { %6771 = vmatpush.bf16.msrb.mxu2 %v8789_v48  ;;  %v9125_v8 = vor.u32 %v11852_v2, %v9122_v10  ;;  %v8985_v34 = vor.u32 %v11817_v57, %v8982_v27  ;;  %v9094_v48 = vld [vmem:[%s13179_s1 + $0x5dc] sm:$0xf0]  ;;  %v11796_v2 = vld [vmem:[%s13179_s1 + $0x43c] sm:$0xf]  ;;  %v8898_v10 = vld [vmem:[%s13179_s1 + $0x454] sm:$0xf0]  ;;  %v9041_v27 = vor.u32 %v11831_v51, %v9038_v9 }
 0x31c   : > { %6714 = vmatmul.bf16.vlgmr.msra.gmra.mxu2 %v13994_v55  ;;  %v9097_v28 = vor.u32 %v11845_v4, %v9094_v48  ;;  %v8618_v57 = vld [vmem:[%s13179_s1 + $0x224] sm:$0xf0]  ;;  %v11789_v4 = vld [vmem:[%s13179_s1 + $0x404] sm:$0xf]  ;;  %v8870_v48 = vld [vmem:[%s13179_s1 + $0x41c] sm:$0xf0] }
 0x31d   : > { %6751 = vmatpush.bf16.msrb.mxu1 %v10857_v33  ;;  %v8705_v33 = vor.u32 %v11747_v24, %v8702_v46  ;;  %v8422_v24 = vld [vmem:[%s13179_s1 + $0x9c] sm:$0xf0]  ;;  %v12090_v17 = vld [vmem:[%s13179_s1 + $0xd6c] sm:$0xf]  ;;  %v8366_v51 = vld [vmem:[%s13179_s1 + $0x2c] sm:$0xf0] }
 0x31e   : > { %6799 = vmatpush.bf16.msrb.mxu0 %v9181_v6  ;;  %6725 = vmatpush.bf16.msra.mxu3 %v10409_v36  ;;  %v8509_v6 = vor.u32 %v11698_v45, %v8506_v54  ;;  %v8478_v36 = vld [vmem:[%s13179_s1 + $0x10c] sm:$0xf0]  ;;  %v12097_v45 = vld [vmem:[%s13179_s1 + $0xda4] sm:$0xf] }
 0x31f   : > { %6772 = vmatpush.bf16.msrb.mxu2 %v8761_v14  ;;  %v11803_v14 = vld [vmem:[%s13179_s1 + $0x474] sm:$0xf]  ;;  %v8481_v42 = vor.u32 %v11691_v5, %v8478_v36  ;;  %v8873_v36 = vor.u32 %v11789_v4, %v8870_v48  ;;  %v11929_v4 = vld [vmem:[%s13179_s1 + $0x864] sm:$0xf]  ;;  %v9430_v48 = vld [vmem:[%s13179_s1 + $0x87c] sm:$0xf0] }
 0x321   : > { %6752 = vmatpush.bf16.msrb.mxu1 %v10829_v59  ;;  %v8926_v59 = vld [vmem:[%s13179_s1 + $0x48c] sm:$0xf0] }
 0x322   : > { %6800 = vmatpush.bf16.msrb.mxu0 %v9153_v41  ;;  %6726 = vmatpush.bf16.msra.mxu3 %v10381_v16  ;;  %v9069_v41 = vor.u32 %v11838_v3, %v9066_v22  ;;  %v8929_v16 = vor.u32 %v11803_v14, %v8926_v59  ;;  %v8593_v22 = vor.u32 %v11719_v18, %v8590_v60 }
 0x323   : > { %6773 = vmatpush.bf16.msrb.mxu2 %v8733_v21  ;;  %v11726_v21 = vld [vmem:[%s13179_s1 + $0x20c] sm:$0xf] }
 0x324   : > { %10982 = vmatmul.msk.bf16.vlgmr.msrb.gmra.mxu1 %vm5952_vm9, %v14010_v53  ;;  %v8621_v54 = vor.u32 %v11726_v21, %v8618_v57  ;;  %v11775_v57 = vld [vmem:[%s13179_s1 + $0x394] sm:$0xf] }
 0x325   : > { %6758 = vmatpush.bf16.msra.mxu1 %v8565_v50  ;;  %6727 = vmatmul.bf16.vlgmr.msra.gmra.mxu3 %v14014_v29  ;;  %v8646_v50 = vld [vmem:[%s13179_s1 + $0x25c] sm:$0xf0] }
 0x326   : > { %6784 = vmatpush.bf16.msrb.mxu3 %v9013_v25  ;;  %6801 = vmatpush.bf16.msrb.mxu0 %v9125_v8  ;;  %v8649_v52 = vor.u32 %v11733_v61, %v8646_v50  ;;  %v10130_v25 = vld [vmem:[%s13179_s1 + $0xdf4] sm:$0xf0]  ;;  %v8901_v8 = vor.u32 %v11796_v2, %v8898_v10  ;;  %v11782_v50 = vld [vmem:[%s13179_s1 + $0x3cc] sm:$0xf]  ;;  %v12083_v2 = vld [vmem:[%s13179_s1 + $0xd34] sm:$0xf] }
 0x327   : > { %6774 = vmatpush.bf16.msrb.mxu2 %v8705_v33  ;;  %v10133_v46 = vor.u32 %v12104_v56, %v10130_v25  ;;  %v6546_v59 = vpop.f32.mrf.mxu2  ;;  %v11936_v56 = vld [vmem:[%s13179_s1 + $0x89c] sm:$0xf]  ;;  %v10046_v10 = vld [vmem:[%s13179_s1 + $0xd4c] sm:$0xf0] }
 0x329   : > { %6759 = vmatpush.bf16.msra.mxu1 %v8537_v43  ;;  %v11677_v43 = vld [vmem:[%s13179_s1 + $0x84] sm:$0xf]  ;;  %v6533_v3 = vpop.f32.mrf.mxu1 }
 0x32a   : > { %6785 = vmatpush.bf16.msrb.mxu3 %v8985_v34  ;;  %6802 = vmatpush.bf16.msrb.mxu0 %v9097_v28  ;;  %v10102_v34 = vld [vmem:[%s13179_s1 + $0xdbc] sm:$0xf0]  ;;  %v8425_v33 = vor.u32 %v11677_v43, %v8422_v24  ;;  %v8394_v28 = vld [vmem:[%s13179_s1 + $0x64] sm:$0xf0]  ;;  %v11978_v43 = vld [vmem:[%s13179_s1 + $0x9ec] sm:$0xf] }
 0x32b   : > { %6775 = vmatpush.bf16.msrb.mxu2 %v8677_v20  ;;  %v10105_v5 = vor.u32 %v12097_v45, %v10102_v34  ;;  %v10074_v20 = vld [vmem:[%s13179_s1 + $0xd84] sm:$0xf0]  ;;  %v8397_v61 = vor.u32 %v11670_v38, %v8394_v28  ;;  %v9906_v45 = vld [vmem:[%s13179_s1 + $0xc34] sm:$0xf0]  ;;  %v10049_v34 = vor.u32 %v12083_v2, %v10046_v10  ;;  %v12062_v2 = vld [vmem:[%s13179_s1 + $0xc8c] sm:$0xf] }
 0x32c   : > { %v9962_v10 = vld [vmem:[%s13179_s1 + $0xca4] sm:$0xf0] }
 0x32d   : > { %6760 = vmatpush.bf16.msra.mxu1 %v8509_v6  ;;  %v11992_v6 = vld [vmem:[%s13179_s1 + $0xa5c] sm:$0xf] }
 0x32e   : > { %6786 = vmatpush.bf16.msrb.mxu3 %v8957_v7  ;;  %6803 = vmatpush.bf16.msrb.mxu0 %v9069_v41  ;;  %v6507_v7 = vpop.f32.mrf.mxu3  ;;  %v8842_v41 = vld [vmem:[%s13179_s1 + $0x3e4] sm:$0xf0] }
 0x32f   : > { %6776 = vmatpush.bf16.msrb.mxu2 %v8649_v52  ;;  %v6508_v14 = vadd.f32 %v6507_v7, %v14855_v15  ;;  %v10077_v15 = vor.u32 %v12090_v17, %v10074_v20  ;;  %v9458_v52 = vld [vmem:[%s13179_s1 + $0x8b4] sm:$0xf0]  ;;  %v8845_v25 = vor.u32 %v11782_v50, %v8842_v41  ;;  %v6548_v38 = vpop.f32.mrf.mxu2  ;;  %v11971_v7 = vld [vmem:[%s13179_s1 + $0x9b4] sm:$0xf]  ;;  %v12041_v17 = vld [vmem:[%s13179_s1 + $0xbe4] sm:$0xf] }
 0x330   : > { %v9461_v24 = vor.u32 %v11936_v56, %v9458_v52  ;;  %v9878_v20 = vld [vmem:[%s13179_s1 + $0xbfc] sm:$0xf0]  ;;  %v11915_v52 = vld [vmem:[%s13179_s1 + $0x7f4] sm:$0xf]  ;;  %v11950_v38 = vld [vmem:[%s13179_s1 + $0x90c] sm:$0xf] }
 0x331   : > { %6761 = vmatpush.bf16.msra.mxu1 %v8481_v42  ;;  %v9685_v42 = vor.u32 %v11992_v6, %v9682_v62  ;;  %v6521_v9 = vadd.f32 %v14866_v26, %v6508_v14  ;;  %v9657_v26 = vor.u32 %v11985_v13, %v9654_v35  ;;  %v6535_v18 = vpop.f32.mrf.mxu1  ;;  %v12076_v6 = vld [vmem:[%s13179_s1 + $0xcfc] sm:$0xf]  ;;  %v10018_v62 = vld [vmem:[%s13179_s1 + $0xd14] sm:$0xf0]  ;;  %v9990_v50 = vld [vmem:[%s13179_s1 + $0xcdc] sm:$0xf0]  ;;  %v9881_v13 = vor.u32 %v12041_v17, %v9878_v20 }
 0x332   : > { %6787 = vmatpush.bf16.msrb.mxu3 %v8929_v16  ;;  %6804 = vmatpush.bf16.msrb.mxu0 %v9041_v27  ;;  %v11663_v16 = vld [vmem:[%s13179_s1 + $0x14] sm:$0xf]  ;;  %v8814_v27 = vld [vmem:[%s13179_s1 + $0x3ac] sm:$0xf0]  ;;  %v14941_v28 = vpop.f32.mrf.mxu0  ;;  %v10021_v14 = vor.u32 %v12076_v6, %v10018_v62  ;;  %v11964_v35 = vld [vmem:[%s13179_s1 + $0x97c] sm:$0xf] }
 0x333   : > { %6777 = vmatpush.bf16.msrb.mxu2 %v8621_v54  ;;  %v8369_v21 = vor.u32 %v11663_v16, %v8366_v51  ;;  %v8817_v60 = vor.u32 %v11775_v57, %v8814_v27  ;;  %v9570_v51 = vld [vmem:[%s13179_s1 + $0x994] sm:$0xf0]  ;;  %v11957_v57 = vld [vmem:[%s13179_s1 + $0x944] sm:$0xf]  ;;  %v12314_v27 = vld [vmem:[%s13179_s1 + $0x146c] sm:$0xf] }
 0x334   : > { %v9934_v18 = vld [vmem:[%s13179_s1 + $0xc6c] sm:$0xf0]  ;;  %v11901_v20 = vld [vmem:[%s13179_s1 + $0x784] sm:$0xf] }
 0x335   : > { %6762 = vmatpush.bf16.msra.mxu1 %v8453_v47  ;;  %6805 = vmatmul.bf16.vlgmr.msrb.gmra.mxu0 %v13728_v1  ;;  %v6534_v47 = vadd.f32 %v6533_v3, %v6521_v9  ;;  %v9433_v3 = vor.u32 %v11929_v4, %v9430_v48  ;;  %v12034_v9 = vld [vmem:[%s13179_s1 + $0xbac] sm:$0xf]  ;;  %v11908_v4 = vld [vmem:[%s13179_s1 + $0x7bc] sm:$0xf]  ;;  %v9346_v48 = vld [vmem:[%s13179_s1 + $0x7d4] sm:$0xf0] }
 0x336   : > { %6849 = vmatpush.bf16.msra.mxu0 %v10133_v46  ;;  %6788 = vmatpush.bf16.msrb.mxu3 %v8901_v8  ;;  %v9626_v46 = vld [vmem:[%s13179_s1 + $0xa04] sm:$0xf0]  ;;  %v12048_v8 = vld [vmem:[%s13179_s1 + $0xc1c] sm:$0xf] }
 0x337   : > { %6778 = vmatpush.bf16.msrb.mxu2 %v8593_v22  ;;  %v14934_v54 = vadd.f32 %v6546_v59, %v6534_v47  ;;  %v9598_v22 = vld [vmem:[%s13179_s1 + $0x9cc] sm:$0xf0]  ;;  %v11922_v59 = vld [vmem:[%s13179_s1 + $0x82c] sm:$0xf] }
 0x338   : > { %v9601_v41 = vor.u32 %v11971_v7, %v9598_v22  ;;  %v9514_v7 = vld [vmem:[%s13179_s1 + $0x924] sm:$0xf0]  ;;  %v9794_v22 = vld [vmem:[%s13179_s1 + $0xb54] sm:$0xf0] }
 0x339   : > { %6763 = vmatpush.bf16.msra.mxu1 %v8425_v33  ;;  %v6509_v33 = vpop.f32.mrf.mxu3 }
 0x33a   : > { %6850 = vmatpush.bf16.msra.mxu0 %v10105_v5  ;;  %6789 = vmatpush.bf16.msrb.mxu3 %v8873_v36  ;;  %v9629_v5 = vor.u32 %v11978_v43, %v9626_v46  ;;  %v9909_v36 = vor.u32 %v12048_v8, %v9906_v45  ;;  %v6574_v47 = vpop.f32.mrf.mxu0  ;;  %v10970_v43 = vld [vmem:[%s13179_s1 + $0x1484] sm:$0x30]  ;;  %v9542_v46 = vld [vmem:[%s13179_s1 + $0x95c] sm:$0xf0]  ;;  %v12027_v8 = vld [vmem:[%s13179_s1 + $0xb74] sm:$0xf] }
 0x33b   : > { %6823 = vmatpush.bf16.msra.mxu2 %v9685_v42  ;;  %v9402_v42 = vld [vmem:[%s13179_s1 + $0x844] sm:$0xf0]  ;;  %v9822_v45 = vld [vmem:[%s13179_s1 + $0xb8c] sm:$0xf0]  ;;  %v12055_v33 = vld [vmem:[%s13179_s1 + $0xc54] sm:$0xf]  ;;  %v9545_v6 = vor.u32 %v11957_v57, %v9542_v46 }
 0x33c   : > { %6779 = vmatmul.bf16.vlgmr.msrb.gmra.mxu2 %v13632_v12  ;;  %v9405_v16 = vor.u32 %v11922_v59, %v9402_v42  ;;  %v9825_v62 = vor.u32 %v12027_v8, %v9822_v45  ;;  %v9937_v17 = vor.u32 %v12055_v33, %v9934_v18  ;;  %v12307_v42 = vld [vmem:[%s13179_s1 + $0x1434] sm:$0xf]  ;;  %v12300_v57 = vld [vmem:[%s13179_s1 + $0x13fc] sm:$0xf]  ;;  %v12006_v45 = vld [vmem:[%s13179_s1 + $0xacc] sm:$0xf] }
 0x33d   : > { %6764 = vmatpush.bf16.msra.mxu1 %v8397_v61  ;;  %v12069_v61 = vld [vmem:[%s13179_s1 + $0xcc4] sm:$0xf]  ;;  %v11887_v33 = vld [vmem:[%s13179_s1 + $0x714] sm:$0xf]  ;;  %v9262_v18 = vld [vmem:[%s13179_s1 + $0x72c] sm:$0xf0] }
 0x33e   : > { %6851 = vmatpush.bf16.msra.mxu0 %v10077_v15  ;;  %6790 = vmatpush.bf16.msrb.mxu3 %v8845_v25  ;;  %v9850_v15 = vld [vmem:[%s13179_s1 + $0xbc4] sm:$0xf0]  ;;  %v9993_v56 = vor.u32 %v12069_v61, %v9990_v50  ;;  %v9374_v25 = vld [vmem:[%s13179_s1 + $0x80c] sm:$0xf0]  ;;  %v9517_v61 = vor.u32 %v11950_v38, %v9514_v7  ;;  %v10886_v7 = vld [vmem:[%s13179_s1 + $0x13dc] sm:$0xf0] }
 0x33f   : > { %6824 = vmatpush.bf16.msra.mxu2 %v9657_v26  ;;  %v9573_v26 = vor.u32 %v11964_v35, %v9570_v51  ;;  %v9486_v35 = vld [vmem:[%s13179_s1 + $0x8ec] sm:$0xf0]  ;;  %v12013_v51 = vld [vmem:[%s13179_s1 + $0xb04] sm:$0xf] }
 0x341   : > { %6765 = vmatpush.bf16.msra.mxu1 %v8369_v21  ;;  %v9853_v21 = vor.u32 %v12034_v9, %v9850_v15  ;;  %v9766_v9 = vld [vmem:[%s13179_s1 + $0xb1c] sm:$0xf0]  ;;  %v12216_v15 = vld [vmem:[%s13179_s1 + $0x115c] sm:$0xf] }
 0x342   : > { %6852 = vmatpush.bf16.msra.mxu0 %v10049_v34  ;;  %6791 = vmatpush.bf16.msrb.mxu3 %v8817_v60  ;;  %v9965_v34 = vor.u32 %v12062_v2, %v9962_v10  ;;  %v10973_v60 = vor.u32 %v12314_v27, %v10970_v43  ;;  %v10914_v27 = vld [vmem:[%s13179_s1 + $0x1414] sm:$0xf0] }
 0x343   : > { %6825 = vmatpush.bf16.msra.mxu2 %v9629_v5  ;;  %v14972_v5 = vpop.f32.mrf.mxu2 }
 0x344   : > { %6766 = vmatmul.bf16.vlgmr.msra.gmra.mxu1 %v13481_v31  ;;  %v5973_v59 = vsel %vm5956_vm1, %v10973_v60, 0 }
 0x345   : > { %6810 = vmatpush.bf16.msrb.mxu1 %v9461_v24  ;;  %6792 = vmatmul.bf16.vlgmr.msrb.gmra.mxu3 %v13428_v30  ;;  %v9377_v24 = vor.u32 %v11915_v52, %v9374_v25  ;;  %v11894_v52 = vld [vmem:[%s13179_s1 + $0x74c] sm:$0xf]  ;;  %v9290_v25 = vld [vmem:[%s13179_s1 + $0x764] sm:$0xf0] }
 0x346   : > { %6836 = vmatpush.bf16.msra.mxu3 %v9909_v36  ;;  %6853 = vmatpush.bf16.msra.mxu0 %v10021_v14  ;;  %v9349_v36 = vor.u32 %v11908_v4, %v9346_v48  ;;  %v9318_v14 = vld [vmem:[%s13179_s1 + $0x79c] sm:$0xf0]  ;;  %v9293_v8 = vor.u32 %v11894_v52, %v9290_v25  ;;  %v12209_v4 = vld [vmem:[%s13179_s1 + $0x1124] sm:$0xf]  ;;  %v10858_v52 = vld [vmem:[%s13179_s1 + $0x13a4] sm:$0xf0] }
 0x347   : > { %6826 = vmatpush.bf16.msra.mxu2 %v9601_v41  ;;  %v10942_v41 = vld [vmem:[%s13179_s1 + $0x144c] sm:$0xf0]  ;;  %v10550_v48 = vld [vmem:[%s13179_s1 + $0x113c] sm:$0xf0] }
 0x348   : > { %v10945_v2 = vor.u32 %v12307_v42, %v10942_v41  ;;  %v6559_v10 = vpop.f32.mrf.mxu3  ;;  %v10522_v42 = vld [vmem:[%s13179_s1 + $0x1104] sm:$0xf0] }
 0x349   : > { %6811 = vmatpush.bf16.msrb.mxu1 %v9433_v3  ;;  %v12020_v3 = vld [vmem:[%s13179_s1 + $0xb3c] sm:$0xf]  ;;  %v6585_v47 = vpop.f32.mrf.mxu1  ;;  %v6560_v43 = vadd.f32 %v6559_v10, %v14934_v54  ;;  %v10917_v54 = vor.u32 %v12300_v57, %v10914_v27  ;;  %v10774_v57 = vld [vmem:[%s13179_s1 + $0x12fc] sm:$0xf0] }
 0x34a   : > { %6837 = vmatpush.bf16.msra.mxu3 %v9881_v13  ;;  %6854 = vmatpush.bf16.msra.mxu0 %v9993_v56  ;;  %v9797_v50 = vor.u32 %v12020_v3, %v9794_v22  ;;  %v11943_v13 = vld [vmem:[%s13179_s1 + $0x8d4] sm:$0xf]  ;;  %v10578_v56 = vld [vmem:[%s13179_s1 + $0x1174] sm:$0xf0]  ;;  %v9265_v22 = vor.u32 %v11887_v33, %v9262_v18  ;;  %v12188_v33 = vld [vmem:[%s13179_s1 + $0x107c] sm:$0xf] }
 0x34b   : > { %6827 = vmatpush.bf16.msra.mxu2 %v9573_v26  ;;  %v9489_v26 = vor.u32 %v11943_v13, %v9486_v35  ;;  %v10581_v46 = vor.u32 %v12216_v15, %v10578_v56  ;;  %v6573_v60 = vadd.f32 %v14941_v28, %v6560_v43  ;;  %v10553_v28 = vor.u32 %v12209_v4, %v10550_v48  ;;  %v12153_v13 = vld [vmem:[%s13179_s1 + $0xf64] sm:$0xf]  ;;  %v10326_v35 = vld [vmem:[%s13179_s1 + $0xf7c] sm:$0xf0]  ;;  %v12286_v56 = vld [vmem:[%s13179_s1 + $0x138c] sm:$0xf] }
 0x34c   : > { %v10861_v27 = vor.u32 %v12286_v56, %v10858_v52  ;;  %v12146_v43 = vld [vmem:[%s13179_s1 + $0xf2c] sm:$0xf]  ;;  %v8568_v4 = vld [vmem:[%s13179_s1 + $0x1a0] sm:$0xf]  ;;  %v11716_v48 = vld [vmem:[%s13179_s1 + $0x1b8] sm:$0xf0] }
 0x34d   : > { %6812 = vmatpush.bf16.msrb.mxu1 %v9405_v16  ;;  %v9321_v16 = vor.u32 %v11901_v20, %v9318_v14  ;;  %v6586_v3 = vadd.f32 %v6585_v47, %v6573_v60  ;;  %v9710_v20 = vld [vmem:[%s13179_s1 + $0xaac] sm:$0xf0]  ;;  %v12202_v14 = vld [vmem:[%s13179_s1 + $0x10ec] sm:$0xf]  ;;  %v10329_v47 = vor.u32 %v12153_v13, %v10326_v35  ;;  %v10466_v60 = vld [vmem:[%s13179_s1 + $0x1094] sm:$0xf0] }
 0x34e   : > { %6838 = vmatpush.bf16.msra.mxu3 %v9853_v21  ;;  %6855 = vmatpush.bf16.msra.mxu0 %v9965_v34  ;;  %v9769_v21 = vor.u32 %v12013_v51, %v9766_v9  ;;  %v9738_v34 = vld [vmem:[%s13179_s1 + $0xae4] sm:$0xf0]  ;;  %v10242_v13 = vld [vmem:[%s13179_s1 + $0xed4] sm:$0xf0]  ;;  %v11702_v56 = vld [vmem:[%s13179_s1 + $0x148] sm:$0xf0] }
 0x34f   : > { %6828 = vmatpush.bf16.msra.mxu2 %v9545_v6  ;;  %v12160_v6 = vld [vmem:[%s13179_s1 + $0xf9c] sm:$0xf]  ;;  %v9741_v38 = vor.u32 %v12006_v45, %v9738_v34  ;;  %v12174_v52 = vld [vmem:[%s13179_s1 + $0x100c] sm:$0xf] }
 0x350   : > { %v6561_v51 = vpop.f32.mrf.mxu3 }
 0x351   : > { %6813 = vmatpush.bf16.msrb.mxu1 %v9377_v24  ;;  %v6600_v24 = vpop.f32.mrf.mxu2  ;;  %v6587_v9 = vpop.f32.mrf.mxu1 }
 0x352   : > { %6839 = vmatpush.bf16.msra.mxu3 %v9825_v62  ;;  %6856 = vmatpush.bf16.msra.mxu0 %v9937_v17  ;;  %v10354_v62 = vld [vmem:[%s13179_s1 + $0xfb4] sm:$0xf0]  ;;  %v11999_v17 = vld [vmem:[%s13179_s1 + $0xa94] sm:$0xf]  ;;  %v15019_v25 = vpop.f32.mrf.mxu0  ;;  %v10298_v24 = vld [vmem:[%s13179_s1 + $0xf44] sm:$0xf0] }
 0x353   : > { %6829 = vmatpush.bf16.msra.mxu2 %v9517_v61  ;;  %v12272_v61 = vld [vmem:[%s13179_s1 + $0x131c] sm:$0xf]  ;;  %v9713_v15 = vor.u32 %v11999_v17, %v9710_v20  ;;  %v10301_v18 = vor.u32 %v12146_v43, %v10298_v24  ;;  %v8540_v17 = vld [vmem:[%s13179_s1 + $0x168] sm:$0xf]  ;;  %v11709_v20 = vld [vmem:[%s13179_s1 + $0x180] sm:$0xf0] }
 0x354   : > { %v8541_v35 = vor.u32 %v11709_v20, %v8540_v17  ;;  %v8484_v24 = vld [vmem:[%s13179_s1 + $0xf8] sm:$0xf] }
 0x355   : > { %6814 = vmatpush.bf16.msrb.mxu1 %v9349_v36  ;;  %6857 = vmatmul.bf16.vlgmr.msra.gmra.mxu0 %v13930_v49  ;;  %v12293_v36 = vld [vmem:[%s13179_s1 + $0x13c4] sm:$0xf] }
 0x356   : > { %6903 = vmatpush.bf16.msrb.mxu0 %v5973_v59  ;;  %6840 = vmatpush.bf16.msra.mxu3 %v9797_v50  ;;  %v10357_v59 = vor.u32 %v12160_v6, %v10354_v62  ;;  %v10802_v50 = vld [vmem:[%s13179_s1 + $0x1334] sm:$0xf0]  ;;  %v10889_v41 = vor.u32 %v12293_v36, %v10886_v7  ;;  %v10746_v6 = vld [vmem:[%s13179_s1 + $0x12c4] sm:$0xf0]  ;;  %v10270_v36 = vld [vmem:[%s13179_s1 + $0xf0c] sm:$0xf0]  ;;  %v8569_v7 = vor.u32 %v11716_v48, %v8568_v4 }
 0x357   : > { %6830 = vmatpush.bf16.msra.mxu2 %v9489_v26  ;;  %v10805_v10 = vor.u32 %v12272_v61, %v10802_v50  ;;  %v10494_v26 = vld [vmem:[%s13179_s1 + $0x10cc] sm:$0xf0]  ;;  %v12251_v61 = vld [vmem:[%s13179_s1 + $0x1274] sm:$0xf] }
 0x358   : > { %v10718_v50 = vld [vmem:[%s13179_s1 + $0x128c] sm:$0xf0]  ;;  %v12167_v4 = vld [vmem:[%s13179_s1 + $0xfd4] sm:$0xf] }
 0x359   : > { %6815 = vmatpush.bf16.msrb.mxu1 %v9321_v16  ;;  %v15015_v16 = vadd.f32 %v14972_v5, %v6586_v3  ;;  %v12195_v5 = vld [vmem:[%s13179_s1 + $0x10b4] sm:$0xf]  ;;  %v10721_v9 = vor.u32 %v12251_v61, %v10718_v50  ;;  %v10382_v48 = vld [vmem:[%s13179_s1 + $0xfec] sm:$0xf0] }
 0x35a   : > { %6904 = vmatpush.bf16.msrb.mxu0 %v10945_v2  ;;  %6841 = vmatpush.bf16.msra.mxu3 %v9769_v21  ;;  %v10525_v2 = vor.u32 %v12202_v14, %v10522_v42  ;;  %v12265_v21 = vld [vmem:[%s13179_s1 + $0x12e4] sm:$0xf]  ;;  %v10497_v45 = vor.u32 %v12195_v5, %v10494_v26  ;;  %v6639_v3 = vpop.f32.mrf.mxu0  ;;  %v10438_v42 = vld [vmem:[%s13179_s1 + $0x105c] sm:$0xf0]  ;;  %v10410_v5 = vld [vmem:[%s13179_s1 + $0x1024] sm:$0xf0]  ;;  %v10385_v17 = vor.u32 %v12167_v4, %v10382_v48 }
 0x35b   : > { %6875 = vmatpush.bf16.msrb.mxu2 %v10581_v46  ;;  %v12279_v46 = vld [vmem:[%s13179_s1 + $0x1354] sm:$0xf]  ;;  %v10777_v34 = vor.u32 %v12265_v21, %v10774_v57  ;;  %v12181_v14 = vld [vmem:[%s13179_s1 + $0x1044] sm:$0xf]  ;;  %v10690_v26 = vld [vmem:[%s13179_s1 + $0x1254] sm:$0xf0] }
 0x35c   : > { %6831 = vmatmul.bf16.vlgmr.msra.gmra.mxu2 %v13879_v39  ;;  %v10441_v51 = vor.u32 %v12181_v14, %v10438_v42  ;;  %v12125_v21 = vld [vmem:[%s13179_s1 + $0xe84] sm:$0xf]  ;;  %v10214_v57 = vld [vmem:[%s13179_s1 + $0xe9c] sm:$0xf0]  ;;  %v11814_v48 = vld [vmem:[%s13179_s1 + $0x4c8] sm:$0xf0] }
 0x35d   : > { %6816 = vmatpush.bf16.msrb.mxu1 %v9293_v8  ;;  %v10830_v8 = vld [vmem:[%s13179_s1 + $0x136c] sm:$0xf0]  ;;  %v8456_v14 = vld [vmem:[%s13179_s1 + $0xc0] sm:$0xf] }
 0x35e   : > { %6905 = vmatpush.bf16.msrb.mxu0 %v10917_v54  ;;  %6842 = vmatpush.bf16.msra.mxu3 %v9741_v38  ;;  %v12258_v54 = vld [vmem:[%s13179_s1 + $0x12ac] sm:$0xf]  ;;  %v10833_v62 = vor.u32 %v12279_v46, %v10830_v8  ;;  %v12139_v38 = vld [vmem:[%s13179_s1 + $0xef4] sm:$0xf]  ;;  %v720_v46 = vmul.f32 %v13336_v19, %v13336_v19  ;;  %v10413_v8 = vor.u32 %v12174_v52, %v10410_v5  ;;  %v8792_v5 = vld [vmem:[%s13179_s1 + $0x360] sm:$0xf] }
 0x35f   : > { %6876 = vmatpush.bf16.msrb.mxu2 %v10553_v28  ;;  %v10469_v28 = vor.u32 %v12188_v33, %v10466_v60  ;;  %v10217_v33 = vor.u32 %v12125_v21, %v10214_v57  ;;  %v10662_v60 = vld [vmem:[%s13179_s1 + $0x121c] sm:$0xf0] }
 0x360   : > { %v729_v3 = vsel %vm686_vm0, %v720_v46, 0.0 }
 0x361   : > { %6817 = vmatpush.bf16.msrb.mxu1 %v9265_v22  ;;  %v10749_v22 = vor.u32 %v12258_v54, %v10746_v6  ;;  %v9016_v54 = vld [vmem:[%s13179_s1 + $0x520] sm:$0xf]  ;;  %v11828_v6 = vld [vmem:[%s13179_s1 + $0x538] sm:$0xf0]  ;;  %v730_v21 = vrot.slane %v729_v3, 4 }
 0x362   : > { %6906 = vmatpush.bf16.msrb.mxu0 %v10889_v41  ;;  %6843 = vmatpush.bf16.msra.mxu3 %v9713_v15  ;;  %v12132_v41 = vld [vmem:[%s13179_s1 + $0xebc] sm:$0xf]  ;;  %v8512_v15 = vld [vmem:[%s13179_s1 + $0x130] sm:$0xf]  ;;  %v9017_v50 = vor.u32 %v11828_v6, %v9016_v54  ;;  %v719_v54 = vmul.f32 %v13292_v40, %v13292_v40  ;;  %v702_v6 = vsel %vm701_vm10, %v13282_v23, 0.0 }
 0x363   : > { %6877 = vmatpush.bf16.msrb.mxu2 %v10525_v2  ;;  %v6611_v2 = vpop.f32.mrf.mxu2  ;;  %v8513_v43 = vor.u32 %v11702_v56, %v8512_v15  ;;  %v12111_v15 = vld [vmem:[%s13179_s1 + $0xe14] sm:$0xf]  ;;  %v10158_v56 = vld [vmem:[%s13179_s1 + $0xe2c] sm:$0xf0] }
 0x364   : > { %6818 = vmatmul.bf16.vlgmr.msrb.gmra.mxu1 %v13847_v0 }
 0x365   : > { %6862 = vmatpush.bf16.msra.mxu1 %v10357_v59  ;;  %6844 = vmatmul.bf16.vlgmr.msra.gmra.mxu3 %v13802_v37  ;;  %v10273_v59 = vor.u32 %v12139_v38, %v10270_v36  ;;  %v10186_v38 = vld [vmem:[%s13179_s1 + $0xe64] sm:$0xf0] }
 0x366   : > { %6888 = vmatpush.bf16.msrb.mxu3 %v10805_v10  ;;  %6907 = vmatpush.bf16.msrb.mxu0 %v10861_v27  ;;  %v10245_v10 = vor.u32 %v12132_v41, %v10242_v13  ;;  %v694_v27 = vsel %vm686_vm0, %v13336_v19, 0.0  ;;  %v12230_v13 = vld [vmem:[%s13179_s1 + $0x11cc] sm:$0xf] }
 0x367   : > { %6878 = vmatpush.bf16.msrb.mxu2 %v10497_v45 }
 0x369   : > { %6863 = vmatpush.bf16.msra.mxu1 %v10329_v47  ;;  %v12244_v47 = vld [vmem:[%s13179_s1 + $0x123c] sm:$0xf] }
 0x36a   : > { %6889 = vmatpush.bf16.msrb.mxu3 %v10777_v34  ;;  %6908 = vmatpush.bf16.msrb.mxu0 %v10833_v62  ;;  %v10693_v45 = vor.u32 %v12244_v47, %v10690_v26  ;;  %v11695_v34 = vld [vmem:[%s13179_s1 + $0x110] sm:$0xf0]  ;;  %v12118_v62 = vld [vmem:[%s13179_s1 + $0xe4c] sm:$0xf]  ;;  %v687_v47 = vsel %vm686_vm0, %v13292_v40, 0.0 }
 0x36b   : > { %6879 = vmatpush.bf16.msrb.mxu2 %v10469_v28  ;;  %v8485_v36 = vor.u32 %v11695_v34, %v8484_v24  ;;  %v6624_v28 = vpop.f32.mrf.mxu3  ;;  %v6613_v42 = vpop.f32.mrf.mxu2  ;;  %v10189_v41 = vor.u32 %v12118_v62, %v10186_v38  ;;  %v10606_v34 = vld [vmem:[%s13179_s1 + $0x11ac] sm:$0xf0]  ;;  %v8764_v38 = vld [vmem:[%s13179_s1 + $0x328] sm:$0xf] }
 0x36c   : > { %v6625_v61 = vadd.f32 %v6624_v28, %v6611_v2  ;;  %v11772_v2 = vld [vmem:[%s13179_s1 + $0x378] sm:$0xf0]  ;;  %v11674_v42 = vld [vmem:[%s13179_s1 + $0x68] sm:$0xf0] }
 0x36d   : > { %6864 = vmatpush.bf16.msra.mxu1 %v10301_v18  ;;  %10983 = vmatmul.msk.bf16.vlgmr.msrb.gmra.mxu0 %vm5952_vm9, %v14010_v53  ;;  %v12237_v18 = vld [vmem:[%s13179_s1 + $0x1204] sm:$0xf]  ;;  %v8793_v4 = vor.u32 %v11772_v2, %v8792_v5  ;;  %v8736_v5 = vld [vmem:[%s13179_s1 + $0x2f0] sm:$0xf]  ;;  %v11758_v2 = vld [vmem:[%s13179_s1 + $0x308] sm:$0xf0] }
 0x36e   : > { %6914 = vmatpush.bf16.msra.mxu0 %v8569_v7  ;;  %6890 = vmatpush.bf16.msrb.mxu3 %v10749_v22  ;;  %v695_v7 = vrot.slane %v694_v27, 4  ;;  %v6650_v22 = vpop.f32.mrf.mxu1  ;;  %v10665_v20 = vor.u32 %v12237_v18, %v10662_v60  ;;  %v6638_v52 = vadd.f32 %v15019_v25, %v6625_v61  ;;  %v11681_v25 = vld [vmem:[%s13179_s1 + $0xa0] sm:$0xf0]  ;;  %v11884_v18 = vld [vmem:[%s13179_s1 + $0x6f8] sm:$0xf0]  ;;  %v688_v60 = vrot.slane %v687_v47, 4 }
 0x36f   : > { %6880 = vmatpush.bf16.msrb.mxu2 %v10441_v51  ;;  %v8988_v51 = vld [vmem:[%s13179_s1 + $0x4e8] sm:$0xf] }
 0x370   : > { %v696_v26 = vadd.f32 %v695_v7, %v694_v27  ;;  %v15087_v24 = vadd.f32 %v6650_v22, %v6638_v52  ;;  %v8960_v27 = vld [vmem:[%s13179_s1 + $0x4b0] sm:$0xf]  ;;  %v721_v7 = vmul.f32 %v13282_v23, %v13282_v23  ;;  %v731_v22 = vadd.f32 %v730_v21, %v729_v3  ;;  %v11807_v3 = vld [vmem:[%s13179_s1 + $0x490] sm:$0xf0] }
 0x371   : > { %6865 = vmatpush.bf16.msra.mxu1 %v10273_v59  ;;  %v11688_v59 = vld [vmem:[%s13179_s1 + $0xd8] sm:$0xf0]  ;;  %v703_v52 = vrot.slane %v702_v6, 4 }
 0x372   : > { %6915 = vmatpush.bf16.msra.mxu0 %v8541_v35  ;;  %6891 = vmatpush.bf16.msrb.mxu3 %v10721_v9  ;;  %v10634_v35 = vld [vmem:[%s13179_s1 + $0x11e4] sm:$0xf0]  ;;  %v11821_v9 = vld [vmem:[%s13179_s1 + $0x500] sm:$0xf0]  ;;  %v697_v28 = vrot.slane %v696_v26, 2  ;;  %v15106_v61 = vpop.f32.mrf.mxu0  ;;  %v736_v21 = vsel %vm701_vm10, %v721_v7, 0.0 }
 0x373   : > { %6881 = vmatpush.bf16.msrb.mxu2 %v10413_v8  ;;  %v10637_v57 = vor.u32 %v12230_v13, %v10634_v35  ;;  %v8989_v46 = vor.u32 %v11821_v9, %v8988_v51  ;;  %v10161_v8 = vor.u32 %v12111_v15, %v10158_v56  ;;  %v8932_v13 = vld [vmem:[%s13179_s1 + $0x478] sm:$0xf]  ;;  %v9212_v51 = vld [vmem:[%s13179_s1 + $0x6a8] sm:$0xf]  ;;  %v11877_v9 = vld [vmem:[%s13179_s1 + $0x6c0] sm:$0xf0]  ;;  %v689_v15 = vadd.f32 %v688_v60, %v687_v47 }
 0x374   : > { %v722_v56 = vsel %vm686_vm0, %v719_v54, 0.0  ;;  %v8372_v47 = vld [vmem:[%s13179_s1 + $0x18] sm:$0xf]  ;;  %v704_v54 = vadd.f32 %v703_v52, %v702_v6  ;;  %v737_v7 = vrot.slane %v736_v21, 4 }
 0x375   : > { %6866 = vmatpush.bf16.msra.mxu1 %v10245_v10  ;;  %v8457_v10 = vor.u32 %v11688_v59, %v8456_v14  ;;  %v8400_v59 = vld [vmem:[%s13179_s1 + $0x50] sm:$0xf]  ;;  %v723_v60 = vrot.slane %v722_v56, 4 }
 0x376   : > { %6916 = vmatpush.bf16.msra.mxu0 %v8513_v43  ;;  %6892 = vmatpush.bf16.msrb.mxu3 %v10693_v45  ;;  %v8428_v43 = vld [vmem:[%s13179_s1 + $0x88] sm:$0xf]  ;;  %v12223_v45 = vld [vmem:[%s13179_s1 + $0x1194] sm:$0xf]  ;;  %v705_v52 = vrot.slane %v704_v54, 2 }
 0x377   : > { %6882 = vmatpush.bf16.msrb.mxu2 %v10385_v17  ;;  %v8429_v62 = vor.u32 %v11681_v25, %v8428_v43  ;;  %v6626_v17 = vpop.f32.mrf.mxu3  ;;  %v10609_v14 = vor.u32 %v12223_v45, %v10606_v34  ;;  %v732_v43 = vrot.slane %v731_v22, 2  ;;  %v11667_v25 = vld [vmem:[%s13179_s1 + $0x30] sm:$0xf0]  ;;  %v9464_v45 = vld [vmem:[%s13179_s1 + $0x8a0] sm:$0xf] }
 0x378   : > { %v11940_v34 = vld [vmem:[%s13179_s1 + $0x8b8] sm:$0xf0] }
 0x379   : > { %6867 = vmatpush.bf16.msra.mxu1 %v10217_v33  ;;  %v9240_v33 = vld [vmem:[%s13179_s1 + $0x6e0] sm:$0xf]  ;;  %v733_v17 = vadd.f32 %v732_v43, %v731_v22  ;;  %v724_v22 = vadd.f32 %v723_v60, %v722_v56  ;;  %v9408_v56 = vld [vmem:[%s13179_s1 + $0x830] sm:$0xf]  ;;  %v11737_v60 = vld [vmem:[%s13179_s1 + $0x260] sm:$0xf0] }
 0x37a   : > { %6917 = vmatpush.bf16.msra.mxu0 %v8485_v36  ;;  %6893 = vmatpush.bf16.msrb.mxu3 %v10665_v20  ;;  %v11765_v36 = vld [vmem:[%s13179_s1 + $0x340] sm:$0xf0]  ;;  %v6652_v20 = vpop.f32.mrf.mxu1 }
 0x37b   : > { %6940 = vmatpush.bf16.msra.mxu2 %v9017_v50  ;;  %v8961_v50 = vor.u32 %v11814_v48, %v8960_v27  ;;  %v8765_v35 = vor.u32 %v11765_v36, %v8764_v38  ;;  %v8904_v27 = vld [vmem:[%s13179_s1 + $0x440] sm:$0xf]  ;;  %v9184_v48 = vld [vmem:[%s13179_s1 + $0x670] sm:$0xf]  ;;  %v8708_v38 = vld [vmem:[%s13179_s1 + $0x2b8] sm:$0xf]  ;;  %v9465_v20 = vor.u32 %v11940_v34, %v9464_v45 }
 0x37c   : > { %6883 = vmatmul.bf16.vlgmr.msrb.gmra.mxu2 %v14014_v29  ;;  %v11751_v36 = vld [vmem:[%s13179_s1 + $0x2d0] sm:$0xf0]  ;;  %v8848_v45 = vld [vmem:[%s13179_s1 + $0x3d0] sm:$0xf] }
 0x37d   : > { %6868 = vmatpush.bf16.msra.mxu1 %v10189_v41  ;;  %v9241_v41 = vor.u32 %v11884_v18, %v9240_v33  ;;  %v11870_v33 = vld [vmem:[%s13179_s1 + $0x688] sm:$0xf0]  ;;  %v690_v18 = vrot.slane %v689_v15, 2 }
 0x37e   : > { %6918 = vmatpush.bf16.msra.mxu0 %v8457_v10  ;;  %6894 = vmatpush.bf16.msrb.mxu3 %v10637_v57  ;;  %v8401_v10 = vor.u32 %v11674_v42, %v8400_v59  ;;  %v698_v57 = vadd.f32 %v697_v28, %v696_v26  ;;  %v11800_v26 = vld [vmem:[%s13179_s1 + $0x458] sm:$0xf0]  ;;  %v9185_v59 = vor.u32 %v11870_v33, %v9184_v48  ;;  %v9436_v42 = vld [vmem:[%s13179_s1 + $0x868] sm:$0xf]  ;;  %v725_v48 = vrot.slane %v724_v22, 2 }
 0x37f   : > { %6941 = vmatpush.bf16.msra.mxu2 %v8989_v46  ;;  %v8933_v46 = vor.u32 %v11807_v3, %v8932_v13  ;;  %v8905_v6 = vor.u32 %v11800_v26, %v8904_v27  ;;  %v8709_v13 = vor.u32 %v11751_v36, %v8708_v38  ;;  %v9156_v3 = vld [vmem:[%s13179_s1 + $0x638] sm:$0xf]  ;;  %v6663_v34 = vpop.f32.mrf.mxu2  ;;  %v9128_v27 = vld [vmem:[%s13179_s1 + $0x600] sm:$0xf] }
 0x380   : > { %v699_v28 = vrot.slane %v698_v57, 1  ;;  %v6664_v33 = vadd.f32 %v6663_v34, %v15087_v24 }
 0x381   : > { %6869 = vmatpush.bf16.msra.mxu1 %v10161_v8  ;;  %v9213_v8 = vor.u32 %v11877_v9, %v9212_v51  ;;  %v11863_v51 = vld [vmem:[%s13179_s1 + $0x650] sm:$0xf0]  ;;  %v15134_v9 = vadd.f32 %v690_v18, %v689_v15  ;;  %v8652_v18 = vld [vmem:[%s13179_s1 + $0x248] sm:$0xf] }
 0x382   : > { %6919 = vmatpush.bf16.msra.mxu0 %v8429_v62  ;;  %6895 = vmatpush.bf16.msrb.mxu3 %v10609_v14  ;;  %v8373_v62 = vor.u32 %v11667_v25, %v8372_v47  ;;  %v6691_v14 = vpop.f32.mrf.mxu0  ;;  %v700_v43 = vadd.f32 %v699_v28, %v698_v57  ;;  %v734_v47 = vrot.slane %v733_v17, 1  ;;  %v11786_v57 = vld [vmem:[%s13179_s1 + $0x3e8] sm:$0xf0] }
 0x383   : > { %6942 = vmatpush.bf16.msra.mxu2 %v8961_v50  ;;  %v11933_v50 = vld [vmem:[%s13179_s1 + $0x880] sm:$0xf0]  ;;  %v692_v26 = vrot.slane %v15134_v9, 1  ;;  %v8849_v24 = vor.u32 %v11786_v57, %v8848_v45  ;;  %v11919_v14 = vld [vmem:[%s13179_s1 + $0x810] sm:$0xf0] }
 0x384   : > { %6870 = vmatmul.bf16.vlgmr.msra.gmra.mxu1 %v13994_v55  ;;  %v9437_v25 = vor.u32 %v11933_v50, %v9436_v42  ;;  %v735_v28 = vadd.f32 %v734_v47, %v733_v17  ;;  %v9100_v42 = vld [vmem:[%s13179_s1 + $0x5c8] sm:$0xf]  ;;  %v11849_v50 = vld [vmem:[%s13179_s1 + $0x5e0] sm:$0xf0]  ;;  %v11842_v57 = vld [vmem:[%s13179_s1 + $0x5a8] sm:$0xf0] }
 0x385   : > { %6927 = vmatpush.bf16.msrb.mxu1 %v8793_v4  ;;  %v8737_v4 = vor.u32 %v11758_v2, %v8736_v5  ;;  %6896 = vmatmul.bf16.vlgmr.msrb.gmra.mxu3 %v13966_v11  ;;  %v11744_v5 = vld [vmem:[%s13179_s1 + $0x298] sm:$0xf0]  ;;  %v738_v2 = vadd.f32 %v737_v7, %v736_v21  ;;  %v9380_v7 = vld [vmem:[%s13179_s1 + $0x7f8] sm:$0xf] }
 0x386   : > { %6953 = vmatpush.bf16.msra.mxu3 %v9241_v41  ;;  %6920 = vmatpush.bf16.msra.mxu0 %v8401_v10  ;;  %v8876_v41 = vld [vmem:[%s13179_s1 + $0x408] sm:$0xf]  ;;  %v8680_v10 = vld [vmem:[%s13179_s1 + $0x280] sm:$0xf] }
 0x387   : > { %6943 = vmatpush.bf16.msra.mxu2 %v8933_v46  ;;  %v9157_v46 = vor.u32 %v11863_v51, %v9156_v3  ;;  %v8681_v21 = vor.u32 %v11744_v5, %v8680_v10  ;;  %v739_v38 = vrot.slane %v738_v2, 2  ;;  %v11730_v3 = vld [vmem:[%s13179_s1 + $0x228] sm:$0xf0]  ;;  %v726_v51 = vadd.f32 %v725_v48, %v724_v22  ;;  %v8596_v48 = vld [vmem:[%s13179_s1 + $0x1d8] sm:$0xf] }
 0x388   : > { %v9381_v10 = vor.u32 %v11919_v14, %v9380_v7  ;;  %v6676_v47 = vpop.f32.mrf.mxu3 }
 0x389   : > { %6928 = vmatpush.bf16.msrb.mxu1 %v8765_v35  ;;  %v11793_v35 = vld [vmem:[%s13179_s1 + $0x420] sm:$0xf0] }
 0x38a   : > { %6954 = vmatpush.bf16.msra.mxu3 %v9213_v8  ;;  %6921 = vmatpush.bf16.msra.mxu0 %v8373_v62  ;;  %v8877_v15 = vor.u32 %v11793_v35, %v8876_v41  ;;  %v11926_v8 = vld [vmem:[%s13179_s1 + $0x848] sm:$0xf0]  ;;  %v706_v62 = vadd.f32 %v705_v52, %v704_v54  ;;  %v8820_v54 = vld [vmem:[%s13179_s1 + $0x398] sm:$0xf]  ;;  %v9912_v41 = vld [vmem:[%s13179_s1 + $0xc20] sm:$0xf]  ;;  %v740_v52 = vadd.f32 %v739_v38, %v738_v2 }
 0x38b   : > { %6944 = vmatpush.bf16.msra.mxu2 %v8905_v6  ;;  %v9409_v36 = vor.u32 %v11926_v8, %v9408_v56  ;;  %v11779_v6 = vld [vmem:[%s13179_s1 + $0x3b0] sm:$0xf0]  ;;  %v8624_v35 = vld [vmem:[%s13179_s1 + $0x210] sm:$0xf]  ;;  %v9101_v2 = vor.u32 %v11849_v50, %v9100_v42  ;;  %v6665_v56 = vpop.f32.mrf.mxu2  ;;  %v6677_v8 = vadd.f32 %v6676_v47, %v6664_v33  ;;  %v727_v38 = vrot.slane %v726_v51, 1 }
 0x38c   : > { %v707_v5 = vrot.slane %v706_v62, 1  ;;  %v8821_v22 = vor.u32 %v11779_v6, %v8820_v54  ;;  %v8625_v34 = vor.u32 %v11730_v3, %v8624_v35  ;;  %v9688_v33 = vld [vmem:[%s13179_s1 + $0xa60] sm:$0xf]  ;;  %v9044_v42 = vld [vmem:[%s13179_s1 + $0x558] sm:$0xf] }
 0x38d   : > { %6929 = vmatpush.bf16.msrb.mxu1 %v8737_v4  ;;  %6922 = vmatmul.bf16.vlgmr.msra.gmra.mxu0 %v13481_v31  ;;  %v11856_v4 = vld [vmem:[%s13179_s1 + $0x618] sm:$0xf0]  ;;  %v15150_v31 = vmul.f32 %v13238_v32, %v700_v43  ;;  %v744_v43 = vmul.f32 %v735_v28, %v13238_v32  ;;  %v9856_v50 = vld [vmem:[%s13179_s1 + $0xbb0] sm:$0xf]  ;;  %v10136_v35 = vld [vmem:[%s13179_s1 + $0xde0] sm:$0xf] }
 0x38e   : > { %6966 = vmatpush.bf16.msrb.mxu0 %v9465_v20  ;;  %6955 = vmatpush.bf16.msra.mxu3 %v9185_v59  ;;  %v9129_v20 = vor.u32 %v11856_v4, %v9128_v27  ;;  %v8653_v59 = vor.u32 %v11737_v60, %v8652_v18  ;;  %v9884_v27 = vld [vmem:[%s13179_s1 + $0xbe8] sm:$0xf]  ;;  %v12045_v4 = vld [vmem:[%s13179_s1 + $0xc00] sm:$0xf0]  ;;  %v11723_v18 = vld [vmem:[%s13179_s1 + $0x1f0] sm:$0xf0]  ;;  %v693_v60 = vadd.f32 %v692_v26, %v15134_v9 }
 0x38f   : > { %6945 = vmatpush.bf16.msra.mxu2 %v8877_v15  ;;  %v747_v17 = vmul.f32 %v15150_v31, %v15150_v31  ;;  %v9352_v15 = vld [vmem:[%s13179_s1 + $0x7c0] sm:$0xf]  ;;  %v11996_v28 = vld [vmem:[%s13179_s1 + $0xa78] sm:$0xf0]  ;;  %v9324_v9 = vld [vmem:[%s13179_s1 + $0x788] sm:$0xf] }
 0x390   : > { %v11905_v26 = vld [vmem:[%s13179_s1 + $0x7a0] sm:$0xf0]  ;;  %v12108_v3 = vld [vmem:[%s13179_s1 + $0xdf8] sm:$0xf0] }
 0x391   : > { %6930 = vmatpush.bf16.msrb.mxu1 %v8709_v13  ;;  %v12052_v13 = vld [vmem:[%s13179_s1 + $0xc38] sm:$0xf0]  ;;  %v750_v14 = vsub.f32 %v744_v43, %v747_v17  ;;  %v15188_v17 = vmul.f32 %v13238_v32, %v693_v60  ;;  %v9660_v43 = vld [vmem:[%s13179_s1 + $0xa28] sm:$0xf]  ;;  %v11989_v47 = vld [vmem:[%s13179_s1 + $0xa40] sm:$0xf0] }
 0x392   : > { %6967 = vmatpush.bf16.msrb.mxu0 %v9437_v25  ;;  %6956 = vmatpush.bf16.msra.mxu3 %v9157_v46  ;;  %v6702_v25 = vpop.f32.mrf.mxu1  ;;  %v11912_v46 = vld [vmem:[%s13179_s1 + $0x7d8] sm:$0xf0]  ;;  %v9913_v45 = vor.u32 %v12052_v13, %v9912_v41  ;;  %v9689_v41 = vor.u32 %v11996_v28, %v9688_v33  ;;  %v12038_v13 = vld [vmem:[%s13179_s1 + $0xbc8] sm:$0xf0]  ;;  %v9632_v60 = vld [vmem:[%s13179_s1 + $0x9f0] sm:$0xf] }
 0x393   : > { %6946 = vmatpush.bf16.msra.mxu2 %v8849_v24  ;;  %v9353_v7 = vor.u32 %v11912_v46, %v9352_v15  ;;  %v708_v24 = vadd.f32 %v707_v5, %v706_v62  ;;  %v11835_v62 = vld [vmem:[%s13179_s1 + $0x570] sm:$0xf0]  ;;  %v9325_v5 = vor.u32 %v11905_v26, %v9324_v9  ;;  %v6678_v15 = vpop.f32.mrf.mxu3  ;;  %v12164_v9 = vld [vmem:[%s13179_s1 + $0xfb8] sm:$0xf0]  ;;  %v9800_v26 = vld [vmem:[%s13179_s1 + $0xb40] sm:$0xf] }
 0x394   : > { %v9045_v56 = vor.u32 %v11835_v62, %v9044_v42  ;;  %v10080_v42 = vld [vmem:[%s13179_s1 + $0xd70] sm:$0xf]  ;;  %v12094_v62 = vld [vmem:[%s13179_s1 + $0xd88] sm:$0xf0]  ;;  %v12017_v15 = vld [vmem:[%s13179_s1 + $0xb20] sm:$0xf0] }
 0x395   : > { %6931 = vmatpush.bf16.msrb.mxu1 %v8681_v21  ;;  %v9072_v21 = vld [vmem:[%s13179_s1 + $0x590] sm:$0xf] }
 0x396   : > { %6968 = vmatpush.bf16.msrb.mxu0 %v9409_v36  ;;  %6957 = vmatpush.bf16.msra.mxu3 %v9129_v20  ;;  %v6690_v36 = vadd.f32 %v15106_v61, %v6677_v8  ;;  %v741_v20 = vrot.slane %v740_v52, 1  ;;  %v9073_v54 = vor.u32 %v11842_v57, %v9072_v21  ;;  %v9885_v61 = vor.u32 %v12045_v4, %v9884_v27  ;;  %v15198_v8 = vpop.f32.mrf.mxu0  ;;  %v9828_v21 = vld [vmem:[%s13179_s1 + $0xb78] sm:$0xf]  ;;  %v12031_v57 = vld [vmem:[%s13179_s1 + $0xb90] sm:$0xf0] }
 0x397   : > { %6947 = vmatpush.bf16.msra.mxu2 %v8821_v22  ;;  %v10108_v27 = vld [vmem:[%s13179_s1 + $0xda8] sm:$0xf]  ;;  %v12101_v4 = vld [vmem:[%s13179_s1 + $0xdc0] sm:$0xf0] }
 0x398   : > { %v15179_v6 = vadd.f32 %v6702_v25, %v6690_v36  ;;  %v15194_v25 = vmul.f32 %v13238_v32, %v708_v24  ;;  %v742_v22 = vadd.f32 %v741_v20, %v740_v52  ;;  %v9661_v52 = vor.u32 %v11989_v47, %v9660_v43  ;;  %v9268_v24 = vld [vmem:[%s13179_s1 + $0x718] sm:$0xf]  ;;  %v11891_v20 = vld [vmem:[%s13179_s1 + $0x730] sm:$0xf0]  ;;  %v10332_v43 = vld [vmem:[%s13179_s1 + $0xf68] sm:$0xf] }
 0x399   : > { %6932 = vmatpush.bf16.msrb.mxu1 %v8653_v59  ;;  %v8597_v59 = vor.u32 %v11723_v18, %v8596_v48  ;;  %v746_v48 = vmul.f32 %v15188_v17, %v15188_v17  ;;  %v12157_v47 = vld [vmem:[%s13179_s1 + $0xf80] sm:$0xf0] }
 0x39a   : > { %6969 = vmatpush.bf16.msrb.mxu0 %v9381_v10  ;;  %6958 = vmatpush.bf16.msra.mxu3 %v9101_v2  ;;  %v728_v10 = vadd.f32 %v727_v38, %v726_v51  ;;  %v753_v2 = vmax.f32 %v750_v14, 0.0  ;;  %v6704_v46 = vpop.f32.mrf.mxu1  ;;  %v9296_v51 = vld [vmem:[%s13179_s1 + $0x750] sm:$0xf]  ;;  %v11982_v38 = vld [vmem:[%s13179_s1 + $0xa08] sm:$0xf0]  ;;  %v748_v33 = vmul.f32 %v15194_v25, %v15194_v25  ;;  %v9829_v14 = vor.u32 %v12031_v57, %v9828_v21 }
 0x39b   : > { %6992 = vmatpush.bf16.msrb.mxu2 %v9913_v45  ;;  %v9857_v45 = vor.u32 %v12038_v13, %v9856_v50  ;;  %v9604_v50 = vld [vmem:[%s13179_s1 + $0x9b8] sm:$0xf]  ;;  %v10333_v21 = vor.u32 %v12157_v47, %v10332_v43  ;;  %v10248_v43 = vld [vmem:[%s13179_s1 + $0xec0] sm:$0xf] }
 0x39c   : > { %6948 = vmatmul.bf16.vlgmr.msra.gmra.mxu2 %v13428_v30  ;;  %v11898_v30 = vld [vmem:[%s13179_s1 + $0x768] sm:$0xf0]  ;;  %v743_v36 = vmul.f32 %v728_v10, %v13238_v32  ;;  %v15212_v28 = vadd.f32 1e-05, %v753_v2  ;;  %v10052_v46 = vld [vmem:[%s13179_s1 + $0xd38] sm:$0xf] }
 0x39d   : > { %6933 = vmatpush.bf16.msrb.mxu1 %v8625_v34  ;;  %v10137_v34 = vor.u32 %v12108_v3, %v10136_v35  ;;  %v9297_v18 = vor.u32 %v11898_v30, %v9296_v51  ;;  %v9576_v51 = vld [vmem:[%s13179_s1 + $0x980] sm:$0xf]  ;;  %v11968_v30 = vld [vmem:[%s13179_s1 + $0x998] sm:$0xf0] }
 0x39e   : > { %6970 = vmatpush.bf16.msrb.mxu0 %v9353_v7  ;;  %6959 = vmatpush.bf16.msra.mxu3 %v9073_v54  ;;  %v745_v7 = vmul.f32 %v742_v22, %v13238_v32  ;;  %v10109_v54 = vor.u32 %v12101_v4, %v10108_v27  ;;  %v10360_v32 = vld [vmem:[%s13179_s1 + $0xfa0] sm:$0xf]  ;;  %v749_v13 = vsub.f32 %v743_v36, %v746_v48  ;;  %12489 = vrsqrt.f32 %v15212_v28  ;;  %v6743_v10 = vpop.f32.mrf.mxu0  ;;  %v9772_v22 = vld [vmem:[%s13179_s1 + $0xb08] sm:$0xf]  ;;  %v10304_v4 = vld [vmem:[%s13179_s1 + $0xf30] sm:$0xf] }
 0x39f   : > { %6993 = vmatpush.bf16.msrb.mxu2 %v9885_v61  ;;  %v9633_v61 = vor.u32 %v11982_v38, %v9632_v60  ;;  %v10361_v3 = vor.u32 %v12164_v9, %v10360_v32  ;;  %v9773_v57 = vor.u32 %v12017_v15, %v9772_v22  ;;  %v12150_v48 = vld [vmem:[%s13179_s1 + $0xf48] sm:$0xf0]  ;;  %v6715_v60 = vpop.f32.mrf.mxu2  ;;  %v9577_v38 = vor.u32 %v11968_v30, %v9576_v51  ;;  %v9520_v10 = vld [vmem:[%s13179_s1 + $0x910] sm:$0xf] }
 0x3a0   : > { %v751_v35 = vsub.f32 %v745_v7, %v748_v33  ;;  %v12010_v36 = vld [vmem:[%s13179_s1 + $0xae8] sm:$0xf0]  ;;  %v10024_v7 = vld [vmem:[%s13179_s1 + $0xd00] sm:$0xf]  ;;  %v12080_v33 = vld [vmem:[%s13179_s1 + $0xd18] sm:$0xf0]  ;;  %vm777_vm11 = vweird.f32 %v15212_v28 }
 0x3a1   : > { %6934 = vmatpush.bf16.msrb.mxu1 %v8597_v59  ;;  %v12024_v59 = vld [vmem:[%s13179_s1 + $0xb58] sm:$0xf0]  ;;  %v12066_v51 = vld [vmem:[%s13179_s1 + $0xca8] sm:$0xf0] }
 0x3a2   : > { %6971 = vmatpush.bf16.msrb.mxu0 %v9325_v5  ;;  %6960 = vmatpush.bf16.msra.mxu3 %v9045_v56  ;;  %v9801_v5 = vor.u32 %v12024_v59, %v9800_v26  ;;  %v12087_v56 = vld [vmem:[%s13179_s1 + $0xd50] sm:$0xf0]  ;;  %v10276_v26 = vld [vmem:[%s13179_s1 + $0xef8] sm:$0xf]  ;;  %v10025_v59 = vor.u32 %v12080_v33, %v10024_v7  ;;  %v10584_v33 = vld [vmem:[%s13179_s1 + $0x1160] sm:$0xf] }
 0x3a3   : > { %6994 = vmatpush.bf16.msrb.mxu2 %v9857_v45  ;;  %v752_v45 = vmax.f32 %v749_v13, 0.0  ;;  %v10053_v27 = vor.u32 %v12087_v56, %v10052_v46  ;;  %v12073_v13 = vld [vmem:[%s13179_s1 + $0xce0] sm:$0xf0]  ;;  %v12136_v46 = vld [vmem:[%s13179_s1 + $0xed8] sm:$0xf0] }
 0x3a4   : > { %6935 = vmatmul.bf16.vlgmr.msrb.gmra.mxu1 %v13632_v12  ;;  %v9269_v12 = vor.u32 %v11891_v20, %v9268_v24  ;;  %v15244_v24 = vpop.eup %12489  ;;  %v6716_v20 = vadd.f32 %v6715_v60, %v15179_v6  ;;  %v12143_v6 = vld [vmem:[%s13179_s1 + $0xf10] sm:$0xf0]  ;;  %v9968_v56 = vld [vmem:[%s13179_s1 + $0xc90] sm:$0xf]  ;;  %v10249_v7 = vor.u32 %v12136_v46, %v10248_v43  ;;  %v10724_v46 = vld [vmem:[%s13179_s1 + $0x1278] sm:$0xf] }
 0x3a5   : > { %6979 = vmatpush.bf16.msra.mxu1 %v9689_v41  ;;  %6961 = vmatmul.bf16.vlgmr.msra.gmra.mxu3 %v13728_v1  ;;  %v11975_v41 = vld [vmem:[%s13179_s1 + $0x9d0] sm:$0xf0]  ;;  %v10081_v1 = vor.u32 %v12094_v62, %v10080_v42  ;;  %v15249_v32 = vadd.f32 1e-05, %v752_v45  ;;  %v9716_v42 = vld [vmem:[%s13179_s1 + $0xa98] sm:$0xf]  ;;  %vm778_vm12 = vweird.f32 %v15244_v24 }
 0x3a6   : > { %7005 = vmatpush.bf16.msrb.mxu3 %v10137_v34  ;;  %6972 = vmatpush.bf16.msrb.mxu0 %v9297_v18  ;;  %v9605_v2 = vor.u32 %v11975_v41, %v9604_v50  ;;  %v754_v34 = vmax.f32 %v751_v35, 0.0  ;;  %v9744_v18 = vld [vmem:[%s13179_s1 + $0xad0] sm:$0xf]  ;;  %v12003_v62 = vld [vmem:[%s13179_s1 + $0xab0] sm:$0xf0]  ;;  %vm15335_vm13 = vmor %vm777_vm11, %vm778_vm12 }
 0x3a7   : > { %6995 = vmatpush.bf16.msrb.mxu2 %v9829_v14  ;;  %v9548_v14 = vld [vmem:[%s13179_s1 + $0x948] sm:$0xf]  ;;  %v10808_v35 = vld [vmem:[%s13179_s1 + $0x1320] sm:$0xf]  ;;  %v6717_v45 = vpop.f32.mrf.mxu2  ;;  %v10976_v60 = vld [vmem:[%s13179_s1 + $0x1470] sm:$0xf]  ;;  %vm767_vm3 = vweird.f32 %v15249_v32 }
 0x3a8   : > { %v15251_v9 = vadd.f32 1e-05, %v754_v34  ;;  %v9996_v41 = vld [vmem:[%s13179_s1 + $0xcc8] sm:$0xf]  ;;  %v6728_v47 = vpop.f32.mrf.mxu3  ;;  %v10948_v45 = vld [vmem:[%s13179_s1 + $0x1438] sm:$0xf] }
 0x3a9   : > { %6980 = vmatpush.bf16.msra.mxu1 %v9661_v52  ;;  %v15235_v52 = vpop.f32.mrf.mxu1  ;;  %v9997_v15 = vor.u32 %v12073_v13, %v9996_v41  ;;  %v6729_v34 = vadd.f32 %v6728_v47, %v6716_v20  ;;  %v12220_v20 = vld [vmem:[%s13179_s1 + $0x1178] sm:$0xf0]  ;;  %v10752_v41 = vld [vmem:[%s13179_s1 + $0x12b0] sm:$0xf]  ;;  %v12262_v13 = vld [vmem:[%s13179_s1 + $0x12c8] sm:$0xf0] }
 0x3aa   : > { %7006 = vmatpush.bf16.msrb.mxu3 %v10109_v54  ;;  %6973 = vmatpush.bf16.msrb.mxu0 %v9269_v12  ;;  %v11961_v54 = vld [vmem:[%s13179_s1 + $0x960] sm:$0xf0]  ;;  %v772_v12 = vmul.f32 %v15244_v24, %v15212_v28  ;;  %12491 = vrsqrt.f32 %v15251_v9  ;;  %v10192_v47 = vld [vmem:[%s13179_s1 + $0xe50] sm:$0xf]  ;;  %v11379_v28 = vld [vmem:[%s13152_s23 + $0x310] sm:$0xf]  ;;  %vm787_vm14 = vweird.f32 %v15251_v9 }
 0x3ab   : > { %6996 = vmatpush.bf16.msrb.mxu2 %v9801_v5  ;;  %v9549_v50 = vor.u32 %v11961_v54, %v9548_v14  ;;  %v11954_v5 = vld [vmem:[%s13179_s1 + $0x928] sm:$0xf0]  ;;  %12493 = vrsqrt.f32 %v15249_v32  ;;  %v9969_v14 = vor.u32 %v12066_v51, %v9968_v56 }
 0x3ac   : > { %v773_v30 = vmul.f32 %v15244_v24, %v772_v12 }
 0x3ad   : > { %6981 = vmatpush.bf16.msra.mxu1 %v9633_v61  ;;  %6974 = vmatmul.bf16.vlgmr.msrb.gmra.mxu0 %v13847_v0  ;;  %v10305_v0 = vor.u32 %v12150_v48, %v10304_v4  ;;  %v9745_v61 = vor.u32 %v12010_v36, %v9744_v18  ;;  %v12269_v4 = vld [vmem:[%s13179_s1 + $0x1300] sm:$0xf0]  ;;  %v9492_v48 = vld [vmem:[%s13179_s1 + $0x8d8] sm:$0xf]  ;;  %v11947_v18 = vld [vmem:[%s13179_s1 + $0x8f0] sm:$0xf0]  ;;  %v6742_v36 = vadd.f32 %v15198_v8, %v6729_v34 }
 0x3ae   : > { %7018 = vmatpush.bf16.msra.mxu0 %v10361_v3  ;;  %7007 = vmatpush.bf16.msrb.mxu3 %v10081_v1  ;;  %v12276_v3 = vld [vmem:[%s13179_s1 + $0x1338] sm:$0xf0]  ;;  %v10277_v1 = vor.u32 %v12143_v6, %v10276_v26  ;;  %v12129_v26 = vld [vmem:[%s13179_s1 + $0xea0] sm:$0xf0]  ;;  %v9493_v8 = vor.u32 %v11947_v18, %v9492_v48  ;;  %v9940_v6 = vld [vmem:[%s13179_s1 + $0xc58] sm:$0xf] }
 0x3af   : > { %6997 = vmatpush.bf16.msrb.mxu2 %v9773_v57  ;;  %v9521_v57 = vor.u32 %v11954_v5, %v9520_v10  ;;  %v15288_v12 = vadd.f32 %v15235_v52, %v6742_v36  ;;  %v12213_v10 = vld [vmem:[%s13179_s1 + $0x1140] sm:$0xf0]  ;;  %v12311_v34 = vld [vmem:[%s13179_s1 + $0x1450] sm:$0xf0]  ;;  %v10164_v18 = vld [vmem:[%s13179_s1 + $0xe18] sm:$0xf] }
 0x3b0   : > { %v6730_v52 = vpop.f32.mrf.mxu3 }
 0x3b1   : > { %6982 = vmatpush.bf16.msra.mxu1 %v9605_v2  ;;  %v6756_v22 = vpop.f32.mrf.mxu1  ;;  %v9717_v2 = vor.u32 %v12003_v62, %v9716_v42  ;;  %v12059_v42 = vld [vmem:[%s13179_s1 + $0xc70] sm:$0xf0]  ;;  %v10668_v52 = vld [vmem:[%s13179_s1 + $0x1208] sm:$0xf] }
 0x3b2   : > { %7019 = vmatpush.bf16.msra.mxu0 %v10333_v21  ;;  %7008 = vmatpush.bf16.msrb.mxu3 %v10053_v27  ;;  %v10809_v21 = vor.u32 %v12276_v3, %v10808_v35  ;;  %v10780_v27 = vld [vmem:[%s13179_s1 + $0x12e8] sm:$0xf]  ;;  %v9941_v43 = vor.u32 %v12059_v42, %v9940_v6  ;;  %v12122_v22 = vld [vmem:[%s13179_s1 + $0xe68] sm:$0xf0]  ;;  %v15303_v56 = vpop.f32.mrf.mxu0  ;;  %v10500_v42 = vld [vmem:[%s13179_s1 + $0x10b8] sm:$0xf] }
 0x3b3   : > { %6998 = vmatpush.bf16.msrb.mxu2 %v9745_v61  ;;  %v10781_v54 = vor.u32 %v12269_v4, %v10780_v27  ;;  %v15283_v61 = vpop.eup %12491  ;;  %v10556_v3 = vld [vmem:[%s13179_s1 + $0x1128] sm:$0xf]  ;;  %v10528_v27 = vld [vmem:[%s13179_s1 + $0x10f0] sm:$0xf]  ;;  %v12206_v4 = vld [vmem:[%s13179_s1 + $0x1108] sm:$0xf0] }
 0x3b4   : > { %v15295_v5 = vpop.eup %12493  ;;  %v10557_v51 = vor.u32 %v12213_v10, %v10556_v3  ;;  %vm788_vm15 = vweird.f32 %v15283_v61 }
 0x3b5   : > { %6983 = vmatpush.bf16.msra.mxu1 %v9577_v38  ;;  %v12318_v38 = vld [vmem:[%s13179_s1 + $0x1488] sm:$0x30]  ;;  %vm15368_vm2 = vmor %vm787_vm14, %vm788_vm15  ;;  %vm768_vm4 = vweird.f32 %v15295_v5  ;;  %vm8104_vm14 = vcmask 1043456  }
 0x3b6   : > { %7020 = vmatpush.bf16.msra.mxu0 %v10305_v0  ;;  %7009 = vmatpush.bf16.msrb.mxu3 %v10025_v59  ;;  %v10220_v0 = vld [vmem:[%s13179_s1 + $0xe88] sm:$0xf]  ;;  %v774_v59 = vmul.f32 0.5, %v773_v30  ;;  %v10977_v62 = vor.u32 %v12318_v38, %v10976_v60  ;;  %v12255_v30 = vld [vmem:[%s13179_s1 + $0x1290] sm:$0xf0]  ;;  %vm15399_vm5 = vmor %vm767_vm3, %vm768_vm4 }
 0x3b7   : > { %6999 = vmatpush.bf16.msrb.mxu2 %v9717_v2  ;;  %v10221_v35 = vor.u32 %v12129_v26, %v10220_v0  ;;  %v10753_v2 = vor.u32 %v12262_v13, %v10752_v41  ;;  %v12115_v60 = vld [vmem:[%s13179_s1 + $0xe30] sm:$0xf0]  ;;  %v10725_v36 = vor.u32 %v12255_v30, %v10724_v46  ;;  %v12248_v0 = vld [vmem:[%s13179_s1 + $0x1258] sm:$0xf0] }
 0x3b8   : > { %v12304_v26 = vld [vmem:[%s13179_s1 + $0x1418] sm:$0xf0]  ;;  %v10165_v6 = vor.u32 %v12115_v60, %v10164_v18  ;;  %v15378_v41 = vld [vmem:[#allocation9] sm:$0x7] }
 0x3b9   : > { %6984 = vmatpush.bf16.msra.mxu1 %v9549_v50  ;;  %v10585_v50 = vor.u32 %v12220_v20, %v10584_v33  ;;  %v11407_v33 = vld [vmem:[%s13152_s23 + $0x348] sm:$0xf]  ;;  %v11636_v20 = vld [vmem:[%s13152_s23 + $0x360] sm:$0xf0]  ;;  %v12192_v46 = vld [vmem:[%s13179_s1 + $0x1098] sm:$0xf0] }
 0x3ba   : > { %7021 = vmatpush.bf16.msra.mxu0 %v10277_v1  ;;  %7010 = vmatpush.bf16.msrb.mxu3 %v9997_v15  ;;  %v782_v1 = vmul.f32 %v15283_v61, %v15251_v9  ;;  %v5976_v15 = vsel %vm5956_vm1, %v10977_v62, 0  ;;  %v12199_v62 = vld [vmem:[%s13179_s1 + $0x10d0] sm:$0xf0] }
 0x3bb   : > { %7044 = vmatpush.bf16.msra.mxu2 %v10809_v21  ;;  %v762_v21 = vmul.f32 %v15295_v5, %v15249_v32  ;;  %v11295_v32 = vld [vmem:[%s13152_s23 + $0x268] sm:$0xf] }
 0x3bc   : > { %7000 = vmatmul.bf16.vlgmr.msrb.gmra.mxu2 %v13802_v37  ;;  %v775_v37 = vsub.f32 1.5, %v774_v59  ;;  %v783_v48 = vmul.f32 %v15283_v61, %v782_v1  ;;  %v15325_v59 = vld [vmem:[#allocation7] sm:$0x7]  ;;  %v11629_v1 = vld [vmem:[%s13152_s23 + $0x328] sm:$0xf0] }
 0x3bd   : > { %6985 = vmatpush.bf16.msra.mxu1 %v9521_v57  ;;  %v10193_v57 = vor.u32 %v12122_v22, %v10192_v47  ;;  %v793_v13 = vperm.slane %v15325_v59, 1  ;;  %v10501_v47 = vor.u32 %v12199_v62, %v10500_v42  ;;  %v12241_v22 = vld [vmem:[%s13179_s1 + $0x1220] sm:$0xf0]  ;;  %v10612_v62 = vld [vmem:[%s13179_s1 + $0x1198] sm:$0xf] }
 0x3be   : > { %7022 = vmatpush.bf16.msra.mxu0 %v10249_v7  ;;  %7011 = vmatpush.bf16.msrb.mxu3 %v9969_v14  ;;  %v776_v38 = vmul.f32 %v15244_v24, %v775_v37  ;;  %v10949_v7 = vor.u32 %v12311_v34, %v10948_v45  ;;  %v10696_v14 = vld [vmem:[%s13179_s1 + $0x1240] sm:$0xf]  ;;  %v10892_v37 = vld [vmem:[%s13179_s1 + $0x13c8] sm:$0xf]  ;;  %v11380_v45 = vor.u32 %v11629_v1, %v11379_v28  ;;  %v11615_v42 = vld [vmem:[%s13152_s23 + $0x2b8] sm:$0xf0] }
 0x3bf   : > { %7045 = vmatpush.bf16.msra.mxu2 %v10781_v54  ;;  %v10529_v54 = vor.u32 %v12206_v4, %v10528_v27  ;;  %v10697_v3 = vor.u32 %v12248_v0, %v10696_v14  ;;  %v11351_v27 = vld [vmem:[%s13152_s23 + $0x2d8] sm:$0xf]  ;;  %v11622_v4 = vld [vmem:[%s13152_s23 + $0x2f0] sm:$0xf0]  ;;  %v6780_v18 = vpop.f32.mrf.mxu2  ;;  %v11580_v28 = vld [vmem:[%s13152_s23 + $0x1a0] sm:$0xf0] }
 0x3c0   : > { %v10444_v14 = vld [vmem:[%s13179_s1 + $0x1048] sm:$0xf]  ;;  %v11577_v1 = vld [vmem:[%s13152_s23 + $0x18c] sm:$0xf] }
 0x3c1   : > { %6986 = vmatpush.bf16.msra.mxu1 %v9493_v8  ;;  %v763_v8 = vmul.f32 %v15295_v5, %v762_v21  ;;  %v6767_v34 = vpop.f32.mrf.mxu1  ;;  %v10669_v21 = vor.u32 %v12241_v22, %v10668_v52  ;;  %v11185_v52 = vld [vmem:[%s13152_s23 + $0x1a4] sm:$0xf0]  ;;  %v756_v22 = vsub.f32 %v13336_v19, %v15150_v31  ;;  %v809_v19 = vperm.slane %v15378_v41, 1  ;;  %v12171_v0 = vld [vmem:[%s13179_s1 + $0xff0] sm:$0xf0] }
 0x3c2   : > { %7023 = vmatpush.bf16.msra.mxu0 %v10221_v35  ;;  %7012 = vmatpush.bf16.msrb.mxu3 %v9941_v43  ;;  %v780_v35 = vsel %vm15335_vm13, %v15244_v24, %v776_v38  ;;  %v6808_v43 = vpop.f32.mrf.mxu0  ;;  %v10472_v24 = vld [vmem:[%s13179_s1 + $0x1080] sm:$0xf]  ;;  %v12234_v38 = vld [vmem:[%s13179_s1 + $0x11e8] sm:$0xf0]  ;;  %vm8102_vm13 = vcmask 1045508  }
 0x3c3   : > { %7046 = vmatpush.bf16.msra.mxu2 %v10753_v2  ;;  %v12297_v2 = vld [vmem:[%s13179_s1 + $0x13e0] sm:$0xf0]  ;;  %v15351_v30 = vmul.f32 %v793_v13, %v780_v35  ;;  %v10473_v60 = vor.u32 %v12192_v46, %v10472_v24  ;;  %v12283_v35 = vld [vmem:[%s13179_s1 + $0x1370] sm:$0xf0]  ;;  %v792_v43 = vperm.slane %v15325_v59, 0 }
 0x3c4   : > { %6987 = vmatmul.bf16.vlgmr.msra.gmra.mxu1 %v13879_v39  ;;  %v10920_v39 = vld [vmem:[%s13179_s1 + $0x1400] sm:$0xf]  ;;  %v11559_v24 = vld [vmem:[%s13152_s23 + $0xf8] sm:$0xf0] }
 0x3c5   : > { %7031 = vmatpush.bf16.msrb.mxu1 %v10585_v50  ;;  %7013 = vmatmul.bf16.vlgmr.msrb.gmra.mxu3 %v13930_v49  ;;  %v784_v50 = vmul.f32 0.5, %v783_v48  ;;  %v11408_v49 = vor.u32 %v11636_v20, %v11407_v33  ;;  %v10921_v10 = vor.u32 %v12304_v26, %v10920_v39  ;;  %v10640_v48 = vld [vmem:[%s13179_s1 + $0x11d0] sm:$0xf]  ;;  %v6781_v20 = vadd.f32 %v6780_v18, %v6767_v34 }
 0x3c6   : > { %7059 = vmatpush.bf16.msra.mxu3 %v5976_v15  ;;  %7024 = vmatpush.bf16.msra.mxu0 %v10193_v57  ;;  %v764_v15 = vmul.f32 0.5, %v763_v8  ;;  %v10893_v57 = vor.u32 %v12297_v2, %v10892_v37  ;;  %v11352_v39 = vor.u32 %v11622_v4, %v11351_v27  ;;  %v11323_v26 = vld [vmem:[%s13152_s23 + $0x2a0] sm:$0xf]  ;;  %v11491_v27 = vld [vmem:[%s13152_s23 + $0x3f0] sm:$0xf] }
 0x3c7   : > { %7047 = vmatpush.bf16.msra.mxu2 %v10725_v36  ;;  %v10864_v36 = vld [vmem:[%s13179_s1 + $0x1390] sm:$0xf]  ;;  %v11324_v37 = vor.u32 %v11615_v42, %v11323_v26  ;;  %v11657_v4 = vld [vmem:[%s13152_s23 + $0x408] sm:$0x30] }
 0x3c8   : > { %v765_v33 = vsub.f32 1.5, %v764_v15  ;;  %v10416_v2 = vld [vmem:[%s13179_s1 + $0x1010] sm:$0xf]  ;;  %v12178_v15 = vld [vmem:[%s13179_s1 + $0x1028] sm:$0xf0]  ;;  %v6793_v34 = vpop.f32.mrf.mxu3  ;;  %v11492_v26 = vor.u32 %v11657_v4, %v11491_v27  ;;  %v755_v4 = vsub.f32 %v13292_v40, %v15188_v17 }
 0x3c9   : > { %7032 = vmatpush.bf16.msrb.mxu1 %v10557_v51  ;;  %v785_v51 = vsub.f32 1.5, %v784_v50  ;;  %v12227_v50 = vld [vmem:[%s13179_s1 + $0x11b0] sm:$0xf0]  ;;  %v6769_v31 = vpop.f32.mrf.mxu1  ;;  %v11191_v27 = vld [vmem:[%s13152_s23 + $0x190] sm:$0xf] }
 0x3ca   : > { %7060 = vmatpush.bf16.msra.mxu3 %v10949_v7  ;;  %7025 = vmatpush.bf16.msra.mxu0 %v10165_v6  ;;  %v12290_v7 = vld [vmem:[%s13179_s1 + $0x13a8] sm:$0xf0]  ;;  %v10641_v6 = vor.u32 %v12234_v38, %v10640_v48  ;;  %v10613_v46 = vor.u32 %v12227_v50, %v10612_v62  ;;  %v10417_v38 = vor.u32 %v12178_v15, %v10416_v2  ;;  %v11127_v50 = vld [vmem:[%s13152_s23 + $0x118] sm:$0xf]  ;;  %v11099_v15 = vld [vmem:[%s13152_s23 + $0xe0] sm:$0xf] }
 0x3cb   : > { %7048 = vmatpush.bf16.msra.mxu2 %v10697_v3  ;;  %v786_v8 = vmul.f32 %v15283_v61, %v785_v51  ;;  %v10865_v9 = vor.u32 %v12290_v7, %v10864_v36  ;;  %v11183_v3 = vld [vmem:[%s13152_s23 + $0x188] sm:$0xf]  ;;  %v11573_v36 = vld [vmem:[%s13152_s23 + $0x168] sm:$0xf0]  ;;  %v11570_v7 = vld [vmem:[%s13152_s23 + $0x154] sm:$0xf] }
 0x3cc   : > { %v11101_v31 = vld [vmem:[%s13152_s23 + $0xfc] sm:$0xf0] }
 0x3cd   : > { %7033 = vmatpush.bf16.msrb.mxu1 %v10529_v54  ;;  %7026 = vmatmul.bf16.vlgmr.msra.gmra.mxu0 %v13994_v55  ;;  %v12185_v54 = vld [vmem:[%s13179_s1 + $0x1060] sm:$0xf0]  ;;  %v802_v55 = vperm.slane %v15351_v30, 0  ;;  %v11608_v30 = vld [vmem:[%s13152_s23 + $0x280] sm:$0xf0] }
 0x3ce   : > { %7785 = vmatpush.bf16.msrb.mxu0 %v11408_v49  ;;  %7061 = vmatpush.bf16.msra.mxu3 %v10921_v10  ;;  %v10445_v13 = vor.u32 %v12185_v54, %v10444_v14  ;;  %v10836_v49 = vld [vmem:[%s13179_s1 + $0x1358] sm:$0xf]  ;;  %v766_v10 = vmul.f32 %v15295_v5, %v765_v33 }
 0x3cf   : > { %7049 = vmatpush.bf16.msra.mxu2 %v10669_v21  ;;  %v10837_v51 = vor.u32 %v12283_v35, %v10836_v49  ;;  %v11184_v21 = vor.u32 %v11580_v28, %v11183_v3  ;;  %v805_v18 = vmul.f32 %v802_v55, %v756_v22  ;;  %v11157_v33 = vld [vmem:[%s13152_s23 + $0x16c] sm:$0xf0]  ;;  %v11129_v49 = vld [vmem:[%s13152_s23 + $0x134] sm:$0xf0]  ;;  %v757_v35 = vsub.f32 %v13282_v23, %v15194_v25 }
 0x3d0   : > { %v770_v48 = vsel %vm15399_vm5, %v15295_v5, %v766_v10  ;;  %v10388_v54 = vld [vmem:[%s13179_s1 + $0xfd8] sm:$0xf]  ;;  %v7752_v28 = vsel %vm5956_vm1, %v11492_v26, 0  ;;  %v11239_v25 = vld [vmem:[%s13152_s23 + $0x1f8] sm:$0xf] }
 0x3d1   : > { %7034 = vmatpush.bf16.msrb.mxu1 %v10501_v47  ;;  %v794_v47 = vperm.slane %v15325_v59, 2  ;;  %v790_v59 = vsel %vm15368_vm2, %v15283_v61, %v786_v8  ;;  %v11188_v61 = vor.u32 %v11577_v1, %v11185_v52  ;;  %v11160_v8 = vor.u32 %v11570_v7, %v11157_v33  ;;  %v11463_v1 = vld [vmem:[%s13152_s23 + $0x3b8] sm:$0xf]  ;;  %v11650_v52 = vld [vmem:[%s13152_s23 + $0x3d0] sm:$0xf0] }
 0x3d2   : > { %7786 = vmatpush.bf16.msrb.mxu0 %v11380_v45  ;;  %7062 = vmatpush.bf16.msra.mxu3 %v10893_v57  ;;  %v6782_v45 = vpop.f32.mrf.mxu2  ;;  %v11155_v57 = vld [vmem:[%s13152_s23 + $0x150] sm:$0xf]  ;;  %v15427_v42 = vadd.f32 %v809_v19, %v805_v18  ;;  %v10389_v62 = vor.u32 %v12171_v0, %v10388_v54  ;;  %v11556_v19 = vld [vmem:[%s13152_s23 + $0xe4] sm:$0xf]  ;;  %v11581_v18 = vld [vmem:[%s13152_s23 + $0x1a8] sm:$0xf0] }
 0x3d3   : > { %7050 = vmatpush.bf16.msra.mxu2 %v10641_v6  ;;  %v800_v14 = vmul.f32 %v794_v47, %v790_v59  ;;  %v11156_v55 = vor.u32 %v11573_v36, %v11155_v57  ;;  %v11267_v6 = vld [vmem:[%s13152_s23 + $0x230] sm:$0xf]  ;;  %v11594_v47 = vld [vmem:[%s13152_s23 + $0x210] sm:$0xf0]  ;;  %v11464_v59 = vor.u32 %v11650_v52, %v11463_v1  ;;  %v11435_v45 = vld [vmem:[%s13152_s23 + $0x380] sm:$0xf]  ;;  %v11192_v0 = vor.u32 %v11581_v18, %v11191_v27 }
 0x3d4   : > { %v821_v22 = vmul.f32 0.2, %v15427_v42  ;;  %v11409_v57 = vld [vmem:[%s13152_s23 + $0x364] sm:$0xf0]  ;;  %v808_v36 = vperm.slane %v15378_v41, 0  ;;  %vm818_vm6 = vcmp.ge.f32.partialorder %v15427_v42, 0.0 }
 0x3d5   : > { %7035 = vmatpush.bf16.msrb.mxu1 %v10473_v60  ;;  %v6794_v60 = vadd.f32 %v6793_v34, %v6781_v20  ;;  %v15423_v20 = vmul.f32 %v792_v43, %v770_v48  ;;  %v803_v3 = vperm.slane %v800_v14, 0  ;;  %v6795_v43 = vpop.f32.mrf.mxu3  ;;  %v11643_v34 = vld [vmem:[%s13152_s23 + $0x398] sm:$0xf0]  ;;  %v11104_v48 = vor.u32 %v11556_v19, %v11101_v31  ;;  %v11549_v7 = vld [vmem:[%s13152_s23 + $0xac] sm:$0xf] }
 0x3d6   : > { %7787 = vmatpush.bf16.msrb.mxu0 %v11352_v39  ;;  %7063 = vmatpush.bf16.msra.mxu3 %v10865_v9  ;;  %v11296_v39 = vor.u32 %v11608_v30, %v11295_v32  ;;  %v11601_v9 = vld [vmem:[%s13152_s23 + $0x248] sm:$0xf0]  ;;  %v11240_v32 = vor.u32 %v11594_v47, %v11239_v25  ;;  %v11587_v30 = vld [vmem:[%s13152_s23 + $0x1d8] sm:$0xf0]  ;;  %v11073_v33 = vld [vmem:[%s13152_s23 + $0xc4] sm:$0xf0] }
 0x3d7   : > { %7051 = vmatpush.bf16.msra.mxu2 %v10613_v46  ;;  %v15421_v5 = vadd.f32 %v15303_v56, %v6794_v60  ;;  %v11563_v56 = vld [vmem:[%s13152_s23 + $0x11c] sm:$0xf]  ;;  %v11268_v10 = vor.u32 %v11601_v9, %v11267_v6  ;;  %v11211_v46 = vld [vmem:[%s13152_s23 + $0x1c0] sm:$0xf]  ;;  %v11071_v60 = vld [vmem:[%s13152_s23 + $0xa8] sm:$0xf]  ;;  %v11076_v6 = vor.u32 %v11549_v7, %v11073_v33 }
 0x3d8   : > { %v11132_v2 = vor.u32 %v11563_v56, %v11129_v49  ;;  %v11212_v17 = vor.u32 %v11587_v30, %v11211_v46  ;;  %v11381_v26 = vld [vmem:[%s13152_s23 + $0x32c] sm:$0xf0]  ;;  %v11574_v9 = vld [vmem:[%s13152_s23 + $0x170] sm:$0xf0]  ;;  %v11567_v43 = vld [vmem:[%s13152_s23 + $0x138] sm:$0xf0] }
 0x3d9   : > { %7036 = vmatpush.bf16.msrb.mxu1 %v10445_v13  ;;  %v11566_v13 = vld [vmem:[%s13152_s23 + $0x130] sm:$0xf0]  ;;  %v11045_v56 = vld [vmem:[%s13152_s23 + $0x8c] sm:$0xf0]  ;;  %v10987_v27 = vld [vmem:[%s13152_s23] sm:$0xf] }
 0x3da   : > { %7788 = vmatpush.bf16.msrb.mxu0 %v11324_v37  ;;  %7064 = vmatpush.bf16.msra.mxu3 %v10837_v51  ;;  %v11128_v23 = vor.u32 %v11566_v13, %v11127_v50  ;;  %v15446_v37 = vpop.f32.mrf.mxu0  ;;  %v806_v51 = vmul.f32 %v803_v3, %v757_v35  ;;  %v11545_v50 = vld [vmem:[%s13152_s23 + $0x88] sm:$0xf0]  ;;  %v11542_v13 = vld [vmem:[%s13152_s23 + $0x74] sm:$0xf]  ;;  %v11619_v3 = vld [vmem:[%s13152_s23 + $0x2dc] sm:$0xf] }
 0x3db   : > { %7811 = vmatpush.bf16.msrb.mxu2 %v11188_v61  ;;  %v11633_v61 = vld [vmem:[%s13152_s23 + $0x34c] sm:$0xf]  ;;  %v11048_v47 = vor.u32 %v11542_v13, %v11045_v56  ;;  %v11493_v19 = vld [vmem:[%s13152_s23 + $0x40c] sm:$0x30]  ;;  %v11528_v18 = vld [vmem:[%s13152_s23 + $0x4] sm:$0xf] }
 0x3dc   : > { %7052 = vmatmul.bf16.vlgmr.msra.gmra.mxu2 %v13966_v11  ;;  %v801_v11 = vperm.slane %v15423_v20, 0  ;;  %v11412_v54 = vor.u32 %v11633_v61, %v11409_v57  ;;  %v11163_v20 = vld [vmem:[%s13152_s23 + $0x158] sm:$0xf]  ;;  %v11560_v57 = vld [vmem:[%s13152_s23 + $0x100] sm:$0xf0] }
 0x3dd   : > { %7037 = vmatpush.bf16.msrb.mxu1 %v10417_v38  ;;  %10984 = vmatmul.msk.bf16.vlgmr.msra.gmra.mxu3 %vm5952_vm9, %v14010_v53  ;;  %v810_v53 = vperm.slane %v15378_v41, 2  ;;  %v11552_v38 = vld [vmem:[%s13152_s23 + $0xc0] sm:$0xf0]  ;;  %v11164_v1 = vor.u32 %v11574_v9, %v11163_v20  ;;  %v11637_v7 = vld [vmem:[%s13152_s23 + $0x368] sm:$0xf0] }
 0x3de   : > { %7772 = vmatpush.bf16.msrb.mxu3 %v11184_v21  ;;  %7789 = vmatpush.bf16.msrb.mxu0 %v11296_v39  ;;  %v11100_v21 = vor.u32 %v11559_v24, %v11099_v15  ;;  %v804_v14 = vmul.f32 %v801_v11, %v755_v4  ;;  %v11072_v41 = vor.u32 %v11552_v38, %v11071_v60  ;;  %v11626_v39 = vld [vmem:[%s13152_s23 + $0x314] sm:$0xf]  ;;  %v11353_v11 = vld [vmem:[%s13152_s23 + $0x2f4] sm:$0xf0]  ;;  %v11535_v15 = vld [vmem:[%s13152_s23 + $0x3c] sm:$0xf] }
 0x3df   : > { %7812 = vmatpush.bf16.msrb.mxu2 %v11160_v8  ;;  %v816_v40 = vadd.f32 %v810_v53, %v806_v51  ;;  %v11135_v53 = vld [vmem:[%s13152_s23 + $0x120] sm:$0xf]  ;;  %v6832_v25 = vpop.f32.mrf.mxu2  ;;  %v11017_v24 = vld [vmem:[%s13152_s23 + $0x54] sm:$0xf0]  ;;  %v11531_v4 = vld [vmem:[%s13152_s23 + $0x18] sm:$0xf0] }
 0x3e0   : > { %v15480_v49 = vadd.f32 %v808_v36, %v804_v14  ;;  %v11020_v61 = vor.u32 %v11535_v15, %v11017_v24  ;;  %v10989_v60 = vld [vmem:[%s13152_s23 + $0x1c] sm:$0xf0]  ;;  %v11465_v13 = vld [vmem:[%s13152_s23 + $0x3d4] sm:$0xf0] }
 0x3e1   : > { %7038 = vmatpush.bf16.msrb.mxu1 %v10389_v62  ;;  %v11043_v62 = vld [vmem:[%s13152_s23 + $0x70] sm:$0xf]  ;;  %vm819_vm7 = vcmp.ge.f32.partialorder %v816_v40, 0.0  ;;  %v822_v35 = vmul.f32 0.2, %v816_v40 }
 0x3e2   : > { %7773 = vmatpush.bf16.msrb.mxu3 %v11156_v55  ;;  %7790 = vmatpush.bf16.msrb.mxu0 %v11268_v10  ;;  %v824_v55 = vsel %vm818_vm6, %v15427_v42, %v821_v22  ;;  %v6860_v8 = vpop.f32.mrf.mxu0  ;;  %v11384_v42 = vor.u32 %v11626_v39, %v11381_v26  ;;  %v11044_v52 = vor.u32 %v11545_v50, %v11043_v62  ;;  %v11015_v22 = vld [vmem:[%s13152_s23 + $0x38] sm:$0xf]  ;;  %v820_v31 = vmul.f32 0.2, %v15480_v49  ;;  %v11437_v15 = vld [vmem:[%s13152_s23 + $0x39c] sm:$0xf0] }
 0x3e3   : > { %7813 = vmatpush.bf16.msrb.mxu2 %v11132_v2  ;;  %v15483_v10 = vpack.c.bf16 %v824_v55, %v824_v55  ;;  %v11538_v2 = vld [vmem:[%s13152_s23 + $0x50] sm:$0xf0]  ;;  %v825_v51 = vsel %vm819_vm7, %v816_v40, %v822_v35  ;;  %vm817_vm9 = vcmp.ge.f32.partialorder %v15480_v49, 0.0  ;;  %v10988_v40 = vor.u32 %v11531_v4, %v10987_v27  ;;  %v11553_v55 = vld [vmem:[%s13152_s23 + $0xc8] sm:$0xf0] }
 0x3e4   : > { %7039 = vmatmul.bf16.vlgmr.msrb.gmra.mxu1 %v14014_v29  ;;  %v11436_v29 = vor.u32 %v11643_v34, %v11435_v45  ;;  %v11016_v30 = vor.u32 %v11538_v2, %v11015_v22  ;;  %v11612_v45 = vld [vmem:[%s13152_s23 + $0x2a4] sm:$0xf]  ;;  %v11325_v34 = vld [vmem:[%s13152_s23 + $0x2bc] sm:$0xf0]  ;;  %v15507_v38 = vpack.c.bf16 %v825_v51, %v825_v51  ;;  %v10992_v26 = vor.u32 %v11528_v18, %v10989_v60  ;;  %v11647_v8 = vld [vmem:[%s13152_s23 + $0x3bc] sm:$0xf] }
 0x3e5   : > { %7803 = vmatpush.bf16.msra.mxu1 %v7752_v28  ;;  %v6819_v28 = vpop.f32.mrf.mxu1  ;;  %v11328_v36 = vor.u32 %v11612_v45, %v11325_v34  ;;  %v11499_v56 = vld [vmem:[%s13152_s23 + $0x3f8] sm:$0xf]  ;;  %v11658_v35 = vld [vmem:[%s13152_s23 + $0x410] sm:$0x30]  ;;  %v11640_v2 = vld [vmem:[%s13152_s23 + $0x384] sm:$0xf] }
 0x3e6   : > { %7774 = vmatpush.bf16.msrb.mxu3 %v11128_v23  ;;  %7791 = vmatpush.bf16.msrb.mxu0 %v11240_v32  ;;  %v6820_v23 = vadd.f32 %v6819_v28, %v15421_v5  ;;  %v11356_v5 = vor.u32 %v11619_v3, %v11353_v11  ;;  %v11136_v32 = vor.u32 %v11567_v43, %v11135_v53  ;;  %v11387_v3 = vld [vmem:[%s13152_s23 + $0x318] sm:$0xf]  ;;  %v11630_v28 = vld [vmem:[%s13152_s23 + $0x330] sm:$0xf0]  ;;  %v11359_v24 = vld [vmem:[%s13152_s23 + $0x2e0] sm:$0xf] }
 0x3e7   : > { %7814 = vmatpush.bf16.msrb.mxu2 %v11104_v48  ;;  %v11468_v43 = vor.u32 %v11647_v8, %v11465_v13  ;;  %v11388_v22 = vor.u32 %v11630_v28, %v11387_v3  ;;  %v11440_v51 = vor.u32 %v11640_v2, %v11437_v15  ;;  %v11539_v45 = vld [vmem:[%s13152_s23 + $0x58] sm:$0xf0]  ;;  %v11471_v27 = vld [vmem:[%s13152_s23 + $0x3c0] sm:$0xf]  ;;  %v11501_v60 = vld [vmem:[%s13152_s23 + $0x414] sm:$0x30] }
 0x3e8   : > { %v6833_v46 = vadd.f32 %v6832_v25, %v6820_v23  ;;  %v6845_v39 = vpop.f32.mrf.mxu3  ;;  %v11051_v23 = vld [vmem:[%s13152_s23 + $0x78] sm:$0xf]  ;;  %v11546_v25 = vld [vmem:[%s13152_s23 + $0x90] sm:$0xf0]  ;;  %v11655_v18 = vld [vmem:[%s13152_s23 + $0x3fc] sm:$0xf] }
 0x3e9   : > { %7804 = vmatpush.bf16.msra.mxu1 %v11464_v59  ;;  %v11654_v59 = vld [vmem:[%s13152_s23 + $0x3f4] sm:$0xf]  ;;  %v11417_v13 = vld [vmem:[%s13152_s23 + $0x36c] sm:$0xf0]  ;;  %v11648_v28 = vld [vmem:[%s13152_s23 + $0x3c4] sm:$0xf] }
 0x3ea   : > { %7775 = vmatpush.bf16.msrb.mxu3 %v11100_v21  ;;  %7792 = vmatpush.bf16.msrb.mxu0 %v11212_v17  ;;  %v11107_v21 = vld [vmem:[%s13152_s23 + $0xe8] sm:$0xf]  ;;  %v11496_v48 = vor.u32 %v11654_v59, %v11493_v19  ;;  %v11605_v17 = vld [vmem:[%s13152_s23 + $0x26c] sm:$0xf]  ;;  %v6846_v9 = vadd.f32 %v6845_v39, %v6833_v46  ;;  %v15522_v62 = vpop.f32.mrf.mxu0  ;;  %v11623_v59 = vld [vmem:[%s13152_s23 + $0x2f8] sm:$0xf0]  ;;  %v11052_v19 = vor.u32 %v11546_v25, %v11051_v23 }
 0x3eb   : > { %7815 = vmatpush.bf16.msrb.mxu2 %v11076_v6  ;;  %v11108_v14 = vor.u32 %v11560_v57, %v11107_v21  ;;  %v823_v6 = vsel %vm817_vm9, %v15480_v49, %v820_v31  ;;  %v11269_v49 = vld [vmem:[%s13152_s23 + $0x24c] sm:$0xf0]  ;;  %v11591_v31 = vld [vmem:[%s13152_s23 + $0x1fc] sm:$0xf]  ;;  %v11241_v46 = vld [vmem:[%s13152_s23 + $0x214] sm:$0xf0]  ;;  %v11360_v21 = vor.u32 %v11623_v59, %v11359_v24 }
 0x3ec   : > { %v7755_v20 = vsel %vm5956_vm1, %v11496_v48, 0  ;;  %v15532_v11 = vadd.f32 %v15446_v37, %v6846_v9  ;;  %v15534_v53 = vpack.c.bf16 %v823_v6, %v823_v6  ;;  %v11616_v57 = vld [vmem:[%s13152_s23 + $0x2c0] sm:$0xf0]  ;;  %v11244_v4 = vor.u32 %v11591_v31, %v11241_v46  ;;  %v11651_v48 = vld [vmem:[%s13152_s23 + $0x3d8] sm:$0xf0] }
 0x3ed   : > { %7805 = vmatpush.bf16.msra.mxu1 %v11436_v29  ;;  %7793 = vmatmul.bf16.vlgmr.msrb.gmra.mxu0 %v15483_v10  ;;  %v11415_v29 = vld [vmem:[%s13152_s23 + $0x350] sm:$0xf]  ;;  %v6821_v33 = vpop.f32.mrf.mxu1  ;;  %v11443_v6 = vld [vmem:[%s13152_s23 + $0x388] sm:$0xf]  ;;  %v11644_v9 = vld [vmem:[%s13152_s23 + $0x3a0] sm:$0xf0] }
 0x3ee   : > { %7850 = vmatpush.bf16.msra.mxu0 %v11192_v0  ;;  %7776 = vmatpush.bf16.msrb.mxu3 %v11072_v41  ;;  %v11079_v0 = vld [vmem:[%s13152_s23 + $0xb0] sm:$0xf]  ;;  %v6834_v41 = vpop.f32.mrf.mxu2  ;;  %v11416_v50 = vor.u32 %v11637_v7, %v11415_v29  ;;  %v11584_v29 = vld [vmem:[%s13152_s23 + $0x1c4] sm:$0xf]  ;;  %v11213_v7 = vld [vmem:[%s13152_s23 + $0x1dc] sm:$0xf0] }
 0x3ef   : > { %7816 = vmatpush.bf16.msrb.mxu2 %v11048_v47  ;;  %v11500_v47 = vor.u32 %v11658_v35, %v11499_v56  ;;  %v10995_v33 = vld [vmem:[%s13152_s23 + $0x8] sm:$0xf]  ;;  %v11504_v41 = vor.u32 %v11655_v18, %v11501_v60  ;;  %v11216_v39 = vor.u32 %v11584_v29, %v11213_v7  ;;  %v11571_v56 = vld [vmem:[%s13152_s23 + $0x15c] sm:$0xf]  ;;  %v11165_v35 = vld [vmem:[%s13152_s23 + $0x174] sm:$0xf0] }
 0x3f0   : > { %v11168_v23 = vor.u32 %v11571_v56, %v11165_v35  ;;  %v11627_v25 = vld [vmem:[%s13152_s23 + $0x31c] sm:$0xf]  ;;  %v11389_v15 = vld [vmem:[%s13152_s23 + $0x334] sm:$0xf0]  ;;  %v11137_v24 = vld [vmem:[%s13152_s23 + $0x13c] sm:$0xf0] }
 0x3f1   : > { %7824 = vmatpush.bf16.msrb.mxu1 %v11412_v54  ;;  %v11297_v54 = vld [vmem:[%s13152_s23 + $0x284] sm:$0xf0]  ;;  %v11641_v46 = vld [vmem:[%s13152_s23 + $0x38c] sm:$0xf]  ;;  %v11620_v18 = vld [vmem:[%s13152_s23 + $0x2e4] sm:$0xf] }
 0x3f2   : > { %7851 = vmatpush.bf16.msra.mxu0 %v11164_v1  ;;  %7777 = vmatpush.bf16.msrb.mxu3 %v11044_v52  ;;  %v11080_v1 = vor.u32 %v11553_v55, %v11079_v0  ;;  %v11598_v52 = vld [vmem:[%s13152_s23 + $0x234] sm:$0xf]  ;;  %v6912_v34 = vpop.f32.mrf.mxu0  ;;  %v11472_v0 = vor.u32 %v11651_v48, %v11471_v27  ;;  %v11109_v27 = vld [vmem:[%s13152_s23 + $0x104] sm:$0xf0]  ;;  %v11361_v60 = vld [vmem:[%s13152_s23 + $0x2fc] sm:$0xf0] }
 0x3f3   : > { %7817 = vmatpush.bf16.msrb.mxu2 %v11020_v61  ;;  %v11272_v37 = vor.u32 %v11598_v52, %v11269_v49  ;;  %v11331_v61 = vld [vmem:[%s13152_s23 + $0x2a8] sm:$0xf]  ;;  %v11444_v52 = vor.u32 %v11644_v9, %v11443_v6  ;;  %v11275_v49 = vld [vmem:[%s13152_s23 + $0x238] sm:$0xf]  ;;  %v11588_v29 = vld [vmem:[%s13152_s23 + $0x1e0] sm:$0xf0] }
 0x3f4   : > { %11517 = vmatmul.msk.bf16.vlgmr.msra.gmra.mxu1 %vm7747_vm8, %v15507_v38  ;;  %v11395_v7 = vld [vmem:[%s13152_s23 + $0x320] sm:$0xf]  ;;  %v11613_v6 = vld [vmem:[%s13152_s23 + $0x2ac] sm:$0xf]  ;;  %v11333_v9 = vld [vmem:[%s13152_s23 + $0x2c4] sm:$0xf0] }
 0x3f5   : > { %7825 = vmatpush.bf16.msrb.mxu1 %v11384_v42  ;;  %v11300_v42 = vor.u32 %v11605_v17, %v11297_v54  ;;  %v11193_v17 = vld [vmem:[%s13152_s23 + $0x1ac] sm:$0xf0]  ;;  %v11332_v54 = vor.u32 %v11616_v57, %v11331_v61  ;;  %v11557_v57 = vld [vmem:[%s13152_s23 + $0xec] sm:$0xf]  ;;  %v11367_v35 = vld [vmem:[%s13152_s23 + $0x2e8] sm:$0xf] }
 0x3f6   : > { %7852 = vmatpush.bf16.msra.mxu0 %v11136_v32  ;;  %7778 = vmatpush.bf16.msrb.mxu3 %v11016_v30  ;;  %v7758_v32 = vsel %vm5956_vm1, %v11500_v47, 0  ;;  %v11023_v30 = vld [vmem:[%s13152_s23 + $0x40] sm:$0xf] }
 0x3f7   : > { %7818 = vmatpush.bf16.msrb.mxu2 %v10992_v26  ;;  %v11303_v26 = vld [vmem:[%s13152_s23 + $0x270] sm:$0xf] }
 0x3f9   : > { %7826 = vmatpush.bf16.msrb.mxu1 %v11356_v5  ;;  %v6847_v5 = vpop.f32.mrf.mxu3 }
 0x3fa   : > { %7853 = vmatpush.bf16.msra.mxu0 %v11108_v14  ;;  %7779 = vmatpush.bf16.msrb.mxu3 %v10988_v40  ;;  %v11532_v14 = vld [vmem:[%s13152_s23 + $0x20] sm:$0xf0]  ;;  %v11578_v40 = vld [vmem:[%s13152_s23 + $0x194] sm:$0xf]  ;;  %v11445_v5 = vld [vmem:[%s13152_s23 + $0x3a4] sm:$0xf0] }
 0x3fb   : > { %7863 = vmatpush.bf16.msra.mxu2 %v11416_v50  ;;  %v10996_v55 = vor.u32 %v11532_v14, %v10995_v33  ;;  %v11196_v8 = vor.u32 %v11578_v40, %v11193_v17  ;;  %v11634_v50 = vld [vmem:[%s13152_s23 + $0x354] sm:$0xf]  ;;  %v11448_v61 = vor.u32 %v11641_v46, %v11445_v5  ;;  %v11631_v33 = vld [vmem:[%s13152_s23 + $0x338] sm:$0xf0]  ;;  %v11112_v14 = vor.u32 %v11557_v57, %v11109_v27  ;;  %v11199_v40 = vld [vmem:[%s13152_s23 + $0x198] sm:$0xf] }
 0x3fc   : > { %7819 = vmatmul.bf16.vlgmr.msrb.gmra.mxu2 %v15534_v53  ;;  %v11582_v17 = vld [vmem:[%s13152_s23 + $0x1b0] sm:$0xf0]  ;;  %v11536_v46 = vld [vmem:[%s13152_s23 + $0x44] sm:$0xf]  ;;  %v11025_v5 = vld [vmem:[%s13152_s23 + $0x5c] sm:$0xf0] }
 0x3fd   : > { %7827 = vmatpush.bf16.msrb.mxu1 %v11328_v36  ;;  %7780 = vmatmul.bf16.vlgmr.msrb.gmra.mxu3 %v15534_v53  ;;  %v11024_v36 = vor.u32 %v11539_v45, %v11023_v30  ;;  %v11423_v30 = vld [vmem:[%s13152_s23 + $0x358] sm:$0xf]  ;;  %v11638_v45 = vld [vmem:[%s13152_s23 + $0x370] sm:$0xf0]  ;;  %v11200_v56 = vor.u32 %v11582_v17, %v11199_v40  ;;  %v11028_v27 = vor.u32 %v11536_v46, %v11025_v5  ;;  %v11283_v17 = vld [vmem:[%s13152_s23 + $0x240] sm:$0xf] }
 0x3fe   : > { %7842 = vmatpush.bf16.msra.mxu3 %v7755_v20  ;;  %7854 = vmatpush.bf16.msra.mxu0 %v11080_v1  ;;  %v11609_v20 = vld [vmem:[%s13152_s23 + $0x288] sm:$0xf0]  ;;  %v11473_v1 = vld [vmem:[%s13152_s23 + $0x3dc] sm:$0xf0]  ;;  %v11424_v48 = vor.u32 %v11638_v45, %v11423_v30  ;;  %v11277_v30 = vld [vmem:[%s13152_s23 + $0x254] sm:$0xf0] }
 0x3ff   : > { %7864 = vmatpush.bf16.msra.mxu2 %v11388_v22  ;;  %v11304_v3 = vor.u32 %v11609_v20, %v11303_v26  ;;  %v11420_v22 = vor.u32 %v11634_v50, %v11417_v13  ;;  %v11476_v2 = vor.u32 %v11648_v28, %v11473_v1  ;;  %v11171_v28 = vld [vmem:[%s13152_s23 + $0x160] sm:$0xf]  ;;  %v11575_v1 = vld [vmem:[%s13152_s23 + $0x178] sm:$0xf0]  ;;  %v11610_v57 = vld [vmem:[%s13152_s23 + $0x290] sm:$0xf0] }
 0x400   : > { %v11507_v45 = vld [vmem:[%s13152_s23 + $0x400] sm:$0xf]  ;;  %v11589_v46 = vld [vmem:[%s13152_s23 + $0x1e8] sm:$0xf0]  ;;  %v11031_v5 = vld [vmem:[%s13152_s23 + $0x48] sm:$0xf] }
 0x401   : > { %7828 = vmatpush.bf16.msrb.mxu1 %v11300_v42  ;;  %v7761_v42 = vsel %vm5956_vm1, %v11504_v41, 0  ;;  %v6871_v47 = vpop.f32.mrf.mxu1  ;;  %v11550_v41 = vld [vmem:[%s13152_s23 + $0xb4] sm:$0xf] }
 0x402   : > { %7843 = vmatpush.bf16.msra.mxu3 %v11468_v43  ;;  %7855 = vmatpush.bf16.msra.mxu0 %v11052_v19  ;;  %v11602_v43 = vld [vmem:[%s13152_s23 + $0x250] sm:$0xf0]  ;;  %v6872_v59 = vadd.f32 %v6871_v47, %v15532_v11  ;;  %v6884_v19 = vpop.f32.mrf.mxu2 }
 0x403   : > { %7865 = vmatpush.bf16.msra.mxu2 %v11360_v21  ;;  %v11276_v31 = vor.u32 %v11602_v43, %v11275_v49  ;;  %v11392_v21 = vor.u32 %v11627_v25, %v11389_v15  ;;  %v11543_v49 = vld [vmem:[%s13152_s23 + $0x7c] sm:$0xf]  ;;  %v11053_v43 = vld [vmem:[%s13152_s23 + $0x94] sm:$0xf0]  ;;  %v11606_v47 = vld [vmem:[%s13152_s23 + $0x274] sm:$0xf] }
 0x404   : > { %v6885_v34 = vadd.f32 %v6884_v19, %v6872_v59  ;;  %v11339_v15 = vld [vmem:[%s13152_s23 + $0x2b0] sm:$0xf]  ;;  %v11143_v59 = vld [vmem:[%s13152_s23 + $0x128] sm:$0xf] }
 0x405   : > { %7829 = vmatpush.bf16.msrb.mxu1 %v11272_v37  ;;  %v11564_v37 = vld [vmem:[%s13152_s23 + $0x124] sm:$0xf] }
 0x406   : > { %7844 = vmatpush.bf16.msra.mxu3 %v11440_v51  ;;  %7856 = vmatpush.bf16.msra.mxu0 %v11024_v36  ;;  %v11247_v51 = vld [vmem:[%s13152_s23 + $0x200] sm:$0xf]  ;;  %v11140_v11 = vor.u32 %v11564_v37, %v11137_v24  ;;  %v11219_v36 = vld [vmem:[%s13152_s23 + $0x1c8] sm:$0xf]  ;;  %v11617_v37 = vld [vmem:[%s13152_s23 + $0x2c8] sm:$0xf0]  ;;  %v11056_v24 = vor.u32 %v11543_v49, %v11053_v43 }
 0x407   : > { %7866 = vmatpush.bf16.msra.mxu2 %v11332_v54 }
 0x408   : > { %v6897_v20 = vpop.f32.mrf.mxu3 }
 0x409   : > { %7830 = vmatpush.bf16.msrb.mxu1 %v11244_v4  ;;  %v6873_v54 = vpop.f32.mrf.mxu1  ;;  %v6898_v50 = vadd.f32 %v6897_v20, %v6885_v34  ;;  %v11659_v34 = vld [vmem:[%s13152_s23 + $0x418] sm:$0x30] }
 0x40a   : > { %7881 = vmatpush.bf16.msrb.mxu3 %v7758_v32  ;;  %7857 = vmatpush.bf16.msra.mxu0 %v10996_v55  ;;  %v11595_v32 = vld [vmem:[%s13152_s23 + $0x218] sm:$0xf0]  ;;  %v6886_v26 = vpop.f32.mrf.mxu2  ;;  %v11220_v55 = vor.u32 %v11588_v29, %v11219_v36  ;;  %v15603_v13 = vpop.f32.mrf.mxu0  ;;  %v10997_v36 = vld [vmem:[%s13152_s23 + $0x24] sm:$0xf0]  ;;  %v11508_v29 = vor.u32 %v11659_v34, %v11507_v45 }
 0x40b   : > { %7867 = vmatpush.bf16.msra.mxu2 %v11304_v3  ;;  %v11248_v4 = vor.u32 %v11595_v32, %v11247_v51  ;;  %v11340_v32 = vor.u32 %v11617_v37, %v11339_v15  ;;  %v11603_v54 = vld [vmem:[%s13152_s23 + $0x258] sm:$0xf0]  ;;  %v11173_v15 = vld [vmem:[%s13152_s23 + $0x17c] sm:$0xf0]  ;;  %v11451_v37 = vld [vmem:[%s13152_s23 + $0x390] sm:$0xf] }
 0x40c   : > { %v7764_v20 = vsel %vm5956_vm1, %v11508_v29, 0 }
 0x40d   : > { %7831 = vmatpush.bf16.msrb.mxu1 %v11216_v39  ;;  %7858 = vmatmul.bf16.vlgmr.msra.gmra.mxu0 %v15534_v53  ;;  %v11081_v39 = vld [vmem:[%s13152_s23 + $0xcc] sm:$0xf0] }
 0x40e   : > { %7882 = vmatpush.bf16.msrb.mxu3 %v11472_v0  ;;  %7920 = vmatpush.bf16.msrb.mxu0 %v7761_v42  ;;  %v11364_v0 = vor.u32 %v11620_v18, %v11361_v60  ;;  %v11624_v42 = vld [vmem:[%s13152_s23 + $0x300] sm:$0xf0]  ;;  %v11084_v3 = vor.u32 %v11550_v41, %v11081_v39  ;;  %v11529_v60 = vld [vmem:[%s13152_s23 + $0xc] sm:$0xf]  ;;  %v11087_v41 = vld [vmem:[%s13152_s23 + $0xb8] sm:$0xf] }
 0x40f   : > { %11518 = vmatmul.msk.bf16.vlgmr.msra.gmra.mxu3 %vm7747_vm8, %v15507_v38  ;;  %7868 = vmatpush.bf16.msra.mxu2 %v11276_v31  ;;  %v11368_v25 = vor.u32 %v11624_v42, %v11367_v35  ;;  %v11599_v31 = vld [vmem:[%s13152_s23 + $0x23c] sm:$0xf]  ;;  %v11554_v39 = vld [vmem:[%s13152_s23 + $0xd0] sm:$0xf0]  ;;  %v11201_v42 = vld [vmem:[%s13152_s23 + $0x1b4] sm:$0xf0] }
 0x410   : > { %7832 = vmatmul.bf16.vlgmr.msrb.gmra.mxu1 %v15483_v10  ;;  %v6899_v51 = vpop.f32.mrf.mxu3  ;;  %v11280_v18 = vor.u32 %v11599_v31, %v11277_v30  ;;  %v11088_v35 = vor.u32 %v11554_v39, %v11087_v41  ;;  %v11227_v31 = vld [vmem:[%s13152_s23 + $0x1d0] sm:$0xf]  ;;  %v11425_v30 = vld [vmem:[%s13152_s23 + $0x374] sm:$0xf0] }
 0x411   : > { %7889 = vmatpush.bf16.msra.mxu1 %v11196_v8  ;;  %v11396_v8 = vor.u32 %v11631_v33, %v11395_v7  ;;  %v11592_v33 = vld [vmem:[%s13152_s23 + $0x204] sm:$0xf] }
 0x412   : > { %7883 = vmatpush.bf16.msrb.mxu3 %v11444_v52  ;;  %7921 = vmatpush.bf16.msrb.mxu0 %v11476_v2  ;;  %v11336_v52 = vor.u32 %v11613_v6, %v11333_v9  ;;  %v11172_v2 = vor.u32 %v11575_v1, %v11171_v28  ;;  %v11284_v6 = vor.u32 %v11603_v54, %v11283_v17  ;;  %v11579_v9 = vld [vmem:[%s13152_s23 + $0x19c] sm:$0xf]  ;;  %v11596_v28 = vld [vmem:[%s13152_s23 + $0x220] sm:$0xf0]  ;;  %v11059_v1 = vld [vmem:[%s13152_s23 + $0x80] sm:$0xf] }
 0x413   : > { %7869 = vmatpush.bf16.msra.mxu2 %v11248_v4  ;;  %v11115_v4 = vld [vmem:[%s13152_s23 + $0xf0] sm:$0xf]  ;;  %v11540_v51 = vld [vmem:[%s13152_s23 + $0x60] sm:$0xf0] }
 0x414   : > { %v11576_v17 = vld [vmem:[%s13152_s23 + $0x180] sm:$0xf0] }
 0x415   : > { %7890 = vmatpush.bf16.msra.mxu1 %v11168_v23  ;;  %v15612_v23 = vadd.f32 %v15522_v62, %v6898_v50  ;;  %v11568_v62 = vld [vmem:[%s13152_s23 + $0x140] sm:$0xf0]  ;;  %v11479_v50 = vld [vmem:[%s13152_s23 + $0x3c8] sm:$0xf] }
 0x416   : > { %7902 = vmatpush.bf16.msra.mxu3 %v11420_v22  ;;  %7922 = vmatpush.bf16.msrb.mxu0 %v11448_v61  ;;  %v11305_v22 = vld [vmem:[%s13152_s23 + $0x28c] sm:$0xf0]  ;;  %v11311_v61 = vld [vmem:[%s13152_s23 + $0x278] sm:$0xf] }
 0x417   : > { %7870 = vmatpush.bf16.msra.mxu2 %v11220_v55  ;;  %v11308_v19 = vor.u32 %v11606_v47, %v11305_v22  ;;  %v11312_v7 = vor.u32 %v11610_v57, %v11311_v61  ;;  %v11585_v55 = vld [vmem:[%s13152_s23 + $0x1cc] sm:$0xf]  ;;  %v11204_v22 = vor.u32 %v11579_v9, %v11201_v42  ;;  %v11228_v61 = vor.u32 %v11589_v46, %v11227_v31  ;;  %v11656_v57 = vld [vmem:[%s13152_s23 + $0x404] sm:$0xf]  ;;  %v11369_v42 = vld [vmem:[%s13152_s23 + $0x304] sm:$0xf0] }
 0x418   : > { %v11642_v46 = vld [vmem:[%s13152_s23 + $0x394] sm:$0xf] }
 0x419   : > { %7891 = vmatpush.bf16.msra.mxu1 %v11140_v11  ;;  %v6925_v11 = vpop.f32.mrf.mxu0 }
 0x41a   : > { %7903 = vmatpush.bf16.msra.mxu3 %v11392_v21  ;;  %7941 = vmatpush.bf16.msra.mxu0 %v11424_v48  ;;  %v11144_v21 = vor.u32 %v11568_v62, %v11143_v59  ;;  %v11561_v48 = vld [vmem:[%s13152_s23 + $0x108] sm:$0xf0]  ;;  %v11583_v11 = vld [vmem:[%s13152_s23 + $0x1b8] sm:$0xf0] }
 0x41b   : > { %7928 = vmatpush.bf16.msrb.mxu2 %v11200_v56  ;;  %v11116_v40 = vor.u32 %v11561_v48, %v11115_v4  ;;  %v11652_v56 = vld [vmem:[%s13152_s23 + $0x3e0] sm:$0xf0]  ;;  %v11032_v4 = vor.u32 %v11540_v51, %v11031_v5  ;;  %v11453_v5 = vld [vmem:[%s13152_s23 + $0x3ac] sm:$0xf0] }
 0x41c   : > { %7871 = vmatmul.bf16.vlgmr.msra.gmra.mxu2 %v15483_v10  ;;  %v11480_v43 = vor.u32 %v11652_v56, %v11479_v50  ;;  %v11544_v51 = vld [vmem:[%s13152_s23 + $0x84] sm:$0xf] }
 0x41d   : > { %7892 = vmatpush.bf16.msra.mxu1 %v11112_v14  ;;  %11520 = vmatmul.msk.bf16.vlgmr.msrb.gmra.mxu0 %vm7747_vm8, %v15507_v38  ;;  %v11249_v14 = vld [vmem:[%s13152_s23 + $0x21c] sm:$0xf0] }
 0x41e   : > { %7904 = vmatpush.bf16.msra.mxu3 %v11364_v0  ;;  %7942 = vmatpush.bf16.msra.mxu0 %v11396_v8  ;;  %v11000_v0 = vor.u32 %v11529_v60, %v10997_v36  ;;  %v11252_v26 = vor.u32 %v11592_v33, %v11249_v14  ;;  %v11221_v8 = vld [vmem:[%s13152_s23 + $0x1e4] sm:$0xf0]  ;;  %v11003_v36 = vld [vmem:[%s13152_s23 + $0x10] sm:$0xf]  ;;  %v11628_v33 = vld [vmem:[%s13152_s23 + $0x324] sm:$0xf] }
 0x41f   : > { %7929 = vmatpush.bf16.msrb.mxu2 %v11172_v2  ;;  %11519 = vmatmul.msk.bf16.vlgmr.msrb.gmra.mxu3 %vm7747_vm8, %v15507_v38  ;;  %v11224_v49 = vor.u32 %v11585_v55, %v11221_v8  ;;  %v6949_v62 = vpop.f32.mrf.mxu2  ;;  %v11145_v60 = vld [vmem:[%s13152_s23 + $0x144] sm:$0xf0]  ;;  %v11397_v14 = vld [vmem:[%s13152_s23 + $0x33c] sm:$0xf0]  ;;  %v11558_v8 = vld [vmem:[%s13152_s23 + $0xf4] sm:$0xf] }
 0x420   : > { %v11400_v55 = vor.u32 %v11628_v33, %v11397_v14  ;;  %v11403_v33 = vld [vmem:[%s13152_s23 + $0x328] sm:$0xf]  ;;  %v11632_v14 = vld [vmem:[%s13152_s23 + $0x340] sm:$0xf0] }
 0x421   : > { %7893 = vmatpush.bf16.msra.mxu1 %v11084_v3  ;;  %v11255_v3 = vld [vmem:[%s13152_s23 + $0x208] sm:$0xf]  ;;  %v6936_v47 = vpop.f32.mrf.mxu1 }
 0x422   : > { %7905 = vmatpush.bf16.msra.mxu3 %v11336_v52  ;;  %7943 = vmatpush.bf16.msra.mxu0 %v11368_v25  ;;  %v11547_v52 = vld [vmem:[%s13152_s23 + $0x98] sm:$0xf0]  ;;  %v11572_v25 = vld [vmem:[%s13152_s23 + $0x164] sm:$0xf]  ;;  %v11256_v2 = vor.u32 %v11596_v28, %v11255_v3  ;;  %v6937_v59 = vadd.f32 %v6936_v47, %v15603_v13  ;;  %v11207_v13 = vld [vmem:[%s13152_s23 + $0x1a0] sm:$0xf] }
 0x423   : > { %7930 = vmatpush.bf16.msrb.mxu2 %v11144_v21  ;;  %v11176_v21 = vor.u32 %v11572_v25, %v11173_v15  ;;  %v11208_v29 = vor.u32 %v11583_v11, %v11207_v13  ;;  %v11151_v28 = vld [vmem:[%s13152_s23 + $0x130] sm:$0xf]  ;;  %v11481_v25 = vld [vmem:[%s13152_s23 + $0x3e4] sm:$0xf0]  ;;  %v11639_v13 = vld [vmem:[%s13152_s23 + $0x378] sm:$0xf0] }
 0x424   : > { %v6950_v45 = vadd.f32 %v6949_v62, %v6937_v59  ;;  %v11123_v62 = vld [vmem:[%s13152_s23 + $0xf8] sm:$0xf] }
 0x425   : > { %7894 = vmatpush.bf16.msra.mxu1 %v11056_v24  ;;  %v11645_v24 = vld [vmem:[%s13152_s23 + $0x3a8] sm:$0xf0] }
 0x426   : > { %7906 = vmatpush.bf16.msra.mxu3 %v11308_v19  ;;  %7944 = vmatpush.bf16.msra.mxu0 %v11340_v32  ;;  %v11060_v19 = vor.u32 %v11547_v52, %v11059_v1  ;;  %v11635_v32 = vld [vmem:[%s13152_s23 + $0x35c] sm:$0xf]  ;;  %v11452_v34 = vor.u32 %v11645_v24, %v11451_v37  ;;  %v11569_v1 = vld [vmem:[%s13152_s23 + $0x148] sm:$0xf0]  ;;  %v11614_v37 = vld [vmem:[%s13152_s23 + $0x2b4] sm:$0xf] }
 0x427   : > { %7931 = vmatpush.bf16.msrb.mxu2 %v11116_v40  ;;  %v11428_v48 = vor.u32 %v11635_v32, %v11425_v30  ;;  %v11179_v40 = vld [vmem:[%s13152_s23 + $0x168] sm:$0xf]  ;;  %v6951_v39 = vpop.f32.mrf.mxu2  ;;  %v11152_v15 = vor.u32 %v11569_v1, %v11151_v28  ;;  %v11341_v24 = vld [vmem:[%s13152_s23 + $0x2cc] sm:$0xf0]  ;;  %v11541_v1 = vld [vmem:[%s13152_s23 + $0x68] sm:$0xf0] }
 0x428   : > { %v11180_v56 = vor.u32 %v11576_v17, %v11179_v40  ;;  %v11344_v30 = vor.u32 %v11614_v37, %v11341_v24  ;;  %v11600_v17 = vld [vmem:[%s13152_s23 + $0x244] sm:$0xf]  ;;  %v11039_v28 = vld [vmem:[%s13152_s23 + $0x50] sm:$0xf]  ;;  %v11586_v37 = vld [vmem:[%s13152_s23 + $0x1d4] sm:$0xf] }
 0x429   : > { %7895 = vmatpush.bf16.msra.mxu1 %v11028_v27  ;;  %v11509_v27 = vld [vmem:[%s13152_s23 + $0x41c] sm:$0x30] }
 0x42a   : > { %7907 = vmatpush.bf16.msra.mxu3 %v11280_v18  ;;  %7945 = vmatpush.bf16.msra.mxu0 %v11312_v7  ;;  %v11565_v18 = vld [vmem:[%s13152_s23 + $0x12c] sm:$0xf]  ;;  %v11512_v54 = vor.u32 %v11656_v57, %v11509_v27  ;;  %v6975_v50 = vpop.f32.mrf.mxu0  ;;  %v11313_v57 = vld [vmem:[%s13152_s23 + $0x294] sm:$0xf0]  ;;  %v11456_v27 = vor.u32 %v11642_v46, %v11453_v5  ;;  %v11534_v46 = vld [vmem:[%s13152_s23 + $0x30] sm:$0xf0] }
 0x42b   : > { %7932 = vmatpush.bf16.msrb.mxu2 %v11088_v35  ;;  %v11533_v7 = vld [vmem:[%s13152_s23 + $0x28] sm:$0xf0]  ;;  %v11148_v41 = vor.u32 %v11565_v18, %v11145_v60 }
 0x42c   : > { %v11621_v35 = vld [vmem:[%s13152_s23 + $0x2ec] sm:$0xf]  ;;  %v7767_v3 = vsel %vm5956_vm1, %v11512_v54, 0  ;;  %v11285_v54 = vld [vmem:[%s13152_s23 + $0x25c] sm:$0xf0] }
 0x42d   : > { %7896 = vmatpush.bf16.msra.mxu1 %v11000_v0  ;;  %v6938_v0 = vpop.f32.mrf.mxu1  ;;  %v11372_v47 = vor.u32 %v11621_v35, %v11369_v42  ;;  %v11593_v42 = vld [vmem:[%s13152_s23 + $0x20c] sm:$0xf] }
 0x42e   : > { %7908 = vmatpush.bf16.msra.mxu3 %v11252_v26  ;;  %7946 = vmatpush.bf16.msra.mxu0 %v11284_v6  ;;  %v6962_v26 = vpop.f32.mrf.mxu3  ;;  %v11117_v6 = vld [vmem:[%s13152_s23 + $0x10c] sm:$0xf0]  ;;  %v11067_v0 = vld [vmem:[%s13152_s23 + $0x88] sm:$0xf] }
 0x42f   : > { %7933 = vmatpush.bf16.msrb.mxu2 %v11060_v19  ;;  %v6963_v9 = vadd.f32 %v6962_v26, %v6950_v45  ;;  %v11562_v19 = vld [vmem:[%s13152_s23 + $0x110] sm:$0xf0]  ;;  %v11061_v45 = vld [vmem:[%s13152_s23 + $0x9c] sm:$0xf0]  ;;  %v11404_v26 = vor.u32 %v11632_v14, %v11403_v33 }
 0x430   : > { %7897 = vmatmul.bf16.vlgmr.msra.gmra.mxu1 %v15534_v53  ;;  %v11064_v18 = vor.u32 %v11544_v51, %v11061_v45  ;;  %v11487_v51 = vld [vmem:[%s13152_s23 + $0x3d0] sm:$0xf] }
 0x431   : > { %7959 = vmatpush.bf16.msrb.mxu1 %v7764_v20  ;;  %v11004_v20 = vor.u32 %v11533_v7, %v11003_v36  ;;  %v15687_v52 = vadd.f32 %v6975_v50, %v6963_v9  ;;  %v11537_v36 = vld [vmem:[%s13152_s23 + $0x4c] sm:$0xf]  ;;  %v11033_v7 = vld [vmem:[%s13152_s23 + $0x64] sm:$0xf0]  ;;  %v11005_v9 = vld [vmem:[%s13152_s23 + $0x2c] sm:$0xf0] }
 0x432   : > { %7909 = vmatpush.bf16.msra.mxu3 %v11224_v49  ;;  %7947 = vmatpush.bf16.msra.mxu0 %v11256_v2  ;;  %v11120_v49 = vor.u32 %v11558_v8, %v11117_v6  ;;  %v11089_v2 = vld [vmem:[%s13152_s23 + $0xd4] sm:$0xf0]  ;;  %v6977_v11 = vpop.f32.mrf.mxu0  ;;  %v11036_v39 = vor.u32 %v11537_v36, %v11033_v7  ;;  %v11660_v8 = vld [vmem:[%s13152_s23 + $0x420] sm:$0x30]  ;;  %v11288_v6 = vor.u32 %v11600_v17, %v11285_v54  ;;  %v11375_v50 = vld [vmem:[%s13152_s23 + $0x2f0] sm:$0xf] }
 0x433   : > { %7934 = vmatpush.bf16.msrb.mxu2 %v11032_v4  ;;  %v11095_v4 = vld [vmem:[%s13152_s23 + $0xc0] sm:$0xf]  ;;  %v11263_v17 = vld [vmem:[%s13152_s23 + $0x210] sm:$0xf]  ;;  %v11597_v54 = vld [vmem:[%s13152_s23 + $0x228] sm:$0xf0] }
 0x435   : > { %7960 = vmatpush.bf16.msrb.mxu1 %v11480_v43  ;;  %7910 = vmatmul.bf16.vlgmr.msra.gmra.mxu3 %v15483_v10  ;;  %v11649_v43 = vld [vmem:[%s13152_s23 + $0x3cc] sm:$0xf] }
 0x436   : > { %7967 = vmatpush.bf16.msrb.mxu3 %v11204_v22  ;;  %7948 = vmatpush.bf16.msra.mxu0 %v11228_v61  ;;  %v11551_v22 = vld [vmem:[%s13152_s23 + $0xbc] sm:$0xf]  ;;  %v11484_v59 = vor.u32 %v11649_v43, %v11481_v25  ;;  %v6964_v32 = vpop.f32.mrf.mxu3 }
 0x437   : > { %7935 = vmatpush.bf16.msrb.mxu2 %v11004_v20  ;;  %v11092_v31 = vor.u32 %v11551_v22, %v11089_v2  ;;  %v11607_v61 = vld [vmem:[%s13152_s23 + $0x27c] sm:$0xf]  ;;  %v11530_v20 = vld [vmem:[%s13152_s23 + $0x14] sm:$0xf]  ;;  %v11347_v2 = vld [vmem:[%s13152_s23 + $0x2b8] sm:$0xf] }
 0x438   : > { %v11008_v43 = vor.u32 %v11530_v20, %v11005_v9  ;;  %v11653_v32 = vld [vmem:[%s13152_s23 + $0x3e8] sm:$0xf0] }
 0x439   : > { %7961 = vmatpush.bf16.msrb.mxu1 %v11452_v34  ;;  %7949 = vmatmul.bf16.vlgmr.msra.gmra.mxu0 %v15483_v10  ;;  %v11431_v34 = vld [vmem:[%s13152_s23 + $0x360] sm:$0xf] }
 0x43a   : > { %7968 = vmatpush.bf16.msrb.mxu3 %v11176_v21  ;;  %8006 = vmatpush.bf16.msrb.mxu0 %v11208_v29  ;;  %v11124_v21 = vor.u32 %v11562_v19, %v11123_v62  ;;  %v11432_v60 = vor.u32 %v11639_v13, %v11431_v34  ;;  %v11316_v29 = vor.u32 %v11607_v61, %v11313_v57  ;;  %v11229_v19 = vld [vmem:[%s13152_s23 + $0x1ec] sm:$0xf0]  ;;  %v11319_v34 = vld [vmem:[%s13152_s23 + $0x280] sm:$0xf]  ;;  %v11611_v13 = vld [vmem:[%s13152_s23 + $0x298] sm:$0xf0] }
 0x43b   : > { %7998 = vmatpush.bf16.msra.mxu2 %v7767_v3  ;;  %v11257_v3 = vld [vmem:[%s13152_s23 + $0x224] sm:$0xf0]  ;;  %v11040_v62 = vor.u32 %v11541_v1, %v11039_v28  ;;  %v11459_v61 = vld [vmem:[%s13152_s23 + $0x398] sm:$0xf]  ;;  %v11646_v57 = vld [vmem:[%s13152_s23 + $0x3b0] sm:$0xf0] }
 0x43c   : > { %7936 = vmatmul.bf16.vlgmr.msrb.gmra.mxu2 %v15534_v53  ;;  %v11260_v22 = vor.u32 %v11593_v42, %v11257_v3 }
 0x43d   : > { %7980 = vmatpush.bf16.msra.mxu1 %v11428_v48  ;;  %v11555_v48 = vld [vmem:[%s13152_s23 + $0xd8] sm:$0xf0] }
 0x43e   : > { %7969 = vmatpush.bf16.msrb.mxu3 %v11148_v41  ;;  %8007 = vmatpush.bf16.msrb.mxu0 %v11180_v56  ;;  %v11096_v40 = vor.u32 %v11555_v48, %v11095_v4  ;;  %v11548_v41 = vld [vmem:[%s13152_s23 + $0xa0] sm:$0xf0]  ;;  %v11625_v56 = vld [vmem:[%s13152_s23 + $0x308] sm:$0xf0]  ;;  %v11291_v48 = vld [vmem:[%s13152_s23 + $0x248] sm:$0xf] }
 0x43f   : > { %7999 = vmatpush.bf16.msra.mxu2 %v11484_v59  ;;  %v11068_v35 = vor.u32 %v11548_v41, %v11067_v0  ;;  %v11376_v25 = vor.u32 %v11625_v56, %v11375_v50  ;;  %v7001_v59 = vpop.f32.mrf.mxu2  ;;  %v11264_v0 = vor.u32 %v11597_v54, %v11263_v17  ;;  %v11235_v41 = vld [vmem:[%s13152_s23 + $0x1d8] sm:$0xf] }
 0x440   : > { %11521 = vmatmul.msk.bf16.vlgmr.msrb.gmra.mxu1 %vm7747_vm8, %v15507_v38 }
 0x441   : > { %7981 = vmatpush.bf16.msra.mxu1 %v11400_v55  ;;  %v11515_v55 = vld [vmem:[%s13152_s23 + $0x408] sm:$0xf] }
 0x442   : > { %7970 = vmatpush.bf16.msrb.mxu3 %v11120_v49  ;;  %8008 = vmatpush.bf16.msrb.mxu0 %v11152_v15  ;;  %v11516_v49 = vor.u32 %v11660_v8, %v11515_v55  ;;  %v11618_v15 = vld [vmem:[%s13152_s23 + $0x2d0] sm:$0xf0] }
 0x443   : > { %8000 = vmatpush.bf16.msra.mxu2 %v11456_v27  ;;  %v11348_v45 = vor.u32 %v11618_v15, %v11347_v2  ;;  %v11320_v27 = vor.u32 %v11611_v13, %v11319_v34 }
 0x444   : > { %v7770_v5 = vsel %vm5956_vm1, %v11516_v49, 0 }
 0x445   : > { %7982 = vmatpush.bf16.msra.mxu1 %v11372_v47  ;;  %v6988_v47 = vpop.f32.mrf.mxu1 }
 0x446   : > { %7971 = vmatpush.bf16.msrb.mxu3 %v11092_v31  ;;  %8009 = vmatpush.bf16.msrb.mxu0 %v11124_v21  ;;  %v6989_v24 = vadd.f32 %v6988_v47, %v15687_v52  ;;  %v11011_v31 = vld [vmem:[%s13152_s23 + $0x18] sm:$0xf]  ;;  %v11232_v52 = vor.u32 %v11586_v37, %v11229_v19  ;;  %v11488_v21 = vor.u32 %v11653_v32, %v11487_v51 }
 0x447   : > { %8019 = vmatpush.bf16.msrb.mxu2 %v11432_v60  ;;  %v11012_v11 = vor.u32 %v11534_v46, %v11011_v31  ;;  %v7003_v60 = vpop.f32.mrf.mxu2 }
 0x448   : > { %v7014_v36 = vpop.f32.mrf.mxu3 }
 0x449   : > { %7983 = vmatpush.bf16.msra.mxu1 %v11344_v30  ;;  %v7002_v30 = vadd.f32 %v7001_v59, %v6989_v24  ;;  %v15760_v59 = vld [vmem:[%s547_s5] sm:$0xff] }
 0x44a   : > { %7972 = vmatpush.bf16.msrb.mxu3 %v11064_v18  ;;  %8010 = vmatpush.bf16.msrb.mxu0 %v11096_v40  ;;  %v11604_v18 = vld [vmem:[%s13152_s23 + $0x260] sm:$0xf0]  ;;  %v7027_v33 = vpop.f32.mrf.mxu0  ;;  %v8048_v46 = vperm.slane %v15760_v59, 1 }
 0x44b   : > { %8020 = vmatpush.bf16.msrb.mxu2 %v11404_v26  ;;  %v7015_v7 = vadd.f32 %v7014_v36, %v7002_v30  ;;  %v11292_v14 = vor.u32 %v11604_v18, %v11291_v48 }
 0x44c   : > { %11522 = vmatmul.msk.bf16.vlgmr.msra.gmra.mxu2 %vm7747_vm8, %v15507_v38 }
 0x44d   : > { %7984 = vmatpush.bf16.msra.mxu1 %v11316_v29  ;;  %v6990_v4 = vpop.f32.mrf.mxu1  ;;  %v11460_v29 = vor.u32 %v11646_v57, %v11459_v61  ;;  %v7028_v40 = vadd.f32 %v7027_v33, %v7015_v7 }
 0x44e   : > { %7973 = vmatpush.bf16.msrb.mxu3 %v11036_v39  ;;  %8011 = vmatpush.bf16.msrb.mxu0 %v11068_v35  ;;  %v11590_v39 = vld [vmem:[%s13152_s23 + $0x1f0] sm:$0xf0] }
 0x44f   : > { %8021 = vmatpush.bf16.msrb.mxu2 %v11376_v25  ;;  %v11236_v55 = vor.u32 %v11590_v39, %v11235_v41 }
 0x450   : > { %v7016_v26 = vpop.f32.mrf.mxu3 }
 0x451   : > { %7985 = vmatpush.bf16.msra.mxu1 %v11288_v6  ;;  %v8050_v26 = vperm.slane %v15760_v59, 3 }
 0x452   : > { %7974 = vmatpush.bf16.msrb.mxu3 %v11008_v43  ;;  %8012 = vmatpush.bf16.msrb.mxu0 %v11040_v62  ;;  %v7029_v20 = vpop.f32.mrf.mxu0  ;;  %v8047_v62 = vperm.slane %v15760_v59, 0 }
 0x453   : > { %8022 = vmatpush.bf16.msrb.mxu2 %v11348_v45 }
 0x455   : > { %7986 = vmatpush.bf16.msra.mxu1 %v11260_v22  ;;  %7975 = vmatmul.bf16.vlgmr.msrb.gmra.mxu3 %v15534_v53 }
 0x456   : > { %8037 = vmatpush.bf16.msra.mxu3 %v7770_v5  ;;  %8013 = vmatpush.bf16.msrb.mxu0 %v11012_v11 }
 0x457   : > { %8023 = vmatpush.bf16.msrb.mxu2 %v11320_v27 }
 0x459   : > { %7987 = vmatpush.bf16.msra.mxu1 %v11232_v52  ;;  %8014 = vmatmul.bf16.vlgmr.msrb.gmra.mxu0 %v15534_v53 }
 0x45a   : > { %8038 = vmatpush.bf16.msra.mxu3 %v11488_v21 }
 0x45b   : > { %8024 = vmatpush.bf16.msrb.mxu2 %v11292_v14  ;;  %v8049_v14 = vperm.slane %v15760_v59, 2 }
 0x45c   : > { %7988 = vmatmul.bf16.vlgmr.msra.gmra.mxu1 %v15483_v10 }
 0x45e   : > { %8039 = vmatpush.bf16.msra.mxu3 %v11460_v29 }
 0x45f   : > { %8025 = vmatpush.bf16.msrb.mxu2 %v11264_v0  ;;  %v7053_v6 = vpop.f32.mrf.mxu2 }
 0x460   : > { %v7066_v9 = vpop.f32.mrf.mxu3 }
 0x461   : > { %v7040_v8 = vpop.f32.mrf.mxu1 }
 0x462   : > { %v7041_v53 = vadd.f32 %v7040_v8, %v7028_v40 }
 0x463   : > { %8026 = vmatpush.bf16.msrb.mxu2 %v11236_v55 }
 0x464   : > { %v7054_v50 = vadd.f32 %v7053_v6, %v7041_v53 }
 0x465   : > { %11523 = vmatmul.msk.bf16.vlgmr.msra.gmra.mxu3 %vm7747_vm8, %v15507_v38 }
 0x466   : > { %8027 = vmatmul.bf16.vlgmr.msrb.gmra.mxu2 %v15483_v10  ;;  %v15756_v56 = vadd.f32 %v7066_v9, %v7054_v50 }
 0x467   : > { %v7055_v42 = vpop.f32.mrf.mxu2 }
 0x468   : > { %v7068_v3 = vpop.f32.mrf.mxu3 }
 0x469   : > { %v7042_v35 = vpop.f32.mrf.mxu1 }
 0x46a   : > { %v7794_v28 = vpop.f32.mrf.mxu0 }
 0x471   : > { %v7807_v1 = vpop.f32.mrf.mxu1 }
 0x472   : > { %v7796_v49 = vpop.f32.mrf.mxu0 }
 0x479   : > { %v7809_v43 = vpop.f32.mrf.mxu1 }
 0x47f   : > { %v7820_v47 = vpop.f32.mrf.mxu2 }
 0x480   : > { %v7781_v25 = vpop.f32.mrf.mxu3  ;;  %v7821_v19 = vadd.f32 %v7820_v47, %v14583_v58 }
 0x481   : > { %v7782_v38 = vadd.f32 %v7781_v25, %v14357_v63 }
 0x483   : > { %v7795_v10 = vadd.f32 %v7794_v28, %v7782_v38 }
 0x485   : > { %v7808_v22 = vadd.f32 %v7807_v1, %v7795_v10 }
 0x487   : > { %v7822_v15 = vpop.f32.mrf.mxu2  ;;  %v8061_v51 = vadd.f32 %v8047_v62, %v7808_v22 }
 0x488   : > { %v7783_v2 = vpop.f32.mrf.mxu3 }
 0x489   : > { %v8075_v52 = vmul.f32 0.2, %v8061_v51  ;;  %vm8068_vm10 = vcmp.ge.f32.partialorder %v8061_v51, 0.0 }
 0x48a   : > { %v7859_v24 = vpop.f32.mrf.mxu0 }
 0x48b   : > { %v8082_v61 = vsel %vm8068_vm10, %v8061_v51, %v8075_v52  ;;  %v7860_v18 = vadd.f32 %v7859_v24, %v14780_v44 }
 0x48d   : > { %v7833_v37 = vpop.f32.mrf.mxu1 }
 0x48e   : > { %v7834_v31 = vadd.f32 %v7833_v37, %v7821_v19  ;;  %v8051_v37 = vperm.slane %v15760_v59, 4  ;;  %v8052_v19 = vperm.slane %v15760_v59, 5 }
 0x492   : > { %v7846_v5 = vpop.f32.mrf.mxu3  ;;  %v7861_v30 = vpop.f32.mrf.mxu0 }
 0x493   : > { %v7847_v32 = vadd.f32 %v7846_v5, %v7834_v31 }
 0x495   : > { %v7835_v63 = vpop.f32.mrf.mxu1  ;;  %v8062_v45 = vadd.f32 %v8048_v46, %v7847_v32 }
 0x497   : > { %vm8069_vm1 = vcmp.ge.f32.partialorder %v8062_v45, 0.0  ;;  %v8076_v34 = vmul.f32 0.2, %v8062_v45 }
 0x499   : > { %v8083_v13 = vsel %vm8069_vm1, %v8062_v45, %v8076_v34 }
 0x49a   : > { %v8096_v11 = vrot.slane %v8083_v13, 6  ;;  %v7848_v21 = vpop.f32.mrf.mxu3  ;;  %v7924_v57 = vpop.f32.mrf.mxu0 }
 0x49c   : > { %v8101_v58 = vsel %vm686_vm0, %v8082_v61, %v8096_v11 }
 0x49f   : > { %v7872_v27 = vpop.f32.mrf.mxu2 }
 0x4a0   : > { %v7873_v29 = vadd.f32 %v7872_v27, %v7860_v18 }
 0x4a2   : > { %v7885_v4 = vpop.f32.mrf.mxu3  ;;  %v7926_v48 = vpop.f32.mrf.mxu0 }
 0x4a3   : > { %v7886_v33 = vadd.f32 %v7885_v4, %v7873_v29 }
 0x4a5   : > { %v8063_v17 = vadd.f32 %v8049_v14, %v7886_v33 }
 0x4a7   : > { %v7874_v60 = vpop.f32.mrf.mxu2  ;;  %v8077_v20 = vmul.f32 0.2, %v8063_v17  ;;  %vm8070_vm11 = vcmp.ge.f32.partialorder %v8063_v17, 0.0 }
 0x4a9   : > { %v8084_v6 = vsel %vm8070_vm11, %v8063_v17, %v8077_v20 }
 0x4aa   : > { %v7887_v7 = vpop.f32.mrf.mxu3 }
 0x4ad   : > { %v7898_v36 = vpop.f32.mrf.mxu1 }
 0x4ae   : > { %v7899_v54 = vadd.f32 %v7898_v36, %v15015_v16  ;;  %v8097_v16 = vrot.slane %v8084_v6, 4 }
 0x4b5   : > { %v7900_v40 = vpop.f32.mrf.mxu1 }
 0x4b6   : > { %v7950_v0 = vpop.f32.mrf.mxu0 }
 0x4b8   : > { %v7911_v41 = vpop.f32.mrf.mxu3 }
 0x4b9   : > { %v7912_v39 = vadd.f32 %v7911_v41, %v7899_v54 }
 0x4bb   : > { %v7925_v44 = vadd.f32 %v7924_v57, %v7912_v39 }
 0x4bd   : > { %v8064_v55 = vadd.f32 %v8050_v26, %v7925_v44  ;;  %v7963_v8 = vpop.f32.mrf.mxu1 }
 0x4be   : > { %v7952_v9 = vpop.f32.mrf.mxu0 }
 0x4bf   : > { %vm8071_vm12 = vcmp.ge.f32.partialorder %v8064_v55, 0.0  ;;  %v8078_v53 = vmul.f32 0.2, %v8064_v55  ;;  %v7937_v3 = vpop.f32.mrf.mxu2 }
 0x4c0   : > { %v7913_v50 = vpop.f32.mrf.mxu3  ;;  %v7938_v25 = vadd.f32 %v7937_v3, %v15288_v12 }
 0x4c1   : > { %v8085_v35 = vsel %vm8071_vm12, %v8064_v55, %v8078_v53 }
 0x4c2   : > { %v8098_v42 = vrot.slane %v8085_v35, 2  ;;  %v7951_v38 = vadd.f32 %v7950_v0, %v7938_v25 }
 0x4c4   : > { %v8103_v28 = vsel %vm8102_vm13, %v8097_v16, %v8098_v42  ;;  %v7964_v15 = vadd.f32 %v7963_v8, %v7951_v38 }
 0x4c5   : > { %v8105_v1 = vsel %vm8104_vm14, %v8101_v58, %v8103_v28  ;;  %v7965_v49 = vpop.f32.mrf.mxu1  ;;  %v8053_v58 = vperm.slane %v15760_v59, 6 }
 0x4c6   : > { %8110 = vst [vmem:[%s15774_s30] sm:$0xff] %v8105_v1  ;;  %v8065_v31 = vadd.f32 %v8051_v37, %v7964_v15 }
 0x4c7   : > { %v7939_v43 = vpop.f32.mrf.mxu2 }
 0x4c8   : > { %v8079_v30 = vmul.f32 0.2, %v8065_v31  ;;  %vm8072_vm2 = vcmp.ge.f32.partialorder %v8065_v31, 0.0 }
 0x4ca   : > { %v8086_v13 = vsel %vm8072_vm2, %v8065_v31, %v8079_v30 }
 0x4cf   : > { %v8002_v47 = vpop.f32.mrf.mxu2 }
 0x4d6   : > { %v8015_v2 = vpop.f32.mrf.mxu0 }
 0x4d7   : > { %v8004_v5 = vpop.f32.mrf.mxu2  ;;  %v8016_v21 = vadd.f32 %v8015_v2, %v15756_v56 }
 0x4d8   : > { %v7976_v22 = vpop.f32.mrf.mxu3 }
 0x4d9   : > { %v7989_v10 = vpop.f32.mrf.mxu1  ;;  %v7977_v24 = vadd.f32 %v7976_v22, %v15612_v23 }
 0x4db   : > { %v7990_v62 = vadd.f32 %v7989_v10, %v7977_v24 }
 0x4dd   : > { %v8003_v46 = vadd.f32 %v8002_v47, %v7990_v62 }
 0x4de   : > { %v8017_v12 = vpop.f32.mrf.mxu0 }
 0x4df   : > { %v8066_v63 = vadd.f32 %v8052_v19, %v8003_v46 }
 0x4e0   : > { %v7978_v32 = vpop.f32.mrf.mxu3 }
 0x4e1   : > { %v7991_v51 = vpop.f32.mrf.mxu1  ;;  %vm8073_vm15 = vcmp.ge.f32.partialorder %v8066_v63, 0.0  ;;  %v8080_v45 = vmul.f32 0.2, %v8066_v63 }
 0x4e3   : > { %v8087_v52 = vsel %vm8073_vm15, %v8066_v63, %v8080_v45 }
 0x4e4   : > { %v8099_v34 = vrot.slane %v8087_v52, 6 }
 0x4e6   : > { %v8106_v23 = vsel %vm686_vm0, %v8086_v13, %v8099_v34 }
 0x4e8   : > { %v8041_v11 = vpop.f32.mrf.mxu3 }
 0x4e9   : > { %v8028_v61 = vpop.f32.mrf.mxu2 }
 0x4ea   : > { %v8029_v57 = vadd.f32 %v8028_v61, %v8016_v21 }
 0x4ec   : > { %v8042_v27 = vadd.f32 %v8041_v11, %v8029_v57 }
 0x4ee   : > { %v8067_v48 = vadd.f32 %v8053_v58, %v8042_v27 }
 0x4f0   : > { %v8043_v4 = vpop.f32.mrf.mxu3  ;;  %vm8074_vm3 = vcmp.ge.f32.partialorder %v8067_v48, 0.0  ;;  %v8081_v18 = vmul.f32 0.2, %v8067_v48 }
 0x4f1   : > { %v8030_v60 = vpop.f32.mrf.mxu2 }
 0x4f2   : > { %v8088_v36 = vsel %vm8074_vm3, %v8067_v48, %v8081_v18 }
 0x4f3   : > { %v8100_v29 = vrot.slane %v8088_v36, 4 }
 0x4f5   : > { %v8107_v7 = vsel %vm8104_vm14, %v8106_v23, %v8100_v29 }
 0x4f6   : > { %8111 = vst [vmem:[%s15774_s30 + $0x8] sm:$0x3f] %v8107_v7 }
 0x4f7 PF: > { %s15884_s20 = sld [smem:[#allocation26_spill]] }
 0x4f8   : > { %s15885_s17 = sld [smem:[#allocation24_spill]] }
 0x4f9   : > { %s15886_s18 = sld [smem:[#allocation25_spill]] }
 0x4fa   : > { %s15887_s19 = sld [smem:[#allocation27_spill]] }
 0x4fd   : > { %p23_p3 = scmp.ge.s32.totalorder %s15884_s20, 9  }
 0x4ff   :  { %25 = sbr.rel (!%p23_p3) target bundleno = 12 (0xc), region = 157 }
 0x504   :  { %8134 = vsyncpa [#allocation3], 1 }
 0x505   :  { %8136 = vsyncpa [#allocation3 + $0x1], 1 }
 0x506   :  { %8137 = vsyncpa [#allocation5], 1 }
 0x507   :  { %8138 = vsyncpa [#allocation8], 1 }
 0x508   :  { %8139 = vsyncpa [#allocation11], 1 }
 0x509   :  { %8140 = vsyncpa [#allocation14], 1 }

</bundles_post_ra>
